<compile_context>
chip_gen: v6e
topology: v6e:2x2x1
jax: 0.10.0
libtpu: 0.0.40
codegen_flags: <defaults>
</compile_context>

<pallas_src>
import functools

import jax
import jax.numpy as jnp
from jax.experimental import pallas as pl
from jax.experimental.pallas import tpu as pltpu


# ------------------------------ small helpers --------------------------------


def _fit_tile(dim, cap):
    """Use the full dim when it is small (or not evenly divisible), else `cap`."""
    if dim <= cap or dim % cap:
        return dim
    return cap


# --------------------------- tiled matmul (+bias) ----------------------------


def _matmul_bias_act_kernel(x_ref, w_ref, b_ref, o_ref, acc_ref, *, act):
    @pl.when(pl.program_id(2) == 0)
    def _():
        acc_ref[...] = jnp.zeros_like(acc_ref)

    acc_ref[...] += jnp.dot(x_ref[...], w_ref[...],
                            preferred_element_type=jnp.float32)

    @pl.when(pl.program_id(2) == pl.num_programs(2) - 1)
    def _():
        acc = acc_ref[...] + b_ref[...]
        if act == "relu":
            acc = jnp.maximum(acc, 0.0)
        elif act == "gelu":
            acc = jax.nn.gelu(acc, approximate=True)
        o_ref[...] = acc.astype(o_ref.dtype)


def matmul_bias_act(x, w, b, act="none", out_dtype=jnp.float32,
                    tm=256, tn=256, tk=512):
    """(M,K) @ (K,N) + b with fused activation.  (M,N,K)-tiled, f32 VMEM acc."""
    M, K = x.shape
    K2, N = w.shape
    assert K == K2
    tm, tn, tk = _fit_tile(M, tm), _fit_tile(N, tn), _fit_tile(K, tk)
    return pl.pallas_call(
        functools.partial(_matmul_bias_act_kernel, act=act),
        out_shape=jax.ShapeDtypeStruct((M, N), out_dtype),
        grid=(M // tm, N // tn, K // tk),
        in_specs=[
            pl.BlockSpec((tm, tk), lambda i, j, k: (i, k)),
            pl.BlockSpec((tk, tn), lambda i, j, k: (k, j)),
            pl.BlockSpec((1, tn), lambda i, j, k: (0, j)),   # constant along k
        ],
        out_specs=pl.BlockSpec((tm, tn), lambda i, j, k: (i, j)),
        scratch_shapes=[pltpu.VMEM((tm, tn), jnp.float32)],
        compiler_params=pltpu.CompilerParams(
            dimension_semantics=("parallel", "parallel", "arbitrary")),
    )(x, w, b.reshape(1, N).astype(jnp.float32))


# --------------------------------- layernorm ---------------------------------
# (only used if the encoder has zero blocks; otherwise the final LN is fused
#  into the last ViT-block kernel)


def _layernorm_kernel(x_ref, g_ref, b_ref, o_ref, *, eps):
    x = x_ref[...].astype(jnp.float32)
    mu = jnp.mean(x, axis=-1, keepdims=True)
    var = jnp.mean(jnp.square(x - mu), axis=-1, keepdims=True)
    y = (x - mu) * jax.lax.rsqrt(var + eps)
    o_ref[...] = (y * g_ref[...] + b_ref[...]).astype(o_ref.dtype)


def layernorm(x, g, b, eps=1e-6, out_dtype=None, tm=512):
    M, D = x.shape
    tm = _fit_tile(M, tm)
    out_dtype = out_dtype or x.dtype
    return pl.pallas_call(
        functools.partial(_layernorm_kernel, eps=eps),
        out_shape=jax.ShapeDtypeStruct((M, D), out_dtype),
        grid=(M // tm,),
        in_specs=[
            pl.BlockSpec((tm, D), lambda i: (i, 0)),
            pl.BlockSpec((1, D), lambda i: (0, 0)),
            pl.BlockSpec((1, D), lambda i: (0, 0)),
        ],
        out_specs=pl.BlockSpec((tm, D), lambda i: (i, 0)),
        compiler_params=pltpu.CompilerParams(dimension_semantics=("parallel",)),
    )(x, g.reshape(1, D).astype(jnp.float32), b.reshape(1, D).astype(jnp.float32))


# -------------------------- fused ViT block kernel ----------------------------


def _vit_block_kernel(*refs, heads, eps, add_pos, final_ln):
    it = iter(refs)
    tok_ref = next(it)
    pos_ref = next(it) if add_pos else None
    g1_ref, b1_ref = next(it), next(it)
    wqkv_ref, bqkv_ref = next(it), next(it)
    wproj_ref, bproj_ref = next(it), next(it)
    g2_ref, b2_ref = next(it), next(it)
    w1_ref, bm1_ref = next(it), next(it)
    w2_ref, bm2_ref = next(it), next(it)
    gf_ref, bf_ref = (next(it), next(it)) if final_ln else (None, None)
    o_ref = next(it)

    x = tok_ref[0].astype(jnp.float32)          # (N, D) residual stream, f32
    if add_pos:                                  # fused positional-embedding add
        x = x + pos_ref[0]
    N, D = x.shape
    dh = D // heads
    scale = 1.0 / float(dh) ** 0.5

    def _ln(v, g, b):                            # f32 VPU math
        mu = jnp.mean(v, axis=-1, keepdims=True)
        var = jnp.mean(jnp.square(v - mu), axis=-1, keepdims=True)
        return (v - mu) * jax.lax.rsqrt(var + eps) * g + b

    # ---- LN1 + fused QKV projection (bf16 MXU, f32 accumulate) ----
    h = _ln(x, g1_ref[...], b1_ref[...])
    qkv = jnp.dot(h.astype(jnp.bfloat16), wqkv_ref[...],
                  preferred_element_type=jnp.float32) + bqkv_ref[...]   # (N, 3D)

    # ---- all heads in one grid step; head-concat folded into out-projection ----
    attn_out = jnp.zeros((N, D), jnp.float32)
    for hh in range(heads):
        q = qkv[:, hh * dh:(hh + 1) * dh]
        k = qkv[:, D + hh * dh:D + (hh + 1) * dh]
        v = qkv[:, 2 * D + hh * dh:2 * D + (hh + 1) * dh]
        s = jnp.dot(q, k.T, preferred_element_type=jnp.float32) * scale
        s = s - jnp.max(s, axis=-1, keepdims=True)
        p = jnp.exp(s)
        p = p * pl.reciprocal(jnp.sum(p, axis=-1, keepdims=True), approx=True)
        a = jnp.dot(p, v, preferred_element_type=jnp.float32)          # (N, dh)
        attn_out = attn_out + jnp.dot(
            a.astype(jnp.bfloat16), wproj_ref[hh * dh:(hh + 1) * dh, :],
            preferred_element_type=jnp.float32)
    x = x + attn_out + bproj_ref[...]

    # ---- LN2 + MLP (GELU) + residual ----
    # TODO(synk): PyTorch nn.GELU default is exact erf; tanh approximation used.
    h2 = _ln(x, g2_ref[...], b2_ref[...])
    m = jnp.dot(h2.astype(jnp.bfloat16), w1_ref[...],
                preferred_element_type=jnp.float32) + bm1_ref[...]
    m = jax.nn.gelu(m, approximate=True)
    m = jnp.dot(m.astype(jnp.bfloat16), w2_ref[...],
                preferred_element_type=jnp.float32) + bm2_ref[...]
    y = x + m

    if final_ln:                                 # fused encoder-final LayerNorm
        y = _ln(y, gf_ref[...], bf_ref[...])

    o_ref[0] = y.astype(o_ref.dtype)


def vit_block(tok, blk, *, heads, eps=1e-6, pos=None, final_ln=None):
    """One fused transformer block: tok [B, N, D] (bf16) -> [B, N, D] (bf16).

    Optionally fuses the first-block positional-embedding add (`pos`) and the
    encoder-final LayerNorm (`final_ln=(gamma, beta)`) into the same kernel.
    """
    B, N, D = tok.shape
    Dh = blk["fc1_w"].shape[1]
    f32, bf16 = jnp.float32, jnp.bfloat16
    const2 = lambda b: (0, 0)
    const3 = lambda b: (0, 0, 0)

    args = [tok]
    in_specs = [pl.BlockSpec((1, N, D), lambda b: (b, 0, 0))]
    if pos is not None:
        args.append(pos.astype(f32))                                    # (1, N, D)
        in_specs.append(pl.BlockSpec((1, N, D), const3))
    args += [
        blk["ln1_g"].reshape(1, D).astype(f32), blk["ln1_b"].reshape(1, D).astype(f32),
        blk["qkv_w"].astype(bf16), blk["qkv_b"].reshape(1, 3 * D).astype(f32),
        blk["proj_w"].astype(bf16), blk["proj_b"].reshape(1, D).astype(f32),
        blk["ln2_g"].reshape(1, D).astype(f32), blk["ln2_b"].reshape(1, D).astype(f32),
        blk["fc1_w"].astype(bf16), blk["fc1_b"].reshape(1, Dh).astype(f32),
        blk["fc2_w"].astype(bf16), blk["fc2_b"].reshape(1, D).astype(f32),
    ]
    in_specs += [
        pl.BlockSpec((1, D), const2), pl.BlockSpec((1, D), const2),
        pl.BlockSpec((D, 3 * D), const2), pl.BlockSpec((1, 3 * D), const2),
        pl.BlockSpec((D, D), const2), pl.BlockSpec((1, D), const2),
        pl.BlockSpec((1, D), const2), pl.BlockSpec((1, D), const2),
        pl.BlockSpec((D, Dh), const2), pl.BlockSpec((1, Dh), const2),
        pl.BlockSpec((Dh, D), const2), pl.BlockSpec((1, D), const2),
    ]
    if final_ln is not None:
        gf, bf = final_ln
        args += [gf.reshape(1, D).astype(f32), bf.reshape(1, D).astype(f32)]
        in_specs += [pl.BlockSpec((1, D), const2), pl.BlockSpec((1, D), const2)]

    return pl.pallas_call(
        functools.partial(_vit_block_kernel, heads=heads, eps=eps,
                          add_pos=pos is not None, final_ln=final_ln is not None),
        out_shape=jax.ShapeDtypeStruct((B, N, D), tok.dtype),
        grid=(B,),
        in_specs=in_specs,
        out_specs=pl.BlockSpec((1, N, D), lambda b: (b, 0, 0)),
        compiler_params=pltpu.CompilerParams(dimension_semantics=("parallel",)),
    )(*args)


# ------------------------- conv3x3 (kw-im2col) kernels ------------------------


def _im2col_kw(x_nhwc, W):
    """Pad 'same' and stack the 3 kw taps into the channel dim (lane-dense)."""
    xp = jnp.pad(x_nhwc.astype(jnp.bfloat16), ((0, 0), (1, 1), (1, 1), (0, 0)))
    x_kw = jnp.concatenate(
        [xp[:, :, 0:W, :], xp[:, :, 1:W + 1, :], xp[:, :, 2:W + 2, :]], axis=-1)
    B, Hp2, _, K3 = x_kw.shape
    return x_kw.reshape(B, Hp2 * W, K3)          # rows flattened (row stride = W)


def _conv_weights_kw(w_oihw):
    """[Cout, Cin, 3, 3] -> [3 (kh), 3*Cin (kw-major), Cout], bf16."""
    Cout, Cin = w_oihw.shape[0], w_oihw.shape[1]
    return (jnp.transpose(w_oihw, (2, 3, 1, 0))
            .reshape(3, 3 * Cin, Cout).astype(jnp.bfloat16))


def _conv3x3_kernel(x_ref, w_ref, b_ref, o_ref, *, W, relu):
    # x_ref: (1, (H+2)*W, 3*Cin) bf16   w_ref: (3, 3*Cin, Cout) bf16
    HW, Cout = o_ref.shape[1], o_ref.shape[2]
    acc = jnp.zeros((HW, Cout), jnp.float32)
    for kh in range(3):                                    # 3 lane-dense matmuls
        acc = acc + jnp.dot(x_ref[0, kh * W:kh * W + HW, :], w_ref[kh],
                            preferred_element_type=jnp.float32)
    acc = acc + b_ref[...]
    if relu:
        acc = jnp.maximum(acc, 0.0)
    o_ref[0] = acc.astype(o_ref.dtype)


def conv3x3(x_nhwc, w_oihw, b, relu=False, out_dtype=jnp.bfloat16):
    """3x3 'same' conv, NHWC input, PyTorch-layout [Cout, Cin, 3, 3] weights."""
    B, H, W, Cin = x_nhwc.shape
    Cout = w_oihw.shape[0]
    x2d = _im2col_kw(x_nhwc, W)                             # (B, (H+2)*W, 3*Cin)
    w3 = _conv_weights_kw(w_oihw)
    out = pl.pallas_call(
        functools.partial(_conv3x3_kernel, W=W, relu=relu),
        out_shape=jax.ShapeDtypeStruct((B, H * W, Cout), out_dtype),
        grid=(B,),
        in_specs=[
            pl.BlockSpec((1, (H + 2) * W, 3 * Cin), lambda bi: (bi, 0, 0)),
            pl.BlockSpec((3, 3 * Cin, Cout), lambda bi: (0, 0, 0)),
            pl.BlockSpec((1, Cout), lambda bi: (0, 0)),
        ],
        out_specs=pl.BlockSpec((1, H * W, Cout), lambda bi: (bi, 0, 0)),
        compiler_params=pltpu.CompilerParams(dimension_semantics=("parallel",)),
    )(x2d, w3, b.reshape(1, Cout).astype(jnp.float32))
    return out.reshape(B, H, W, Cout)


def _head_kernel(x_ref, w_ref, b_ref, w2_ref, b2_ref, o_ref, *, W):
    # fused: Conv3x3(Cin->32)+ReLU then Conv1x1(32->1)+ReLU, lane-dense output.
    HW = o_ref.shape[-1]
    Cout = w_ref.shape[2]
    acc = jnp.zeros((HW, Cout), jnp.float32)
    for kh in range(3):
        acc = acc + jnp.dot(x_ref[0, kh * W:kh * W + HW, :], w_ref[kh],
                            preferred_element_type=jnp.float32)
    acc = jnp.maximum(acc + b_ref[...], 0.0)                # ReLU after 3x3
    # 1x1 conv (32 -> 1) + ReLU, emitted as a lane-dense (1, H*W) row.
    d = jnp.dot(w2_ref[...], acc.T, preferred_element_type=jnp.float32)
    o_ref[0] = jnp.maximum(d + b2_ref[...], 0.0)


def conv3x3_relu_conv1x1_relu(x_nhwc, w_oihw, b, w1x1, b1x1):
    """Fused output head: returns depth [B, H, W] (already ReLU'd)."""
    B, H, W, Cin = x_nhwc.shape
    Cout = w_oihw.shape[0]
    x2d = _im2col_kw(x_nhwc, W)
    w3 = _conv_weights_kw(w_oihw)
    w2t = w1x1.reshape(Cout, 1).T.astype(jnp.float32)        # (1, Cout)
    depth = pl.pallas_call(
        functools.partial(_head_kernel, W=W),
        out_shape=jax.ShapeDtypeStruct((B, 1, H * W), jnp.float32),
        grid=(B,),
        in_specs=[
            pl.BlockSpec((1, (H + 2) * W, 3 * Cin), lambda bi: (bi, 0, 0)),
            pl.BlockSpec((3, 3 * Cin, Cout), lambda bi: (0, 0, 0)),
            pl.BlockSpec((1, Cout), lambda bi: (0, 0)),
            pl.BlockSpec((1, Cout), lambda bi: (0, 0)),
            pl.BlockSpec((1, 1), lambda bi: (0, 0)),
        ],
        out_specs=pl.BlockSpec((1, 1, H * W), lambda bi: (bi, 0, 0)),
        compiler_params=pltpu.CompilerParams(dimension_semantics=("parallel",)),
    )(x2d, w3, b.reshape(1, Cout).astype(jnp.float32),
      w2t, b1x1.reshape(1, 1).astype(jnp.float32))
    return depth.reshape(B, H, W)


# ------------------------------- JAX glue ------------------------------------


def bilinear_upsample_align_corners(x, out_h, out_w):
    """F.interpolate(mode='bilinear', align_corners=True), single-pass lerp."""
    B, H, W, C = x.shape

    def coords(n_in, n_out):
        src = jnp.arange(n_out, dtype=jnp.float32) * (n_in - 1) / max(n_out - 1, 1)
        lo = jnp.floor(src).astype(jnp.int32)
        hi = jnp.minimum(lo + 1, n_in - 1)
        return src - lo.astype(jnp.float32), lo, hi

    fh, hlo, hhi = coords(H, out_h)
    fw, wlo, whi = coords(W, out_w)
    xf = x.astype(jnp.float32)
    fh_ = fh[None, :, None, None]
    rows = jnp.take(xf, hlo, axis=1) * (1.0 - fh_) + jnp.take(xf, hhi, axis=1) * fh_
    fw_ = fw[None, None, :, None]
    # TODO(synk): at production sizes fuse this fixed interpolation into the
    #             following conv kernel's input read instead of a gather pass.
    return jnp.take(rows, wlo, axis=2) * (1.0 - fw_) + jnp.take(rows, whi, axis=2) * fw_


# ------------------------- parameters (deterministic) ------------------------


def init_params(key, *, dim=32, patch=2, in_chans=3, heads=4, depth=2, img=16):
    assert dim % heads == 0 and dim % 2 == 0
    hidden = 4 * dim
    n_tok = (img // patch) ** 2
    features = dim  # DPT "features"; output_conv2 input is features // 2

    keys = iter(jax.random.split(key, 64))

    def dense(fan_in, shape):
        return jax.random.normal(next(keys), shape, jnp.float32) * (fan_in ** -0.5)

    p = {
        "dim": dim,
        "patch": patch,
        "heads": heads,
        "pe_w": dense(in_chans * patch * patch, (in_chans * patch * patch, dim)),
        "pe_b": jnp.zeros((dim,), jnp.float32),
        "pos": jax.random.normal(next(keys), (1, n_tok, dim), jnp.float32) * 0.02,
        "blocks": [],
        "ln_f_g": jnp.ones((dim,), jnp.float32),
        "ln_f_b": jnp.zeros((dim,), jnp.float32),
        # DPT scratch.output_conv1: Conv2d(features, features//2, 3, 1, 1)
        "oc1_w": dense(features * 9, (features // 2, features, 3, 3)),
        "oc1_b": jnp.zeros((features // 2,), jnp.float32),
        # replaced scratch.output_conv2:
        #   Conv2d(features//2, 32, 3, 1, 1) + ReLU + Conv2d(32, 1, 1) + ReLU
        "oc2a_w": dense((features // 2) * 9, (32, features // 2, 3, 3)),
        "oc2a_b": jnp.zeros((32,), jnp.float32),
        "oc2b_w": dense(32, (32, 1)),
        "oc2b_b": jnp.zeros((1,), jnp.float32),
    }
    for _ in range(depth):
        p["blocks"].append(
            {
                "ln1_g": jnp.ones((dim,), jnp.float32),
                "ln1_b": jnp.zeros((dim,), jnp.float32),
                "qkv_w": dense(dim, (dim, 3 * dim)),
                "qkv_b": jnp.zeros((3 * dim,), jnp.float32),
                "proj_w": dense(dim, (dim, dim)),
                "proj_b": jnp.zeros((dim,), jnp.float32),
                "ln2_g": jnp.ones((dim,), jnp.float32),
                "ln2_b": jnp.zeros((dim,), jnp.float32),
                "fc1_w": dense(dim, (dim, hidden)),
                "fc1_b": jnp.zeros((hidden,), jnp.float32),
                "fc2_w": dense(hidden, (hidden, dim)),
                "fc2_b": jnp.zeros((dim,), jnp.float32),
            }
        )
    return p


# ------------------------------ forward pass ---------------------------------


def relative_depth_anything_forward(params, x_nchw):
    B, C, H, W = x_nchw.shape
    P, D, heads = params["patch"], params["dim"], params["heads"]
    ph, pw = H // P, W // P
    n_tok = ph * pw

    x = jnp.transpose(x_nchw, (0, 2, 3, 1))  # -> NHWC

    # ---- patch embedding (strided conv == per-patch matmul, tiled MXU kernel) ----
    patches = (
        x.reshape(B, ph, P, pw, P, C)
        .transpose(0, 1, 3, 2, 4, 5)
        .reshape(B * n_tok, P * P * C)
    ).astype(jnp.bfloat16)
    tok = matmul_bias_act(patches, params["pe_w"].astype(jnp.bfloat16),
                          params["pe_b"], out_dtype=jnp.bfloat16)
    tok = tok.reshape(B, n_tok, D)

    # ---- transformer blocks: ONE fused pallas_call per block.
    #      pos-embed add fused into the first block, final LN into the last. ----
    blocks = params["blocks"]
    if blocks:
        last = len(blocks) - 1
        for i, blk in enumerate(blocks):
            tok = vit_block(
                tok, blk, heads=heads,
                pos=params["pos"] if i == 0 else None,
                final_ln=(params["ln_f_g"], params["ln_f_b"]) if i == last else None)
    else:
        tok = (tok.astype(jnp.float32) + params["pos"]).astype(jnp.bfloat16)
        tok = layernorm(tok.reshape(B * n_tok, D), params["ln_f_g"],
                        params["ln_f_b"], out_dtype=jnp.bfloat16).reshape(B, n_tok, D)

    feat = tok.reshape(B, ph, pw, D)  # NHWC feature map (bf16)

    # ---- DPT output head ----
    out = conv3x3(feat, params["oc1_w"], params["oc1_b"], relu=False)  # features//2
    # TODO(synk): real DPT interpolates to (patch_h*14, patch_w*14); here a x2
    #             align_corners bilinear upsample stands in (plain-JAX glue).
    out = bilinear_upsample_align_corners(out, ph * P, pw * P)

    # replaced output_conv2, fully fused:
    #   Conv3x3(features//2 -> 32) + ReLU + Conv1x1(32 -> 1) + ReLU
    # (final ReLU of DepthAnythingV2.forward is idempotent with the in-kernel one)
    depth = conv3x3_relu_conv1x1_relu(out, params["oc2a_w"], params["oc2a_b"],
                                      params["oc2b_w"], params["oc2b_b"])
    return depth  # [B, H_out, W_out]


# ---------------------------------- main --------------------------------------

if __name__ == "__main__":
    root = jax.random.PRNGKey(0)
    pkey, xkey = jax.random.split(root)

    params = init_params(pkey, dim=32, patch=2, in_chans=3, heads=4, depth=2, img=16)
    x = jax.random.normal(xkey, (2, 3, 16, 16), jnp.float32)  # NCHW, like PyTorch

    fwd = jax.jit(lambda inp: relative_depth_anything_forward(params, inp))
    depth = jax.block_until_ready(fwd(x))

    assert depth.shape == (2, 16, 16), depth.shape
    assert depth.dtype == jnp.float32
    assert bool(jnp.all(depth >= 0.0))
    print("KERNEL_OK")
</pallas_src>

<mosaic_0001>
module attributes {stable_mosaic.version = 11 : i64} {
  func.func @_matmul_bias_act_kernel(%arg0: i32, %arg1: i32, %arg2: i32, %arg3: memref<128x12xbf16, #tpu.memory_space<vmem>>, %arg4: memref<12x32xbf16, #tpu.memory_space<vmem>>, %arg5: memref<1x32xf32, #tpu.memory_space<vmem>>, %arg6: memref<128x32xbf16, #tpu.memory_space<vmem>>, %arg7: memref<128x32xf32, #tpu.memory_space<vmem>>) attributes {dimension_semantics = [#tpu.dimension_semantics<parallel>, #tpu.dimension_semantics<parallel>, #tpu.dimension_semantics<arbitrary>], iteration_bounds = array<i64: 1, 1, 1>, scalar_prefetch = 0 : i64, scratch_operands = 1 : i64, tpu.core_type = #tpu.core_type<tc>, window_params = [{transform_indices = @transform_0, window_bounds = array<i64: 128, 12>}, {transform_indices = @transform_1, window_bounds = array<i64: 12, 32>}, {transform_indices = @transform_2, window_bounds = array<i64: 1, 32>}, {transform_indices = @transform_3, window_bounds = array<i64: 128, 32>}]} {
    %c0_i32 = arith.constant 0 : i32
    %0 = arith.cmpi eq, %arg2, %c0_i32 : i32
    %1 = arith.extui %0 : i1 to i32
    %c0_i32_0 = arith.constant 0 : i32
    %2 = arith.cmpi ne, %1, %c0_i32_0 : i32
    scf.if %2 {
      %cst_10 = arith.constant 0.000000e+00 : f32
      %12 = vector.broadcast %cst_10 : f32 to vector<128x32xf32>
      %c0_11 = arith.constant 0 : index
      %c0_12 = arith.constant 0 : index
      %13 = vector.load %arg7[%c0_11, %c0_12] : memref<128x32xf32, #tpu.memory_space<vmem>>, vector<128x32xf32>
      tpu.vector_store %arg7[%c0_11, %c0_12], %12 {strides = array<i32>} : memref<128x32xf32, #tpu.memory_space<vmem>>, vector<128x32xf32>,
    } else {
    }
    %c0 = arith.constant 0 : index
    %c0_1 = arith.constant 0 : index
    %3 = vector.load %arg7[%c0, %c0_1] : memref<128x32xf32, #tpu.memory_space<vmem>>, vector<128x32xf32>
    %c0_2 = arith.constant 0 : index
    %c0_3 = arith.constant 0 : index
    %4 = vector.load %arg3[%c0_2, %c0_3] : memref<128x12xbf16, #tpu.memory_space<vmem>>, vector<128x12xbf16>
    %c0_4 = arith.constant 0 : index
    %c0_5 = arith.constant 0 : index
    %5 = vector.load %arg4[%c0_4, %c0_5] : memref<12x32xbf16, #tpu.memory_space<vmem>>, vector<12x32xbf16>
    %cst = arith.constant dense<0.000000e+00> : vector<128x32xf32>
    %6 = tpu.matmul %4, %5, %cst {dimension_numbers = #tpu.dot_dimension_numbers<[1], [0], [0], [1], [0, 0, 1, 1], [], []>} : vector<128x12xbf16>, vector<12x32xbf16>, vector<128x32xf32> -> vector<128x32xf32>
    %7 = arith.addf %3, %6 : vector<128x32xf32>
    %c0_6 = arith.constant 0 : index
    %c0_7 = arith.constant 0 : index
    %8 = vector.load %arg7[%c0_6, %c0_7] : memref<128x32xf32, #tpu.memory_space<vmem>>, vector<128x32xf32>
    tpu.vector_store %arg7[%c0_6, %c0_7], %7 {strides = array<i32>} : memref<128x32xf32, #tpu.memory_space<vmem>>, vector<128x32xf32>,
    %c0_i32_8 = arith.constant 0 : i32
    %9 = arith.cmpi eq, %arg2, %c0_i32_8 : i32
    %10 = arith.extui %9 : i1 to i32
    %c0_i32_9 = arith.constant 0 : i32
    %11 = arith.cmpi ne, %10, %c0_i32_9 : i32
    scf.if %11 {
      %c0_10 = arith.constant 0 : index
      %c0_11 = arith.constant 0 : index
      %12 = vector.load %arg7[%c0_10, %c0_11] : memref<128x32xf32, #tpu.memory_space<vmem>>, vector<128x32xf32>
      %c0_12 = arith.constant 0 : index
      %c0_13 = arith.constant 0 : index
      %13 = vector.load %arg5[%c0_12, %c0_13] : memref<1x32xf32, #tpu.memory_space<vmem>>, vector<1x32xf32>
      %14 = vector.broadcast %13 : vector<1x32xf32> to vector<128x32xf32>
      %15 = arith.addf %12, %14 : vector<128x32xf32>
      %16 = arith.truncf %15 : vector<128x32xf32> to vector<128x32xbf16>
      %c0_14 = arith.constant 0 : index
      %c0_15 = arith.constant 0 : index
      %17 = vector.load %arg6[%c0_14, %c0_15] : memref<128x32xbf16, #tpu.memory_space<vmem>>, vector<128x32xbf16>
      tpu.vector_store %arg6[%c0_14, %c0_15], %16 {strides = array<i32>} : memref<128x32xbf16, #tpu.memory_space<vmem>>, vector<128x32xbf16>,
    } else {
    }
    return
  }
  func.func @transform_0(%arg0: i32, %arg1: i32, %arg2: i32) -> (i32, i32) {
    %c0_i32 = arith.constant 0 : i32
    return %arg0, %arg2 : i32, i32
  }
  func.func @transform_1(%arg0: i32, %arg1: i32, %arg2: i32) -> (i32, i32) {
    %c0_i32 = arith.constant 0 : i32
    return %arg2, %arg1 : i32, i32
  }
  func.func @transform_2(%arg0: i32, %arg1: i32, %arg2: i32) -> (i32, i32) {
    %c0_i32 = arith.constant 0 : i32
    %c0_i32_0 = arith.constant 0 : i32
    return %c0_i32, %arg1 : i32, i32
  }
  func.func @transform_3(%arg0: i32, %arg1: i32, %arg2: i32) -> (i32, i32) {
    %c0_i32 = arith.constant 0 : i32
    return %arg0, %arg1 : i32, i32
  }
}

module attributes {stable_mosaic.version = 11 : i64} {
  func.func @_vit_block_kernel(%arg0: i32, %arg1: memref<1x64x32xbf16, #tpu.memory_space<vmem>>, %arg2: memref<1x64x32xf32, #tpu.memory_space<vmem>>, %arg3: memref<1x32xf32, #tpu.memory_space<vmem>>, %arg4: memref<1x32xf32, #tpu.memory_space<vmem>>, %arg5: memref<32x96xbf16, #tpu.memory_space<vmem>>, %arg6: memref<1x96xf32, #tpu.memory_space<vmem>>, %arg7: memref<32x32xbf16, #tpu.memory_space<vmem>>, %arg8: memref<1x32xf32, #tpu.memory_space<vmem>>, %arg9: memref<1x32xf32, #tpu.memory_space<vmem>>, %arg10: memref<1x32xf32, #tpu.memory_space<vmem>>, %arg11: memref<32x128xbf16, #tpu.memory_space<vmem>>, %arg12: memref<1x128xf32, #tpu.memory_space<vmem>>, %arg13: memref<128x32xbf16, #tpu.memory_space<vmem>>, %arg14: memref<1x32xf32, #tpu.memory_space<vmem>>, %arg15: memref<1x64x32xbf16, #tpu.memory_space<vmem>>) attributes {dimension_semantics = [#tpu.dimension_semantics<parallel>], iteration_bounds = array<i64: 2>, scalar_prefetch = 0 : i64, scratch_operands = 0 : i64, tpu.core_type = #tpu.core_type<tc>, window_params = [{transform_indices = @transform_0, window_bounds = array<i64: 1, 64, 32>}, {pipeline_mode = #tpu.pipeline_mode<synchronous>, transform_indices = @transform_1, window_bounds = array<i64: 1, 64, 32>}, {pipeline_mode = #tpu.pipeline_mode<synchronous>, transform_indices = @transform_2, window_bounds = array<i64: 1, 32>}, {pipeline_mode = #tpu.pipeline_mode<synchronous>, transform_indices = @transform_3, window_bounds = array<i64: 1, 32>}, {pipeline_mode = #tpu.pipeline_mode<synchronous>, transform_indices = @transform_4, window_bounds = array<i64: 32, 96>}, {pipeline_mode = #tpu.pipeline_mode<synchronous>, transform_indices = @transform_5, window_bounds = array<i64: 1, 96>}, {pipeline_mode = #tpu.pipeline_mode<synchronous>, transform_indices = @transform_6, window_bounds = array<i64: 32, 32>}, {pipeline_mode = #tpu.pipeline_mode<synchronous>, transform_indices = @transform_7, window_bounds = array<i64: 1, 32>}, {pipeline_mode = #tpu.pipeline_mode<synchronous>, transform_indices = @transform_8, window_bounds = array<i64: 1, 32>}, {pipeline_mode = #tpu.pipeline_mode<synchronous>, transform_indices = @transform_9, window_bounds = array<i64: 1, 32>}, {pipeline_mode = #tpu.pipeline_mode<synchronous>, transform_indices = @transform_10, window_bounds = array<i64: 32, 128>}, {pipeline_mode = #tpu.pipeline_mode<synchronous>, transform_indices = @transform_11, window_bounds = array<i64: 1, 128>}, {pipeline_mode = #tpu.pipeline_mode<synchronous>, transform_indices = @transform_12, window_bounds = array<i64: 128, 32>}, {pipeline_mode = #tpu.pipeline_mode<synchronous>, transform_indices = @transform_13, window_bounds = array<i64: 1, 32>}, {transform_indices = @transform_14, window_bounds = array<i64: 1, 64, 32>}]} {
    %c0 = arith.constant 0 : index
    %c0_0 = arith.constant 0 : index
    %c0_1 = arith.constant 0 : index
    %0 = vector.load %arg1[%c0, %c0_0, %c0_1] : memref<1x64x32xbf16, #tpu.memory_space<vmem>>, vector<1x64x32xbf16>
    %1 = vector.shape_cast %0 : vector<1x64x32xbf16> to vector<64x32xbf16>
    %2 = arith.extf %1 : vector<64x32xbf16> to vector<64x32xf32>
    %c0_2 = arith.constant 0 : index
    %c0_3 = arith.constant 0 : index
    %c0_4 = arith.constant 0 : index
    %3 = vector.load %arg2[%c0_2, %c0_3, %c0_4] : memref<1x64x32xf32, #tpu.memory_space<vmem>>, vector<1x64x32xf32>
    %4 = vector.shape_cast %3 : vector<1x64x32xf32> to vector<64x32xf32>
    %5 = arith.addf %2, %4 : vector<64x32xf32>
    %c0_5 = arith.constant 0 : index
    %c0_6 = arith.constant 0 : index
    %6 = vector.load %arg3[%c0_5, %c0_6] : memref<1x32xf32, #tpu.memory_space<vmem>>, vector<1x32xf32>
    %c0_7 = arith.constant 0 : index
    %c0_8 = arith.constant 0 : index
    %7 = vector.load %arg4[%c0_7, %c0_8] : memref<1x32xf32, #tpu.memory_space<vmem>>, vector<1x32xf32>
    %cst = arith.constant dense<0.000000e+00> : vector<64xf32>
    %8 = vector.multi_reduction <add>, %5, %cst [1] : vector<64x32xf32> to vector<64xf32>
    %9 = vector.shape_cast %8 : vector<64xf32> to vector<64x1xf32>
    %cst_9 = arith.constant 3.200000e+01 : f32
    %10 = vector.broadcast %cst_9 : f32 to vector<64x1xf32>
    %11 = arith.divf %9, %10 : vector<64x1xf32>
    %12 = vector.broadcast %11 : vector<64x1xf32> to vector<64x32xf32>
    %13 = arith.subf %5, %12 : vector<64x32xf32>
    %14 = arith.mulf %13, %13 : vector<64x32xf32>
    %cst_10 = arith.constant dense<0.000000e+00> : vector<64xf32>
    %15 = vector.multi_reduction <add>, %14, %cst_10 [1] : vector<64x32xf32> to vector<64xf32>
    %16 = vector.shape_cast %15 : vector<64xf32> to vector<64x1xf32>
    %cst_11 = arith.constant 3.200000e+01 : f32
    %17 = vector.broadcast %cst_11 : f32 to vector<64x1xf32>
    %18 = arith.divf %16, %17 : vector<64x1xf32>
    %19 = vector.broadcast %11 : vector<64x1xf32> to vector<64x32xf32>
    %20 = arith.subf %5, %19 : vector<64x32xf32>
    %cst_12 = arith.constant 9.99999997E-7 : f32
    %21 = vector.broadcast %cst_12 : f32 to vector<64x1xf32>
    %22 = arith.addf %18, %21 : vector<64x1xf32>
    %23 = math.rsqrt %22 : vector<64x1xf32>
    %24 = vector.broadcast %23 : vector<64x1xf32> to vector<64x32xf32>
    %25 = arith.mulf %20, %24 : vector<64x32xf32>
    %26 = vector.broadcast %6 : vector<1x32xf32> to vector<64x32xf32>
    %27 = arith.mulf %25, %26 : vector<64x32xf32>
    %28 = vector.broadcast %7 : vector<1x32xf32> to vector<64x32xf32>
    %29 = arith.addf %27, %28 : vector<64x32xf32>
    %30 = arith.truncf %29 : vector<64x32xf32> to vector<64x32xbf16>
    %c0_13 = arith.constant 0 : index
    %c0_14 = arith.constant 0 : index
    %31 = vector.load %arg5[%c0_13, %c0_14] : memref<32x96xbf16, #tpu.memory_space<vmem>>, vector<32x96xbf16>
    %cst_15 = arith.constant dense<0.000000e+00> : vector<64x96xf32>
    %32 = tpu.matmul %30, %31, %cst_15 {dimension_numbers = #tpu.dot_dimension_numbers<[1], [0], [0], [1], [0, 0, 1, 1], [], []>} : vector<64x32xbf16>, vector<32x96xbf16>, vector<64x96xf32> -> vector<64x96xf32>
    %c0_16 = arith.constant 0 : index
    %c0_17 = arith.constant 0 : index
    %33 = vector.load %arg6[%c0_16, %c0_17] : memref<1x96xf32, #tpu.memory_space<vmem>>, vector<1x96xf32>
    %34 = vector.broadcast %33 : vector<1x96xf32> to vector<64x96xf32>
    %35 = arith.addf %32, %34 : vector<64x96xf32>
    %cst_18 = arith.constant 0.000000e+00 : f32
    %36 = vector.broadcast %cst_18 : f32 to vector<64x32xf32>
    %37 = vector.extract_strided_slice %35 {offsets = [0, 0], sizes = [64, 8], strides = [1, 1]} : vector<64x96xf32> to vector<64x8xf32>
    %38 = vector.extract_strided_slice %35 {offsets = [0, 32], sizes = [64, 8], strides = [1, 1]} : vector<64x96xf32> to vector<64x8xf32>
    %39 = vector.extract_strided_slice %35 {offsets = [0, 64], sizes = [64, 8], strides = [1, 1]} : vector<64x96xf32> to vector<64x8xf32>
    %40 = tpu.transpose %38, [1, 0] : vector<64x8xf32> -> vector<8x64xf32>
    %cst_19 = arith.constant dense<0.000000e+00> : vector<64x64xf32>
    %41 = tpu.matmul %37, %40, %cst_19 {dimension_numbers = #tpu.dot_dimension_numbers<[1], [0], [0], [1], [0, 0, 1, 1], [], []>} : vector<64x8xf32>, vector<8x64xf32>, vector<64x64xf32> -> vector<64x64xf32>
    %cst_20 = arith.constant 0.353553385 : f32
    %42 = vector.broadcast %cst_20 : f32 to vector<64x64xf32>
    %43 = arith.mulf %41, %42 : vector<64x64xf32>
    %cst_21 = arith.constant dense<0xFF800000> : vector<64xf32>
    %44 = vector.multi_reduction <maximumf>, %43, %cst_21 [1] : vector<64x64xf32> to vector<64xf32>
    %45 = vector.shape_cast %44 : vector<64xf32> to vector<64x1xf32>
    %46 = vector.broadcast %45 : vector<64x1xf32> to vector<64x64xf32>
    %47 = arith.subf %43, %46 : vector<64x64xf32>
    %48 = math.exp %47 : vector<64x64xf32>
    %cst_22 = arith.constant dense<0.000000e+00> : vector<64xf32>
    %49 = vector.multi_reduction <add>, %48, %cst_22 [1] : vector<64x64xf32> to vector<64xf32>
    %50 = vector.shape_cast %49 : vector<64xf32> to vector<64x1xf32>
    %51 = tpu.reciprocal %50 {approx = true} : vector<64x1xf32> -> vector<64x1xf32>
    %52 = vector.broadcast %51 : vector<64x1xf32> to vector<64x64xf32>
    %53 = arith.mulf %48, %52 : vector<64x64xf32>
    %cst_23 = arith.constant dense<0.000000e+00> : vector<64x8xf32>
    %54 = tpu.matmul %53, %39, %cst_23 {dimension_numbers = #tpu.dot_dimension_numbers<[1], [0], [0], [1], [0, 0, 1, 1], [], []>} : vector<64x64xf32>, vector<64x8xf32>, vector<64x8xf32> -> vector<64x8xf32>
    %55 = arith.truncf %54 : vector<64x8xf32> to vector<64x8xbf16>
    %c0_24 = arith.constant 0 : index
    %c0_25 = arith.constant 0 : index
    %56 = vector.load %arg7[%c0_24, %c0_25] : memref<32x32xbf16, #tpu.memory_space<vmem>>, vector<8x32xbf16>
    %cst_26 = arith.constant dense<0.000000e+00> : vector<64x32xf32>
    %57 = tpu.matmul %55, %56, %cst_26 {dimension_numbers = #tpu.dot_dimension_numbers<[1], [0], [0], [1], [0, 0, 1, 1], [], []>} : vector<64x8xbf16>, vector<8x32xbf16>, vector<64x32xf32> -> vector<64x32xf32>
    %58 = arith.addf %36, %57 : vector<64x32xf32>
    %59 = vector.extract_strided_slice %35 {offsets = [0, 8], sizes = [64, 8], strides = [1, 1]} : vector<64x96xf32> to vector<64x8xf32>
    %60 = vector.extract_strided_slice %35 {offsets = [0, 40], sizes = [64, 8], strides = [1, 1]} : vector<64x96xf32> to vector<64x8xf32>
    %61 = vector.extract_strided_slice %35 {offsets = [0, 72], sizes = [64, 8], strides = [1, 1]} : vector<64x96xf32> to vector<64x8xf32>
    %62 = tpu.transpose %60, [1, 0] : vector<64x8xf32> -> vector<8x64xf32>
    %cst_27 = arith.constant dense<0.000000e+00> : vector<64x64xf32>
    %63 = tpu.matmul %59, %62, %cst_27 {dimension_numbers = #tpu.dot_dimension_numbers<[1], [0], [0], [1], [0, 0, 1, 1], [], []>} : vector<64x8xf32>, vector<8x64xf32>, vector<64x64xf32> -> vector<64x64xf32>
    %cst_28 = arith.constant 0.353553385 : f32
    %64 = vector.broadcast %cst_28 : f32 to vector<64x64xf32>
    %65 = arith.mulf %63, %64 : vector<64x64xf32>
    %cst_29 = arith.constant dense<0xFF800000> : vector<64xf32>
    %66 = vector.multi_reduction <maximumf>, %65, %cst_29 [1] : vector<64x64xf32> to vector<64xf32>
    %67 = vector.shape_cast %66 : vector<64xf32> to vector<64x1xf32>
    %68 = vector.broadcast %67 : vector<64x1xf32> to vector<64x64xf32>
    %69 = arith.subf %65, %68 : vector<64x64xf32>
    %70 = math.exp %69 : vector<64x64xf32>
    %cst_30 = arith.constant dense<0.000000e+00> : vector<64xf32>
    %71 = vector.multi_reduction <add>, %70, %cst_30 [1] : vector<64x64xf32> to vector<64xf32>
    %72 = vector.shape_cast %71 : vector<64xf32> to vector<64x1xf32>
    %73 = tpu.reciprocal %72 {approx = true} : vector<64x1xf32> -> vector<64x1xf32>
    %74 = vector.broadcast %73 : vector<64x1xf32> to vector<64x64xf32>
    %75 = arith.mulf %70, %74 : vector<64x64xf32>
    %cst_31 = arith.constant dense<0.000000e+00> : vector<64x8xf32>
    %76 = tpu.matmul %75, %61, %cst_31 {dimension_numbers = #tpu.dot_dimension_numbers<[1], [0], [0], [1], [0, 0, 1, 1], [], []>} : vector<64x64xf32>, vector<64x8xf32>, vector<64x8xf32> -> vector<64x8xf32>
    %77 = arith.truncf %76 : vector<64x8xf32> to vector<64x8xbf16>
    %c8 = arith.constant 8 : index
    %c0_32 = arith.constant 0 : index
    %78 = vector.load %arg7[%c8, %c0_32] : memref<32x32xbf16, #tpu.memory_space<vmem>>, vector<8x32xbf16>
    %cst_33 = arith.constant dense<0.000000e+00> : vector<64x32xf32>
    %79 = tpu.matmul %77, %78, %cst_33 {dimension_numbers = #tpu.dot_dimension_numbers<[1], [0], [0], [1], [0, 0, 1, 1], [], []>} : vector<64x8xbf16>, vector<8x32xbf16>, vector<64x32xf32> -> vector<64x32xf32>
    %80 = arith.addf %58, %79 : vector<64x32xf32>
    %81 = vector.extract_strided_slice %35 {offsets = [0, 16], sizes = [64, 8], strides = [1, 1]} : vector<64x96xf32> to vector<64x8xf32>
    %82 = vector.extract_strided_slice %35 {offsets = [0, 48], sizes = [64, 8], strides = [1, 1]} : vector<64x96xf32> to vector<64x8xf32>
    %83 = vector.extract_strided_slice %35 {offsets = [0, 80], sizes = [64, 8], strides = [1, 1]} : vector<64x96xf32> to vector<64x8xf32>
    %84 = tpu.transpose %82, [1, 0] : vector<64x8xf32> -> vector<8x64xf32>
    %cst_34 = arith.constant dense<0.000000e+00> : vector<64x64xf32>
    %85 = tpu.matmul %81, %84, %cst_34 {dimension_numbers = #tpu.dot_dimension_numbers<[1], [0], [0], [1], [0, 0, 1, 1], [], []>} : vector<64x8xf32>, vector<8x64xf32>, vector<64x64xf32> -> vector<64x64xf32>
    %cst_35 = arith.constant 0.353553385 : f32
    %86 = vector.broadcast %cst_35 : f32 to vector<64x64xf32>
    %87 = arith.mulf %85, %86 : vector<64x64xf32>
    %cst_36 = arith.constant dense<0xFF800000> : vector<64xf32>
    %88 = vector.multi_reduction <maximumf>, %87, %cst_36 [1] : vector<64x64xf32> to vector<64xf32>
    %89 = vector.shape_cast %88 : vector<64xf32> to vector<64x1xf32>
    %90 = vector.broadcast %89 : vector<64x1xf32> to vector<64x64xf32>
    %91 = arith.subf %87, %90 : vector<64x64xf32>
    %92 = math.exp %91 : vector<64x64xf32>
    %cst_37 = arith.constant dense<0.000000e+00> : vector<64xf32>
    %93 = vector.multi_reduction <add>, %92, %cst_37 [1] : vector<64x64xf32> to vector<64xf32>
    %94 = vector.shape_cast %93 : vector<64xf32> to vector<64x1xf32>
    %95 = tpu.reciprocal %94 {approx = true} : vector<64x1xf32> -> vector<64x1xf32>
    %96 = vector.broadcast %95 : vector<64x1xf32> to vector<64x64xf32>
    %97 = arith.mulf %92, %96 : vector<64x64xf32>
    %cst_38 = arith.constant dense<0.000000e+00> : vector<64x8xf32>
    %98 = tpu.matmul %97, %83, %cst_38 {dimension_numbers = #tpu.dot_dimension_numbers<[1], [0], [0], [1], [0, 0, 1, 1], [], []>} : vector<64x64xf32>, vector<64x8xf32>, vector<64x8xf32> -> vector<64x8xf32>
    %99 = arith.truncf %98 : vector<64x8xf32> to vector<64x8xbf16>
    %c16 = arith.constant 16 : index
    %c0_39 = arith.constant 0 : index
    %100 = vector.load %arg7[%c16, %c0_39] : memref<32x32xbf16, #tpu.memory_space<vmem>>, vector<8x32xbf16>
    %cst_40 = arith.constant dense<0.000000e+00> : vector<64x32xf32>
    %101 = tpu.matmul %99, %100, %cst_40 {dimension_numbers = #tpu.dot_dimension_numbers<[1], [0], [0], [1], [0, 0, 1, 1], [], []>} : vector<64x8xbf16>, vector<8x32xbf16>, vector<64x32xf32> -> vector<64x32xf32>
    %102 = arith.addf %80, %101 : vector<64x32xf32>
    %103 = vector.extract_strided_slice %35 {offsets = [0, 24], sizes = [64, 8], strides = [1, 1]} : vector<64x96xf32> to vector<64x8xf32>
    %104 = vector.extract_strided_slice %35 {offsets = [0, 56], sizes = [64, 8], strides = [1, 1]} : vector<64x96xf32> to vector<64x8xf32>
    %105 = vector.extract_strided_slice %35 {offsets = [0, 88], sizes = [64, 8], strides = [1, 1]} : vector<64x96xf32> to vector<64x8xf32>
    %106 = tpu.transpose %104, [1, 0] : vector<64x8xf32> -> vector<8x64xf32>
    %cst_41 = arith.constant dense<0.000000e+00> : vector<64x64xf32>
    %107 = tpu.matmul %103, %106, %cst_41 {dimension_numbers = #tpu.dot_dimension_numbers<[1], [0], [0], [1], [0, 0, 1, 1], [], []>} : vector<64x8xf32>, vector<8x64xf32>, vector<64x64xf32> -> vector<64x64xf32>
    %cst_42 = arith.constant 0.353553385 : f32
    %108 = vector.broadcast %cst_42 : f32 to vector<64x64xf32>
    %109 = arith.mulf %107, %108 : vector<64x64xf32>
    %cst_43 = arith.constant dense<0xFF800000> : vector<64xf32>
    %110 = vector.multi_reduction <maximumf>, %109, %cst_43 [1] : vector<64x64xf32> to vector<64xf32>
    %111 = vector.shape_cast %110 : vector<64xf32> to vector<64x1xf32>
    %112 = vector.broadcast %111 : vector<64x1xf32> to vector<64x64xf32>
    %113 = arith.subf %109, %112 : vector<64x64xf32>
    %114 = math.exp %113 : vector<64x64xf32>
    %cst_44 = arith.constant dense<0.000000e+00> : vector<64xf32>
    %115 = vector.multi_reduction <add>, %114, %cst_44 [1] : vector<64x64xf32> to vector<64xf32>
    %116 = vector.shape_cast %115 : vector<64xf32> to vector<64x1xf32>
    %117 = tpu.reciprocal %116 {approx = true} : vector<64x1xf32> -> vector<64x1xf32>
    %118 = vector.broadcast %117 : vector<64x1xf32> to vector<64x64xf32>
    %119 = arith.mulf %114, %118 : vector<64x64xf32>
    %cst_45 = arith.constant dense<0.000000e+00> : vector<64x8xf32>
    %120 = tpu.matmul %119, %105, %cst_45 {dimension_numbers = #tpu.dot_dimension_numbers<[1], [0], [0], [1], [0, 0, 1, 1], [], []>} : vector<64x64xf32>, vector<64x8xf32>, vector<64x8xf32> -> vector<64x8xf32>
    %121 = arith.truncf %120 : vector<64x8xf32> to vector<64x8xbf16>
    %c24 = arith.constant 24 : index
    %c0_46 = arith.constant 0 : index
    %122 = vector.load %arg7[%c24, %c0_46] : memref<32x32xbf16, #tpu.memory_space<vmem>>, vector<8x32xbf16>
    %cst_47 = arith.constant dense<0.000000e+00> : vector<64x32xf32>
    %123 = tpu.matmul %121, %122, %cst_47 {dimension_numbers = #tpu.dot_dimension_numbers<[1], [0], [0], [1], [0, 0, 1, 1], [], []>} : vector<64x8xbf16>, vector<8x32xbf16>, vector<64x32xf32> -> vector<64x32xf32>
    %124 = arith.addf %102, %123 : vector<64x32xf32>
    %125 = arith.addf %5, %124 : vector<64x32xf32>
    %c0_48 = arith.constant 0 : index
    %c0_49 = arith.constant 0 : index
    %126 = vector.load %arg8[%c0_48, %c0_49] : memref<1x32xf32, #tpu.memory_space<vmem>>, vector<1x32xf32>
    %127 = vector.broadcast %126 : vector<1x32xf32> to vector<64x32xf32>
    %128 = arith.addf %125, %127 : vector<64x32xf32>
    %c0_50 = arith.constant 0 : index
    %c0_51 = arith.constant 0 : index
    %129 = vector.load %arg9[%c0_50, %c0_51] : memref<1x32xf32, #tpu.memory_space<vmem>>, vector<1x32xf32>
    %c0_52 = arith.constant 0 : index
    %c0_53 = arith.constant 0 : index
    %130 = vector.load %arg10[%c0_52, %c0_53] : memref<1x32xf32, #tpu.memory_space<vmem>>, vector<1x32xf32>
    %cst_54 = arith.constant dense<0.000000e+00> : vector<64xf32>
    %131 = vector.multi_reduction <add>, %128, %cst_54 [1] : vector<64x32xf32> to vector<64xf32>
    %132 = vector.shape_cast %131 : vector<64xf32> to vector<64x1xf32>
    %cst_55 = arith.constant 3.200000e+01 : f32
    %133 = vector.broadcast %cst_55 : f32 to vector<64x1xf32>
    %134 = arith.divf %132, %133 : vector<64x1xf32>
    %135 = vector.broadcast %134 : vector<64x1xf32> to vector<64x32xf32>
    %136 = arith.subf %128, %135 : vector<64x32xf32>
    %137 = arith.mulf %136, %136 : vector<64x32xf32>
    %cst_56 = arith.constant dense<0.000000e+00> : vector<64xf32>
    %138 = vector.multi_reduction <add>, %137, %cst_56 [1] : vector<64x32xf32> to vector<64xf32>
    %139 = vector.shape_cast %138 : vector<64xf32> to vector<64x1xf32>
    %cst_57 = arith.constant 3.200000e+01 : f32
    %140 = vector.broadcast %cst_57 : f32 to vector<64x1xf32>
    %141 = arith.divf %139, %140 : vector<64x1xf32>
    %142 = vector.broadcast %134 : vector<64x1xf32> to vector<64x32xf32>
    %143 = arith.subf %128, %142 : vector<64x32xf32>
    %cst_58 = arith.constant 9.99999997E-7 : f32
    %144 = vector.broadcast %cst_58 : f32 to vector<64x1xf32>
    %145 = arith.addf %141, %144 : vector<64x1xf32>
    %146 = math.rsqrt %145 : vector<64x1xf32>
    %147 = vector.broadcast %146 : vector<64x1xf32> to vector<64x32xf32>
    %148 = arith.mulf %143, %147 : vector<64x32xf32>
    %149 = vector.broadcast %129 : vector<1x32xf32> to vector<64x32xf32>
    %150 = arith.mulf %148, %149 : vector<64x32xf32>
    %151 = vector.broadcast %130 : vector<1x32xf32> to vector<64x32xf32>
    %152 = arith.addf %150, %151 : vector<64x32xf32>
    %153 = arith.truncf %152 : vector<64x32xf32> to vector<64x32xbf16>
    %c0_59 = arith.constant 0 : index
    %c0_60 = arith.constant 0 : index
    %154 = vector.load %arg11[%c0_59, %c0_60] : memref<32x128xbf16, #tpu.memory_space<vmem>>, vector<32x128xbf16>
    %cst_61 = arith.constant dense<0.000000e+00> : vector<64x128xf32>
    %155 = tpu.matmul %153, %154, %cst_61 {dimension_numbers = #tpu.dot_dimension_numbers<[1], [0], [0], [1], [0, 0, 1, 1], [], []>} : vector<64x32xbf16>, vector<32x128xbf16>, vector<64x128xf32> -> vector<64x128xf32>
    %c0_62 = arith.constant 0 : index
    %c0_63 = arith.constant 0 : index
    %156 = vector.load %arg12[%c0_62, %c0_63] : memref<1x128xf32, #tpu.memory_space<vmem>>, vector<1x128xf32>
    %157 = vector.broadcast %156 : vector<1x128xf32> to vector<64x128xf32>
    %158 = arith.addf %155, %157 : vector<64x128xf32>
    %159 = arith.mulf %158, %158 : vector<64x128xf32>
    %160 = arith.mulf %158, %159 : vector<64x128xf32>
    %cst_64 = arith.constant 4.471500e-02 : f32
    %161 = vector.broadcast %cst_64 : f32 to vector<64x128xf32>
    %162 = arith.mulf %161, %160 : vector<64x128xf32>
    %163 = arith.addf %158, %162 : vector<64x128xf32>
    %cst_65 = arith.constant 0.797884583 : f32
    %164 = vector.broadcast %cst_65 : f32 to vector<64x128xf32>
    %165 = arith.mulf %164, %163 : vector<64x128xf32>
    %166 = math.tanh %165 : vector<64x128xf32>
    %cst_66 = arith.constant 1.000000e+00 : f32
    %167 = vector.broadcast %cst_66 : f32 to vector<64x128xf32>
    %168 = arith.addf %167, %166 : vector<64x128xf32>
    %cst_67 = arith.constant 5.000000e-01 : f32
    %169 = vector.broadcast %cst_67 : f32 to vector<64x128xf32>
    %170 = arith.mulf %169, %168 : vector<64x128xf32>
    %171 = arith.mulf %158, %170 : vector<64x128xf32>
    %172 = arith.truncf %171 : vector<64x128xf32> to vector<64x128xbf16>
    %c0_68 = arith.constant 0 : index
    %c0_69 = arith.constant 0 : index
    %173 = vector.load %arg13[%c0_68, %c0_69] : memref<128x32xbf16, #tpu.memory_space<vmem>>, vector<128x32xbf16>
    %cst_70 = arith.constant dense<0.000000e+00> : vector<64x32xf32>
    %174 = tpu.matmul %172, %173, %cst_70 {dimension_numbers = #tpu.dot_dimension_numbers<[1], [0], [0], [1], [0, 0, 1, 1], [], []>} : vector<64x128xbf16>, vector<128x32xbf16>, vector<64x32xf32> -> vector<64x32xf32>
    %c0_71 = arith.constant 0 : index
    %c0_72 = arith.constant 0 : index
    %175 = vector.load %arg14[%c0_71, %c0_72] : memref<1x32xf32, #tpu.memory_space<vmem>>, vector<1x32xf32>
    %176 = vector.broadcast %175 : vector<1x32xf32> to vector<64x32xf32>
    %177 = arith.addf %174, %176 : vector<64x32xf32>
    %178 = arith.addf %128, %177 : vector<64x32xf32>
    %179 = arith.truncf %178 : vector<64x32xf32> to vector<64x32xbf16>
    %c0_73 = arith.constant 0 : index
    %c0_74 = arith.constant 0 : index
    %c0_75 = arith.constant 0 : index
    %180 = vector.load %arg15[%c0_73, %c0_74, %c0_75] : memref<1x64x32xbf16, #tpu.memory_space<vmem>>, vector<1x64x32xbf16>
    %181 = vector.shape_cast %180 : vector<1x64x32xbf16> to vector<64x32xbf16>
    %182 = vector.shape_cast %179 : vector<64x32xbf16> to vector<1x64x32xbf16>
    tpu.vector_store %arg15[%c0_73, %c0_74, %c0_75], %182 {strides = array<i32>} : memref<1x64x32xbf16, #tpu.memory_space<vmem>>, vector<1x64x32xbf16>,
    return
  }
  func.func @transform_0(%arg0: i32) -> (i32, i32, i32) {
    %c0_i32 = arith.constant 0 : i32
    %c0_i32_0 = arith.constant 0 : i32
    %c0_i32_1 = arith.constant 0 : i32
    return %arg0, %c0_i32, %c0_i32_0 : i32, i32, i32
  }
  func.func @transform_1(%arg0: i32) -> (i32, i32, i32) {
    %c0_i32 = arith.constant 0 : i32
    %c0_i32_0 = arith.constant 0 : i32
    %c0_i32_1 = arith.constant 0 : i32
    %c0_i32_2 = arith.constant 0 : i32
    return %c0_i32, %c0_i32_0, %c0_i32_1 : i32, i32, i32
  }
  func.func @transform_2(%arg0: i32) -> (i32, i32) {
    %c0_i32 = arith.constant 0 : i32
    %c0_i32_0 = arith.constant 0 : i32
    %c0_i32_1 = arith.constant 0 : i32
    return %c0_i32, %c0_i32_0 : i32, i32
  }
  func.func @transform_3(%arg0: i32) -> (i32, i32) {
    %c0_i32 = arith.constant 0 : i32
    %c0_i32_0 = arith.constant 0 : i32
    %c0_i32_1 = arith.constant 0 : i32
    return %c0_i32, %c0_i32_0 : i32, i32
  }
  func.func @transform_4(%arg0: i32) -> (i32, i32) {
    %c0_i32 = arith.constant 0 : i32
    %c0_i32_0 = arith.constant 0 : i32
    %c0_i32_1 = arith.constant 0 : i32
    return %c0_i32, %c0_i32_0 : i32, i32
  }
  func.func @transform_5(%arg0: i32) -> (i32, i32) {
    %c0_i32 = arith.constant 0 : i32
    %c0_i32_0 = arith.constant 0 : i32
    %c0_i32_1 = arith.constant 0 : i32
    return %c0_i32, %c0_i32_0 : i32, i32
  }
  func.func @transform_6(%arg0: i32) -> (i32, i32) {
    %c0_i32 = arith.constant 0 : i32
    %c0_i32_0 = arith.constant 0 : i32
    %c0_i32_1 = arith.constant 0 : i32
    return %c0_i32, %c0_i32_0 : i32, i32
  }
  func.func @transform_7(%arg0: i32) -> (i32, i32) {
    %c0_i32 = arith.constant 0 : i32
    %c0_i32_0 = arith.constant 0 : i32
    %c0_i32_1 = arith.constant 0 : i32
    return %c0_i32, %c0_i32_0 : i32, i32
  }
  func.func @transform_8(%arg0: i32) -> (i32, i32) {
    %c0_i32 = arith.constant 0 : i32
    %c0_i32_0 = arith.constant 0 : i32
    %c0_i32_1 = arith.constant 0 : i32
    return %c0_i32, %c0_i32_0 : i32, i32
  }
  func.func @transform_9(%arg0: i32) -> (i32, i32) {
    %c0_i32 = arith.constant 0 : i32
    %c0_i32_0 = arith.constant 0 : i32
    %c0_i32_1 = arith.constant 0 : i32
    return %c0_i32, %c0_i32_0 : i32, i32
  }
  func.func @transform_10(%arg0: i32) -> (i32, i32) {
    %c0_i32 = arith.constant 0 : i32
    %c0_i32_0 = arith.constant 0 : i32
    %c0_i32_1 = arith.constant 0 : i32
    return %c0_i32, %c0_i32_0 : i32, i32
  }
  func.func @transform_11(%arg0: i32) -> (i32, i32) {
    %c0_i32 = arith.constant 0 : i32
    %c0_i32_0 = arith.constant 0 : i32
    %c0_i32_1 = arith.constant 0 : i32
    return %c0_i32, %c0_i32_0 : i32, i32
  }
  func.func @transform_12(%arg0: i32) -> (i32, i32) {
    %c0_i32 = arith.constant 0 : i32
    %c0_i32_0 = arith.constant 0 : i32
    %c0_i32_1 = arith.constant 0 : i32
    return %c0_i32, %c0_i32_0 : i32, i32
  }
  func.func @transform_13(%arg0: i32) -> (i32, i32) {
    %c0_i32 = arith.constant 0 : i32
    %c0_i32_0 = arith.constant 0 : i32
    %c0_i32_1 = arith.constant 0 : i32
    return %c0_i32, %c0_i32_0 : i32, i32
  }
  func.func @transform_14(%arg0: i32) -> (i32, i32, i32) {
    %c0_i32 = arith.constant 0 : i32
    %c0_i32_0 = arith.constant 0 : i32
    %c0_i32_1 = arith.constant 0 : i32
    return %arg0, %c0_i32, %c0_i32_0 : i32, i32, i32
  }
}

module attributes {stable_mosaic.version = 11 : i64} {
  func.func @_vit_block_kernel(%arg0: i32, %arg1: memref<1x64x32xbf16, #tpu.memory_space<vmem>>, %arg2: memref<1x32xf32, #tpu.memory_space<vmem>>, %arg3: memref<1x32xf32, #tpu.memory_space<vmem>>, %arg4: memref<32x96xbf16, #tpu.memory_space<vmem>>, %arg5: memref<1x96xf32, #tpu.memory_space<vmem>>, %arg6: memref<32x32xbf16, #tpu.memory_space<vmem>>, %arg7: memref<1x32xf32, #tpu.memory_space<vmem>>, %arg8: memref<1x32xf32, #tpu.memory_space<vmem>>, %arg9: memref<1x32xf32, #tpu.memory_space<vmem>>, %arg10: memref<32x128xbf16, #tpu.memory_space<vmem>>, %arg11: memref<1x128xf32, #tpu.memory_space<vmem>>, %arg12: memref<128x32xbf16, #tpu.memory_space<vmem>>, %arg13: memref<1x32xf32, #tpu.memory_space<vmem>>, %arg14: memref<1x32xf32, #tpu.memory_space<vmem>>, %arg15: memref<1x32xf32, #tpu.memory_space<vmem>>, %arg16: memref<1x64x32xbf16, #tpu.memory_space<vmem>>) attributes {dimension_semantics = [#tpu.dimension_semantics<parallel>], iteration_bounds = array<i64: 2>, scalar_prefetch = 0 : i64, scratch_operands = 0 : i64, tpu.core_type = #tpu.core_type<tc>, window_params = [{transform_indices = @transform_0, window_bounds = array<i64: 1, 64, 32>}, {pipeline_mode = #tpu.pipeline_mode<synchronous>, transform_indices = @transform_1, window_bounds = array<i64: 1, 32>}, {pipeline_mode = #tpu.pipeline_mode<synchronous>, transform_indices = @transform_2, window_bounds = array<i64: 1, 32>}, {pipeline_mode = #tpu.pipeline_mode<synchronous>, transform_indices = @transform_3, window_bounds = array<i64: 32, 96>}, {pipeline_mode = #tpu.pipeline_mode<synchronous>, transform_indices = @transform_4, window_bounds = array<i64: 1, 96>}, {pipeline_mode = #tpu.pipeline_mode<synchronous>, transform_indices = @transform_5, window_bounds = array<i64: 32, 32>}, {pipeline_mode = #tpu.pipeline_mode<synchronous>, transform_indices = @transform_6, window_bounds = array<i64: 1, 32>}, {pipeline_mode = #tpu.pipeline_mode<synchronous>, transform_indices = @transform_7, window_bounds = array<i64: 1, 32>}, {pipeline_mode = #tpu.pipeline_mode<synchronous>, transform_indices = @transform_8, window_bounds = array<i64: 1, 32>}, {pipeline_mode = #tpu.pipeline_mode<synchronous>, transform_indices = @transform_9, window_bounds = array<i64: 32, 128>}, {pipeline_mode = #tpu.pipeline_mode<synchronous>, transform_indices = @transform_10, window_bounds = array<i64: 1, 128>}, {pipeline_mode = #tpu.pipeline_mode<synchronous>, transform_indices = @transform_11, window_bounds = array<i64: 128, 32>}, {pipeline_mode = #tpu.pipeline_mode<synchronous>, transform_indices = @transform_12, window_bounds = array<i64: 1, 32>}, {pipeline_mode = #tpu.pipeline_mode<synchronous>, transform_indices = @transform_13, window_bounds = array<i64: 1, 32>}, {pipeline_mode = #tpu.pipeline_mode<synchronous>, transform_indices = @transform_14, window_bounds = array<i64: 1, 32>}, {transform_indices = @transform_15, window_bounds = array<i64: 1, 64, 32>}]} {
    %c0 = arith.constant 0 : index
    %c0_0 = arith.constant 0 : index
    %c0_1 = arith.constant 0 : index
    %0 = vector.load %arg1[%c0, %c0_0, %c0_1] : memref<1x64x32xbf16, #tpu.memory_space<vmem>>, vector<1x64x32xbf16>
    %1 = vector.shape_cast %0 : vector<1x64x32xbf16> to vector<64x32xbf16>
    %2 = arith.extf %1 : vector<64x32xbf16> to vector<64x32xf32>
    %c0_2 = arith.constant 0 : index
    %c0_3 = arith.constant 0 : index
    %3 = vector.load %arg2[%c0_2, %c0_3] : memref<1x32xf32, #tpu.memory_space<vmem>>, vector<1x32xf32>
    %c0_4 = arith.constant 0 : index
    %c0_5 = arith.constant 0 : index
    %4 = vector.load %arg3[%c0_4, %c0_5] : memref<1x32xf32, #tpu.memory_space<vmem>>, vector<1x32xf32>
    %cst = arith.constant dense<0.000000e+00> : vector<64xf32>
    %5 = vector.multi_reduction <add>, %2, %cst [1] : vector<64x32xf32> to vector<64xf32>
    %6 = vector.shape_cast %5 : vector<64xf32> to vector<64x1xf32>
    %cst_6 = arith.constant 3.200000e+01 : f32
    %7 = vector.broadcast %cst_6 : f32 to vector<64x1xf32>
    %8 = arith.divf %6, %7 : vector<64x1xf32>
    %9 = vector.broadcast %8 : vector<64x1xf32> to vector<64x32xf32>
    %10 = arith.subf %2, %9 : vector<64x32xf32>
    %11 = arith.mulf %10, %10 : vector<64x32xf32>
    %cst_7 = arith.constant dense<0.000000e+00> : vector<64xf32>
    %12 = vector.multi_reduction <add>, %11, %cst_7 [1] : vector<64x32xf32> to vector<64xf32>
    %13 = vector.shape_cast %12 : vector<64xf32> to vector<64x1xf32>
    %cst_8 = arith.constant 3.200000e+01 : f32
    %14 = vector.broadcast %cst_8 : f32 to vector<64x1xf32>
    %15 = arith.divf %13, %14 : vector<64x1xf32>
    %16 = vector.broadcast %8 : vector<64x1xf32> to vector<64x32xf32>
    %17 = arith.subf %2, %16 : vector<64x32xf32>
    %cst_9 = arith.constant 9.99999997E-7 : f32
    %18 = vector.broadcast %cst_9 : f32 to vector<64x1xf32>
    %19 = arith.addf %15, %18 : vector<64x1xf32>
    %20 = math.rsqrt %19 : vector<64x1xf32>
    %21 = vector.broadcast %20 : vector<64x1xf32> to vector<64x32xf32>
    %22 = arith.mulf %17, %21 : vector<64x32xf32>
    %23 = vector.broadcast %3 : vector<1x32xf32> to vector<64x32xf32>
    %24 = arith.mulf %22, %23 : vector<64x32xf32>
    %25 = vector.broadcast %4 : vector<1x32xf32> to vector<64x32xf32>
    %26 = arith.addf %24, %25 : vector<64x32xf32>
    %27 = arith.truncf %26 : vector<64x32xf32> to vector<64x32xbf16>
    %c0_10 = arith.constant 0 : index
    %c0_11 = arith.constant 0 : index
    %28 = vector.load %arg4[%c0_10, %c0_11] : memref<32x96xbf16, #tpu.memory_space<vmem>>, vector<32x96xbf16>
    %cst_12 = arith.constant dense<0.000000e+00> : vector<64x96xf32>
    %29 = tpu.matmul %27, %28, %cst_12 {dimension_numbers = #tpu.dot_dimension_numbers<[1], [0], [0], [1], [0, 0, 1, 1], [], []>} : vector<64x32xbf16>, vector<32x96xbf16>, vector<64x96xf32> -> vector<64x96xf32>
    %c0_13 = arith.constant 0 : index
    %c0_14 = arith.constant 0 : index
    %30 = vector.load %arg5[%c0_13, %c0_14] : memref<1x96xf32, #tpu.memory_space<vmem>>, vector<1x96xf32>
    %31 = vector.broadcast %30 : vector<1x96xf32> to vector<64x96xf32>
    %32 = arith.addf %29, %31 : vector<64x96xf32>
    %cst_15 = arith.constant 0.000000e+00 : f32
    %33 = vector.broadcast %cst_15 : f32 to vector<64x32xf32>
    %34 = vector.extract_strided_slice %32 {offsets = [0, 0], sizes = [64, 8], strides = [1, 1]} : vector<64x96xf32> to vector<64x8xf32>
    %35 = vector.extract_strided_slice %32 {offsets = [0, 32], sizes = [64, 8], strides = [1, 1]} : vector<64x96xf32> to vector<64x8xf32>
    %36 = vector.extract_strided_slice %32 {offsets = [0, 64], sizes = [64, 8], strides = [1, 1]} : vector<64x96xf32> to vector<64x8xf32>
    %37 = tpu.transpose %35, [1, 0] : vector<64x8xf32> -> vector<8x64xf32>
    %cst_16 = arith.constant dense<0.000000e+00> : vector<64x64xf32>
    %38 = tpu.matmul %34, %37, %cst_16 {dimension_numbers = #tpu.dot_dimension_numbers<[1], [0], [0], [1], [0, 0, 1, 1], [], []>} : vector<64x8xf32>, vector<8x64xf32>, vector<64x64xf32> -> vector<64x64xf32>
    %cst_17 = arith.constant 0.353553385 : f32
    %39 = vector.broadcast %cst_17 : f32 to vector<64x64xf32>
    %40 = arith.mulf %38, %39 : vector<64x64xf32>
    %cst_18 = arith.constant dense<0xFF800000> : vector<64xf32>
    %41 = vector.multi_reduction <maximumf>, %40, %cst_18 [1] : vector<64x64xf32> to vector<64xf32>
    %42 = vector.shape_cast %41 : vector<64xf32> to vector<64x1xf32>
    %43 = vector.broadcast %42 : vector<64x1xf32> to vector<64x64xf32>
    %44 = arith.subf %40, %43 : vector<64x64xf32>
    %45 = math.exp %44 : vector<64x64xf32>
    %cst_19 = arith.constant dense<0.000000e+00> : vector<64xf32>
    %46 = vector.multi_reduction <add>, %45, %cst_19 [1] : vector<64x64xf32> to vector<64xf32>
    %47 = vector.shape_cast %46 : vector<64xf32> to vector<64x1xf32>
    %48 = tpu.reciprocal %47 {approx = true} : vector<64x1xf32> -> vector<64x1xf32>
    %49 = vector.broadcast %48 : vector<64x1xf32> to vector<64x64xf32>
    %50 = arith.mulf %45, %49 : vector<64x64xf32>
    %cst_20 = arith.constant dense<0.000000e+00> : vector<64x8xf32>
    %51 = tpu.matmul %50, %36, %cst_20 {dimension_numbers = #tpu.dot_dimension_numbers<[1], [0], [0], [1], [0, 0, 1, 1], [], []>} : vector<64x64xf32>, vector<64x8xf32>, vector<64x8xf32> -> vector<64x8xf32>
    %52 = arith.truncf %51 : vector<64x8xf32> to vector<64x8xbf16>
    %c0_21 = arith.constant 0 : index
    %c0_22 = arith.constant 0 : index
    %53 = vector.load %arg6[%c0_21, %c0_22] : memref<32x32xbf16, #tpu.memory_space<vmem>>, vector<8x32xbf16>
    %cst_23 = arith.constant dense<0.000000e+00> : vector<64x32xf32>
    %54 = tpu.matmul %52, %53, %cst_23 {dimension_numbers = #tpu.dot_dimension_numbers<[1], [0], [0], [1], [0, 0, 1, 1], [], []>} : vector<64x8xbf16>, vector<8x32xbf16>, vector<64x32xf32> -> vector<64x32xf32>
    %55 = arith.addf %33, %54 : vector<64x32xf32>
    %56 = vector.extract_strided_slice %32 {offsets = [0, 8], sizes = [64, 8], strides = [1, 1]} : vector<64x96xf32> to vector<64x8xf32>
    %57 = vector.extract_strided_slice %32 {offsets = [0, 40], sizes = [64, 8], strides = [1, 1]} : vector<64x96xf32> to vector<64x8xf32>
    %58 = vector.extract_strided_slice %32 {offsets = [0, 72], sizes = [64, 8], strides = [1, 1]} : vector<64x96xf32> to vector<64x8xf32>
    %59 = tpu.transpose %57, [1, 0] : vector<64x8xf32> -> vector<8x64xf32>
    %cst_24 = arith.constant dense<0.000000e+00> : vector<64x64xf32>
    %60 = tpu.matmul %56, %59, %cst_24 {dimension_numbers = #tpu.dot_dimension_numbers<[1], [0], [0], [1], [0, 0, 1, 1], [], []>} : vector<64x8xf32>, vector<8x64xf32>, vector<64x64xf32> -> vector<64x64xf32>
    %cst_25 = arith.constant 0.353553385 : f32
    %61 = vector.broadcast %cst_25 : f32 to vector<64x64xf32>
    %62 = arith.mulf %60, %61 : vector<64x64xf32>
    %cst_26 = arith.constant dense<0xFF800000> : vector<64xf32>
    %63 = vector.multi_reduction <maximumf>, %62, %cst_26 [1] : vector<64x64xf32> to vector<64xf32>
    %64 = vector.shape_cast %63 : vector<64xf32> to vector<64x1xf32>
    %65 = vector.broadcast %64 : vector<64x1xf32> to vector<64x64xf32>
    %66 = arith.subf %62, %65 : vector<64x64xf32>
    %67 = math.exp %66 : vector<64x64xf32>
    %cst_27 = arith.constant dense<0.000000e+00> : vector<64xf32>
    %68 = vector.multi_reduction <add>, %67, %cst_27 [1] : vector<64x64xf32> to vector<64xf32>
    %69 = vector.shape_cast %68 : vector<64xf32> to vector<64x1xf32>
    %70 = tpu.reciprocal %69 {approx = true} : vector<64x1xf32> -> vector<64x1xf32>
    %71 = vector.broadcast %70 : vector<64x1xf32> to vector<64x64xf32>
    %72 = arith.mulf %67, %71 : vector<64x64xf32>
    %cst_28 = arith.constant dense<0.000000e+00> : vector<64x8xf32>
    %73 = tpu.matmul %72, %58, %cst_28 {dimension_numbers = #tpu.dot_dimension_numbers<[1], [0], [0], [1], [0, 0, 1, 1], [], []>} : vector<64x64xf32>, vector<64x8xf32>, vector<64x8xf32> -> vector<64x8xf32>
    %74 = arith.truncf %73 : vector<64x8xf32> to vector<64x8xbf16>
    %c8 = arith.constant 8 : index
    %c0_29 = arith.constant 0 : index
    %75 = vector.load %arg6[%c8, %c0_29] : memref<32x32xbf16, #tpu.memory_space<vmem>>, vector<8x32xbf16>
    %cst_30 = arith.constant dense<0.000000e+00> : vector<64x32xf32>
    %76 = tpu.matmul %74, %75, %cst_30 {dimension_numbers = #tpu.dot_dimension_numbers<[1], [0], [0], [1], [0, 0, 1, 1], [], []>} : vector<64x8xbf16>, vector<8x32xbf16>, vector<64x32xf32> -> vector<64x32xf32>
    %77 = arith.addf %55, %76 : vector<64x32xf32>
    %78 = vector.extract_strided_slice %32 {offsets = [0, 16], sizes = [64, 8], strides = [1, 1]} : vector<64x96xf32> to vector<64x8xf32>
    %79 = vector.extract_strided_slice %32 {offsets = [0, 48], sizes = [64, 8], strides = [1, 1]} : vector<64x96xf32> to vector<64x8xf32>
    %80 = vector.extract_strided_slice %32 {offsets = [0, 80], sizes = [64, 8], strides = [1, 1]} : vector<64x96xf32> to vector<64x8xf32>
    %81 = tpu.transpose %79, [1, 0] : vector<64x8xf32> -> vector<8x64xf32>
    %cst_31 = arith.constant dense<0.000000e+00> : vector<64x64xf32>
    %82 = tpu.matmul %78, %81, %cst_31 {dimension_numbers = #tpu.dot_dimension_numbers<[1], [0], [0], [1], [0, 0, 1, 1], [], []>} : vector<64x8xf32>, vector<8x64xf32>, vector<64x64xf32> -> vector<64x64xf32>
    %cst_32 = arith.constant 0.353553385 : f32
    %83 = vector.broadcast %cst_32 : f32 to vector<64x64xf32>
    %84 = arith.mulf %82, %83 : vector<64x64xf32>
    %cst_33 = arith.constant dense<0xFF800000> : vector<64xf32>
    %85 = vector.multi_reduction <maximumf>, %84, %cst_33 [1] : vector<64x64xf32> to vector<64xf32>
    %86 = vector.shape_cast %85 : vector<64xf32> to vector<64x1xf32>
    %87 = vector.broadcast %86 : vector<64x1xf32> to vector<64x64xf32>
    %88 = arith.subf %84, %87 : vector<64x64xf32>
    %89 = math.exp %88 : vector<64x64xf32>
    %cst_34 = arith.constant dense<0.000000e+00> : vector<64xf32>
    %90 = vector.multi_reduction <add>, %89, %cst_34 [1] : vector<64x64xf32> to vector<64xf32>
    %91 = vector.shape_cast %90 : vector<64xf32> to vector<64x1xf32>
    %92 = tpu.reciprocal %91 {approx = true} : vector<64x1xf32> -> vector<64x1xf32>
    %93 = vector.broadcast %92 : vector<64x1xf32> to vector<64x64xf32>
    %94 = arith.mulf %89, %93 : vector<64x64xf32>
    %cst_35 = arith.constant dense<0.000000e+00> : vector<64x8xf32>
    %95 = tpu.matmul %94, %80, %cst_35 {dimension_numbers = #tpu.dot_dimension_numbers<[1], [0], [0], [1], [0, 0, 1, 1], [], []>} : vector<64x64xf32>, vector<64x8xf32>, vector<64x8xf32> -> vector<64x8xf32>
    %96 = arith.truncf %95 : vector<64x8xf32> to vector<64x8xbf16>
    %c16 = arith.constant 16 : index
    %c0_36 = arith.constant 0 : index
    %97 = vector.load %arg6[%c16, %c0_36] : memref<32x32xbf16, #tpu.memory_space<vmem>>, vector<8x32xbf16>
    %cst_37 = arith.constant dense<0.000000e+00> : vector<64x32xf32>
    %98 = tpu.matmul %96, %97, %cst_37 {dimension_numbers = #tpu.dot_dimension_numbers<[1], [0], [0], [1], [0, 0, 1, 1], [], []>} : vector<64x8xbf16>, vector<8x32xbf16>, vector<64x32xf32> -> vector<64x32xf32>
    %99 = arith.addf %77, %98 : vector<64x32xf32>
    %100 = vector.extract_strided_slice %32 {offsets = [0, 24], sizes = [64, 8], strides = [1, 1]} : vector<64x96xf32> to vector<64x8xf32>
    %101 = vector.extract_strided_slice %32 {offsets = [0, 56], sizes = [64, 8], strides = [1, 1]} : vector<64x96xf32> to vector<64x8xf32>
    %102 = vector.extract_strided_slice %32 {offsets = [0, 88], sizes = [64, 8], strides = [1, 1]} : vector<64x96xf32> to vector<64x8xf32>
    %103 = tpu.transpose %101, [1, 0] : vector<64x8xf32> -> vector<8x64xf32>
    %cst_38 = arith.constant dense<0.000000e+00> : vector<64x64xf32>
    %104 = tpu.matmul %100, %103, %cst_38 {dimension_numbers = #tpu.dot_dimension_numbers<[1], [0], [0], [1], [0, 0, 1, 1], [], []>} : vector<64x8xf32>, vector<8x64xf32>, vector<64x64xf32> -> vector<64x64xf32>
    %cst_39 = arith.constant 0.353553385 : f32
    %105 = vector.broadcast %cst_39 : f32 to vector<64x64xf32>
    %106 = arith.mulf %104, %105 : vector<64x64xf32>
    %cst_40 = arith.constant dense<0xFF800000> : vector<64xf32>
    %107 = vector.multi_reduction <maximumf>, %106, %cst_40 [1] : vector<64x64xf32> to vector<64xf32>
    %108 = vector.shape_cast %107 : vector<64xf32> to vector<64x1xf32>
    %109 = vector.broadcast %108 : vector<64x1xf32> to vector<64x64xf32>
    %110 = arith.subf %106, %109 : vector<64x64xf32>
    %111 = math.exp %110 : vector<64x64xf32>
    %cst_41 = arith.constant dense<0.000000e+00> : vector<64xf32>
    %112 = vector.multi_reduction <add>, %111, %cst_41 [1] : vector<64x64xf32> to vector<64xf32>
    %113 = vector.shape_cast %112 : vector<64xf32> to vector<64x1xf32>
    %114 = tpu.reciprocal %113 {approx = true} : vector<64x1xf32> -> vector<64x1xf32>
    %115 = vector.broadcast %114 : vector<64x1xf32> to vector<64x64xf32>
    %116 = arith.mulf %111, %115 : vector<64x64xf32>
    %cst_42 = arith.constant dense<0.000000e+00> : vector<64x8xf32>
    %117 = tpu.matmul %116, %102, %cst_42 {dimension_numbers = #tpu.dot_dimension_numbers<[1], [0], [0], [1], [0, 0, 1, 1], [], []>} : vector<64x64xf32>, vector<64x8xf32>, vector<64x8xf32> -> vector<64x8xf32>
    %118 = arith.truncf %117 : vector<64x8xf32> to vector<64x8xbf16>
    %c24 = arith.constant 24 : index
    %c0_43 = arith.constant 0 : index
    %119 = vector.load %arg6[%c24, %c0_43] : memref<32x32xbf16, #tpu.memory_space<vmem>>, vector<8x32xbf16>
    %cst_44 = arith.constant dense<0.000000e+00> : vector<64x32xf32>
    %120 = tpu.matmul %118, %119, %cst_44 {dimension_numbers = #tpu.dot_dimension_numbers<[1], [0], [0], [1], [0, 0, 1, 1], [], []>} : vector<64x8xbf16>, vector<8x32xbf16>, vector<64x32xf32> -> vector<64x32xf32>
    %121 = arith.addf %99, %120 : vector<64x32xf32>
    %122 = arith.addf %2, %121 : vector<64x32xf32>
    %c0_45 = arith.constant 0 : index
    %c0_46 = arith.constant 0 : index
    %123 = vector.load %arg7[%c0_45, %c0_46] : memref<1x32xf32, #tpu.memory_space<vmem>>, vector<1x32xf32>
    %124 = vector.broadcast %123 : vector<1x32xf32> to vector<64x32xf32>
    %125 = arith.addf %122, %124 : vector<64x32xf32>
    %c0_47 = arith.constant 0 : index
    %c0_48 = arith.constant 0 : index
    %126 = vector.load %arg8[%c0_47, %c0_48] : memref<1x32xf32, #tpu.memory_space<vmem>>, vector<1x32xf32>
    %c0_49 = arith.constant 0 : index
    %c0_50 = arith.constant 0 : index
    %127 = vector.load %arg9[%c0_49, %c0_50] : memref<1x32xf32, #tpu.memory_space<vmem>>, vector<1x32xf32>
    %cst_51 = arith.constant dense<0.000000e+00> : vector<64xf32>
    %128 = vector.multi_reduction <add>, %125, %cst_51 [1] : vector<64x32xf32> to vector<64xf32>
    %129 = vector.shape_cast %128 : vector<64xf32> to vector<64x1xf32>
    %cst_52 = arith.constant 3.200000e+01 : f32
    %130 = vector.broadcast %cst_52 : f32 to vector<64x1xf32>
    %131 = arith.divf %129, %130 : vector<64x1xf32>
    %132 = vector.broadcast %131 : vector<64x1xf32> to vector<64x32xf32>
    %133 = arith.subf %125, %132 : vector<64x32xf32>
    %134 = arith.mulf %133, %133 : vector<64x32xf32>
    %cst_53 = arith.constant dense<0.000000e+00> : vector<64xf32>
    %135 = vector.multi_reduction <add>, %134, %cst_53 [1] : vector<64x32xf32> to vector<64xf32>
    %136 = vector.shape_cast %135 : vector<64xf32> to vector<64x1xf32>
    %cst_54 = arith.constant 3.200000e+01 : f32
    %137 = vector.broadcast %cst_54 : f32 to vector<64x1xf32>
    %138 = arith.divf %136, %137 : vector<64x1xf32>
    %139 = vector.broadcast %131 : vector<64x1xf32> to vector<64x32xf32>
    %140 = arith.subf %125, %139 : vector<64x32xf32>
    %cst_55 = arith.constant 9.99999997E-7 : f32
    %141 = vector.broadcast %cst_55 : f32 to vector<64x1xf32>
    %142 = arith.addf %138, %141 : vector<64x1xf32>
    %143 = math.rsqrt %142 : vector<64x1xf32>
    %144 = vector.broadcast %143 : vector<64x1xf32> to vector<64x32xf32>
    %145 = arith.mulf %140, %144 : vector<64x32xf32>
    %146 = vector.broadcast %126 : vector<1x32xf32> to vector<64x32xf32>
    %147 = arith.mulf %145, %146 : vector<64x32xf32>
    %148 = vector.broadcast %127 : vector<1x32xf32> to vector<64x32xf32>
    %149 = arith.addf %147, %148 : vector<64x32xf32>
    %150 = arith.truncf %149 : vector<64x32xf32> to vector<64x32xbf16>
    %c0_56 = arith.constant 0 : index
    %c0_57 = arith.constant 0 : index
    %151 = vector.load %arg10[%c0_56, %c0_57] : memref<32x128xbf16, #tpu.memory_space<vmem>>, vector<32x128xbf16>
    %cst_58 = arith.constant dense<0.000000e+00> : vector<64x128xf32>
    %152 = tpu.matmul %150, %151, %cst_58 {dimension_numbers = #tpu.dot_dimension_numbers<[1], [0], [0], [1], [0, 0, 1, 1], [], []>} : vector<64x32xbf16>, vector<32x128xbf16>, vector<64x128xf32> -> vector<64x128xf32>
    %c0_59 = arith.constant 0 : index
    %c0_60 = arith.constant 0 : index
    %153 = vector.load %arg11[%c0_59, %c0_60] : memref<1x128xf32, #tpu.memory_space<vmem>>, vector<1x128xf32>
    %154 = vector.broadcast %153 : vector<1x128xf32> to vector<64x128xf32>
    %155 = arith.addf %152, %154 : vector<64x128xf32>
    %156 = arith.mulf %155, %155 : vector<64x128xf32>
    %157 = arith.mulf %155, %156 : vector<64x128xf32>
    %cst_61 = arith.constant 4.471500e-02 : f32
    %158 = vector.broadcast %cst_61 : f32 to vector<64x128xf32>
    %159 = arith.mulf %158, %157 : vector<64x128xf32>
    %160 = arith.addf %155, %159 : vector<64x128xf32>
    %cst_62 = arith.constant 0.797884583 : f32
    %161 = vector.broadcast %cst_62 : f32 to vector<64x128xf32>
    %162 = arith.mulf %161, %160 : vector<64x128xf32>
    %163 = math.tanh %162 : vector<64x128xf32>
    %cst_63 = arith.constant 1.000000e+00 : f32
    %164 = vector.broadcast %cst_63 : f32 to vector<64x128xf32>
    %165 = arith.addf %164, %163 : vector<64x128xf32>
    %cst_64 = arith.constant 5.000000e-01 : f32
    %166 = vector.broadcast %cst_64 : f32 to vector<64x128xf32>
    %167 = arith.mulf %166, %165 : vector<64x128xf32>
    %168 = arith.mulf %155, %167 : vector<64x128xf32>
    %169 = arith.truncf %168 : vector<64x128xf32> to vector<64x128xbf16>
    %c0_65 = arith.constant 0 : index
    %c0_66 = arith.constant 0 : index
    %170 = vector.load %arg12[%c0_65, %c0_66] : memref<128x32xbf16, #tpu.memory_space<vmem>>, vector<128x32xbf16>
    %cst_67 = arith.constant dense<0.000000e+00> : vector<64x32xf32>
    %171 = tpu.matmul %169, %170, %cst_67 {dimension_numbers = #tpu.dot_dimension_numbers<[1], [0], [0], [1], [0, 0, 1, 1], [], []>} : vector<64x128xbf16>, vector<128x32xbf16>, vector<64x32xf32> -> vector<64x32xf32>
    %c0_68 = arith.constant 0 : index
    %c0_69 = arith.constant 0 : index
    %172 = vector.load %arg13[%c0_68, %c0_69] : memref<1x32xf32, #tpu.memory_space<vmem>>, vector<1x32xf32>
    %173 = vector.broadcast %172 : vector<1x32xf32> to vector<64x32xf32>
    %174 = arith.addf %171, %173 : vector<64x32xf32>
    %175 = arith.addf %125, %174 : vector<64x32xf32>
    %c0_70 = arith.constant 0 : index
    %c0_71 = arith.constant 0 : index
    %176 = vector.load %arg14[%c0_70, %c0_71] : memref<1x32xf32, #tpu.memory_space<vmem>>, vector<1x32xf32>
    %c0_72 = arith.constant 0 : index
    %c0_73 = arith.constant 0 : index
    %177 = vector.load %arg15[%c0_72, %c0_73] : memref<1x32xf32, #tpu.memory_space<vmem>>, vector<1x32xf32>
    %cst_74 = arith.constant dense<0.000000e+00> : vector<64xf32>
    %178 = vector.multi_reduction <add>, %175, %cst_74 [1] : vector<64x32xf32> to vector<64xf32>
    %179 = vector.shape_cast %178 : vector<64xf32> to vector<64x1xf32>
    %cst_75 = arith.constant 3.200000e+01 : f32
    %180 = vector.broadcast %cst_75 : f32 to vector<64x1xf32>
    %181 = arith.divf %179, %180 : vector<64x1xf32>
    %182 = vector.broadcast %181 : vector<64x1xf32> to vector<64x32xf32>
    %183 = arith.subf %175, %182 : vector<64x32xf32>
    %184 = arith.mulf %183, %183 : vector<64x32xf32>
    %cst_76 = arith.constant dense<0.000000e+00> : vector<64xf32>
    %185 = vector.multi_reduction <add>, %184, %cst_76 [1] : vector<64x32xf32> to vector<64xf32>
    %186 = vector.shape_cast %185 : vector<64xf32> to vector<64x1xf32>
    %cst_77 = arith.constant 3.200000e+01 : f32
    %187 = vector.broadcast %cst_77 : f32 to vector<64x1xf32>
    %188 = arith.divf %186, %187 : vector<64x1xf32>
    %189 = vector.broadcast %181 : vector<64x1xf32> to vector<64x32xf32>
    %190 = arith.subf %175, %189 : vector<64x32xf32>
    %cst_78 = arith.constant 9.99999997E-7 : f32
    %191 = vector.broadcast %cst_78 : f32 to vector<64x1xf32>
    %192 = arith.addf %188, %191 : vector<64x1xf32>
    %193 = math.rsqrt %192 : vector<64x1xf32>
    %194 = vector.broadcast %193 : vector<64x1xf32> to vector<64x32xf32>
    %195 = arith.mulf %190, %194 : vector<64x32xf32>
    %196 = vector.broadcast %176 : vector<1x32xf32> to vector<64x32xf32>
    %197 = arith.mulf %195, %196 : vector<64x32xf32>
    %198 = vector.broadcast %177 : vector<1x32xf32> to vector<64x32xf32>
    %199 = arith.addf %197, %198 : vector<64x32xf32>
    %200 = arith.truncf %199 : vector<64x32xf32> to vector<64x32xbf16>
    %c0_79 = arith.constant 0 : index
    %c0_80 = arith.constant 0 : index
    %c0_81 = arith.constant 0 : index
    %201 = vector.load %arg16[%c0_79, %c0_80, %c0_81] : memref<1x64x32xbf16, #tpu.memory_space<vmem>>, vector<1x64x32xbf16>
    %202 = vector.shape_cast %201 : vector<1x64x32xbf16> to vector<64x32xbf16>
    %203 = vector.shape_cast %200 : vector<64x32xbf16> to vector<1x64x32xbf16>
    tpu.vector_store %arg16[%c0_79, %c0_80, %c0_81], %203 {strides = array<i32>} : memref<1x64x32xbf16, #tpu.memory_space<vmem>>, vector<1x64x32xbf16>,
    return
  }
  func.func @transform_0(%arg0: i32) -> (i32, i32, i32) {
    %c0_i32 = arith.constant 0 : i32
    %c0_i32_0 = arith.constant 0 : i32
    %c0_i32_1 = arith.constant 0 : i32
    return %arg0, %c0_i32, %c0_i32_0 : i32, i32, i32
  }
  func.func @transform_1(%arg0: i32) -> (i32, i32) {
    %c0_i32 = arith.constant 0 : i32
    %c0_i32_0 = arith.constant 0 : i32
    %c0_i32_1 = arith.constant 0 : i32
    return %c0_i32, %c0_i32_0 : i32, i32
  }
  func.func @transform_2(%arg0: i32) -> (i32, i32) {
    %c0_i32 = arith.constant 0 : i32
    %c0_i32_0 = arith.constant 0 : i32
    %c0_i32_1 = arith.constant 0 : i32
    return %c0_i32, %c0_i32_0 : i32, i32
  }
  func.func @transform_3(%arg0: i32) -> (i32, i32) {
    %c0_i32 = arith.constant 0 : i32
    %c0_i32_0 = arith.constant 0 : i32
    %c0_i32_1 = arith.constant 0 : i32
    return %c0_i32, %c0_i32_0 : i32, i32
  }
  func.func @transform_4(%arg0: i32) -> (i32, i32) {
    %c0_i32 = arith.constant 0 : i32
    %c0_i32_0 = arith.constant 0 : i32
    %c0_i32_1 = arith.constant 0 : i32
    return %c0_i32, %c0_i32_0 : i32, i32
  }
  func.func @transform_5(%arg0: i32) -> (i32, i32) {
    %c0_i32 = arith.constant 0 : i32
    %c0_i32_0 = arith.constant 0 : i32
    %c0_i32_1 = arith.constant 0 : i32
    return %c0_i32, %c0_i32_0 : i32, i32
  }
  func.func @transform_6(%arg0: i32) -> (i32, i32) {
    %c0_i32 = arith.constant 0 : i32
    %c0_i32_0 = arith.constant 0 : i32
    %c0_i32_1 = arith.constant 0 : i32
    return %c0_i32, %c0_i32_0 : i32, i32
  }
  func.func @transform_7(%arg0: i32) -> (i32, i32) {
    %c0_i32 = arith.constant 0 : i32
    %c0_i32_0 = arith.constant 0 : i32
    %c0_i32_1 = arith.constant 0 : i32
    return %c0_i32, %c0_i32_0 : i32, i32
  }
  func.func @transform_8(%arg0: i32) -> (i32, i32) {
    %c0_i32 = arith.constant 0 : i32
    %c0_i32_0 = arith.constant 0 : i32
    %c0_i32_1 = arith.constant 0 : i32
    return %c0_i32, %c0_i32_0 : i32, i32
  }
  func.func @transform_9(%arg0: i32) -> (i32, i32) {
    %c0_i32 = arith.constant 0 : i32
    %c0_i32_0 = arith.constant 0 : i32
    %c0_i32_1 = arith.constant 0 : i32
    return %c0_i32, %c0_i32_0 : i32, i32
  }
  func.func @transform_10(%arg0: i32) -> (i32, i32) {
    %c0_i32 = arith.constant 0 : i32
    %c0_i32_0 = arith.constant 0 : i32
    %c0_i32_1 = arith.constant 0 : i32
    return %c0_i32, %c0_i32_0 : i32, i32
  }
  func.func @transform_11(%arg0: i32) -> (i32, i32) {
    %c0_i32 = arith.constant 0 : i32
    %c0_i32_0 = arith.constant 0 : i32
    %c0_i32_1 = arith.constant 0 : i32
    return %c0_i32, %c0_i32_0 : i32, i32
  }
  func.func @transform_12(%arg0: i32) -> (i32, i32) {
    %c0_i32 = arith.constant 0 : i32
    %c0_i32_0 = arith.constant 0 : i32
    %c0_i32_1 = arith.constant 0 : i32
    return %c0_i32, %c0_i32_0 : i32, i32
  }
  func.func @transform_13(%arg0: i32) -> (i32, i32) {
    %c0_i32 = arith.constant 0 : i32
    %c0_i32_0 = arith.constant 0 : i32
    %c0_i32_1 = arith.constant 0 : i32
    return %c0_i32, %c0_i32_0 : i32, i32
  }
  func.func @transform_14(%arg0: i32) -> (i32, i32) {
    %c0_i32 = arith.constant 0 : i32
    %c0_i32_0 = arith.constant 0 : i32
    %c0_i32_1 = arith.constant 0 : i32
    return %c0_i32, %c0_i32_0 : i32, i32
  }
  func.func @transform_15(%arg0: i32) -> (i32, i32, i32) {
    %c0_i32 = arith.constant 0 : i32
    %c0_i32_0 = arith.constant 0 : i32
    %c0_i32_1 = arith.constant 0 : i32
    return %arg0, %c0_i32, %c0_i32_0 : i32, i32, i32
  }
}

module attributes {stable_mosaic.version = 11 : i64} {
  func.func @_conv3x3_kernel(%arg0: i32, %arg1: memref<1x80x96xbf16, #tpu.memory_space<vmem>>, %arg2: memref<3x96x16xbf16, #tpu.memory_space<vmem>>, %arg3: memref<1x16xf32, #tpu.memory_space<vmem>>, %arg4: memref<1x64x16xbf16, #tpu.memory_space<vmem>>) attributes {dimension_semantics = [#tpu.dimension_semantics<parallel>], iteration_bounds = array<i64: 2>, scalar_prefetch = 0 : i64, scratch_operands = 0 : i64, tpu.core_type = #tpu.core_type<tc>, window_params = [{transform_indices = @transform_0, window_bounds = array<i64: 1, 80, 96>}, {pipeline_mode = #tpu.pipeline_mode<synchronous>, transform_indices = @transform_1, window_bounds = array<i64: 3, 96, 16>}, {pipeline_mode = #tpu.pipeline_mode<synchronous>, transform_indices = @transform_2, window_bounds = array<i64: 1, 16>}, {transform_indices = @transform_3, window_bounds = array<i64: 1, 64, 16>}]} {
    %cst = arith.constant 0.000000e+00 : f32
    %0 = vector.broadcast %cst : f32 to vector<64x16xf32>
    %c0 = arith.constant 0 : index
    %c0_0 = arith.constant 0 : index
    %c0_1 = arith.constant 0 : index
    %1 = vector.load %arg1[%c0, %c0_0, %c0_1] : memref<1x80x96xbf16, #tpu.memory_space<vmem>>, vector<1x64x96xbf16>
    %2 = vector.shape_cast %1 : vector<1x64x96xbf16> to vector<64x96xbf16>
    %c0_2 = arith.constant 0 : index
    %c0_3 = arith.constant 0 : index
    %c0_4 = arith.constant 0 : index
    %3 = vector.load %arg2[%c0_2, %c0_3, %c0_4] : memref<3x96x16xbf16, #tpu.memory_space<vmem>>, vector<1x96x16xbf16>
    %4 = vector.shape_cast %3 : vector<1x96x16xbf16> to vector<96x16xbf16>
    %cst_5 = arith.constant dense<0.000000e+00> : vector<64x16xf32>
    %5 = tpu.matmul %2, %4, %cst_5 {dimension_numbers = #tpu.dot_dimension_numbers<[1], [0], [0], [1], [0, 0, 1, 1], [], []>} : vector<64x96xbf16>, vector<96x16xbf16>, vector<64x16xf32> -> vector<64x16xf32>
    %6 = arith.addf %0, %5 : vector<64x16xf32>
    %c0_6 = arith.constant 0 : index
    %c8 = arith.constant 8 : index
    %c0_7 = arith.constant 0 : index
    %7 = vector.load %arg1[%c0_6, %c8, %c0_7] : memref<1x80x96xbf16, #tpu.memory_space<vmem>>, vector<1x64x96xbf16>
    %8 = vector.shape_cast %7 : vector<1x64x96xbf16> to vector<64x96xbf16>
    %c1 = arith.constant 1 : index
    %c0_8 = arith.constant 0 : index
    %c0_9 = arith.constant 0 : index
    %9 = vector.load %arg2[%c1, %c0_8, %c0_9] : memref<3x96x16xbf16, #tpu.memory_space<vmem>>, vector<1x96x16xbf16>
    %10 = vector.shape_cast %9 : vector<1x96x16xbf16> to vector<96x16xbf16>
    %cst_10 = arith.constant dense<0.000000e+00> : vector<64x16xf32>
    %11 = tpu.matmul %8, %10, %cst_10 {dimension_numbers = #tpu.dot_dimension_numbers<[1], [0], [0], [1], [0, 0, 1, 1], [], []>} : vector<64x96xbf16>, vector<96x16xbf16>, vector<64x16xf32> -> vector<64x16xf32>
    %12 = arith.addf %6, %11 : vector<64x16xf32>
    %c0_11 = arith.constant 0 : index
    %c16 = arith.constant 16 : index
    %c0_12 = arith.constant 0 : index
    %13 = vector.load %arg1[%c0_11, %c16, %c0_12] : memref<1x80x96xbf16, #tpu.memory_space<vmem>>, vector<1x64x96xbf16>
    %14 = vector.shape_cast %13 : vector<1x64x96xbf16> to vector<64x96xbf16>
    %c2 = arith.constant 2 : index
    %c0_13 = arith.constant 0 : index
    %c0_14 = arith.constant 0 : index
    %15 = vector.load %arg2[%c2, %c0_13, %c0_14] : memref<3x96x16xbf16, #tpu.memory_space<vmem>>, vector<1x96x16xbf16>
    %16 = vector.shape_cast %15 : vector<1x96x16xbf16> to vector<96x16xbf16>
    %cst_15 = arith.constant dense<0.000000e+00> : vector<64x16xf32>
    %17 = tpu.matmul %14, %16, %cst_15 {dimension_numbers = #tpu.dot_dimension_numbers<[1], [0], [0], [1], [0, 0, 1, 1], [], []>} : vector<64x96xbf16>, vector<96x16xbf16>, vector<64x16xf32> -> vector<64x16xf32>
    %18 = arith.addf %12, %17 : vector<64x16xf32>
    %c0_16 = arith.constant 0 : index
    %c0_17 = arith.constant 0 : index
    %19 = vector.load %arg3[%c0_16, %c0_17] : memref<1x16xf32, #tpu.memory_space<vmem>>, vector<1x16xf32>
    %20 = vector.broadcast %19 : vector<1x16xf32> to vector<64x16xf32>
    %21 = arith.addf %18, %20 : vector<64x16xf32>
    %22 = arith.truncf %21 : vector<64x16xf32> to vector<64x16xbf16>
    %c0_18 = arith.constant 0 : index
    %c0_19 = arith.constant 0 : index
    %c0_20 = arith.constant 0 : index
    %23 = vector.load %arg4[%c0_18, %c0_19, %c0_20] : memref<1x64x16xbf16, #tpu.memory_space<vmem>>, vector<1x64x16xbf16>
    %24 = vector.shape_cast %23 : vector<1x64x16xbf16> to vector<64x16xbf16>
    %25 = vector.shape_cast %22 : vector<64x16xbf16> to vector<1x64x16xbf16>
    tpu.vector_store %arg4[%c0_18, %c0_19, %c0_20], %25 {strides = array<i32>} : memref<1x64x16xbf16, #tpu.memory_space<vmem>>, vector<1x64x16xbf16>,
    return
  }
  func.func @transform_0(%arg0: i32) -> (i32, i32, i32) {
    %c0_i32 = arith.constant 0 : i32
    %c0_i32_0 = arith.constant 0 : i32
    %c0_i32_1 = arith.constant 0 : i32
    return %arg0, %c0_i32, %c0_i32_0 : i32, i32, i32
  }
  func.func @transform_1(%arg0: i32) -> (i32, i32, i32) {
    %c0_i32 = arith.constant 0 : i32
    %c0_i32_0 = arith.constant 0 : i32
    %c0_i32_1 = arith.constant 0 : i32
    %c0_i32_2 = arith.constant 0 : i32
    return %c0_i32, %c0_i32_0, %c0_i32_1 : i32, i32, i32
  }
  func.func @transform_2(%arg0: i32) -> (i32, i32) {
    %c0_i32 = arith.constant 0 : i32
    %c0_i32_0 = arith.constant 0 : i32
    %c0_i32_1 = arith.constant 0 : i32
    return %c0_i32, %c0_i32_0 : i32, i32
  }
  func.func @transform_3(%arg0: i32) -> (i32, i32, i32) {
    %c0_i32 = arith.constant 0 : i32
    %c0_i32_0 = arith.constant 0 : i32
    %c0_i32_1 = arith.constant 0 : i32
    return %arg0, %c0_i32, %c0_i32_0 : i32, i32, i32
  }
}

module attributes {stable_mosaic.version = 11 : i64} {
  func.func @_head_kernel(%arg0: i32, %arg1: memref<1x288x48xbf16, #tpu.memory_space<vmem>>, %arg2: memref<3x48x32xbf16, #tpu.memory_space<vmem>>, %arg3: memref<1x32xf32, #tpu.memory_space<vmem>>, %arg4: memref<1x32xf32, #tpu.memory_space<vmem>>, %arg5: memref<1x1xf32, #tpu.memory_space<vmem>>, %arg6: memref<1x1x256xf32, #tpu.memory_space<vmem>>) attributes {dimension_semantics = [#tpu.dimension_semantics<parallel>], iteration_bounds = array<i64: 2>, scalar_prefetch = 0 : i64, scratch_operands = 0 : i64, tpu.core_type = #tpu.core_type<tc>, window_params = [{transform_indices = @transform_0, window_bounds = array<i64: 1, 288, 48>}, {pipeline_mode = #tpu.pipeline_mode<synchronous>, transform_indices = @transform_1, window_bounds = array<i64: 3, 48, 32>}, {pipeline_mode = #tpu.pipeline_mode<synchronous>, transform_indices = @transform_2, window_bounds = array<i64: 1, 32>}, {pipeline_mode = #tpu.pipeline_mode<synchronous>, transform_indices = @transform_3, window_bounds = array<i64: 1, 32>}, {pipeline_mode = #tpu.pipeline_mode<synchronous>, transform_indices = @transform_4, window_bounds = array<i64: 1, 1>}, {transform_indices = @transform_5, window_bounds = array<i64: 1, 1, 256>}]} {
    %cst = arith.constant 0.000000e+00 : f32
    %0 = vector.broadcast %cst : f32 to vector<256x32xf32>
    %c0 = arith.constant 0 : index
    %c0_0 = arith.constant 0 : index
    %c0_1 = arith.constant 0 : index
    %1 = vector.load %arg1[%c0, %c0_0, %c0_1] : memref<1x288x48xbf16, #tpu.memory_space<vmem>>, vector<1x256x48xbf16>
    %2 = vector.shape_cast %1 : vector<1x256x48xbf16> to vector<256x48xbf16>
    %c0_2 = arith.constant 0 : index
    %c0_3 = arith.constant 0 : index
    %c0_4 = arith.constant 0 : index
    %3 = vector.load %arg2[%c0_2, %c0_3, %c0_4] : memref<3x48x32xbf16, #tpu.memory_space<vmem>>, vector<1x48x32xbf16>
    %4 = vector.shape_cast %3 : vector<1x48x32xbf16> to vector<48x32xbf16>
    %cst_5 = arith.constant dense<0.000000e+00> : vector<256x32xf32>
    %5 = tpu.matmul %2, %4, %cst_5 {dimension_numbers = #tpu.dot_dimension_numbers<[1], [0], [0], [1], [0, 0, 1, 1], [], []>} : vector<256x48xbf16>, vector<48x32xbf16>, vector<256x32xf32> -> vector<256x32xf32>
    %6 = arith.addf %0, %5 : vector<256x32xf32>
    %c0_6 = arith.constant 0 : index
    %c16 = arith.constant 16 : index
    %c0_7 = arith.constant 0 : index
    %7 = vector.load %arg1[%c0_6, %c16, %c0_7] : memref<1x288x48xbf16, #tpu.memory_space<vmem>>, vector<1x256x48xbf16>
    %8 = vector.shape_cast %7 : vector<1x256x48xbf16> to vector<256x48xbf16>
    %c1 = arith.constant 1 : index
    %c0_8 = arith.constant 0 : index
    %c0_9 = arith.constant 0 : index
    %9 = vector.load %arg2[%c1, %c0_8, %c0_9] : memref<3x48x32xbf16, #tpu.memory_space<vmem>>, vector<1x48x32xbf16>
    %10 = vector.shape_cast %9 : vector<1x48x32xbf16> to vector<48x32xbf16>
    %cst_10 = arith.constant dense<0.000000e+00> : vector<256x32xf32>
    %11 = tpu.matmul %8, %10, %cst_10 {dimension_numbers = #tpu.dot_dimension_numbers<[1], [0], [0], [1], [0, 0, 1, 1], [], []>} : vector<256x48xbf16>, vector<48x32xbf16>, vector<256x32xf32> -> vector<256x32xf32>
    %12 = arith.addf %6, %11 : vector<256x32xf32>
    %c0_11 = arith.constant 0 : index
    %c32 = arith.constant 32 : index
    %c0_12 = arith.constant 0 : index
    %13 = vector.load %arg1[%c0_11, %c32, %c0_12] : memref<1x288x48xbf16, #tpu.memory_space<vmem>>, vector<1x256x48xbf16>
    %14 = vector.shape_cast %13 : vector<1x256x48xbf16> to vector<256x48xbf16>
    %c2 = arith.constant 2 : index
    %c0_13 = arith.constant 0 : index
    %c0_14 = arith.constant 0 : index
    %15 = vector.load %arg2[%c2, %c0_13, %c0_14] : memref<3x48x32xbf16, #tpu.memory_space<vmem>>, vector<1x48x32xbf16>
    %16 = vector.shape_cast %15 : vector<1x48x32xbf16> to vector<48x32xbf16>
    %cst_15 = arith.constant dense<0.000000e+00> : vector<256x32xf32>
    %17 = tpu.matmul %14, %16, %cst_15 {dimension_numbers = #tpu.dot_dimension_numbers<[1], [0], [0], [1], [0, 0, 1, 1], [], []>} : vector<256x48xbf16>, vector<48x32xbf16>, vector<256x32xf32> -> vector<256x32xf32>
    %18 = arith.addf %12, %17 : vector<256x32xf32>
    %c0_16 = arith.constant 0 : index
    %c0_17 = arith.constant 0 : index
    %19 = vector.load %arg3[%c0_16, %c0_17] : memref<1x32xf32, #tpu.memory_space<vmem>>, vector<1x32xf32>
    %20 = vector.broadcast %19 : vector<1x32xf32> to vector<256x32xf32>
    %21 = arith.addf %18, %20 : vector<256x32xf32>
    %cst_18 = arith.constant 0.000000e+00 : f32
    %22 = vector.broadcast %cst_18 : f32 to vector<256x32xf32>
    %23 = arith.maximumf %21, %22 : vector<256x32xf32>
    %c0_19 = arith.constant 0 : index
    %c0_20 = arith.constant 0 : index
    %24 = vector.load %arg4[%c0_19, %c0_20] : memref<1x32xf32, #tpu.memory_space<vmem>>, vector<1x32xf32>
    %25 = tpu.transpose %23, [1, 0] : vector<256x32xf32> -> vector<32x256xf32>
    %cst_21 = arith.constant dense<0.000000e+00> : vector<1x256xf32>
    %26 = tpu.matmul %24, %25, %cst_21 {dimension_numbers = #tpu.dot_dimension_numbers<[1], [0], [0], [1], [0, 0, 1, 1], [], []>} : vector<1x32xf32>, vector<32x256xf32>, vector<1x256xf32> -> vector<1x256xf32>
    %c0_22 = arith.constant 0 : index
    %c0_23 = arith.constant 0 : index
    %27 = vector.load %arg5[%c0_22, %c0_23] : memref<1x1xf32, #tpu.memory_space<vmem>>, vector<1x1xf32>
    %28 = vector.broadcast %27 : vector<1x1xf32> to vector<1x256xf32>
    %29 = arith.addf %26, %28 : vector<1x256xf32>
    %cst_24 = arith.constant 0.000000e+00 : f32
    %30 = vector.broadcast %cst_24 : f32 to vector<1x256xf32>
    %31 = arith.maximumf %29, %30 : vector<1x256xf32>
    %c0_25 = arith.constant 0 : index
    %c0_26 = arith.constant 0 : index
    %c0_27 = arith.constant 0 : index
    %32 = vector.load %arg6[%c0_25, %c0_26, %c0_27] : memref<1x1x256xf32, #tpu.memory_space<vmem>>, vector<1x1x256xf32>
    %33 = vector.shape_cast %32 : vector<1x1x256xf32> to vector<1x256xf32>
    %34 = vector.shape_cast %31 : vector<1x256xf32> to vector<1x1x256xf32>
    tpu.vector_store %arg6[%c0_25, %c0_26, %c0_27], %34 {strides = array<i32>} : memref<1x1x256xf32, #tpu.memory_space<vmem>>, vector<1x1x256xf32>,
    return
  }
  func.func @transform_0(%arg0: i32) -> (i32, i32, i32) {
    %c0_i32 = arith.constant 0 : i32
    %c0_i32_0 = arith.constant 0 : i32
    %c0_i32_1 = arith.constant 0 : i32
    return %arg0, %c0_i32, %c0_i32_0 : i32, i32, i32
  }
  func.func @transform_1(%arg0: i32) -> (i32, i32, i32) {
    %c0_i32 = arith.constant 0 : i32
    %c0_i32_0 = arith.constant 0 : i32
    %c0_i32_1 = arith.constant 0 : i32
    %c0_i32_2 = arith.constant 0 : i32
    return %c0_i32, %c0_i32_0, %c0_i32_1 : i32, i32, i32
  }
  func.func @transform_2(%arg0: i32) -> (i32, i32) {
    %c0_i32 = arith.constant 0 : i32
    %c0_i32_0 = arith.constant 0 : i32
    %c0_i32_1 = arith.constant 0 : i32
    return %c0_i32, %c0_i32_0 : i32, i32
  }
  func.func @transform_3(%arg0: i32) -> (i32, i32) {
    %c0_i32 = arith.constant 0 : i32
    %c0_i32_0 = arith.constant 0 : i32
    %c0_i32_1 = arith.constant 0 : i32
    return %c0_i32, %c0_i32_0 : i32, i32
  }
  func.func @transform_4(%arg0: i32) -> (i32, i32) {
    %c0_i32 = arith.constant 0 : i32
    %c0_i32_0 = arith.constant 0 : i32
    %c0_i32_1 = arith.constant 0 : i32
    return %c0_i32, %c0_i32_0 : i32, i32
  }
  func.func @transform_5(%arg0: i32) -> (i32, i32, i32) {
    %c0_i32 = arith.constant 0 : i32
    %c0_i32_0 = arith.constant 0 : i32
    %c0_i32_1 = arith.constant 0 : i32
    return %arg0, %c0_i32, %c0_i32_0 : i32, i32, i32
  }
}

</mosaic_0001>

<bundles_post_ra>
// kernel: _lambda_.5
= control target key start
LH: loop header
LB: loop body
LE: loop exit
PB: predicated region body
PF: predicated region fallthrough
CT: control target
= control target key end

     0   :  { %vm140_vm0 = vcmask 1045504   ;;  %vm19_vm1 = vcmask 261120   ;;  %v492_v1 = vmov 0.0   ;;  %vm115_vm2 = vcmask 97280   ;;  %s668_s1 = inlined_call_operand.vmem [shape: bf16[12,32], index: 1, kind: input, shape index: {}]   ;;  %s669_s0 = inlined_call_operand.vmem [shape: bf16[128,12], index: 0, kind: input, shape index: {}]   ;;  %s670_s2 = inlined_call_operand.vmem [shape: f32[1,32], index: 2, kind: input, shape index: {}]   ;;  %s671_s3 = inlined_call_operand.vmem [shape: bf16[128,32], index: 3, kind: output, shape index: {}]  }
   0x1   :  { %v483_v0 = vld [vmem:[%s668_s1] sm:$0x3f]   ;;  %22 = vst.msk [vmem:[#allocation2 + $0x10] sm:$0xff] %vm19_vm1, %v492_v1  ;;  %20 = vst.msk [vmem:[#allocation2] sm:$0xff] %vm19_vm1, %v492_v1  ;;  %v486_v5 = vld [vmem:[%s669_s0 + $0x8] sm:$0xff]   ;;  %vm380_vm3 = vcmask 257024  }
   0x2   :  { %21 = vst.msk [vmem:[#allocation2 + $0x8] sm:$0xff] %vm19_vm1, %v492_v1  ;;  %23 = vst.msk [vmem:[#allocation2 + $0x18] sm:$0xff] %vm19_vm1, %v492_v1  ;;  %v484_v2 = vld [vmem:[%s669_s0] sm:$0xff]   ;;  %480 = vmatprep.subr.msk.bf16.mxu0 %vm140_vm0, %v483_v0  ;;  %481 = vmatprep.subr.msk.bf16.mxu1 %vm140_vm0, %v483_v0  ;;  %v142_v3 = vsel %vm140_vm0, %v483_v0, 0  ;;  %v487_v6 = vld [vmem:[%s669_s0 + $0x28] sm:$0xff]  }
   0x3   :  { %24 = vst.msk [vmem:[#allocation2 + $0x20] sm:$0xff] %vm19_vm1, %v492_v1  ;;  %25 = vst.msk [vmem:[#allocation2 + $0x28] sm:$0xff] %vm19_vm1, %v492_v1  ;;  %v485_v4 = vld [vmem:[%s669_s0 + $0x20] sm:$0xff]   ;;  %461 = vmatpush3.bf16.msra.mxu0 %v142_v3  ;;  %479 = vmatpush3.bf16.msra.mxu1 %v142_v3  ;;  %v488_v7 = vld [vmem:[%s669_s0 + $0x10] sm:$0xff]  }
   0x4   :  { %26 = vst.msk [vmem:[#allocation2 + $0x30] sm:$0xff] %vm19_vm1, %v492_v1  ;;  %27 = vst.msk [vmem:[#allocation2 + $0x38] sm:$0xff] %vm19_vm1, %v492_v1  ;;  %462 = vmatprep.mubr.msk.bf16.mxu0 %vm115_vm2, %v484_v2  ;;  %470 = vmatprep.mubr.msk.bf16.mxu1 %vm115_vm2, %v485_v4  ;;  %v489_v8 = vld [vmem:[%s669_s0 + $0x30] sm:$0xff]   ;;  %v490_v9 = vld [vmem:[%s669_s0 + $0x18] sm:$0xff]  }
   0x5   :  { %28 = vst.msk [vmem:[#allocation2 + $0x40] sm:$0xff] %vm19_vm1, %v492_v1  ;;  %29 = vst.msk [vmem:[#allocation2 + $0x48] sm:$0xff] %vm19_vm1, %v492_v1  ;;  %v491_v10 = vld [vmem:[%s669_s0 + $0x38] sm:$0xff]   ;;  %v576_v37 = vld [vmem:[%s670_s2] ss:$0 sm:$0xff] }
   0x6   :  { %30 = vst.msk [vmem:[#allocation2 + $0x50] sm:$0xff] %vm19_vm1, %v492_v1  ;;  %31 = vst.msk [vmem:[#allocation2 + $0x58] sm:$0xff] %vm19_vm1, %v492_v1  ;;  %463 = vmatmul.mubr.msk.bf16.vlgmr.msra.gmra.mxu0 %vm115_vm2, %v486_v5  ;;  %471 = vmatmul.mubr.msk.bf16.vlgmr.msra.gmra.mxu1 %vm115_vm2, %v487_v6 }
   0x7   :  { %32 = vst.msk [vmem:[#allocation2 + $0x60] sm:$0xff] %vm19_vm1, %v492_v1  ;;  %33 = vst.msk [vmem:[#allocation2 + $0x68] sm:$0xff] %vm19_vm1, %v492_v1  ;;  %466 = vmatprep.mubr.msk.bf16.mxu0 %vm115_vm2, %v488_v7  ;;  %474 = vmatprep.mubr.msk.bf16.mxu1 %vm115_vm2, %v489_v8 }
   0x8   :  { %34 = vst.msk [vmem:[#allocation2 + $0x70] sm:$0xff] %vm19_vm1, %v492_v1  ;;  %35 = vst.msk [vmem:[#allocation2 + $0x78] sm:$0xff] %vm19_vm1, %v492_v1  ;;  %v38_v11 = vld [vmem:[#allocation2 + $0x10] sm:$0xff]  ;;  %v36_v15 = vld [vmem:[#allocation2] sm:$0xff] }
   0x9   :  { %v39_v21 = vld [vmem:[#allocation2 + $0x18] sm:$0xff]  ;;  %v37_v27 = vld [vmem:[#allocation2 + $0x8] sm:$0xff] }
   0xa   :  { %v40_v40 = vld [vmem:[#allocation2 + $0x20] sm:$0xff]  ;;  %v41_v62 = vld [vmem:[#allocation2 + $0x28] sm:$0xff] }
   0xb   :  { %v42_v33 = vld [vmem:[#allocation2 + $0x30] sm:$0xff]  ;;  %v43_v52 = vld [vmem:[#allocation2 + $0x38] sm:$0xff] }
   0xc   :  { %v44_v16 = vld [vmem:[#allocation2 + $0x40] sm:$0xff]  ;;  %v45_v28 = vld [vmem:[#allocation2 + $0x48] sm:$0xff] }
   0xd   :  { %v46_v12 = vld [vmem:[#allocation2 + $0x50] sm:$0xff]  ;;  %v47_v22 = vld [vmem:[#allocation2 + $0x58] sm:$0xff] }
   0xe   :  { %467 = vmatmul.mubr.msk.bf16.gmra.mxu0 %vm115_vm2, %v490_v9  ;;  %475 = vmatmul.mubr.msk.bf16.gmra.mxu1 %vm115_vm2, %v491_v10  ;;  %v48_v41 = vld [vmem:[#allocation2 + $0x60] sm:$0xff]  ;;  %v49_v63 = vld [vmem:[#allocation2 + $0x68] sm:$0xff] }
   0xf   :  { %v50_v34 = vld [vmem:[#allocation2 + $0x70] sm:$0xff]  ;;  %v51_v53 = vld [vmem:[#allocation2 + $0x78] sm:$0xff] }
  0xc6   :  { %v464_v13 = vpop.f32.mrf.mxu0  ;;  %v472_v14 = vpop.f32.mrf.mxu1 }
  0xc7   :  { %v243_v17 = vadd.f32 %v464_v13, %v38_v11  ;;  %v251_v18 = vadd.f32 %v472_v14, %v46_v12 }
  0xc8   :  { %v178_v19 = vpop.f32.mrf.mxu0  ;;  %v210_v20 = vpop.f32.mrf.mxu1 }
  0xc9   :  { %260 = vst.msk [vmem:[#allocation2 + $0x10] sm:$0xff] %vm19_vm1, %v243_v17  ;;  %268 = vst.msk [vmem:[#allocation2 + $0x50] sm:$0xff] %vm19_vm1, %v251_v18  ;;  %v241_v23 = vadd.f32 %v178_v19, %v36_v15  ;;  %v249_v24 = vadd.f32 %v210_v20, %v44_v16 }
  0xca   :  { %v465_v25 = vpop.f32.mrf.mxu0  ;;  %v473_v26 = vpop.f32.mrf.mxu1 }
  0xcb   :  { %258 = vst.msk [vmem:[#allocation2] sm:$0xff] %vm19_vm1, %v241_v23  ;;  %266 = vst.msk [vmem:[#allocation2 + $0x40] sm:$0xff] %vm19_vm1, %v249_v24  ;;  %v244_v29 = vadd.f32 %v465_v25, %v39_v21  ;;  %v252_v30 = vadd.f32 %v473_v26, %v47_v22 }
  0xcc   :  { %v181_v31 = vpop.f32.mrf.mxu0  ;;  %v213_v32 = vpop.f32.mrf.mxu1 }
  0xcd   :  { %261 = vst.msk [vmem:[#allocation2 + $0x18] sm:$0xff] %vm19_vm1, %v244_v29  ;;  %269 = vst.msk [vmem:[#allocation2 + $0x58] sm:$0xff] %vm19_vm1, %v252_v30  ;;  %v242_v35 = vadd.f32 %v181_v31, %v37_v27  ;;  %v250_v36 = vadd.f32 %v213_v32, %v45_v28 }
  0xce   :  { %v468_v38 = vpop.f32.mrf.mxu0  ;;  %v476_v39 = vpop.f32.mrf.mxu1 }
  0xcf   :  { %259 = vst.msk [vmem:[#allocation2 + $0x8] sm:$0xff] %vm19_vm1, %v242_v35  ;;  %267 = vst.msk [vmem:[#allocation2 + $0x48] sm:$0xff] %vm19_vm1, %v250_v36  ;;  %v247_v42 = vadd.f32 %v468_v38, %v42_v33  ;;  %v255_v43 = vadd.f32 %v476_v39, %v50_v34 }
  0xd0   :  { %v279_v44 = vld [vmem:[#allocation2 + $0x10] sm:$0xff]  ;;  %v194_v46 = vpop.f32.mrf.mxu0  ;;  %v226_v47 = vpop.f32.mrf.mxu1 }
  0xd1   :  { %v287_v45 = vld [vmem:[#allocation2 + $0x50] sm:$0xff]  ;;  %v302_v48 = vadd.f32 %v576_v37, %v279_v44  ;;  %264 = vst.msk [vmem:[#allocation2 + $0x30] sm:$0xff] %vm19_vm1, %v247_v42  ;;  %272 = vst.msk [vmem:[#allocation2 + $0x70] sm:$0xff] %vm19_vm1, %v255_v43  ;;  %v245_v50 = vadd.f32 %v194_v46, %v40_v40  ;;  %v253_v51 = vadd.f32 %v226_v47, %v48_v41 }
  0xd2   :  { %v310_v49 = vadd.f32 %v576_v37, %v287_v45  ;;  %v277_v54 = vld [vmem:[#allocation2] sm:$0xff]  ;;  %v469_v56 = vpop.f32.mrf.mxu0  ;;  %v477_v57 = vpop.f32.mrf.mxu1 }
  0xd3   :  { %v285_v55 = vld [vmem:[#allocation2 + $0x40] sm:$0xff]  ;;  %v437_v58 = vpack.c.bf16 %v302_v48, %v302_v48  ;;  %v300_v60 = vadd.f32 %v576_v37, %v277_v54  ;;  %262 = vst.msk [vmem:[#allocation2 + $0x20] sm:$0xff] %vm19_vm1, %v245_v50  ;;  %270 = vst.msk [vmem:[#allocation2 + $0x60] sm:$0xff] %vm19_vm1, %v253_v51  ;;  %v248_v2 = vadd.f32 %v469_v56, %v43_v52 }
  0xd4   :  { %v445_v59 = vpack.c.bf16 %v310_v49, %v310_v49  ;;  %v308_v61 = vadd.f32 %v576_v37, %v285_v55  ;;  %v280_v0 = vld [vmem:[#allocation2 + $0x18] sm:$0xff]  ;;  %v256_v3 = vadd.f32 %v477_v57, %v51_v53  ;;  %v197_v4 = vpop.f32.mrf.mxu0  ;;  %v229_v5 = vpop.f32.mrf.mxu1 }
  0xd5   :  { %v288_v1 = vld [vmem:[#allocation2 + $0x58] sm:$0xff]  ;;  %383 = vst.msk [vmem:[%s671_s3 + $0x8] sm:$0xf] %vm380_vm3, %v437_v58  ;;  %v435_v6 = vpack.c.bf16 %v300_v60, %v300_v60  ;;  %v303_v8 = vadd.f32 %v576_v37, %v280_v0  ;;  %v246_v12 = vadd.f32 %v197_v4, %v41_v62  ;;  %v254_v13 = vadd.f32 %v229_v5, %v49_v63 }
  0xd6   :  { %391 = vst.msk [vmem:[%s671_s3 + $0x28] sm:$0xf] %vm380_vm3, %v445_v59  ;;  %v443_v7 = vpack.c.bf16 %v308_v61, %v308_v61  ;;  %v311_v9 = vadd.f32 %v576_v37, %v288_v1  ;;  %v278_v10 = vld [vmem:[#allocation2 + $0x8] sm:$0xff] }
  0xd7   :  { %v286_v11 = vld [vmem:[#allocation2 + $0x48] sm:$0xff]  ;;  %265 = vst.msk [vmem:[#allocation2 + $0x38] sm:$0xff] %vm19_vm1, %v248_v2  ;;  %273 = vst.msk [vmem:[#allocation2 + $0x78] sm:$0xff] %vm19_vm1, %v256_v3  ;;  %v438_v14 = vpack.c.bf16 %v303_v8, %v303_v8  ;;  %v301_v16 = vadd.f32 %v576_v37, %v278_v10 }
  0xd8   :  { %381 = vst.msk [vmem:[%s671_s3] sm:$0xf] %vm380_vm3, %v435_v6  ;;  %389 = vst.msk [vmem:[%s671_s3 + $0x20] sm:$0xf] %vm380_vm3, %v443_v7  ;;  %v446_v15 = vpack.c.bf16 %v311_v9, %v311_v9  ;;  %v309_v17 = vadd.f32 %v576_v37, %v286_v11  ;;  %v283_v18 = vld [vmem:[#allocation2 + $0x30] sm:$0xff] }
  0xd9   :  { %v291_v19 = vld [vmem:[#allocation2 + $0x70] sm:$0xff]  ;;  %263 = vst.msk [vmem:[#allocation2 + $0x28] sm:$0xff] %vm19_vm1, %v246_v12  ;;  %271 = vst.msk [vmem:[#allocation2 + $0x68] sm:$0xff] %vm19_vm1, %v254_v13  ;;  %v436_v20 = vpack.c.bf16 %v301_v16, %v301_v16  ;;  %v306_v22 = vadd.f32 %v576_v37, %v283_v18 }
  0xda   :  { %384 = vst.msk [vmem:[%s671_s3 + $0xc] sm:$0xf] %vm380_vm3, %v438_v14  ;;  %392 = vst.msk [vmem:[%s671_s3 + $0x2c] sm:$0xf] %vm380_vm3, %v446_v15  ;;  %v444_v21 = vpack.c.bf16 %v309_v17, %v309_v17  ;;  %v314_v23 = vadd.f32 %v576_v37, %v291_v19  ;;  %v281_v24 = vld [vmem:[#allocation2 + $0x20] sm:$0xff] }
  0xdb   :  { %v289_v25 = vld [vmem:[#allocation2 + $0x60] sm:$0xff]  ;;  %382 = vst.msk [vmem:[%s671_s3 + $0x4] sm:$0xf] %vm380_vm3, %v436_v20  ;;  %v441_v26 = vpack.c.bf16 %v306_v22, %v306_v22  ;;  %v304_v28 = vadd.f32 %v576_v37, %v281_v24 }
  0xdc   :  { %390 = vst.msk [vmem:[%s671_s3 + $0x24] sm:$0xf] %vm380_vm3, %v444_v21  ;;  %v449_v27 = vpack.c.bf16 %v314_v23, %v314_v23  ;;  %v312_v29 = vadd.f32 %v576_v37, %v289_v25 }
  0xdd   :  { %387 = vst.msk [vmem:[%s671_s3 + $0x18] sm:$0xf] %vm380_vm3, %v441_v26  ;;  %v439_v30 = vpack.c.bf16 %v304_v28, %v304_v28 }
  0xde   :  { %395 = vst.msk [vmem:[%s671_s3 + $0x38] sm:$0xf] %vm380_vm3, %v449_v27  ;;  %v447_v31 = vpack.c.bf16 %v312_v29, %v312_v29  ;;  %v284_v32 = vld [vmem:[#allocation2 + $0x38] sm:$0xff] }
  0xdf   :  { %v292_v33 = vld [vmem:[#allocation2 + $0x78] sm:$0xff]  ;;  %v307_v34 = vadd.f32 %v576_v37, %v284_v32  ;;  %385 = vst.msk [vmem:[%s671_s3 + $0x10] sm:$0xf] %vm380_vm3, %v439_v30 }
  0xe0   :  { %v315_v35 = vadd.f32 %v576_v37, %v292_v33  ;;  %393 = vst.msk [vmem:[%s671_s3 + $0x30] sm:$0xf] %vm380_vm3, %v447_v31  ;;  %v282_v36 = vld [vmem:[#allocation2 + $0x28] sm:$0xff] }
  0xe1   :  { %v290_v38 = vld [vmem:[#allocation2 + $0x68] sm:$0xff]  ;;  %v442_v39 = vpack.c.bf16 %v307_v34, %v307_v34  ;;  %v305_v41 = vadd.f32 %v576_v37, %v282_v36 }
  0xe2   :  { %v450_v40 = vpack.c.bf16 %v315_v35, %v315_v35  ;;  %v313_v42 = vadd.f32 %v576_v37, %v290_v38 }
  0xe3   :  { %388 = vst.msk [vmem:[%s671_s3 + $0x1c] sm:$0xf] %vm380_vm3, %v442_v39  ;;  %v440_v43 = vpack.c.bf16 %v305_v41, %v305_v41 }
  0xe4   :  { %396 = vst.msk [vmem:[%s671_s3 + $0x3c] sm:$0xf] %vm380_vm3, %v450_v40  ;;  %v448_v44 = vpack.c.bf16 %v313_v42, %v313_v42 }
  0xe5   :  { %386 = vst.msk [vmem:[%s671_s3 + $0x14] sm:$0xf] %vm380_vm3, %v440_v43 }
  0xe6   :  { %394 = vst.msk [vmem:[%s671_s3 + $0x34] sm:$0xf] %vm380_vm3, %v448_v44 }

// kernel: _lambda_.6
= control target key start
LH: loop header
LB: loop body
LE: loop exit
PB: predicated region body
PF: predicated region fallthrough
CT: control target
= control target key end

     0   :  { %s4334_s29 = smov 0   ;;  %s5334_s0 = inlined_call_operand.vmem [shape: bf16[2,64,32], index: 0, kind: input, shape index: {}]   ;;  %s5335_s1 = inlined_call_operand.vmem [shape: f32[1,64,32], index: 1, kind: input, shape index: {}]   ;;  %s5336_s2 = inlined_call_operand.vmem [shape: f32[1,32], index: 2, kind: input, shape index: {}, may-alias: {2,8}]   ;;  %s5337_s3 = inlined_call_operand.vmem [shape: f32[1,32], index: 3, kind: input, shape index: {}, may-alias: {3,7,9,13}]   ;;  %s5338_s4 = inlined_call_operand.vmem [shape: bf16[32,96], index: 4, kind: input, shape index: {}]   ;;  %s5339_s5 = inlined_call_operand.vmem [shape: f32[1,96], index: 5, kind: input, shape index: {}]   ;;  %s5340_s6 = inlined_call_operand.vmem [shape: bf16[32,32], index: 6, kind: input, shape index: {}]   ;;  %s5341_s7 = inlined_call_operand.vmem [shape: f32[1,32], index: 7, kind: input, shape index: {}, may-alias: {3,7,9,13}]   ;;  %s5342_s8 = inlined_call_operand.vmem [shape: f32[1,32], index: 8, kind: input, shape index: {}, may-alias: {2,8}]   ;;  %s5343_s9 = inlined_call_operand.vmem [shape: f32[1,32], index: 9, kind: input, shape index: {}, may-alias: {3,7,9,13}]   ;;  %s5344_s10 = inlined_call_operand.vmem [shape: bf16[32,128], index: 10, kind: input, shape index: {}]   ;;  %s5345_s11 = inlined_call_operand.vmem [shape: f32[1,128], index: 11, kind: input, shape index: {}]   ;;  %s5346_s12 = inlined_call_operand.vmem [shape: bf16[128,32], index: 12, kind: input, shape index: {}]   ;;  %s5347_s13 = inlined_call_operand.vmem [shape: f32[1,32], index: 13, kind: input, shape index: {}, may-alias: {3,7,9,13}]   ;;  %s5348_s14 = inlined_call_operand.vmem [shape: bf16[2,64,32], index: 14, kind: output, shape index: {}]  }
   0x1 LB: > { %s3341_s30 = sadd.s32 4294967295, %s4246_s29   ;;  %p3345_p0 = scmp.ge.s32.totalorder %s4246_s29, 1  ;;  %s4246_s29 = sphi %s4334_s29, %s24_s29  }
   0x2   : > { %p412_p1 = scmp.lt.s32.totalorder %s4246_s29, 3 }
   0x4   : > { %p413_p2 = pnand %p3345_p0, %p412_p1 }
   0x5   : > { %p458_p3 = scmp.lt.s32.totalorder (!%p413_p2), %s3341_s30, 1  ;;  %s4248_s19 = smov (!%p413_p2), 96  }
   0x6   : > { %416 = sbr.rel (%p413_p2) target bundleno = 4003 (0xfa3), region = 76  ;;  %s4249_s20 = smov (!%p413_p2), 64  }
   0x7   : > { %s4250_s21 = smov (!%p413_p2), 88   ;;  %s4251_s22 = smov (!%p413_p2), 120  }
   0x8   : > { %s4252_s23 = smov (!%p413_p2), 56   ;;  %s4254_s27 = smov (!%p413_p2), 112  }
   0x9   : > { %s4255_s28 = smov (!%p413_p2), 72   ;;  %s4256_s16 = smov (!%p413_p2), 104  }
   0xb   : > { %s5350_s30 = smov (!%p458_p3, %s3341_s30), 1  ;;  %v485_v0 = vld [vmem:[%s5335_s1] sm:$0xff]  ;;  %v487_v1 = vld [vmem:[%s5335_s1 + $0x10] sm:$0xff]  ;;  %v486_v2 = vld [vmem:[%s5335_s1 + $0x8] sm:$0xff]  ;;  %vm503_vm0 = vcmask 261120   ;;  %vm765_vm1 = vcmask 64512  }
   0xc   : > { %s3500_s15 = sshll.u32 %s5350_s30, 5  ;;  %v488_v3 = vld [vmem:[%s5335_s1 + $0x18] sm:$0xff]  ;;  %v489_v13 = vld [vmem:[%s5335_s1 + $0x20] sm:$0xff]  ;;  %v490_v15 = vld [vmem:[%s5335_s1 + $0x28] sm:$0xff]  ;;  %vm911_vm2 = vcmask 523264   ;;  %vm1593_vm3 = vcmask 1043456  }
   0xd   : > { %s462_s26 = scalar_lea.vmem %s5334_s0, %s3500_s15  ;;  %v491_v28 = vld [vmem:[%s5335_s1 + $0x30] sm:$0xff]  ;;  %v492_v29 = vld [vmem:[%s5335_s1 + $0x38] sm:$0xff]  ;;  %s5306_s18 = scalar_lea.vmem %s5348_s14, %s3500_s15  ;;  %vm3277_vm4 = vcmask 257024  }
   0xe   : > { %v3511_v4 = vld [vmem:[%s462_s26] sm:$0xff]   ;;  %v3526_v5 = vld [vmem:[%s462_s26 + $0x8] sm:$0xff]   ;;  %v3527_v6 = vld [vmem:[%s462_s26 + $0x10] sm:$0xff]  }
   0xf   : > { %v3512_v7 = vunpack.c.l.bf16 %v3511_v4  ;;  %v3516_v8 = vunpack.c.l.bf16 %v3526_v5  ;;  %v3513_v9 = vunpack.c.h.bf16 %v3511_v4  ;;  %v3517_v10 = vunpack.c.h.bf16 %v3526_v5  ;;  %v3528_v11 = vld [vmem:[%s462_s26 + $0x18] sm:$0xff]   ;;  %s4253_s26 = smov 80  }
  0x10   : > { %v3520_v12 = vunpack.c.l.bf16 %v3527_v6  ;;  %v3521_v14 = vunpack.c.h.bf16 %v3527_v6  ;;  %v3524_v22 = vunpack.c.l.bf16 %v3528_v11  ;;  %v3525_v23 = vunpack.c.h.bf16 %v3528_v11 }
  0x11   : > { %v4368_v16 = vadd.f32 %v3512_v7, %v485_v0  ;;  %v4370_v17 = vadd.f32 %v3516_v8, %v487_v1  ;;  %v4372_v18 = vadd.f32 %v3513_v9, %v486_v2  ;;  %v4374_v19 = vadd.f32 %v3517_v10, %v488_v3 }
  0x12   : > { %v4384_v26 = vadd.f32 %v3520_v12, %v489_v13  ;;  %v4386_v27 = vadd.f32 %v3521_v14, %v490_v15  ;;  %v4398_v32 = vadd.f32 %v3524_v22, %v491_v28  ;;  %v4400_v33 = vadd.f32 %v3525_v23, %v492_v29  ;;  %v4052_v12 = vld [vmem:[%s5338_s4 + $0x8] sm:$0xff]   ;;  %v4053_v13 = vld [vmem:[%s5338_s4] sm:$0xff]  }
  0x13   : > { %v504_v20 = vsel %vm503_vm0, %v4368_v16, 0.0  ;;  %v510_v21 = vsel %vm503_vm0, %v4370_v17, 0.0  ;;  %v507_v24 = vsel %vm503_vm0, %v4372_v18, 0.0  ;;  %v513_v25 = vsel %vm503_vm0, %v4374_v19, 0.0  ;;  %3701 = vmatprep.subr.bf16.mxu0 %v4052_v12 }
  0x14   : > { %505 = vadd.xlane.f32.xlu0 %v504_v20  ;;  %511 = vadd.xlane.f32.xlu1 %v510_v21  ;;  %v516_v30 = vsel %vm503_vm0, %v4384_v26, 0.0  ;;  %v519_v31 = vsel %vm503_vm0, %v4386_v27, 0.0  ;;  %v522_v34 = vsel %vm503_vm0, %v4398_v32, 0.0  ;;  %v525_v35 = vsel %vm503_vm0, %v4400_v33, 0.0 }
  0x15   : > { %3702 = vmatpush3.bf16.msra.mxu0 %v4052_v12 }
  0x16   : > { %3703 = vmatprep.subr.bf16.mxu0 %v4053_v13 }
  0x18   : > { %508 = vadd.xlane.f32.xlu0 %v507_v24  ;;  %514 = vadd.xlane.f32.xlu1 %v513_v25 }
  0x19   : > { %3704 = vmatpush3.bf16.msra.mxu0 %v4053_v13 }
  0x1c   : > { %517 = vadd.xlane.f32.xlu0 %v516_v30  ;;  %520 = vadd.xlane.f32.xlu1 %v519_v31 }
  0x20   : > { %523 = vadd.xlane.f32.xlu0 %v522_v34  ;;  %526 = vadd.xlane.f32.xlu1 %v525_v35 }
  0x9d   : > { %v506_v36 = vpop.xlane.xlu0 %505  ;;  %v512_v37 = vpop.xlane.xlu1 %511 }
  0x9e   : > { %v529_v38 = vmul.f32 0.03125, %v506_v36  ;;  %v531_v39 = vmul.f32 0.03125, %v512_v37 }
  0xa0   : > { %v4407_v40 = vsub.f32 %v4368_v16, %v529_v38  ;;  %v4410_v41 = vsub.f32 %v4370_v17, %v531_v39 }
  0xa1   : > { %v509_v42 = vpop.xlane.xlu0 %508  ;;  %v515_v43 = vpop.xlane.xlu1 %514 }
  0xa2   : > { %v530_v44 = vmul.f32 0.03125, %v509_v42  ;;  %v532_v45 = vmul.f32 0.03125, %v515_v43  ;;  %v545_v46 = vmul.f32 %v4407_v40, %v4407_v40  ;;  %v547_v47 = vmul.f32 %v4410_v41, %v4410_v41 }
  0xa4   : > { %v4417_v48 = vsub.f32 %v4372_v18, %v530_v44  ;;  %v4420_v49 = vsub.f32 %v4374_v19, %v532_v45  ;;  %v553_v50 = vsel %vm503_vm0, %v545_v46, 0.0  ;;  %v559_v53 = vsel %vm503_vm0, %v547_v47, 0.0 }
  0xa5   : > { %554 = vadd.xlane.f32.xlu0 %v553_v50  ;;  %v518_v51 = vpop.xlane.xlu0 %517  ;;  %v521_v52 = vpop.xlane.xlu1 %520 }
  0xa6   : > { %v533_v54 = vmul.f32 0.03125, %v518_v51  ;;  %v534_v55 = vmul.f32 0.03125, %v521_v52  ;;  %v546_v56 = vmul.f32 %v4417_v48, %v4417_v48  ;;  %v548_v57 = vmul.f32 %v4420_v49, %v4420_v49  ;;  %v3350_v52 = vld [vmem:[%s5336_s2] ss:$0 sm:$0xff] }
  0xa8   : > { %v4429_v58 = vsub.f32 %v4384_v26, %v533_v54  ;;  %v4432_v59 = vsub.f32 %v4386_v27, %v534_v55  ;;  %v556_v60 = vsel %vm503_vm0, %v546_v56, 0.0  ;;  %v562_v63 = vsel %vm503_vm0, %v548_v57, 0.0  ;;  %v3351_v57 = vld [vmem:[%s5337_s3] ss:$0 sm:$0xff] }
  0xa9   : > { %560 = vadd.xlane.f32.xlu0 %v559_v53  ;;  %557 = vadd.xlane.f32.xlu1 %v556_v60  ;;  %v524_v61 = vpop.xlane.xlu0 %523  ;;  %v527_v62 = vpop.xlane.xlu1 %526 }
  0xaa   : > { %v535_v0 = vmul.f32 0.03125, %v524_v61  ;;  %v536_v1 = vmul.f32 0.03125, %v527_v62  ;;  %v549_v2 = vmul.f32 %v4429_v58, %v4429_v58  ;;  %v550_v3 = vmul.f32 %v4432_v59, %v4432_v59 }
  0xac   : > { %v4441_v4 = vsub.f32 %v4398_v32, %v535_v0  ;;  %v4444_v5 = vsub.f32 %v4400_v33, %v536_v1  ;;  %v565_v6 = vsel %vm503_vm0, %v549_v2, 0.0  ;;  %v568_v7 = vsel %vm503_vm0, %v550_v3, 0.0 }
  0xad   : > { %563 = vadd.xlane.f32.xlu1 %v562_v63  ;;  %566 = vadd.xlane.f32.xlu0 %v565_v6 }
  0xae   : > { %v551_v8 = vmul.f32 %v4441_v4, %v4441_v4  ;;  %v552_v9 = vmul.f32 %v4444_v5, %v4444_v5 }
  0xb0   : > { %v571_v10 = vsel %vm503_vm0, %v551_v8, 0.0  ;;  %v574_v11 = vsel %vm503_vm0, %v552_v9, 0.0 }
  0xb1   : > { %569 = vadd.xlane.f32.xlu1 %v568_v7  ;;  %572 = vadd.xlane.f32.xlu0 %v571_v10 }
  0xb5   : > { %575 = vadd.xlane.f32.xlu1 %v574_v11 }
 0x12e   : > { %v555_v14 = vpop.xlane.xlu0 %554 }
 0x12f   : > { %v577_v15 = vmul.f32 0.03125, %v555_v14 }
 0x131   : > { %v585_v20 = vadd.f32 1e-06, %v577_v15 }
 0x132   : > { %v558_v21 = vpop.xlane.xlu1 %557  ;;  %v561_v22 = vpop.xlane.xlu0 %560 }
 0x133   : > { %4064 = vrsqrt.f32 %v585_v20  ;;  %v578_v23 = vmul.f32 0.03125, %v558_v21  ;;  %v579_v24 = vmul.f32 0.03125, %v561_v22 }
 0x135   : > { %v586_v25 = vadd.f32 1e-06, %v578_v23  ;;  %v587_v28 = vadd.f32 1e-06, %v579_v24 }
 0x136   : > { %v564_v29 = vpop.xlane.xlu1 %563  ;;  %v567_v30 = vpop.xlane.xlu0 %566 }
 0x137   : > { %4066 = vrsqrt.f32 %v586_v25  ;;  %v580_v31 = vmul.f32 0.03125, %v564_v29  ;;  %v581_v34 = vmul.f32 0.03125, %v567_v30 }
 0x138   : > { %4068 = vrsqrt.f32 %v587_v28  ;;  %v3352_v28 = vld [vmem:[%s5339_s5] ss:$0 sm:$0xff] }
 0x139   : > { %v588_v35 = vadd.f32 1e-06, %v580_v31  ;;  %v589_v36 = vadd.f32 1e-06, %v581_v34 }
 0x13a   : > { %v570_v37 = vpop.xlane.xlu1 %569  ;;  %v573_v38 = vpop.xlane.xlu0 %572 }
 0x13b   : > { %4070 = vrsqrt.f32 %v588_v35  ;;  %v582_v39 = vmul.f32 0.03125, %v570_v37  ;;  %v583_v42 = vmul.f32 0.03125, %v573_v38 }
 0x13c   : > { %4072 = vrsqrt.f32 %v589_v36 }
 0x13d   : > { %v590_v43 = vadd.f32 1e-06, %v582_v39  ;;  %v591_v44 = vadd.f32 1e-06, %v583_v42 }
 0x13e   : > { %v576_v45 = vpop.xlane.xlu1 %575 }
 0x13f   : > { %4074 = vrsqrt.f32 %v590_v43  ;;  %v584_v46 = vmul.f32 0.03125, %v576_v45 }
 0x140   : > { %v4065_v47 = vpop.eup %4064  ;;  %4076 = vrsqrt.f32 %v591_v44 }
 0x141   : > { %v592_v50 = vadd.f32 1e-06, %v584_v46  ;;  %v601_v51 = vmul.f32 %v4065_v47, %v4407_v40 }
 0x143   : > { %4078 = vrsqrt.f32 %v592_v50  ;;  %v615_v56 = vmul.f32 %v3350_v52, %v601_v51 }
 0x144   : > { %v4067_v53 = vpop.eup %4066 }
 0x145   : > { %v4069_v54 = vpop.eup %4068  ;;  %v602_v55 = vmul.f32 %v4067_v53, %v4417_v48  ;;  %v629_v40 = vadd.f32 %v3351_v57, %v615_v56 }
 0x146   : > { %v603_v60 = vmul.f32 %v4069_v54, %v4410_v41 }
 0x147   : > { %v616_v61 = vmul.f32 %v3350_v52, %v602_v55 }
 0x148   : > { %v4071_v62 = vpop.eup %4070  ;;  %v617_v2 = vmul.f32 %v3350_v52, %v603_v60 }
 0x149   : > { %v4073_v63 = vpop.eup %4072  ;;  %v630_v0 = vadd.f32 %v3351_v57, %v616_v61  ;;  %v604_v1 = vmul.f32 %v4071_v62, %v4420_v49 }
 0x14a   : > { %v605_v3 = vmul.f32 %v4073_v63, %v4429_v58  ;;  %v631_v9 = vadd.f32 %v3351_v57, %v617_v2 }
 0x14b   : > { %v637_v6 = vpack.c.bf16 %v630_v0, %v629_v40  ;;  %v618_v7 = vmul.f32 %v3350_v52, %v604_v1 }
 0x14c   : > { %v4075_v48 = vpop.eup %4074  ;;  %v619_v11 = vmul.f32 %v3350_v52, %v605_v3 }
 0x14d   : > { %v4077_v8 = vpop.eup %4076  ;;  %3705 = vmatprep.mubr.msk.bf16.mxu0 %vm503_vm0, %v637_v6  ;;  %v632_v10 = vadd.f32 %v3351_v57, %v618_v7  ;;  %v606_v41 = vmul.f32 %v4075_v48, %v4432_v59 }
 0x14e   : > { %v607_v12 = vmul.f32 %v4077_v8, %v4441_v4  ;;  %v633_v49 = vadd.f32 %v3351_v57, %v619_v11 }
 0x14f   : > { %v638_v13 = vpack.c.bf16 %v632_v10, %v631_v9  ;;  %v620_v14 = vmul.f32 %v3350_v52, %v606_v41 }
 0x150   : > { %v4079_v15 = vpop.eup %4078  ;;  %v621_v21 = vmul.f32 %v3350_v52, %v607_v12 }
 0x151   : > { %3706 = vmatmul.mubr.msk.bf16.vlgmr.msra.gmra.mxu0 %vm503_vm0, %v638_v13  ;;  %v634_v58 = vadd.f32 %v3351_v57, %v620_v14  ;;  %v608_v20 = vmul.f32 %v4079_v15, %v4444_v5 }
 0x152   : > { %v635_v24 = vadd.f32 %v3351_v57, %v621_v21 }
 0x153   : > { %v639_v22 = vpack.c.bf16 %v634_v58, %v633_v49  ;;  %v622_v23 = vmul.f32 %v3350_v52, %v608_v20 }
 0x155   : > { %3709 = vmatprep.mubr.msk.bf16.mxu0 %vm503_vm0, %v639_v22  ;;  %v636_v25 = vadd.f32 %v3351_v57, %v622_v23 }
 0x157   : > { %v640_v59 = vpack.c.bf16 %v636_v25, %v635_v24 }
 0x159   : > { %3710 = vmatmul.mubr.msk.bf16.gmra.mxu0 %vm503_vm0, %v640_v59 }
 0x211   : > { %v3707_v4 = vpop.f32.mrf.mxu0 }
 0x212   : > { %v4502_v46 = vadd.f32 %v3707_v4, %v3352_v28 }
 0x213   : > { %v710_v29 = vpop.f32.mrf.mxu0 }
 0x214   : > { %v4481_v30 = vadd.f32 %v3352_v28, %v710_v29 }
 0x215   : > { %v3708_v5 = vpop.f32.mrf.mxu0 }
 0x216   : > { %3729 = vmatprep.mubr.msk.f32.mxu1 %vm765_vm1, %v4481_v30  ;;  %v4493_v43 = vadd.f32 %v3708_v5, %v3352_v28 }
 0x217   : > { %v713_v31 = vpop.f32.mrf.mxu0 }
 0x218   : > { %v4499_v45 = vadd.f32 %v3352_v28, %v713_v31 }
 0x219   : > { %v3711_v34 = vpop.f32.mrf.mxu0 }
 0x21a   : > { %v4485_v35 = vadd.f32 %v3711_v34, %v3352_v28 }
 0x21b   : > { %v726_v36 = vpop.f32.mrf.mxu0 }
 0x21c   : > { %761 = vrot.lane.b32.xlu1 %v4485_v35, %s4248_s19  ;;  %v4496_v44 = vadd.f32 %v3352_v28, %v726_v36 }
 0x21d   : > { %v3712_v37 = vpop.f32.mrf.mxu0 }
 0x21e   : > { %v4488_v38 = vadd.f32 %v3712_v37, %v3352_v28 }
 0x21f   : > { %v729_v39 = vpop.f32.mrf.mxu0 }
 0x220   : > { %v4490_v42 = vadd.f32 %v3352_v28, %v729_v39  ;;  %763 = vrot.lane.b32.xlu0 %v4488_v38, %s4248_s19 }
 0x222   : > { %759 = vrot.lane.b32.xlu1 %v4490_v42, %s4248_s19 }
 0x224   : > { %755 = vrot.lane.b32.xlu0 %v4493_v43, %s4248_s19 }
 0x226   : > { %757 = vrot.lane.b32.xlu1 %v4496_v44, %s4248_s19 }
 0x228   : > { %751 = vrot.lane.b32.xlu0 %v4499_v45, %s4248_s19 }
 0x22a   : > { %753 = vrot.lane.b32.xlu1 %v4502_v46, %s4248_s19 }
 0x22c   : > { %1014 = vrot.lane.b32.xlu0 %v4488_v38, %s4249_s20 }
 0x22e   : > { %749 = vrot.lane.b32.xlu1 %v4481_v30, %s4248_s19  ;;  %s4257_s19 = smov 48  }
 0x230   : > { %1006 = vrot.lane.b32.xlu0 %v4493_v43, %s4249_s20 }
 0x232   : > { %1012 = vrot.lane.b32.xlu1 %v4485_v35, %s4249_s20 }
 0x234   : > { %1002 = vrot.lane.b32.xlu0 %v4499_v45, %s4249_s20 }
 0x236   : > { %1008 = vrot.lane.b32.xlu1 %v4496_v44, %s4249_s20 }
 0x238   : > { %1188 = vrot.lane.b32.xlu0 %v4488_v38, %s4250_s21 }
 0x23a   : > { %1004 = vrot.lane.b32.xlu1 %v4502_v46, %s4249_s20 }
 0x23e   : > { %1000 = vrot.lane.b32.xlu1 %v4481_v30, %s4249_s20 }
 0x242   : > { %1186 = vrot.lane.b32.xlu1 %v4485_v35, %s4250_s21 }
 0x246   : > { %1010 = vrot.lane.b32.xlu1 %v4490_v42, %s4249_s20  ;;  %s4258_s20 = smov 40  }
 0x28e   : > { %v762_v47 = vpop.permute.xlu1 %761 }
 0x292   : > { %v764_v50 = vpop.permute.xlu0 %763 }
 0x293   : > { %3713 = vmatprep.subr.msk.mxu1 %vm765_vm1, %v764_v50 }
 0x294   : > { %3714 = vmatpush3.xpose.msk.msra.mxu1 %vm765_vm1, %v764_v50  ;;  %v760_v51 = vpop.permute.xlu1 %759 }
 0x295   : > { %3715 = vmatprep.subr.msk.mxu1 %vm765_vm1, %v762_v47 }
 0x296   : > { %v756_v52 = vpop.permute.xlu0 %755 }
 0x298   : > { %3716 = vmatpush3.xpose.msk.msra.mxu1 %vm765_vm1, %v762_v47  ;;  %v758_v53 = vpop.permute.xlu1 %757 }
 0x299   : > { %3717 = vmatprep.subr.msk.mxu1 %vm765_vm1, %v760_v51 }
 0x29a   : > { %v752_v54 = vpop.permute.xlu0 %751 }
 0x29c   : > { %3718 = vmatpush3.xpose.msk.msra.mxu1 %vm765_vm1, %v760_v51  ;;  %v754_v55 = vpop.permute.xlu1 %753 }
 0x29d   : > { %3719 = vmatprep.subr.msk.mxu1 %vm765_vm1, %v758_v53 }
 0x29e   : > { %v1015_v56 = vpop.permute.xlu0 %1014 }
 0x29f   : > { %3741 = vmatprep.subr.mxu0 %v1015_v56 }
 0x2a0   : > { %3720 = vmatpush3.xpose.msk.msra.mxu1 %vm765_vm1, %v758_v53  ;;  %3742 = vmatpush3.msra.mxu0 %v1015_v56  ;;  %v750_v57 = vpop.permute.xlu1 %749 }
 0x2a1   : > { %3721 = vmatprep.subr.msk.mxu1 %vm765_vm1, %v756_v52 }
 0x2a2   : > { %v1007_v0 = vpop.permute.xlu0 %1006 }
 0x2a4   : > { %3722 = vmatpush3.xpose.msk.msra.mxu1 %vm765_vm1, %v756_v52  ;;  %v1013_v60 = vpop.permute.xlu1 %1012 }
 0x2a5   : > { %3723 = vmatprep.subr.msk.mxu1 %vm765_vm1, %v754_v55  ;;  %3743 = vmatprep.subr.mxu0 %v1013_v60 }
 0x2a6   : > { %3744 = vmatpush3.msra.mxu0 %v1013_v60  ;;  %v1003_v2 = vpop.permute.xlu0 %1002 }
 0x2a8   : > { %3724 = vmatpush3.xpose.msk.msra.mxu1 %vm765_vm1, %v754_v55  ;;  %v1009_v61 = vpop.permute.xlu1 %1008 }
 0x2a9   : > { %3725 = vmatprep.subr.msk.mxu1 %vm765_vm1, %v752_v54 }
 0x2aa   : > { %v4551_v3 = vpop.permute.xlu0 %1188 }
 0x2ac   : > { %3726 = vmatpush3.xpose.msk.msra.mxu1 %vm765_vm1, %v752_v54  ;;  %v1005_v62 = vpop.permute.xlu1 %1004 }
 0x2ad   : > { %3727 = vmatprep.subr.msk.mxu1 %vm765_vm1, %v750_v57 }
 0x2b0   : > { %3728 = vmatpush3.xpose.msk.msra.mxu1 %vm765_vm1, %v750_v57  ;;  %v1001_v63 = vpop.permute.xlu1 %1000 }
 0x2b3   : > { %3730 = vmatmul.mubr.msk.f32.vlgmr.msra.gmra.mxu1 %vm765_vm1, %v4499_v45 }
 0x2b4   : > { %3732 = vmatprep.mubr.msk.f32.mxu1 %vm765_vm1, %v4502_v46  ;;  %v4539_v40 = vpop.permute.xlu1 %1186 }
 0x2b7   : > { %3733 = vmatmul.mubr.msk.f32.gmra.mxu1 %vm765_vm1, %v4493_v43 }
 0x2b8   : > { %3735 = vmatprep.mubr.msk.f32.mxu1 %vm765_vm1, %v4496_v44  ;;  %v1011_v1 = vpop.permute.xlu1 %1010 }
 0x2b9   : > { %3745 = vmatprep.subr.mxu0 %v1011_v1 }
 0x2ba   : > { %3746 = vmatpush3.msra.mxu0 %v1011_v1 }
 0x2bb   : > { %3736 = vmatmul.mubr.msk.f32.gmra.mxu1 %vm765_vm1, %v4490_v42  ;;  %3747 = vmatprep.subr.mxu0 %v1009_v61 }
 0x2bc   : > { %3738 = vmatprep.mubr.msk.f32.mxu1 %vm765_vm1, %v4485_v35  ;;  %3748 = vmatpush3.msra.mxu0 %v1009_v61 }
 0x2bd   : > { %3749 = vmatprep.subr.mxu0 %v1007_v0 }
 0x2be   : > { %3750 = vmatpush3.msra.mxu0 %v1007_v0 }
 0x2bf   : > { %3739 = vmatmul.mubr.msk.f32.gmra.mxu1 %vm765_vm1, %v4488_v38  ;;  %3751 = vmatprep.subr.mxu0 %v1005_v62 }
 0x2c0   : > { %3752 = vmatpush3.msra.mxu0 %v1005_v62 }
 0x2c1   : > { %3753 = vmatprep.subr.mxu0 %v1003_v2 }
 0x2c2   : > { %3754 = vmatpush3.msra.mxu0 %v1003_v2 }
 0x2c3   : > { %3755 = vmatprep.subr.mxu0 %v1001_v63 }
 0x2c4   : > { %3756 = vmatpush3.msra.mxu0 %v1001_v63 }
 0x2c5   : > { %3769 = vmatprep.subr.msk.mxu0 %vm765_vm1, %v4551_v3 }
 0x373   : > { %v3731_v6 = vpop.f32.mrf.mxu1 }
 0x374   : > { %v904_v7 = vmul.f32 0.35355338, %v3731_v6 }
 0x375   : > { %v864_v48 = vpop.f32.mrf.mxu1 }
 0x376   : > { %v903_v8 = vmul.f32 0.35355338, %v864_v48  ;;  %v915_v9 = vsel %vm911_vm2, %v904_v7, -inf }
 0x377   : > { %916 = vmax.xlane.f32.xlu1 %v915_v9  ;;  %v3734_v10 = vpop.f32.mrf.mxu1 }
 0x378   : > { %v906_v41 = vmul.f32 0.35355338, %v3734_v10  ;;  %v912_v11 = vsel %vm911_vm2, %v903_v8, -inf }
 0x379   : > { %913 = vmax.xlane.f32.xlu0 %v912_v11  ;;  %v874_v12 = vpop.f32.mrf.mxu1 }
 0x37a   : > { %v905_v14 = vmul.f32 0.35355338, %v874_v12  ;;  %v921_v49 = vsel %vm911_vm2, %v906_v41, -inf }
 0x37b   : > { %v3737_v13 = vpop.f32.mrf.mxu1 }
 0x37c   : > { %v908_v15 = vmul.f32 0.35355338, %v3737_v13  ;;  %v918_v24 = vsel %vm911_vm2, %v905_v14, -inf }
 0x37d   : > { %922 = vmax.xlane.f32.xlu0 %v921_v49  ;;  %v884_v58 = vpop.f32.mrf.mxu1 }
 0x37e   : > { %v927_v20 = vsel %vm911_vm2, %v908_v15, -inf  ;;  %v907_v22 = vmul.f32 0.35355338, %v884_v58 }
 0x37f   : > { %928 = vmax.xlane.f32.xlu1 %v927_v20  ;;  %v3740_v21 = vpop.f32.mrf.mxu1 }
 0x380   : > { %v910_v23 = vmul.f32 0.35355338, %v3740_v21  ;;  %v924_v28 = vsel %vm911_vm2, %v907_v22, -inf }
 0x381   : > { %919 = vmax.xlane.f32.xlu0 %v918_v24  ;;  %v894_v25 = vpop.f32.mrf.mxu1 }
 0x382   : > { %v933_v59 = vsel %vm911_vm2, %v910_v23, -inf  ;;  %v909_v4 = vmul.f32 0.35355338, %v894_v25 }
 0x383   : > { %934 = vmax.xlane.f32.xlu1 %v933_v59 }
 0x384   : > { %v930_v29 = vsel %vm911_vm2, %v909_v4, -inf }
 0x385   : > { %925 = vmax.xlane.f32.xlu0 %v924_v28 }
 0x389   : > { %931 = vmax.xlane.f32.xlu0 %v930_v29 }
 0x394   : > { %1182 = vrot.lane.b32.xlu1 %v4496_v44, %s4250_s21 }
 0x39f   : > { %1184 = vrot.lane.b32.xlu0 %v4490_v42, %s4250_s21 }
 0x400   : > { %v917_v5 = vpop.xlane.xlu1 %916 }
 0x401   : > { %v937_v31 = vsub.f32 %v904_v7, %v917_v5 }
 0x402   : > { %v914_v34 = vpop.xlane.xlu0 %913 }
 0x403   : > { %v946_v36 = vmul.f32 1.442695, %v937_v31  ;;  %v936_v37 = vsub.f32 %v903_v8, %v914_v34 }
 0x405   : > { %4080 = vpow2.f32 %v946_v36  ;;  %v944_v39 = vmul.f32 1.442695, %v936_v37 }
 0x406   : > { %v923_v53 = vpop.xlane.xlu0 %922 }
 0x407   : > { %4082 = vpow2.f32 %v944_v39  ;;  %v939_v56 = vsub.f32 %v906_v41, %v923_v53 }
 0x408   : > { %v929_v55 = vpop.xlane.xlu1 %928 }
 0x409   : > { %v950_v61 = vmul.f32 1.442695, %v939_v56  ;;  %v941_v62 = vsub.f32 %v908_v15, %v929_v55 }
 0x40a   : > { %v920_v54 = vpop.xlane.xlu0 %919 }
 0x40b   : > { %v938_v60 = vsub.f32 %v905_v14, %v920_v54  ;;  %4084 = vpow2.f32 %v950_v61  ;;  %v954_v6 = vmul.f32 1.442695, %v941_v62 }
 0x40c   : > { %v935_v63 = vpop.xlane.xlu1 %934 }
 0x40d   : > { %v948_v0 = vmul.f32 1.442695, %v938_v60  ;;  %v943_v7 = vsub.f32 %v910_v23, %v935_v63 }
 0x40e   : > { %v926_v57 = vpop.xlane.xlu0 %925 }
 0x40f   : > { %v940_v1 = vsub.f32 %v907_v22, %v926_v57  ;;  %4086 = vpow2.f32 %v948_v0  ;;  %v958_v9 = vmul.f32 1.442695, %v943_v7 }
 0x410   : > { %4088 = vpow2.f32 %v954_v6  ;;  %v1183_v24 = vpop.permute.xlu1 %1182 }
 0x411   : > { %v952_v48 = vmul.f32 1.442695, %v940_v1 }
 0x412   : > { %v4567_v47 = vpop.eup %4080  ;;  %v932_v2 = vpop.xlane.xlu0 %931 }
 0x413   : > { %v963_v50 = vsel %vm911_vm2, %v4567_v47, 0.0  ;;  %v942_v8 = vsub.f32 %v909_v4, %v932_v2  ;;  %4090 = vpow2.f32 %v952_v48 }
 0x414   : > { %v4571_v51 = vpop.eup %4082  ;;  %964 = vadd.xlane.f32.xlu1 %v963_v50  ;;  %4092 = vpow2.f32 %v958_v9 }
 0x415   : > { %v960_v52 = vsel %vm911_vm2, %v4571_v51, 0.0  ;;  %v956_v10 = vmul.f32 1.442695, %v942_v8 }
 0x416   : > { %961 = vadd.xlane.f32.xlu0 %v960_v52  ;;  %v1185_v25 = vpop.permute.xlu0 %1184 }
 0x417   : > { %4094 = vpow2.f32 %v956_v10 }
 0x418   : > { %v4579_v41 = vpop.eup %4084 }
 0x419   : > { %v969_v12 = vsel %vm911_vm2, %v4579_v41, 0.0 }
 0x41c   : > { %v4581_v11 = vpop.eup %4086 }
 0x41d   : > { %v4585_v13 = vpop.eup %4088  ;;  %v966_v14 = vsel %vm911_vm2, %v4581_v11, 0.0 }
 0x41e   : > { %v975_v49 = vsel %vm911_vm2, %v4585_v13, 0.0 }
 0x420   : > { %v4589_v15 = vpop.eup %4090 }
 0x421   : > { %v4593_v58 = vpop.eup %4092  ;;  %v972_v20 = vsel %vm911_vm2, %v4589_v15, 0.0 }
 0x422   : > { %v981_v22 = vsel %vm911_vm2, %v4593_v58, 0.0 }
 0x424   : > { %v4597_v21 = vpop.eup %4094 }
 0x425   : > { %1178 = vrot.lane.b32.xlu1 %v4502_v46, %s4250_s21  ;;  %v978_v23 = vsel %vm911_vm2, %v4597_v21, 0.0 }
 0x42c   : > { %1180 = vrot.lane.b32.xlu0 %v4493_v43, %s4250_s21 }
 0x449   : > { %970 = vadd.xlane.f32.xlu1 %v969_v12 }
 0x44b   : > { %967 = vadd.xlane.f32.xlu0 %v966_v14 }
 0x44d   : > { %976 = vadd.xlane.f32.xlu1 %v975_v49 }
 0x44f   : > { %973 = vadd.xlane.f32.xlu0 %v972_v20 }
 0x451   : > { %982 = vadd.xlane.f32.xlu1 %v981_v22 }
 0x453   : > { %979 = vadd.xlane.f32.xlu0 %v978_v23 }
 0x462   : > { %1174 = vrot.lane.b32.xlu1 %v4481_v30, %s4250_s21 }
 0x466   : > { %1160 = vrot.lane.b32.xlu1 %v4499_v45, %s4251_s22 }
 0x469   : > { %1176 = vrot.lane.b32.xlu0 %v4499_v45, %s4250_s21 }
 0x46a   : > { %1164 = vrot.lane.b32.xlu1 %v4493_v43, %s4251_s22 }
 0x46d   : > { %1158 = vrot.lane.b32.xlu0 %v4481_v30, %s4251_s22 }
 0x46e   : > { %1168 = vrot.lane.b32.xlu1 %v4490_v42, %s4251_s22 }
 0x471   : > { %1162 = vrot.lane.b32.xlu0 %v4502_v46, %s4251_s22 }
 0x472   : > { %1172 = vrot.lane.b32.xlu1 %v4488_v38, %s4251_s22 }
 0x475   : > { %1166 = vrot.lane.b32.xlu0 %v4496_v44, %s4251_s22 }
 0x476   : > { %1435 = vrot.lane.b32.xlu1 %v4485_v35, %s4252_s23 }
 0x479   : > { %1170 = vrot.lane.b32.xlu0 %v4485_v35, %s4251_s22 }
 0x47a   : > { %1433 = vrot.lane.b32.xlu1 %v4490_v42, %s4252_s23 }
 0x47d   : > { %1437 = vrot.lane.b32.xlu0 %v4488_v38, %s4252_s23 }
 0x49d   : > { %v965_v59 = vpop.xlane.xlu1 %964 }
 0x49e   : > { %4096 = vrcp.f32 %v965_v59 }
 0x49f   : > { %v962_v4 = vpop.xlane.xlu0 %961 }
 0x4a0   : > { %4098 = vrcp.f32 %v962_v4 }
 0x4a1   : > { %v1179_v36 = vpop.permute.xlu1 %1178 }
 0x4a3   : > { %v1181_v34 = vpop.permute.xlu0 %1180 }
 0x4ab   : > { %v4097_v28 = vpop.eup %4096 }
 0x4ac   : > { %v993_v31 = vmul.f32 %v4097_v28, %v4567_v47 }
 0x4ad   : > { %v4099_v29 = vpop.eup %4098 }
 0x4ae   : > { %v992_v5 = vmul.f32 %v4099_v29, %v4571_v51 }
 0x4b0   : > { %3757 = vmatprep.mubr.msk.f32.mxu0 %vm911_vm2, %v992_v5 }
 0x4b1   : > { %3758 = vmatmul.mubr.msk.f32.vlgmr.msra.gmra.mxu0 %vm911_vm2, %v993_v31 }
 0x4b2   : > { %3770 = vmatpush3.xpose.msk.msra.mxu0 %vm765_vm1, %v4551_v3 }
 0x4b3   : > { %3771 = vmatprep.subr.msk.mxu0 %vm765_vm1, %v4539_v40 }
 0x4b6   : > { %3772 = vmatpush3.xpose.msk.msra.mxu0 %vm765_vm1, %v4539_v40 }
 0x4b7   : > { %3773 = vmatprep.subr.msk.mxu0 %vm765_vm1, %v1185_v25 }
 0x4ba   : > { %3774 = vmatpush3.xpose.msk.msra.mxu0 %vm765_vm1, %v1185_v25 }
 0x4bb   : > { %3775 = vmatprep.subr.msk.mxu0 %vm765_vm1, %v1183_v24 }
 0x4be   : > { %3776 = vmatpush3.xpose.msk.msra.mxu0 %vm765_vm1, %v1183_v24 }
 0x4bf   : > { %3777 = vmatprep.subr.msk.mxu0 %vm765_vm1, %v1181_v34 }
 0x4c2   : > { %3778 = vmatpush3.xpose.msk.msra.mxu0 %vm765_vm1, %v1181_v34 }
 0x4c3   : > { %3779 = vmatprep.subr.msk.mxu0 %vm765_vm1, %v1179_v36 }
 0x4c6   : > { %3780 = vmatpush3.xpose.msk.msra.mxu0 %vm765_vm1, %v1179_v36 }
 0x4d2   : > { %v971_v3 = vpop.xlane.xlu1 %970 }
 0x4d3   : > { %4100 = vrcp.f32 %v971_v3 }
 0x4d4   : > { %v968_v40 = vpop.xlane.xlu0 %967 }
 0x4d5   : > { %4102 = vrcp.f32 %v968_v40 }
 0x4d6   : > { %v977_v37 = vpop.xlane.xlu1 %976 }
 0x4d7   : > { %4104 = vrcp.f32 %v977_v37 }
 0x4d8   : > { %v974_v39 = vpop.xlane.xlu0 %973 }
 0x4d9   : > { %4106 = vrcp.f32 %v974_v39 }
 0x4da   : > { %v983_v47 = vpop.xlane.xlu1 %982 }
 0x4db   : > { %4108 = vrcp.f32 %v983_v47 }
 0x4dc   : > { %v980_v50 = vpop.xlane.xlu0 %979 }
 0x4dd   : > { %4110 = vrcp.f32 %v980_v50 }
 0x4de   : > { %v1175_v51 = vpop.permute.xlu1 %1174 }
 0x4e0   : > { %v1177_v52 = vpop.permute.xlu0 %1176  ;;  %v4101_v53 = vpop.eup %4100 }
 0x4e1   : > { %3781 = vmatprep.subr.msk.mxu0 %vm765_vm1, %v1177_v52  ;;  %v995_v60 = vmul.f32 %v4101_v53, %v4579_v41 }
 0x4e2   : > { %v4103_v54 = vpop.eup %4102  ;;  %3782 = vmatpush3.xpose.msk.msra.mxu0 %vm765_vm1, %v1177_v52  ;;  %v1161_v55 = vpop.permute.xlu1 %1160 }
 0x4e3   : > { %3783 = vmatprep.subr.msk.mxu0 %vm765_vm1, %v1175_v51  ;;  %v994_v56 = vmul.f32 %v4103_v54, %v4581_v11 }
 0x4e4   : > { %v1159_v57 = vpop.permute.xlu0 %1158  ;;  %v4105_v61 = vpop.eup %4104 }
 0x4e5   : > { %3760 = vmatprep.mubr.msk.f32.mxu0 %vm911_vm2, %v994_v56  ;;  %v997_v2 = vmul.f32 %v4105_v61, %v4585_v13 }
 0x4e6   : > { %v4107_v62 = vpop.eup %4106  ;;  %3761 = vmatmul.mubr.msk.f32.gmra.mxu0 %vm911_vm2, %v995_v60  ;;  %v1165_v63 = vpop.permute.xlu1 %1164 }
 0x4e7   : > { %3784 = vmatpush3.xpose.msk.msra.mxu0 %vm765_vm1, %v1175_v51  ;;  %v996_v0 = vmul.f32 %v4107_v62, %v4589_v15  ;;  %v1157_v15 = vld [vmem:[%s5340_s6] sm:$0xf] }
 0x4e8   : > { %v1163_v1 = vpop.permute.xlu0 %1162  ;;  %v4109_v6 = vpop.eup %4108  ;;  %4030 = vmatprep.subr.msk.bf16.mxu0 %vm1593_vm3, %v1157_v15  ;;  %v1675_v49 = vsel %vm1593_vm3, %v1157_v15, 0 }
 0x4e9   : > { %3763 = vmatprep.mubr.msk.f32.mxu0 %vm911_vm2, %v996_v0  ;;  %v999_v10 = vmul.f32 %v4109_v6, %v4593_v58 }
 0x4ea   : > { %v4111_v7 = vpop.eup %4110  ;;  %3764 = vmatmul.mubr.msk.f32.gmra.mxu0 %vm911_vm2, %v997_v2  ;;  %v1169_v48 = vpop.permute.xlu1 %1168 }
 0x4eb   : > { %v998_v8 = vmul.f32 %v4111_v7, %v4597_v21 }
 0x4ec   : > { %v1167_v9 = vpop.permute.xlu0 %1166 }
 0x4ed   : > { %3766 = vmatprep.mubr.msk.f32.mxu0 %vm911_vm2, %v998_v8 }
 0x4ee   : > { %3767 = vmatmul.mubr.msk.f32.gmra.mxu0 %vm911_vm2, %v999_v10  ;;  %v1173_v41 = vpop.permute.xlu1 %1172 }
 0x4ef   : > { %3785 = vmatprep.mubr.msk.f32.mxu0 %vm765_vm1, %v1159_v57 }
 0x4f0   : > { %v1171_v11 = vpop.permute.xlu0 %1170 }
 0x4f2   : > { %3786 = vmatmul.mubr.msk.f32.vlgmr.msra.gmra.mxu0 %vm765_vm1, %v1161_v55  ;;  %v1436_v12 = vpop.permute.xlu1 %1435 }
 0x4f3   : > { %3788 = vmatprep.mubr.msk.f32.mxu0 %vm765_vm1, %v1163_v1  ;;  %3836 = vmatpush3.bf16.msra.mxu0 %v1675_v49 }
 0x4f4   : > { %v1438_v13 = vpop.permute.xlu0 %1437 }
 0x4f5   : > { %3797 = vmatprep.subr.mxu1 %v1438_v13 }
 0x4f6   : > { %3789 = vmatmul.mubr.msk.f32.gmra.mxu0 %vm765_vm1, %v1165_v63  ;;  %3798 = vmatpush3.msra.mxu1 %v1438_v13  ;;  %v1434_v14 = vpop.permute.xlu1 %1433 }
 0x4f7   : > { %3791 = vmatprep.mubr.msk.f32.mxu0 %vm765_vm1, %v1167_v9  ;;  %3799 = vmatprep.subr.mxu1 %v1436_v12 }
 0x4f8   : > { %3800 = vmatpush3.msra.mxu1 %v1436_v12 }
 0x4f9   : > { %3801 = vmatprep.subr.mxu1 %v1434_v14 }
 0x4fa   : > { %3792 = vmatmul.mubr.msk.f32.gmra.mxu0 %vm765_vm1, %v1169_v48  ;;  %3802 = vmatpush3.msra.mxu1 %v1434_v14 }
 0x4fb   : > { %3794 = vmatprep.mubr.msk.f32.mxu0 %vm765_vm1, %v1171_v11 }
 0x4fe   : > { %3795 = vmatmul.mubr.msk.f32.gmra.mxu0 %vm765_vm1, %v1173_v41 }
 0x571   : > { %v3759_v58 = vpop.f32.mrf.mxu0 }
 0x573   : > { %v1114_v20 = vpop.f32.mrf.mxu0 }
 0x574   : > { %v1153_v21 = vpack.c.bf16 %v3759_v58, %v1114_v20 }
 0x576   : > { %3837 = vmatprep.mubr.msk.bf16.mxu0 %vm765_vm1, %v1153_v21 }
 0x5a6   : > { %v3762_v22 = vpop.f32.mrf.mxu0 }
 0x5a8   : > { %v1124_v23 = vpop.f32.mrf.mxu0 }
 0x5a9   : > { %v1154_v24 = vpack.c.bf16 %v3762_v22, %v1124_v23 }
 0x5aa   : > { %v3765_v25 = vpop.f32.mrf.mxu0 }
 0x5ab   : > { %3838 = vmatmul.mubr.msk.bf16.vlgmr.msra.gmra.mxu0 %vm765_vm1, %v1154_v24 }
 0x5ac   : > { %v1134_v59 = vpop.f32.mrf.mxu0 }
 0x5ad   : > { %v1155_v4 = vpack.c.bf16 %v3765_v25, %v1134_v59 }
 0x5ae   : > { %v3768_v28 = vpop.f32.mrf.mxu0 }
 0x5af   : > { %3841 = vmatprep.mubr.msk.bf16.mxu0 %vm765_vm1, %v1155_v4 }
 0x5b0   : > { %v1144_v29 = vpop.f32.mrf.mxu0 }
 0x5b1   : > { %v1156_v5 = vpack.c.bf16 %v3768_v28, %v1144_v29 }
 0x5b2   : > { %v3787_v31 = vpop.f32.mrf.mxu0 }
 0x5b3   : > { %v1328_v34 = vmul.f32 0.35355338, %v3787_v31  ;;  %3842 = vmatmul.mubr.msk.bf16.gmra.mxu0 %vm765_vm1, %v1156_v5 }
 0x5b4   : > { %v1288_v36 = vpop.f32.mrf.mxu0 }
 0x5b5   : > { %v1327_v3 = vmul.f32 0.35355338, %v1288_v36  ;;  %v1338_v40 = vsel %vm911_vm2, %v1328_v34, -inf }
 0x5b6   : > { %1339 = vmax.xlane.f32.xlu1 %v1338_v40  ;;  %v3790_v37 = vpop.f32.mrf.mxu0 }
 0x5b7   : > { %v1330_v39 = vmul.f32 0.35355338, %v3790_v37  ;;  %v1335_v47 = vsel %vm911_vm2, %v1327_v3, -inf }
 0x5b8   : > { %1336 = vmax.xlane.f32.xlu0 %v1335_v47  ;;  %v1298_v50 = vpop.f32.mrf.mxu0 }
 0x5b9   : > { %v1329_v52 = vmul.f32 0.35355338, %v1298_v50  ;;  %v1344_v54 = vsel %vm911_vm2, %v1330_v39, -inf }
 0x5ba   : > { %v3793_v51 = vpop.f32.mrf.mxu0 }
 0x5bb   : > { %v1332_v53 = vmul.f32 0.35355338, %v3793_v51  ;;  %v1341_v62 = vsel %vm911_vm2, %v1329_v52, -inf }
 0x5bc   : > { %1345 = vmax.xlane.f32.xlu0 %v1344_v54  ;;  %v1308_v55 = vpop.f32.mrf.mxu0 }
 0x5bd   : > { %v1350_v56 = vsel %vm911_vm2, %v1332_v53, -inf  ;;  %v1331_v60 = vmul.f32 0.35355338, %v1308_v55 }
 0x5be   : > { %1351 = vmax.xlane.f32.xlu1 %v1350_v56  ;;  %v3796_v57 = vpop.f32.mrf.mxu0 }
 0x5bf   : > { %v4676_v61 = vmul.f32 0.35355338, %v3796_v57  ;;  %v1347_v0 = vsel %vm911_vm2, %v1331_v60, -inf }
 0x5c0   : > { %1342 = vmax.xlane.f32.xlu0 %v1341_v62  ;;  %v1318_v1 = vpop.f32.mrf.mxu0 }
 0x5c1   : > { %v1356_v63 = vsel %vm911_vm2, %v4676_v61, -inf  ;;  %v1333_v2 = vmul.f32 0.35355338, %v1318_v1 }
 0x5c2   : > { %1357 = vmax.xlane.f32.xlu1 %v1356_v63 }
 0x5c3   : > { %v1353_v6 = vsel %vm911_vm2, %v1333_v2, -inf }
 0x5c4   : > { %1348 = vmax.xlane.f32.xlu0 %v1347_v0 }
 0x5d3   : > { %1431 = vrot.lane.b32.xlu1 %v4496_v44, %s4252_s23 }
 0x5da   : > { %1429 = vrot.lane.b32.xlu0 %v4493_v43, %s4252_s23 }
 0x5f9   : > { %1354 = vmax.xlane.f32.xlu0 %v1353_v6 }
 0x60f   : > { %1427 = vrot.lane.b32.xlu0 %v4502_v46, %s4252_s23 }
 0x63f   : > { %v1340_v7 = vpop.xlane.xlu1 %1339 }
 0x640   : > { %v1360_v48 = vsub.f32 %v1328_v34, %v1340_v7 }
 0x641   : > { %v1337_v8 = vpop.xlane.xlu0 %1336 }
 0x642   : > { %v1369_v9 = vmul.f32 1.442695, %v1360_v48  ;;  %v1359_v10 = vsub.f32 %v1327_v3, %v1337_v8 }
 0x644   : > { %4112 = vpow2.f32 %v1369_v9  ;;  %v1367_v41 = vmul.f32 1.442695, %v1359_v10  ;;  %v1580_v10 = vld [vmem:[%s5340_s6 + $0x4] sm:$0xf] }
 0x645   : > { %v1346_v11 = vpop.xlane.xlu0 %1345 }
 0x646   : > { %4114 = vpow2.f32 %v1367_v41  ;;  %v1362_v12 = vsub.f32 %v1330_v39, %v1346_v11 }
 0x647   : > { %v1352_v13 = vpop.xlane.xlu1 %1351 }
 0x648   : > { %v1373_v14 = vmul.f32 1.442695, %v1362_v12  ;;  %v1364_v15 = vsub.f32 %v1332_v53, %v1352_v13  ;;  %v1595_v12 = vsel %vm1593_vm3, %v1580_v10, 0 }
 0x649   : > { %v1343_v49 = vpop.xlane.xlu0 %1342 }
 0x64a   : > { %4116 = vpow2.f32 %v1373_v14  ;;  %v1361_v58 = vsub.f32 %v1329_v52, %v1343_v49  ;;  %v1377_v21 = vmul.f32 1.442695, %v1364_v15 }
 0x64b   : > { %v1358_v20 = vpop.xlane.xlu1 %1357 }
 0x64c   : > { %v1371_v22 = vmul.f32 1.442695, %v1361_v58  ;;  %v1366_v47 = vsub.f32 %v4676_v61, %v1358_v20 }
 0x64d   : > { %v1349_v23 = vpop.xlane.xlu0 %1348 }
 0x64e   : > { %4118 = vpow2.f32 %v1371_v22  ;;  %v1363_v37 = vsub.f32 %v1331_v60, %v1349_v23  ;;  %v1381_v52 = vmul.f32 1.442695, %v1366_v47 }
 0x64f   : > { %v1432_v24 = vpop.permute.xlu1 %1431  ;;  %4120 = vpow2.f32 %v1377_v21 }
 0x650   : > { %3803 = vmatprep.subr.mxu1 %v1432_v24  ;;  %v1375_v39 = vmul.f32 1.442695, %v1363_v37 }
 0x651   : > { %v4689_v25 = vpop.eup %4112  ;;  %v1430_v59 = vpop.permute.xlu0 %1429  ;;  %3804 = vmatpush3.msra.mxu1 %v1432_v24 }
 0x652   : > { %3805 = vmatprep.subr.mxu1 %v1430_v59  ;;  %v1386_v4 = vsel %vm911_vm2, %v4689_v25, 0.0  ;;  %4122 = vpow2.f32 %v1375_v39 }
 0x653   : > { %v4693_v28 = vpop.eup %4114  ;;  %1387 = vadd.xlane.f32.xlu1 %v1386_v4  ;;  %3806 = vmatpush3.msra.mxu1 %v1430_v59 }
 0x654   : > { %v1383_v29 = vsel %vm911_vm2, %v4693_v28, 0.0 }
 0x655   : > { %1384 = vadd.xlane.f32.xlu0 %v1383_v29 }
 0x657   : > { %v4697_v5 = vpop.eup %4116 }
 0x658   : > { %v1392_v31 = vsel %vm911_vm2, %v4697_v5, 0.0 }
 0x659   : > { %1393 = vadd.xlane.f32.xlu1 %v1392_v31 }
 0x65b   : > { %v4701_v34 = vpop.eup %4118 }
 0x65c   : > { %v1389_v36 = vsel %vm911_vm2, %v4701_v34, 0.0  ;;  %v4705_v3 = vpop.eup %4120 }
 0x65d   : > { %1390 = vadd.xlane.f32.xlu0 %v1389_v36  ;;  %v1398_v40 = vsel %vm911_vm2, %v4705_v3, 0.0 }
 0x65f   : > { %v4718_v55 = vpop.eup %4122 }
 0x660   : > { %v1395_v56 = vsel %vm911_vm2, %v4718_v55, 0.0 }
 0x661   : > { %1399 = vadd.xlane.f32.xlu0 %v1398_v40 }
 0x66a   : > { %1423 = vrot.lane.b32.xlu1 %v4481_v30, %s4252_s23 }
 0x677   : > { %1425 = vrot.lane.b32.xlu0 %v4499_v45, %s4252_s23 }
 0x67b   : > { %1772 = vrot.lane.b32.xlu0 %v4488_v38, %s4253_s26 }
 0x67f   : > { %1770 = vrot.lane.b32.xlu0 %v4485_v35, %s4253_s26 }
 0x682   : > { %v1355_v50 = vpop.xlane.xlu0 %1354 }
 0x683   : > { %v1365_v51 = vsub.f32 %v1333_v2, %v1355_v50  ;;  %1768 = vrot.lane.b32.xlu0 %v4490_v42, %s4253_s26 }
 0x685   : > { %v1379_v53 = vmul.f32 1.442695, %v1365_v51 }
 0x686   : > { %v1428_v54 = vpop.permute.xlu0 %1427 }
 0x687   : > { %4124 = vpow2.f32 %v1379_v53  ;;  %1766 = vrot.lane.b32.xlu0 %v4496_v44, %s4253_s26  ;;  %3807 = vmatprep.subr.mxu1 %v1428_v54 }
 0x688   : > { %3808 = vmatpush3.msra.mxu1 %v1428_v54  ;;  %4126 = vpow2.f32 %v1381_v52 }
 0x68b   : > { %1764 = vrot.lane.b32.xlu0 %v4493_v43, %s4253_s26 }
 0x68e   : > { %1396 = vadd.xlane.f32.xlu1 %v1395_v56 }
 0x68f   : > { %1762 = vrot.lane.b32.xlu0 %v4502_v46, %s4253_s26 }
 0x693   : > { %1760 = vrot.lane.b32.xlu0 %v4499_v45, %s4253_s26 }
 0x694   : > { %v4725_v57 = vpop.eup %4124 }
 0x695   : > { %v1401_v60 = vsel %vm911_vm2, %v4725_v57, 0.0  ;;  %v4729_v61 = vpop.eup %4126 }
 0x696   : > { %1402 = vadd.xlane.f32.xlu1 %v1401_v60  ;;  %v1404_v62 = vsel %vm911_vm2, %v4729_v61, 0.0 }
 0x697   : > { %1758 = vrot.lane.b32.xlu0 %v4481_v30, %s4253_s26 }
 0x69a   : > { %1405 = vadd.xlane.f32.xlu1 %v1404_v62 }
 0x69b   : > { %1742 = vrot.lane.b32.xlu0 %v4481_v30, %s4254_s27 }
 0x69f   : > { %1746 = vrot.lane.b32.xlu0 %v4502_v46, %s4254_s27 }
 0x6a3   : > { %1748 = vrot.lane.b32.xlu0 %v4493_v43, %s4254_s27 }
 0x6a7   : > { %1750 = vrot.lane.b32.xlu0 %v4496_v44, %s4254_s27 }
 0x6ab   : > { %1752 = vrot.lane.b32.xlu0 %v4490_v42, %s4254_s27  ;;  %1744 = vrot.lane.b32.xlu1 %v4499_v45, %s4254_s27 }
 0x6af   : > { %1754 = vrot.lane.b32.xlu0 %v4485_v35, %s4254_s27  ;;  %1756 = vrot.lane.b32.xlu1 %v4488_v38, %s4254_s27 }
 0x6b3   : > { %2283 = vrot.lane.b32.xlu0 %v4488_v38, %s4255_s28  ;;  %2281 = vrot.lane.b32.xlu1 %v4485_v35, %s4255_s28 }
 0x6b7   : > { %2279 = vrot.lane.b32.xlu0 %v4490_v42, %s4255_s28  ;;  %2277 = vrot.lane.b32.xlu1 %v4496_v44, %s4255_s28 }
 0x6bb   : > { %2275 = vrot.lane.b32.xlu0 %v4493_v43, %s4255_s28  ;;  %2273 = vrot.lane.b32.xlu1 %v4502_v46, %s4255_s28 }
 0x6bf   : > { %2271 = vrot.lane.b32.xlu0 %v4499_v45, %s4255_s28  ;;  %2269 = vrot.lane.b32.xlu1 %v4481_v30, %s4255_s28 }
 0x6c3   : > { %2253 = vrot.lane.b32.xlu0 %v4481_v30, %s4256_s16  ;;  %2255 = vrot.lane.b32.xlu1 %v4499_v45, %s4256_s16 }
 0x6c7   : > { %2257 = vrot.lane.b32.xlu0 %v4502_v46, %s4256_s16  ;;  %2259 = vrot.lane.b32.xlu1 %v4493_v43, %s4256_s16 }
 0x6cb   : > { %2261 = vrot.lane.b32.xlu0 %v4496_v44, %s4256_s16  ;;  %2263 = vrot.lane.b32.xlu1 %v4490_v42, %s4256_s16 }
 0x6cf   : > { %2265 = vrot.lane.b32.xlu0 %v4485_v35, %s4256_s16  ;;  %2267 = vrot.lane.b32.xlu1 %v4488_v38, %s4256_s16 }
 0x6dc   : > { %v1388_v63 = vpop.xlane.xlu1 %1387 }
 0x6de   : > { %v1385_v0 = vpop.xlane.xlu0 %1384 }
 0x6df   : > { %4128 = vrcp.f32 %v1385_v0 }
 0x6e0   : > { %4130 = vrcp.f32 %v1388_v63 }
 0x6e2   : > { %v1394_v1 = vpop.xlane.xlu1 %1393 }
 0x6e3   : > { %4132 = vrcp.f32 %v1394_v1 }
 0x6e6   : > { %v1391_v2 = vpop.xlane.xlu0 %1390  ;;  %v1424_v41 = vpop.permute.xlu1 %1423 }
 0x6e7   : > { %4134 = vrcp.f32 %v1391_v2 }
 0x6ea   : > { %v1400_v6 = vpop.xlane.xlu0 %1399 }
 0x6eb   : > { %4136 = vrcp.f32 %v1400_v6 }
 0x6ec   : > { %v4129_v7 = vpop.eup %4128 }
 0x6ed   : > { %v1415_v48 = vmul.f32 %v4129_v7, %v4693_v28  ;;  %v4131_v8 = vpop.eup %4130 }
 0x6ee   : > { %v1426_v9 = vpop.permute.xlu0 %1425  ;;  %v1416_v11 = vmul.f32 %v4131_v8, %v4689_v25 }
 0x6ef   : > { %3809 = vmatprep.subr.mxu1 %v1426_v9  ;;  %3813 = vmatprep.mubr.msk.f32.mxu1 %vm911_vm2, %v1415_v48 }
 0x6f0   : > { %3810 = vmatpush3.msra.mxu1 %v1426_v9  ;;  %v4133_v13 = vpop.eup %4132 }
 0x6f1   : > { %3811 = vmatprep.subr.mxu1 %v1424_v41  ;;  %v1418_v58 = vmul.f32 %v4133_v13, %v4697_v5 }
 0x6f2   : > { %3812 = vmatpush3.msra.mxu1 %v1424_v41  ;;  %v1773_v15 = vpop.permute.xlu0 %1772 }
 0x6f3   : > { %3814 = vmatmul.mubr.msk.f32.vlgmr.msra.gmra.mxu1 %vm911_vm2, %v1416_v11  ;;  %4029 = vmatprep.subr.msk.bf16.mxu1 %vm1593_vm3, %v1580_v10 }
 0x6f4   : > { %v4135_v14 = vpop.eup %4134  ;;  %3826 = vmatpush3.bf16.msra.mxu1 %v1595_v12 }
 0x6f5   : > { %3845 = vmatprep.subr.msk.mxu1 %vm765_vm1, %v1773_v15  ;;  %v1417_v49 = vmul.f32 %v4135_v14, %v4701_v34 }
 0x6f6   : > { %v1771_v31 = vpop.permute.xlu0 %1770 }
 0x6f7   : > { %3816 = vmatprep.mubr.msk.f32.mxu1 %vm911_vm2, %v1417_v49 }
 0x6f8   : > { %3817 = vmatmul.mubr.msk.f32.gmra.mxu1 %vm911_vm2, %v1418_v58  ;;  %v4137_v23 = vpop.eup %4136 }
 0x6f9   : > { %v1420_v59 = vmul.f32 %v4137_v23, %v4705_v3 }
 0x6fa   : > { %v1769_v34 = vpop.permute.xlu0 %1768 }
 0x6fe   : > { %v1767_v36 = vpop.permute.xlu0 %1766 }
 0x702   : > { %v1765_v40 = vpop.permute.xlu0 %1764 }
 0x706   : > { %v1763_v37 = vpop.permute.xlu0 %1762 }
 0x70a   : > { %v1761_v3 = vpop.permute.xlu0 %1760 }
 0x70e   : > { %v1759_v39 = vpop.permute.xlu0 %1758 }
 0x712   : > { %v1743_v51 = vpop.permute.xlu0 %1742 }
 0x716   : > { %v1747_v56 = vpop.permute.xlu0 %1746 }
 0x717   : > { %v1397_v20 = vpop.xlane.xlu1 %1396 }
 0x718   : > { %4138 = vrcp.f32 %v1397_v20 }
 0x71f   : > { %v1403_v21 = vpop.xlane.xlu1 %1402 }
 0x720   : > { %4140 = vrcp.f32 %v1403_v21 }
 0x723   : > { %v1406_v22 = vpop.xlane.xlu1 %1405 }
 0x724   : > { %4142 = vrcp.f32 %v1406_v22 }
 0x725   : > { %v4139_v24 = vpop.eup %4138 }
 0x726   : > { %v1419_v25 = vmul.f32 %v4139_v24, %v4718_v55 }
 0x727   : > { %v1745_v7 = vpop.permute.xlu1 %1744 }
 0x728   : > { %3819 = vmatprep.mubr.msk.f32.mxu1 %vm911_vm2, %v1419_v25 }
 0x729   : > { %3820 = vmatmul.mubr.msk.f32.gmra.mxu1 %vm911_vm2, %v1420_v59 }
 0x72b   : > { %v1757_v10 = vpop.permute.xlu1 %1756 }
 0x72d   : > { %v4141_v4 = vpop.eup %4140 }
 0x72e   : > { %v1421_v28 = vmul.f32 %v4141_v4, %v4725_v57  ;;  %v1749_v57 = vpop.permute.xlu0 %1748 }
 0x72f   : > { %v2282_v11 = vpop.permute.xlu1 %2281 }
 0x730   : > { %3822 = vmatprep.mubr.msk.f32.mxu1 %vm911_vm2, %v1421_v28 }
 0x731   : > { %v4143_v29 = vpop.eup %4142 }
 0x732   : > { %v1422_v5 = vmul.f32 %v4143_v29, %v4729_v61  ;;  %v1751_v60 = vpop.permute.xlu0 %1750 }
 0x733   : > { %v2278_v13 = vpop.permute.xlu1 %2277 }
 0x734   : > { %3823 = vmatmul.mubr.msk.f32.gmra.mxu1 %vm911_vm2, %v1422_v5 }
 0x736   : > { %v1753_v61 = vpop.permute.xlu0 %1752 }
 0x73a   : > { %v1755_v62 = vpop.permute.xlu0 %1754 }
 0x73e   : > { %v2284_v63 = vpop.permute.xlu0 %2283 }
 0x742   : > { %v2280_v9 = vpop.permute.xlu0 %2279 }
 0x746   : > { %v2276_v41 = vpop.permute.xlu0 %2275 }
 0x74a   : > { %v2272_v12 = vpop.permute.xlu0 %2271 }
 0x74e   : > { %v2254_v14 = vpop.permute.xlu0 %2253 }
 0x752   : > { %v2258_v20 = vpop.permute.xlu0 %2257 }
 0x756   : > { %v2262_v22 = vpop.permute.xlu0 %2261 }
 0x75a   : > { %v2266_v24 = vpop.permute.xlu0 %2265 }
 0x7b3   : > { %v3815_v47 = vpop.f32.mrf.mxu1 }
 0x7b5   : > { %v1537_v50 = vpop.f32.mrf.mxu1 }
 0x7b6   : > { %v1576_v52 = vpack.c.bf16 %v3815_v47, %v1537_v50 }
 0x7b8   : > { %v3818_v53 = vpop.f32.mrf.mxu1  ;;  %3827 = vmatprep.mubr.msk.bf16.mxu1 %vm765_vm1, %v1576_v52 }
 0x7ba   : > { %v1547_v54 = vpop.f32.mrf.mxu1 }
 0x7bb   : > { %v1577_v55 = vpack.c.bf16 %v3818_v53, %v1547_v54 }
 0x7bd   : > { %3828 = vmatmul.mubr.msk.bf16.vlgmr.msra.gmra.mxu1 %vm765_vm1, %v1577_v55 }
 0x7be   : > { %3846 = vmatpush3.xpose.msk.msra.mxu1 %vm765_vm1, %v1773_v15  ;;  %v2274_v15 = vpop.permute.xlu1 %2273 }
 0x7bf   : > { %3847 = vmatprep.subr.msk.mxu1 %vm765_vm1, %v1771_v31 }
 0x7c2   : > { %3848 = vmatpush3.xpose.msk.msra.mxu1 %vm765_vm1, %v1771_v31  ;;  %v2270_v49 = vpop.permute.xlu1 %2269 }
 0x7c3   : > { %3849 = vmatprep.subr.msk.mxu1 %vm765_vm1, %v1769_v34 }
 0x7c6   : > { %3850 = vmatpush3.xpose.msk.msra.mxu1 %vm765_vm1, %v1769_v34  ;;  %v2256_v58 = vpop.permute.xlu1 %2255 }
 0x7c7   : > { %3851 = vmatprep.subr.msk.mxu1 %vm765_vm1, %v1767_v36 }
 0x7ca   : > { %3852 = vmatpush3.xpose.msk.msra.mxu1 %vm765_vm1, %v1767_v36  ;;  %v2260_v21 = vpop.permute.xlu1 %2259 }
 0x7cb   : > { %3853 = vmatprep.subr.msk.mxu1 %vm765_vm1, %v1765_v40 }
 0x7ce   : > { %3854 = vmatpush3.xpose.msk.msra.mxu1 %vm765_vm1, %v1765_v40  ;;  %v2264_v23 = vpop.permute.xlu1 %2263 }
 0x7cf   : > { %3855 = vmatprep.subr.msk.mxu1 %vm765_vm1, %v1763_v37 }
 0x7d2   : > { %3856 = vmatpush3.xpose.msk.msra.mxu1 %vm765_vm1, %v1763_v37  ;;  %v2268_v25 = vpop.permute.xlu1 %2267 }
 0x7d3   : > { %3857 = vmatprep.subr.msk.mxu1 %vm765_vm1, %v1761_v3 }
 0x7d6   : > { %3858 = vmatpush3.xpose.msk.msra.mxu1 %vm765_vm1, %v1761_v3 }
 0x7d7   : > { %3859 = vmatprep.subr.msk.mxu1 %vm765_vm1, %v1759_v39 }
 0x7da   : > { %3860 = vmatpush3.xpose.msk.msra.mxu1 %vm765_vm1, %v1759_v39 }
 0x7db   : > { %3911 = vmatprep.subr.msk.mxu1 %vm765_vm1, %v2284_v63 }
 0x7e9   : > { %v3821_v0 = vpop.f32.mrf.mxu1 }
 0x7eb   : > { %v1557_v1 = vpop.f32.mrf.mxu1 }
 0x7ec   : > { %v1578_v2 = vpack.c.bf16 %v3821_v0, %v1557_v1 }
 0x7ee   : > { %3831 = vmatprep.mubr.msk.bf16.mxu1 %vm765_vm1, %v1578_v2 }
 0x7f4   : > { %v3824_v6 = vpop.f32.mrf.mxu1 }
 0x7f6   : > { %v1567_v48 = vpop.f32.mrf.mxu1 }
 0x7f7   : > { %v1579_v8 = vpack.c.bf16 %v3824_v6, %v1567_v48 }
 0x7f9   : > { %3832 = vmatmul.mubr.msk.bf16.gmra.mxu1 %vm765_vm1, %v1579_v8 }
 0x7fa   : > { %3861 = vmatprep.mubr.msk.f32.mxu1 %vm765_vm1, %v1743_v51 }
 0x801   : > { %3862 = vmatmul.mubr.msk.f32.vlgmr.msra.gmra.mxu1 %vm765_vm1, %v1745_v7 }
 0x802   : > { %3912 = vmatpush3.xpose.msk.msra.mxu1 %vm765_vm1, %v2284_v63  ;;  %3864 = vmatprep.mubr.msk.f32.mxu1 %vm765_vm1, %v1747_v56 }
 0x803   : > { %3913 = vmatprep.subr.msk.mxu1 %vm765_vm1, %v2282_v11 }
 0x805   : > { %3865 = vmatmul.mubr.msk.f32.gmra.mxu1 %vm765_vm1, %v1749_v57 }
 0x806   : > { %3914 = vmatpush3.xpose.msk.msra.mxu1 %vm765_vm1, %v2282_v11  ;;  %3867 = vmatprep.mubr.msk.f32.mxu1 %vm765_vm1, %v1751_v60 }
 0x807   : > { %3915 = vmatprep.subr.msk.mxu1 %vm765_vm1, %v2280_v9 }
 0x809   : > { %3868 = vmatmul.mubr.msk.f32.gmra.mxu1 %vm765_vm1, %v1753_v61 }
 0x80a   : > { %3916 = vmatpush3.xpose.msk.msra.mxu1 %vm765_vm1, %v2280_v9  ;;  %3870 = vmatprep.mubr.msk.f32.mxu1 %vm765_vm1, %v1755_v62 }
 0x80b   : > { %3917 = vmatprep.subr.msk.mxu1 %vm765_vm1, %v2278_v13 }
 0x80d   : > { %3871 = vmatmul.mubr.msk.f32.gmra.mxu1 %vm765_vm1, %v1757_v10 }
 0x80e   : > { %3918 = vmatpush3.xpose.msk.msra.mxu1 %vm765_vm1, %v2278_v13  ;;  %3927 = vmatprep.mubr.msk.f32.mxu1 %vm765_vm1, %v2254_v14 }
 0x80f   : > { %3919 = vmatprep.subr.msk.mxu1 %vm765_vm1, %v2276_v41 }
 0x812   : > { %3920 = vmatpush3.xpose.msk.msra.mxu1 %vm765_vm1, %v2276_v41 }
 0x813   : > { %3921 = vmatprep.subr.msk.mxu1 %vm765_vm1, %v2274_v15 }
 0x816   : > { %3922 = vmatpush3.xpose.msk.msra.mxu1 %vm765_vm1, %v2274_v15 }
 0x817   : > { %3923 = vmatprep.subr.msk.mxu1 %vm765_vm1, %v2272_v12 }
 0x81a   : > { %3924 = vmatpush3.xpose.msk.msra.mxu1 %vm765_vm1, %v2272_v12 }
 0x81b   : > { %3925 = vmatprep.subr.msk.mxu1 %vm765_vm1, %v2270_v49 }
 0x81e   : > { %3926 = vmatpush3.xpose.msk.msra.mxu1 %vm765_vm1, %v2270_v49 }
 0x821   : > { %3928 = vmatmul.mubr.msk.f32.vlgmr.msra.gmra.mxu1 %vm765_vm1, %v2256_v58 }
 0x822   : > { %3930 = vmatprep.mubr.msk.f32.mxu1 %vm765_vm1, %v2258_v20 }
 0x825   : > { %3931 = vmatmul.mubr.msk.f32.gmra.mxu1 %vm765_vm1, %v2260_v21 }
 0x826   : > { %3933 = vmatprep.mubr.msk.f32.mxu1 %vm765_vm1, %v2262_v22 }
 0x829   : > { %3934 = vmatmul.mubr.msk.f32.gmra.mxu1 %vm765_vm1, %v2264_v23 }
 0x82a   : > { %3936 = vmatprep.mubr.msk.f32.mxu1 %vm765_vm1, %v2266_v24 }
 0x82d   : > { %3937 = vmatmul.mubr.msk.f32.gmra.mxu1 %vm765_vm1, %v2268_v25 }
 0x87d   : > { %v4831_v59 = vpop.f32.mrf.mxu1 }
 0x87f   : > { %v4833_v4 = vpop.f32.mrf.mxu1 }
 0x881   : > { %v4835_v28 = vpop.f32.mrf.mxu1 }
 0x883   : > { %v4837_v29 = vpop.f32.mrf.mxu1 }
 0x8b9   : > { %v4839_v5 = vpop.f32.mrf.mxu1 }
 0x8bb   : > { %v4841_v31 = vpop.f32.mrf.mxu1 }
 0x8bd   : > { %v4843_v34 = vpop.f32.mrf.mxu1 }
 0x8bf   : > { %v4845_v36 = vpop.f32.mrf.mxu1 }
 0x8c1   : > { %v3863_v40 = vpop.f32.mrf.mxu1 }
 0x8c2   : > { %v1912_v37 = vmul.f32 0.35355338, %v3863_v40 }
 0x8c3   : > { %v1872_v3 = vpop.f32.mrf.mxu1 }
 0x8c4   : > { %v1911_v39 = vmul.f32 0.35355338, %v1872_v3  ;;  %v1922_v47 = vsel %vm911_vm2, %v1912_v37, -inf }
 0x8c5   : > { %1923 = vmax.xlane.f32.xlu1 %v1922_v47  ;;  %v3866_v50 = vpop.f32.mrf.mxu1 }
 0x8c6   : > { %v1919_v51 = vsel %vm911_vm2, %v1911_v39, -inf  ;;  %v1914_v55 = vmul.f32 0.35355338, %v3866_v50 }
 0x8c7   : > { %1920 = vmax.xlane.f32.xlu0 %v1919_v51  ;;  %v1882_v52 = vpop.f32.mrf.mxu1 }
 0x8c8   : > { %v1913_v53 = vmul.f32 0.35355338, %v1882_v52  ;;  %v1928_v62 = vsel %vm911_vm2, %v1914_v55, -inf }
 0x8c9   : > { %v3869_v54 = vpop.f32.mrf.mxu1 }
 0x8ca   : > { %v1925_v56 = vsel %vm911_vm2, %v1913_v53, -inf  ;;  %v1916_v61 = vmul.f32 0.35355338, %v3869_v54 }
 0x8cb   : > { %1926 = vmax.xlane.f32.xlu0 %v1925_v56  ;;  %v1892_v57 = vpop.f32.mrf.mxu1 }
 0x8cc   : > { %v1915_v60 = vmul.f32 0.35355338, %v1892_v57  ;;  %v1934_v2 = vsel %vm911_vm2, %v1916_v61, -inf }
 0x8cd   : > { %v3872_v0 = vpop.f32.mrf.mxu1 }
 0x8ce   : > { %v1931_v63 = vsel %vm911_vm2, %v1915_v60, -inf  ;;  %v1918_v1 = vmul.f32 0.35355338, %v3872_v0 }
 0x8cf   : > { %1929 = vmax.xlane.f32.xlu0 %v1928_v62  ;;  %1932 = vmax.xlane.f32.xlu1 %v1931_v63  ;;  %v1902_v7 = vpop.f32.mrf.mxu1 }
 0x8d0   : > { %v1940_v6 = vsel %vm911_vm2, %v1918_v1, -inf  ;;  %v4862_v48 = vmul.f32 0.35355338, %v1902_v7 }
 0x8d2   : > { %v1937_v8 = vsel %vm911_vm2, %v4862_v48, -inf }
 0x8d3   : > { %1935 = vmax.xlane.f32.xlu0 %v1934_v2 }
 0x8d7   : > { %1941 = vmax.xlane.f32.xlu0 %v1940_v6 }
 0x8e0   : > { %2021 = vrot.lane.b32.xlu1 %v4488_v38, %s4257_s19 }
 0x8e4   : > { %2017 = vrot.lane.b32.xlu1 %v4490_v42, %s4257_s19 }
 0x8ed   : > { %2019 = vrot.lane.b32.xlu0 %v4485_v35, %s4257_s19 }
 0x8f1   : > { %2013 = vrot.lane.b32.xlu0 %v4493_v43, %s4257_s19 }
 0x908   : > { %1938 = vmax.xlane.f32.xlu1 %v1937_v8 }
 0x919   : > { %2015 = vrot.lane.b32.xlu1 %v4496_v44, %s4257_s19 }
 0x91d   : > { %2011 = vrot.lane.b32.xlu1 %v4502_v46, %s4257_s19 }
 0x94e   : > { %v1924_v9 = vpop.xlane.xlu1 %1923 }
 0x94f   : > { %v1944_v10 = vsub.f32 %v1912_v37, %v1924_v9 }
 0x950   : > { %v1921_v41 = vpop.xlane.xlu0 %1920 }
 0x951   : > { %v1953_v11 = vmul.f32 1.442695, %v1944_v10  ;;  %v1943_v12 = vsub.f32 %v1911_v39, %v1921_v41 }
 0x953   : > { %4144 = vpow2.f32 %v1953_v11  ;;  %v1951_v13 = vmul.f32 1.442695, %v1943_v12  ;;  %v3929_v12 = vpop.f32.mrf.mxu1 }
 0x954   : > { %v1927_v14 = vpop.xlane.xlu0 %1926 }
 0x955   : > { %4146 = vpow2.f32 %v1951_v13  ;;  %v1945_v15 = vsub.f32 %v1913_v53, %v1927_v14  ;;  %v2383_v14 = vpop.f32.mrf.mxu1 }
 0x957   : > { %v1955_v49 = vmul.f32 1.442695, %v1945_v15  ;;  %v3932_v15 = vpop.f32.mrf.mxu1 }
 0x958   : > { %v1930_v58 = vpop.xlane.xlu0 %1929  ;;  %v1933_v20 = vpop.xlane.xlu1 %1932 }
 0x959   : > { %4148 = vpow2.f32 %v1955_v49  ;;  %v1946_v21 = vsub.f32 %v1914_v55, %v1930_v58  ;;  %v1947_v22 = vsub.f32 %v1915_v60, %v1933_v20  ;;  %v4903_v58 = vmul.f32 0.35355338, %v2383_v14  ;;  %v2393_v20 = vpop.f32.mrf.mxu1 }
 0x95b   : > { %v1957_v23 = vmul.f32 1.442695, %v1946_v21  ;;  %v1959_v24 = vmul.f32 1.442695, %v1947_v22  ;;  %v4907_v21 = vmul.f32 0.35355338, %v2393_v20 }
 0x95c   : > { %v1936_v25 = vpop.xlane.xlu0 %1935  ;;  %v2022_v40 = vpop.permute.xlu1 %2021  ;;  %v2430_v22 = vsel %vm911_vm2, %v4903_v58, -inf }
 0x95d   : > { %4150 = vpow2.f32 %v1957_v23  ;;  %v1948_v37 = vsub.f32 %v1916_v61, %v1936_v25  ;;  %3873 = vmatprep.subr.mxu0 %v2022_v40  ;;  %v3935_v23 = vpop.f32.mrf.mxu1  ;;  %v2436_v25 = vsel %vm911_vm2, %v4907_v21, -inf }
 0x95e   : > { %4152 = vpow2.f32 %v1959_v24  ;;  %3874 = vmatpush3.msra.mxu0 %v2022_v40  ;;  %v4911_v24 = vmul.f32 0.35355338, %v3932_v15 }
 0x95f   : > { %v1961_v3 = vmul.f32 1.442695, %v1948_v37  ;;  %v2403_v40 = vpop.f32.mrf.mxu1  ;;  %v4915_v37 = vmul.f32 0.35355338, %v3935_v23 }
 0x960   : > { %v4870_v39 = vpop.eup %4144  ;;  %v1942_v47 = vpop.xlane.xlu0 %1941 }
 0x961   : > { %4154 = vpow2.f32 %v1961_v3  ;;  %v1950_v50 = vsub.f32 %v1918_v1, %v1942_v47  ;;  %v1970_v51 = vsel %vm911_vm2, %v4870_v39, 0.0  ;;  %v2018_v57 = vpop.permute.xlu1 %2017  ;;  %v2439_v3 = vsel %vm911_vm2, %v4911_v24, -inf  ;;  %v3938_v47 = vpop.f32.mrf.mxu1 }
 0x962   : > { %v4874_v52 = vpop.eup %4146  ;;  %1971 = vadd.xlane.f32.xlu0 %v1970_v51  ;;  %v2445_v51 = vsel %vm911_vm2, %v4915_v37, -inf }
 0x963   : > { %v1965_v53 = vmul.f32 1.442695, %v1950_v50  ;;  %v1967_v54 = vsel %vm911_vm2, %v4874_v52, 0.0  ;;  %v4919_v50 = vmul.f32 0.35355338, %v3938_v47 }
 0x964   : > { %v2020_v55 = vpop.permute.xlu0 %2019  ;;  %1968 = vadd.xlane.f32.xlu1 %v1967_v54  ;;  %v4931_v54 = vmul.f32 0.35355338, %v3929_v12  ;;  %v2164_v12 = vld [vmem:[%s5340_s6 + $0x8] sm:$0xf] }
 0x965   : > { %4156 = vpow2.f32 %v1965_v53  ;;  %3875 = vmatprep.subr.mxu0 %v2020_v55  ;;  %v2451_v53 = vsel %vm911_vm2, %v4919_v50, -inf  ;;  %v2178_v20 = vsel %vm1593_vm3, %v2164_v12, 0 }
 0x966   : > { %v4878_v56 = vpop.eup %4148  ;;  %3876 = vmatpush3.msra.mxu0 %v2020_v55  ;;  %v4933_v55 = vmul.f32 0.35355338, %v2403_v40 }
 0x967   : > { %3877 = vmatprep.subr.mxu0 %v2018_v57  ;;  %v1973_v60 = vsel %vm911_vm2, %v4878_v56, 0.0 }
 0x968   : > { %1974 = vadd.xlane.f32.xlu1 %v1973_v60  ;;  %3878 = vmatpush3.msra.mxu0 %v2018_v57  ;;  %v2014_v11 = vpop.permute.xlu0 %2013  ;;  %v2433_v57 = vsel %vm911_vm2, %v4931_v54, -inf  ;;  %v2413_v60 = vpop.f32.mrf.mxu1 }
 0x96a   : > { %v4882_v61 = vpop.eup %4150 }
 0x96b   : > { %v4884_v62 = vpop.eup %4152  ;;  %v1976_v63 = vsel %vm911_vm2, %v4882_v61, 0.0 }
 0x96c   : > { %1977 = vadd.xlane.f32.xlu0 %v1976_v63  ;;  %v1979_v0 = vsel %vm911_vm2, %v4884_v62, 0.0  ;;  %v4937_v63 = vmul.f32 0.35355338, %v2413_v60 }
 0x96d   : > { %1980 = vadd.xlane.f32.xlu1 %v1979_v0  ;;  %v2442_v0 = vsel %vm911_vm2, %v4933_v55, -inf }
 0x96e   : > { %v4890_v1 = vpop.eup %4154 }
 0x96f   : > { %v1982_v2 = vsel %vm911_vm2, %v4890_v1, 0.0 }
 0x970   : > { %1983 = vadd.xlane.f32.xlu0 %v1982_v2 }
 0x972   : > { %v4894_v6 = vpop.eup %4156 }
 0x973   : > { %v1988_v7 = vsel %vm911_vm2, %v4894_v6, 0.0 }
 0x974   : > { %1989 = vadd.xlane.f32.xlu0 %v1988_v7 }
 0x98a   : > { %2009 = vrot.lane.b32.xlu0 %v4499_v45, %s4257_s19 }
 0x991   : > { %v1939_v8 = vpop.xlane.xlu1 %1938 }
 0x992   : > { %v1949_v9 = vsub.f32 %v4862_v48, %v1939_v8 }
 0x994   : > { %v1963_v10 = vmul.f32 1.442695, %v1949_v9 }
 0x995   : > { %v2016_v41 = vpop.permute.xlu1 %2015 }
 0x996   : > { %4158 = vpow2.f32 %v1963_v10  ;;  %3879 = vmatprep.subr.mxu0 %v2016_v41 }
 0x997   : > { %3880 = vmatpush3.msra.mxu0 %v2016_v41 }
 0x998   : > { %3881 = vmatprep.subr.mxu0 %v2014_v11 }
 0x999   : > { %3882 = vmatpush3.msra.mxu0 %v2014_v11  ;;  %v2012_v13 = vpop.permute.xlu1 %2011 }
 0x99a   : > { %3883 = vmatprep.subr.mxu0 %v2012_v13 }
 0x99b   : > { %3884 = vmatpush3.msra.mxu0 %v2012_v13 }
 0x9a3   : > { %v4901_v49 = vpop.eup %4158 }
 0x9a4   : > { %v1985_v48 = vsel %vm911_vm2, %v4901_v49, 0.0 }
 0x9a5   : > { %1986 = vadd.xlane.f32.xlu1 %v1985_v48 }
 0x9a9   : > { %2431 = vmax.xlane.f32.xlu0 %v2430_v22 }
 0x9ad   : > { %2437 = vmax.xlane.f32.xlu0 %v2436_v25 }
 0x9b1   : > { %2440 = vmax.xlane.f32.xlu0 %v2439_v3 }
 0x9b5   : > { %2446 = vmax.xlane.f32.xlu0 %v2445_v51 }
 0x9b6   : > { %2007 = vrot.lane.b32.xlu1 %v4481_v30, %s4257_s19 }
 0x9b9   : > { %2452 = vmax.xlane.f32.xlu0 %v2451_v53 }
 0x9cf   : > { %2530 = vrot.lane.b32.xlu0 %v4485_v35, %s4258_s20  ;;  %v2448_v35 = vsel %vm911_vm2, %v4937_v63, -inf }
 0x9d3   : > { %2524 = vrot.lane.b32.xlu0 %v4493_v43, %s4258_s20 }
 0x9da   : > { %2434 = vmax.xlane.f32.xlu1 %v2433_v57 }
 0x9de   : > { %2443 = vmax.xlane.f32.xlu1 %v2442_v0 }
 0x9e2   : > { %2449 = vmax.xlane.f32.xlu1 %v2448_v35 }
 0x9eb   : > { %v1972_v2 = vpop.xlane.xlu0 %1971 }
 0x9ed   : > { %v1969_v43 = vpop.xlane.xlu1 %1968 }
 0x9ee   : > { %4160 = vrcp.f32 %v1969_v43 }
 0x9ef   : > { %4162 = vrcp.f32 %v1972_v2 }
 0x9f3   : > { %2532 = vrot.lane.b32.xlu1 %v4488_v38, %s4258_s20  ;;  %v1975_v38 = vpop.xlane.xlu1 %1974 }
 0x9f4   : > { %4164 = vrcp.f32 %v1975_v38 }
 0x9f5   : > { %v1978_v7 = vpop.xlane.xlu0 %1977 }
 0x9f6   : > { %4166 = vrcp.f32 %v1978_v7 }
 0x9f7   : > { %2528 = vrot.lane.b32.xlu1 %v4490_v42, %s4258_s20  ;;  %v1981_v42 = vpop.xlane.xlu1 %1980 }
 0x9f8   : > { %4168 = vrcp.f32 %v1981_v42 }
 0x9f9   : > { %v1984_v8 = vpop.xlane.xlu0 %1983 }
 0x9fa   : > { %4170 = vrcp.f32 %v1984_v8 }
 0x9fb   : > { %v4161_v9 = vpop.eup %4160  ;;  %2526 = vrot.lane.b32.xlu1 %v4496_v44, %s4258_s20 }
 0x9fc   : > { %v1999_v10 = vmul.f32 %v4161_v9, %v4874_v52  ;;  %v4163_v52 = vpop.eup %4162 }
 0x9fd   : > { %v1990_v41 = vpop.xlane.xlu0 %1989  ;;  %v2000_v15 = vmul.f32 %v4163_v52, %v4870_v39 }
 0x9fe   : > { %3889 = vmatprep.mubr.msk.f32.mxu0 %vm911_vm2, %v1999_v10  ;;  %4172 = vrcp.f32 %v1990_v41 }
 0x9ff   : > { %2522 = vrot.lane.b32.xlu1 %v4502_v46, %s4258_s20 }
 0xa01   : > { %v2010_v11 = vpop.permute.xlu0 %2009  ;;  %v4165_v13 = vpop.eup %4164 }
 0xa02   : > { %3885 = vmatprep.subr.mxu0 %v2010_v11  ;;  %v2001_v23 = vmul.f32 %v4165_v13, %v4878_v56 }
 0xa03   : > { %3886 = vmatpush3.msra.mxu0 %v2010_v11  ;;  %v4167_v22 = vpop.eup %4166 }
 0xa05   : > { %v4169_v25 = vpop.eup %4168 }
 0xa06   : > { %v2003_v51 = vmul.f32 %v4169_v25, %v4884_v62 }
 0xa07   : > { %v4171_v47 = vpop.eup %4170 }
 0xa08   : > { %v2004_v57 = vmul.f32 %v4171_v47, %v4890_v1 }
 0xa0b   : > { %v4173_v56 = vpop.eup %4172 }
 0xa2e   : > { %v1987_v44 = vpop.xlane.xlu1 %1986 }
 0xa2f   : > { %4174 = vrcp.f32 %v1987_v44 }
 0xa32   : > { %v2432_v46 = vpop.xlane.xlu0 %2431  ;;  %v2008_v14 = vpop.permute.xlu1 %2007 }
 0xa33   : > { %v2454_v48 = vsub.f32 %v4903_v58, %v2432_v46  ;;  %3887 = vmatprep.subr.mxu0 %v2008_v14  ;;  %v2002_v58 = vmul.f32 %v4167_v22, %v4882_v61  ;;  %v2006_v61 = vmul.f32 %v4173_v56, %v4894_v6 }
 0xa34   : > { %3888 = vmatpush3.msra.mxu0 %v2008_v14 }
 0xa35   : > { %v2462_v40 = vmul.f32 1.442695, %v2454_v48  ;;  %3890 = vmatmul.mubr.msk.f32.vlgmr.msra.gmra.mxu0 %vm911_vm2, %v2000_v15  ;;  %4031 = vmatprep.subr.msk.bf16.mxu0 %vm1593_vm3, %v2164_v12 }
 0xa36   : > { %v2438_v3 = vpop.xlane.xlu0 %2437  ;;  %3892 = vmatprep.mubr.msk.f32.mxu0 %vm911_vm2, %v2001_v23  ;;  %3902 = vmatpush3.bf16.msra.mxu0 %v2178_v20 }
 0xa37   : > { %4176 = vpow2.f32 %v2462_v40  ;;  %v2456_v39 = vsub.f32 %v4907_v21, %v2438_v3 }
 0xa39   : > { %v2466_v53 = vmul.f32 1.442695, %v2456_v39  ;;  %3893 = vmatmul.mubr.msk.f32.gmra.mxu0 %vm911_vm2, %v2002_v58 }
 0xa3a   : > { %3895 = vmatprep.mubr.msk.f32.mxu0 %vm911_vm2, %v2003_v51  ;;  %v2441_v43 = vpop.xlane.xlu0 %2440 }
 0xa3b   : > { %4178 = vpow2.f32 %v2466_v53  ;;  %v2457_v2 = vsub.f32 %v4911_v24, %v2441_v43 }
 0xa3c   : > { %v4175_v60 = vpop.eup %4174 }
 0xa3d   : > { %3896 = vmatmul.mubr.msk.f32.gmra.mxu0 %vm911_vm2, %v2004_v57  ;;  %v2005_v0 = vmul.f32 %v4175_v60, %v4901_v49  ;;  %v2468_v8 = vmul.f32 1.442695, %v2457_v2  ;;  %v5041_v57 = vpop.f32.mrf.mxu0 }
 0xa3e   : > { %v2447_v49 = vpop.xlane.xlu0 %2446 }
 0xa3f   : > { %3898 = vmatprep.mubr.msk.f32.mxu0 %vm911_vm2, %v2005_v0  ;;  %v2459_v9 = vsub.f32 %v4915_v37, %v2447_v49  ;;  %v5043_v60 = vpop.f32.mrf.mxu0 }
 0xa41   : > { %3899 = vmatmul.mubr.msk.f32.gmra.mxu0 %vm911_vm2, %v2006_v61  ;;  %v2472_v42 = vmul.f32 1.442695, %v2459_v9  ;;  %v5045_v0 = vpop.f32.mrf.mxu0 }
 0xa42   : > { %v2453_v41 = vpop.xlane.xlu0 %2452 }
 0xa43   : > { %v2461_v44 = vsub.f32 %v4919_v50, %v2453_v41 }
 0xa44   : > { %v4974_v62 = vpop.eup %4176 }
 0xa45   : > { %v2478_v21 = vsel %vm911_vm2, %v4974_v62, 0.0 }
 0xa46   : > { %2479 = vadd.xlane.f32.xlu1 %v2478_v21  ;;  %v4992_v37 = vpop.permute.xlu0 %2530 }
 0xa48   : > { %v4978_v35 = vpop.eup %4178 }
 0xa49   : > { %v2484_v1 = vsel %vm911_vm2, %v4978_v35, 0.0 }
 0xa4a   : > { %2485 = vadd.xlane.f32.xlu1 %v2484_v1  ;;  %v5012_v20 = vpop.permute.xlu0 %2524  ;;  %v5048_v1 = vpop.f32.mrf.mxu0 }
 0xa63   : > { %v2435_v7 = vpop.xlane.xlu1 %2434 }
 0xa64   : > { %v2455_v6 = vsub.f32 %v4931_v54, %v2435_v7  ;;  %v2476_v54 = vmul.f32 1.442695, %v2461_v44 }
 0xa66   : > { %v2464_v10 = vmul.f32 1.442695, %v2455_v6 }
 0xa67   : > { %v2444_v11 = vpop.xlane.xlu1 %2443 }
 0xa68   : > { %4180 = vpow2.f32 %v2464_v10  ;;  %v2458_v38 = vsub.f32 %v4933_v55, %v2444_v11 }
 0xa69   : > { %4182 = vpow2.f32 %v2468_v8 }
 0xa6a   : > { %v2470_v52 = vmul.f32 1.442695, %v2458_v38 }
 0xa6b   : > { %v2450_v12 = vpop.xlane.xlu1 %2449 }
 0xa6c   : > { %4184 = vpow2.f32 %v2470_v52  ;;  %v2460_v24 = vsub.f32 %v4937_v63, %v2450_v12 }
 0xa6d   : > { %4186 = vpow2.f32 %v2472_v42 }
 0xa6e   : > { %v2474_v13 = vmul.f32 1.442695, %v2460_v24 }
 0xa6f   : > { %v4988_v46 = vpop.permute.xlu1 %2532 }
 0xa70   : > { %4188 = vpow2.f32 %v2474_v13  ;;  %3939 = vmatprep.subr.mxu0 %v4988_v46  ;;  %4013 = vmatprep.subr.mxu1 %v4988_v46 }
 0xa71   : > { %4021 = vmatpush3.msra.mxu1 %v4988_v46  ;;  %4190 = vpow2.f32 %v2476_v54 }
 0xa72   : > { %4014 = vmatprep.subr.mxu1 %v4992_v37 }
 0xa73   : > { %4022 = vmatpush3.msra.mxu1 %v4992_v37  ;;  %v4997_v50 = vpop.permute.xlu1 %2528 }
 0xa74   : > { %4015 = vmatprep.subr.mxu1 %v4997_v50 }
 0xa75   : > { %v5000_v55 = vpop.eup %4180  ;;  %4023 = vmatpush3.msra.mxu1 %v4997_v50 }
 0xa76   : > { %v2481_v63 = vsel %vm911_vm2, %v5000_v55, 0.0  ;;  %v5005_v14 = vpop.eup %4182 }
 0xa77   : > { %2482 = vadd.xlane.f32.xlu0 %v2481_v63  ;;  %v5007_v15 = vpop.permute.xlu1 %2526  ;;  %v2487_v22 = vsel %vm911_vm2, %v5005_v14, 0.0 }
 0xa78   : > { %4016 = vmatprep.subr.mxu1 %v5007_v15 }
 0xa79   : > { %v5010_v48 = vpop.eup %4184  ;;  %4024 = vmatpush3.msra.mxu1 %v5007_v15 }
 0xa7a   : > { %4017 = vmatprep.subr.mxu1 %v5012_v20  ;;  %v2490_v23 = vsel %vm911_vm2, %v5010_v48, 0.0  ;;  %v5020_v25 = vpop.eup %4186 }
 0xa7b   : > { %2488 = vadd.xlane.f32.xlu0 %v2487_v22  ;;  %2491 = vadd.xlane.f32.xlu1 %v2490_v23  ;;  %v5022_v40 = vpop.permute.xlu1 %2522  ;;  %v2493_v39 = vsel %vm911_vm2, %v5020_v25, 0.0 }
 0xa7c   : > { %4025 = vmatpush3.msra.mxu1 %v5012_v20 }
 0xa7d   : > { %v5025_v3 = vpop.eup %4188  ;;  %4018 = vmatprep.subr.mxu1 %v5022_v40 }
 0xa7e   : > { %4026 = vmatpush3.msra.mxu1 %v5022_v40  ;;  %v2496_v58 = vsel %vm911_vm2, %v5025_v3, 0.0  ;;  %v5033_v47 = vpop.eup %4190 }
 0xa7f   : > { %2494 = vadd.xlane.f32.xlu0 %v2493_v39  ;;  %2497 = vadd.xlane.f32.xlu1 %v2496_v58  ;;  %v2499_v51 = vsel %vm911_vm2, %v5033_v47, 0.0 }
 0xa83   : > { %2500 = vadd.xlane.f32.xlu0 %v2499_v51 }
 0xa90   : > { %2518 = vrot.lane.b32.xlu1 %v4481_v30, %s4258_s20  ;;  %v5051_v30 = vpop.f32.mrf.mxu0 }
 0xa92   : > { %v5053_v43 = vpop.f32.mrf.mxu0 }
 0xa99   : > { %2520 = vrot.lane.b32.xlu0 %v4499_v45, %s4258_s20  ;;  %v5055_v45 = vpop.f32.mrf.mxu0 }
 0xa9b   : > { %v5057_v49 = vpop.f32.mrf.mxu0 }
 0xacf   : > { %v2480_v53 = vpop.xlane.xlu1 %2479 }
 0xad3   : > { %v2486_v56 = vpop.xlane.xlu1 %2485 }
 0xad4   : > { %4192 = vrcp.f32 %v2486_v56 }
 0xad5   : > { %4194 = vrcp.f32 %v2480_v53 }
 0xae1   : > { %v4193_v61 = vpop.eup %4192 }
 0xae2   : > { %v2512_v21 = vmul.f32 %v4193_v61, %v4978_v35  ;;  %v4195_v44 = vpop.eup %4194 }
 0xae3   : > { %v2510_v13 = vmul.f32 %v4195_v44, %v4974_v62 }
 0xae4   : > { %3958 = vmatprep.mubr.msk.f32.mxu1 %vm911_vm2, %v2512_v21  ;;  %v1712_v21 = vadd.f32 %v5043_v60, %v4833_v4  ;;  %v1728_v4 = vadd.f32 %v5053_v43, %v4841_v31 }
 0xaf5   : > { %v3891_v2 = vpop.f32.mrf.mxu0 }
 0xaf7   : > { %v2121_v7 = vpop.f32.mrf.mxu0 }
 0xaf8   : > { %v2160_v6 = vpack.c.bf16 %v3891_v2, %v2121_v7  ;;  %v1723_v7 = vadd.f32 %v5045_v0, %v4835_v28  ;;  %v1739_v28 = vadd.f32 %v5055_v45, %v4843_v34 }
 0xaf9   : > { %v3894_v8 = vpop.f32.mrf.mxu0 }
 0xafa   : > { %3903 = vmatprep.mubr.msk.bf16.mxu0 %vm765_vm1, %v2160_v6 }
 0xafb   : > { %v2131_v35 = vpop.f32.mrf.mxu0 }
 0xafc   : > { %v2161_v9 = vpack.c.bf16 %v3894_v8, %v2131_v35  ;;  %v1715_v35 = vadd.f32 %v5048_v1, %v4837_v29  ;;  %v1731_v29 = vadd.f32 %v5057_v49, %v4845_v36 }
 0xafd   : > { %v3897_v10 = vpop.f32.mrf.mxu0 }
 0xafe   : > { %3904 = vmatmul.mubr.msk.bf16.vlgmr.msra.gmra.mxu0 %vm765_vm1, %v2161_v9 }
 0xaff   : > { %3940 = vmatpush3.msra.mxu0 %v4988_v46  ;;  %v2141_v41 = vpop.f32.mrf.mxu0 }
 0xb00   : > { %v2162_v11 = vpack.c.bf16 %v3897_v10, %v2141_v41  ;;  %3941 = vmatprep.subr.mxu0 %v4992_v37  ;;  %v2483_v38 = vpop.xlane.xlu0 %2482  ;;  %v1736_v41 = vadd.f32 %v5051_v30, %v4839_v5 }
 0xb01   : > { %3942 = vmatpush3.msra.mxu0 %v4992_v37  ;;  %v3900_v42 = vpop.f32.mrf.mxu0  ;;  %4196 = vrcp.f32 %v2483_v38 }
 0xb02   : > { %3943 = vmatprep.subr.mxu0 %v4997_v50  ;;  %3907 = vmatprep.mubr.msk.bf16.mxu0 %vm765_vm1, %v2162_v11 }
 0xb03   : > { %3944 = vmatpush3.msra.mxu0 %v4997_v50  ;;  %v2151_v52 = vpop.f32.mrf.mxu0 }
 0xb04   : > { %v2163_v12 = vpack.c.bf16 %v3900_v42, %v2151_v52  ;;  %3945 = vmatprep.subr.mxu0 %v5007_v15  ;;  %v2489_v24 = vpop.xlane.xlu0 %2488  ;;  %v2492_v54 = vpop.xlane.xlu1 %2491 }
 0xb05   : > { %4198 = vrcp.f32 %v2489_v24  ;;  %3946 = vmatpush3.msra.mxu0 %v5007_v15 }
 0xb06   : > { %4200 = vrcp.f32 %v2492_v54  ;;  %3947 = vmatprep.subr.mxu0 %v5012_v20  ;;  %3908 = vmatmul.mubr.msk.bf16.gmra.mxu0 %vm765_vm1, %v2163_v12 }
 0xb07   : > { %3948 = vmatpush3.msra.mxu0 %v5012_v20  ;;  %3955 = vmatprep.mubr.msk.f32.mxu0 %vm911_vm2, %v2510_v13 }
 0xb08   : > { %3949 = vmatprep.subr.mxu0 %v5022_v40  ;;  %v2495_v46 = vpop.xlane.xlu0 %2494  ;;  %v2498_v37 = vpop.xlane.xlu1 %2497 }
 0xb09   : > { %4202 = vrcp.f32 %v2495_v46  ;;  %3950 = vmatpush3.msra.mxu0 %v5022_v40 }
 0xb0a   : > { %4204 = vrcp.f32 %v2498_v37 }
 0xb0c   : > { %v2501_v50 = vpop.xlane.xlu0 %2500  ;;  %v2519_v22 = vpop.permute.xlu1 %2518 }
 0xb0d   : > { %4206 = vrcp.f32 %v2501_v50 }
 0xb0e   : > { %v4197_v62 = vpop.eup %4196 }
 0xb0f   : > { %v2511_v23 = vmul.f32 %v4197_v62, %v5000_v55 }
 0xb10   : > { %v2521_v63 = vpop.permute.xlu0 %2520 }
 0xb11   : > { %3951 = vmatprep.subr.mxu0 %v2521_v63  ;;  %4019 = vmatprep.subr.mxu1 %v2521_v63 }
 0xb12   : > { %v4199_v15 = vpop.eup %4198  ;;  %3952 = vmatpush3.msra.mxu0 %v2521_v63  ;;  %4027 = vmatpush3.msra.mxu1 %v2521_v63 }
 0xb13   : > { %v4201_v20 = vpop.eup %4200  ;;  %v2513_v39 = vmul.f32 %v4199_v15, %v5005_v14  ;;  %3953 = vmatprep.subr.mxu0 %v2519_v22  ;;  %4020 = vmatprep.subr.mxu1 %v2519_v22  ;;  %v3471_v15 = vld [vmem:[%s5341_s7] ss:$0 sm:$0xff] }
 0xb14   : > { %3954 = vmatpush3.msra.mxu0 %v2519_v22  ;;  %4028 = vmatpush3.msra.mxu1 %v2519_v22  ;;  %v2514_v40 = vmul.f32 %v4201_v20, %v5010_v48  ;;  %v2675_v48 = vld [vmem:[%s5340_s6 + $0xc] sm:$0xf] }
 0xb15   : > { %3956 = vmatmul.mubr.msk.f32.vlgmr.msra.gmra.mxu0 %vm911_vm2, %v2511_v23  ;;  %3959 = vmatmul.mubr.msk.f32.vlgmr.msra.gmra.mxu1 %vm911_vm2, %v2513_v39  ;;  %v2689_v61 = vsel %vm1593_vm3, %v2675_v48, 0 }
 0xb16   : > { %v4203_v58 = vpop.eup %4202  ;;  %3961 = vmatprep.mubr.msk.f32.mxu1 %vm911_vm2, %v2514_v40  ;;  %4032 = vmatprep.subr.msk.bf16.mxu0 %vm1593_vm3, %v2675_v48 }
 0xb17   : > { %v4205_v51 = vpop.eup %4204  ;;  %v2515_v53 = vmul.f32 %v4203_v58, %v5020_v25  ;;  %3968 = vmatpush3.bf16.msra.mxu0 %v2689_v61  ;;  %v1720_v25 = vadd.f32 %v5041_v57, %v4831_v59 }
 0xb18   : > { %v2516_v55 = vmul.f32 %v4205_v51, %v5025_v3 }
 0xb19   : > { %3962 = vmatmul.mubr.msk.f32.gmra.mxu1 %vm911_vm2, %v2515_v53 }
 0xb1a   : > { %v4207_v14 = vpop.eup %4206  ;;  %3964 = vmatprep.mubr.msk.f32.mxu1 %vm911_vm2, %v2516_v55 }
 0xb1b   : > { %v2517_v56 = vmul.f32 %v4207_v14, %v5033_v47 }
 0xb1d   : > { %3965 = vmatmul.mubr.msk.f32.gmra.mxu1 %vm911_vm2, %v2517_v56 }
 0xbbe   : > { %v3905_v3 = vpop.f32.mrf.mxu0 }
 0xbbf   : > { %v2247_v2 = vadd.f32 %v3905_v3, %v1720_v25 }
 0xbc0   : > { %v2214_v47 = vpop.f32.mrf.mxu0 }
 0xbc1   : > { %v2245_v6 = vadd.f32 %v2214_v47, %v1712_v21 }
 0xbc2   : > { %v3906_v8 = vpop.f32.mrf.mxu0 }
 0xbc3   : > { %v2248_v9 = vadd.f32 %v3906_v8, %v1723_v7 }
 0xbc4   : > { %v2217_v10 = vpop.f32.mrf.mxu0 }
 0xbc5   : > { %v2246_v59 = vadd.f32 %v2217_v10, %v1715_v35 }
 0xbc6   : > { %v3909_v57 = vpop.f32.mrf.mxu0 }
 0xbc7   : > { %v2251_v60 = vadd.f32 %v3909_v57, %v1736_v41 }
 0xbc8   : > { %v2230_v11 = vpop.f32.mrf.mxu0 }
 0xbc9   : > { %v2249_v0 = vadd.f32 %v2230_v11, %v1728_v4 }
 0xbca   : > { %v3910_v38 = vpop.f32.mrf.mxu0 }
 0xbcb   : > { %v2252_v1 = vadd.f32 %v3910_v38, %v1739_v28 }
 0xbcc   : > { %v2233_v42 = vpop.f32.mrf.mxu0 }
 0xbcd   : > { %v2250_v44 = vadd.f32 %v2233_v42, %v1731_v29 }
 0xbd5   : > { %v3957_v52 = vpop.f32.mrf.mxu0  ;;  %v3960_v5 = vpop.f32.mrf.mxu1 }
 0xbd7   : > { %v2632_v30 = vpop.f32.mrf.mxu0  ;;  %v2642_v12 = vpop.f32.mrf.mxu1 }
 0xbd8   : > { %v2671_v24 = vpack.c.bf16 %v3957_v52, %v2632_v30  ;;  %v2672_v54 = vpack.c.bf16 %v3960_v5, %v2642_v12 }
 0xbd9   : > { %v3963_v31 = vpop.f32.mrf.mxu1 }
 0xbda   : > { %3969 = vmatprep.mubr.msk.bf16.mxu0 %vm765_vm1, %v2671_v24 }
 0xbdb   : > { %v2652_v43 = vpop.f32.mrf.mxu1  ;;  %3970 = vmatmul.mubr.msk.bf16.vlgmr.msra.gmra.mxu0 %vm765_vm1, %v2672_v54 }
 0xbdc   : > { %v2673_v34 = vpack.c.bf16 %v3963_v31, %v2652_v43 }
 0xbdd   : > { %v3966_v45 = vpop.f32.mrf.mxu1 }
 0xbde   : > { %3973 = vmatprep.mubr.msk.bf16.mxu0 %vm765_vm1, %v2673_v34 }
 0xbdf   : > { %v2662_v36 = vpop.f32.mrf.mxu1 }
 0xbe0   : > { %v2674_v49 = vpack.c.bf16 %v3966_v45, %v2662_v36 }
 0xbe3   : > { %3974 = vmatmul.mubr.msk.bf16.gmra.mxu0 %vm765_vm1, %v2674_v49 }
 0xc9b   : > { %v3971_v13 = vpop.f32.mrf.mxu0 }
 0xc9c   : > { %v2758_v46 = vadd.f32 %v3971_v13, %v2247_v2 }
 0xc9d   : > { %v2725_v37 = vpop.f32.mrf.mxu0 }
 0xc9e   : > { %v2756_v50 = vadd.f32 %v2725_v37, %v2245_v6  ;;  %v2766_v62 = vadd.f32 %v2758_v46, %v4370_v17 }
 0xc9f   : > { %v3972_v63 = vpop.f32.mrf.mxu0 }
 0xca0   : > { %v2764_v22 = vadd.f32 %v2756_v50, %v4368_v16  ;;  %v2759_v20 = vadd.f32 %v3972_v63, %v2248_v9  ;;  %v5120_v58 = vadd.f32 %v3471_v15, %v2766_v62 }
 0xca1   : > { %v2728_v23 = vpop.f32.mrf.mxu0 }
 0xca2   : > { %v5118_v39 = vadd.f32 %v3471_v15, %v2764_v22  ;;  %v2757_v40 = vadd.f32 %v2728_v23, %v2246_v59  ;;  %v2767_v51 = vadd.f32 %v2759_v20, %v4374_v19  ;;  %v2795_v3 = vsel %vm503_vm0, %v5120_v58, 0.0 }
 0xca3   : > { %v3975_v53 = vpop.f32.mrf.mxu0 }
 0xca4   : > { %v2765_v55 = vadd.f32 %v2757_v40, %v4372_v18  ;;  %v2762_v17 = vadd.f32 %v3975_v53, %v2251_v60  ;;  %v2789_v14 = vsel %vm503_vm0, %v5118_v39, 0.0  ;;  %v5128_v61 = vadd.f32 %v3471_v15, %v2767_v51 }
 0xca5   : > { %2790 = vadd.xlane.f32.xlu0 %v2789_v14  ;;  %v2741_v56 = vpop.f32.mrf.mxu0 }
 0xca6   : > { %v5126_v48 = vadd.f32 %v3471_v15, %v2765_v55  ;;  %v2760_v16 = vadd.f32 %v2741_v56, %v2249_v0  ;;  %v2770_v19 = vadd.f32 %v2762_v17, %v4398_v32  ;;  %v2798_v8 = vsel %vm503_vm0, %v5128_v61, 0.0 }
 0xca7   : > { %v3976_v25 = vpop.f32.mrf.mxu0 }
 0xca8   : > { %v2768_v21 = vadd.f32 %v2760_v16, %v4384_v26  ;;  %v2763_v18 = vadd.f32 %v3976_v25, %v2252_v1  ;;  %v2792_v2 = vsel %vm503_vm0, %v5126_v48, 0.0  ;;  %v5140_v35 = vadd.f32 %v3471_v15, %v2770_v19  ;;  %v4054_v16 = vld [vmem:[%s5344_s10 + $0x8] sm:$0xff]   ;;  %v4055_v25 = vld [vmem:[%s5344_s10] sm:$0xff]  }
 0xca9   : > { %2796 = vadd.xlane.f32.xlu0 %v2795_v3  ;;  %2793 = vadd.xlane.f32.xlu1 %v2792_v2  ;;  %v2744_v47 = vpop.f32.mrf.mxu0 }
 0xcaa   : > { %v5136_v7 = vadd.f32 %v3471_v15, %v2768_v21  ;;  %v2761_v6 = vadd.f32 %v2744_v47, %v2250_v44  ;;  %v2771_v9 = vadd.f32 %v2763_v18, %v4400_v33  ;;  %v2807_v59 = vsel %vm503_vm0, %v5140_v35, 0.0  ;;  %3977 = vmatprep.subr.bf16.mxu1 %v4054_v16 }
 0xcab   : > { %3978 = vmatpush3.bf16.msra.mxu1 %v4054_v16 }
 0xcac   : > { %v2769_v32 = vadd.f32 %v2761_v6, %v4386_v27  ;;  %v2801_v26 = vsel %vm503_vm0, %v5136_v7, 0.0  ;;  %v5148_v41 = vadd.f32 %v3471_v15, %v2771_v9  ;;  %3979 = vmatprep.subr.bf16.mxu1 %v4055_v25 }
 0xcad   : > { %2799 = vadd.xlane.f32.xlu0 %v2798_v8  ;;  %2802 = vadd.xlane.f32.xlu1 %v2801_v26 }
 0xcae   : > { %v5146_v10 = vadd.f32 %v3471_v15, %v2769_v32  ;;  %v2810_v27 = vsel %vm503_vm0, %v5148_v41, 0.0 }
 0xcaf   : > { %3980 = vmatpush3.bf16.msra.mxu1 %v4055_v25 }
 0xcb0   : > { %v2804_v57 = vsel %vm503_vm0, %v5146_v10, 0.0 }
 0xcb1   : > { %2808 = vadd.xlane.f32.xlu1 %v2807_v59  ;;  %2805 = vadd.xlane.f32.xlu0 %v2804_v57 }
 0xcb5   : > { %2811 = vadd.xlane.f32.xlu0 %v2810_v27 }
 0xd2e   : > { %v2791_v33 = vpop.xlane.xlu0 %2790 }
 0xd2f   : > { %v2813_v4 = vmul.f32 0.03125, %v2791_v33 }
 0xd31   : > { %v5157_v60 = vsub.f32 %v5118_v39, %v2813_v4 }
 0xd32   : > { %v2797_v11 = vpop.xlane.xlu0 %2796  ;;  %v2794_v28 = vpop.xlane.xlu1 %2793 }
 0xd33   : > { %v2815_v0 = vmul.f32 0.03125, %v2797_v11  ;;  %v2814_v38 = vmul.f32 0.03125, %v2794_v28  ;;  %v2829_v29 = vmul.f32 %v5157_v60, %v5157_v60 }
 0xd35   : > { %v5162_v1 = vsub.f32 %v5120_v58, %v2815_v0  ;;  %v5165_v42 = vsub.f32 %v5126_v48, %v2814_v38  ;;  %v2837_v44 = vsel %vm503_vm0, %v2829_v29, 0.0 }
 0xd36   : > { %v2800_v52 = vpop.xlane.xlu0 %2799  ;;  %2838 = vadd.xlane.f32.xlu1 %v2837_v44  ;;  %v2803_v5 = vpop.xlane.xlu1 %2802 }
 0xd37   : > { %v2816_v30 = vmul.f32 0.03125, %v2800_v52  ;;  %v2817_v12 = vmul.f32 0.03125, %v2803_v5  ;;  %v2831_v24 = vmul.f32 %v5162_v1, %v5162_v1  ;;  %v2830_v54 = vmul.f32 %v5165_v42, %v5165_v42 }
 0xd39   : > { %v5173_v31 = vsub.f32 %v5128_v61, %v2816_v30  ;;  %v5176_v43 = vsub.f32 %v5136_v7, %v2817_v12  ;;  %v2843_v34 = vsel %vm503_vm0, %v2831_v24, 0.0  ;;  %v2840_v45 = vsel %vm503_vm0, %v2830_v54, 0.0  ;;  %v3472_v24 = vld [vmem:[%s5342_s8] ss:$0 sm:$0xff] }
 0xd3a   : > { %2844 = vadd.xlane.f32.xlu1 %v2843_v34  ;;  %v2809_v36 = vpop.xlane.xlu1 %2808  ;;  %2841 = vadd.xlane.f32.xlu0 %v2840_v45  ;;  %v2806_v49 = vpop.xlane.xlu0 %2805 }
 0xd3b   : > { %v2819_v13 = vmul.f32 0.03125, %v2809_v36  ;;  %v2818_v46 = vmul.f32 0.03125, %v2806_v49  ;;  %v2833_v37 = vmul.f32 %v5176_v43, %v5176_v43  ;;  %v2832_v50 = vmul.f32 %v5173_v31, %v5173_v31  ;;  %v3473_v49 = vld [vmem:[%s5343_s9] ss:$0 sm:$0xff] }
 0xd3d   : > { %v5185_v62 = vsub.f32 %v5140_v35, %v2819_v13  ;;  %v5188_v63 = vsub.f32 %v5146_v10, %v2818_v46  ;;  %v2849_v15 = vsel %vm503_vm0, %v2833_v37, 0.0  ;;  %v2846_v22 = vsel %vm503_vm0, %v2832_v50, 0.0 }
 0xd3e   : > { %2850 = vadd.xlane.f32.xlu1 %v2849_v15  ;;  %2847 = vadd.xlane.f32.xlu0 %v2846_v22  ;;  %v2812_v20 = vpop.xlane.xlu0 %2811 }
 0xd3f   : > { %v2820_v23 = vmul.f32 0.03125, %v2812_v20  ;;  %v2835_v40 = vmul.f32 %v5185_v62, %v5185_v62  ;;  %v2834_v51 = vmul.f32 %v5188_v63, %v5188_v63 }
 0xd41   : > { %v5197_v53 = vsub.f32 %v5148_v41, %v2820_v23  ;;  %v2855_v55 = vsel %vm503_vm0, %v2835_v40, 0.0  ;;  %v2852_v17 = vsel %vm503_vm0, %v2834_v51, 0.0 }
 0xd42   : > { %2856 = vadd.xlane.f32.xlu1 %v2855_v55  ;;  %2853 = vadd.xlane.f32.xlu0 %v2852_v17 }
 0xd43   : > { %v2836_v14 = vmul.f32 %v5197_v53, %v5197_v53 }
 0xd45   : > { %v2858_v56 = vsel %vm503_vm0, %v2836_v14, 0.0 }
 0xd46   : > { %2859 = vadd.xlane.f32.xlu0 %v2858_v56 }
 0xdbf   : > { %v2839_v3 = vpop.xlane.xlu1 %2838 }
 0xdc0   : > { %v2861_v19 = vmul.f32 0.03125, %v2839_v3 }
 0xdc2   : > { %v2869_v21 = vadd.f32 1e-06, %v2861_v19 }
 0xdc3   : > { %v2845_v18 = vpop.xlane.xlu1 %2844  ;;  %v2842_v2 = vpop.xlane.xlu0 %2841 }
 0xdc4   : > { %4208 = vrsqrt.f32 %v2869_v21  ;;  %v2863_v47 = vmul.f32 0.03125, %v2845_v18  ;;  %v2862_v6 = vmul.f32 0.03125, %v2842_v2 }
 0xdc6   : > { %v2871_v8 = vadd.f32 1e-06, %v2863_v47  ;;  %v2870_v9 = vadd.f32 1e-06, %v2862_v6 }
 0xdc7   : > { %v2851_v32 = vpop.xlane.xlu1 %2850  ;;  %v2848_v26 = vpop.xlane.xlu0 %2847 }
 0xdc8   : > { %4210 = vrsqrt.f32 %v2871_v8  ;;  %v2865_v59 = vmul.f32 0.03125, %v2851_v32  ;;  %v2864_v57 = vmul.f32 0.03125, %v2848_v26  ;;  %v4059_v32 = vld [vmem:[%s5346_s12 + $0x20] sm:$0xff]   ;;  %v4060_v26 = vld [vmem:[%s5346_s12 + $0x18] sm:$0xff]  }
 0xdc9   : > { %4212 = vrsqrt.f32 %v2870_v9  ;;  %v4058_v9 = vld [vmem:[%s5346_s12 + $0x28] sm:$0xff]  }
 0xdca   : > { %v2873_v27 = vadd.f32 1e-06, %v2865_v59  ;;  %v2872_v33 = vadd.f32 1e-06, %v2864_v57  ;;  %v4061_v59 = vld [vmem:[%s5346_s12 + $0x10] sm:$0xff]   ;;  %v4062_v57 = vld [vmem:[%s5346_s12 + $0x8] sm:$0xff]  }
 0xdcb   : > { %v2857_v4 = vpop.xlane.xlu1 %2856  ;;  %v2854_v11 = vpop.xlane.xlu0 %2853 }
 0xdcc   : > { %4214 = vrsqrt.f32 %v2873_v27  ;;  %v2867_v28 = vmul.f32 0.03125, %v2857_v4  ;;  %v2866_v0 = vmul.f32 0.03125, %v2854_v11  ;;  %v4063_v27 = vld [vmem:[%s5346_s12] sm:$0xff]  }
 0xdcd   : > { %4216 = vrsqrt.f32 %v2872_v33  ;;  %v3474_v33 = vld [vmem:[%s5345_s11] ss:$0 sm:$0xff] }
 0xdce   : > { %v2875_v38 = vadd.f32 1e-06, %v2867_v28  ;;  %v2874_v29 = vadd.f32 1e-06, %v2866_v0 }
 0xdcf   : > { %v2860_v44 = vpop.xlane.xlu0 %2859 }
 0xdd0   : > { %4218 = vrsqrt.f32 %v2875_v38  ;;  %v2868_v52 = vmul.f32 0.03125, %v2860_v44 }
 0xdd1   : > { %v4209_v5 = vpop.eup %4208  ;;  %4220 = vrsqrt.f32 %v2874_v29 }
 0xdd2   : > { %v2876_v30 = vadd.f32 1e-06, %v2868_v52  ;;  %v2885_v12 = vmul.f32 %v4209_v5, %v5157_v60 }
 0xdd4   : > { %4222 = vrsqrt.f32 %v2876_v30  ;;  %v2899_v45 = vmul.f32 %v3472_v24, %v2885_v12 }
 0xdd5   : > { %v4211_v54 = vpop.eup %4210 }
 0xdd6   : > { %v4213_v34 = vpop.eup %4212  ;;  %v2887_v36 = vmul.f32 %v4211_v54, %v5162_v1  ;;  %v2913_v60 = vadd.f32 %v3473_v49, %v2899_v45 }
 0xdd7   : > { %v2886_v13 = vmul.f32 %v4213_v34, %v5165_v42 }
 0xdd8   : > { %v2901_v15 = vmul.f32 %v3472_v24, %v2887_v36 }
 0xdd9   : > { %v4215_v46 = vpop.eup %4214  ;;  %v2900_v37 = vmul.f32 %v3472_v24, %v2886_v13 }
 0xdda   : > { %v4217_v50 = vpop.eup %4216  ;;  %v2889_v23 = vmul.f32 %v4215_v46, %v5176_v43  ;;  %v2915_v14 = vadd.f32 %v3473_v49, %v2901_v15 }
 0xddb   : > { %v2888_v22 = vmul.f32 %v4217_v50, %v5173_v31  ;;  %v2914_v20 = vadd.f32 %v3473_v49, %v2900_v37 }
 0xddc   : > { %v2903_v16 = vmul.f32 %v3472_v24, %v2889_v23 }
 0xddd   : > { %v4219_v40 = vpop.eup %4218  ;;  %v2902_v51 = vmul.f32 %v3472_v24, %v2888_v22  ;;  %v2921_v55 = vpack.c.bf16 %v2914_v20, %v2913_v60 }
 0xdde   : > { %v4221_v1 = vpop.eup %4220  ;;  %v2891_v17 = vmul.f32 %v4219_v40, %v5185_v62  ;;  %v2917_v43 = vadd.f32 %v3473_v49, %v2903_v16 }
 0xddf   : > { %3981 = vmatprep.mubr.msk.bf16.mxu1 %vm503_vm0, %v2921_v55  ;;  %v2916_v42 = vadd.f32 %v3473_v49, %v2902_v51  ;;  %v2890_v56 = vmul.f32 %v4221_v1, %v5188_v63  ;;  %v4056_v63 = vld [vmem:[%s5346_s12 + $0x38] sm:$0xff]  }
 0xde0   : > { %v2905_v21 = vmul.f32 %v3472_v24, %v2891_v17  ;;  %3989 = vmatprep.subr.bf16.mxu0 %v4056_v63 }
 0xde1   : > { %v4223_v25 = vpop.eup %4222  ;;  %v2922_v3 = vpack.c.bf16 %v2916_v42, %v2915_v14  ;;  %v2904_v19 = vmul.f32 %v3472_v24, %v2890_v56  ;;  %3990 = vmatpush3.bf16.msra.mxu0 %v4056_v63 }
 0xde2   : > { %v2892_v31 = vmul.f32 %v4223_v25, %v5197_v53  ;;  %v2919_v62 = vadd.f32 %v3473_v49, %v2905_v21  ;;  %v4057_v53 = vld [vmem:[%s5346_s12 + $0x30] sm:$0xff]  }
 0xde3   : > { %3982 = vmatmul.mubr.msk.bf16.vlgmr.msra.gmra.mxu1 %vm503_vm0, %v2922_v3  ;;  %v2918_v18 = vadd.f32 %v3473_v49, %v2904_v19  ;;  %3991 = vmatprep.subr.bf16.mxu0 %v4057_v53 }
 0xde4   : > { %v2906_v2 = vmul.f32 %v3472_v24, %v2892_v31 }
 0xde5   : > { %v2923_v47 = vpack.c.bf16 %v2918_v18, %v2917_v43  ;;  %3992 = vmatpush3.bf16.msra.mxu0 %v4057_v53 }
 0xde6   : > { %v2920_v6 = vadd.f32 %v3473_v49, %v2906_v2  ;;  %3993 = vmatprep.subr.bf16.mxu0 %v4058_v9 }
 0xde7   : > { %3985 = vmatprep.mubr.msk.bf16.mxu1 %vm503_vm0, %v2923_v47 }
 0xde8   : > { %v2924_v8 = vpack.c.bf16 %v2920_v6, %v2919_v62 }
 0xde9   : > { %3994 = vmatpush3.bf16.msra.mxu0 %v4058_v9 }
 0xdea   : > { %3995 = vmatprep.subr.bf16.mxu0 %v4059_v32 }
 0xdeb   : > { %3986 = vmatmul.mubr.msk.bf16.gmra.mxu1 %vm503_vm0, %v2924_v8 }
 0xded   : > { %3996 = vmatpush3.bf16.msra.mxu0 %v4059_v32 }
 0xdee   : > { %3997 = vmatprep.subr.bf16.mxu0 %v4060_v26 }
 0xdf1   : > { %3998 = vmatpush3.bf16.msra.mxu0 %v4060_v26 }
 0xdf2   : > { %3999 = vmatprep.subr.bf16.mxu0 %v4061_v59 }
 0xdf5   : > { %4000 = vmatpush3.bf16.msra.mxu0 %v4061_v59 }
 0xdf6   : > { %4001 = vmatprep.subr.bf16.mxu0 %v4062_v57 }
 0xdf9   : > { %4002 = vmatpush3.bf16.msra.mxu0 %v4062_v57 }
 0xdfa   : > { %4003 = vmatprep.subr.bf16.mxu0 %v4063_v27 }
 0xdfd   : > { %4004 = vmatpush3.bf16.msra.mxu0 %v4063_v27 }
 0xea3   : > { %v3983_v4 = vpop.f32.mrf.mxu1 }
 0xea4   : > { %v5255_v11 = vadd.f32 %v3983_v4, %v3474_v33 }
 0xea5   : > { %v2994_v28 = vpop.f32.mrf.mxu1 }
 0xea6   : > { %v3027_v0 = vmul.f32 %v5255_v11, %v5255_v11  ;;  %v5259_v38 = vadd.f32 %v3474_v33, %v2994_v28 }
 0xea7   : > { %v3984_v29 = vpop.f32.mrf.mxu1 }
 0xea8   : > { %v3035_v44 = vmul.f32 %v3027_v0, %v5255_v11  ;;  %v3025_v52 = vmul.f32 %v5259_v38, %v5259_v38  ;;  %v5264_v5 = vadd.f32 %v3984_v29, %v3474_v33 }
 0xea9   : > { %v2997_v30 = vpop.f32.mrf.mxu1 }
 0xeaa   : > { %v3043_v12 = vmul.f32 0.044715, %v3035_v44  ;;  %v3033_v24 = vmul.f32 %v3025_v52, %v5259_v38  ;;  %v3028_v54 = vmul.f32 %v5264_v5, %v5264_v5  ;;  %v5269_v34 = vadd.f32 %v3474_v33, %v2997_v30 }
 0xeab   : > { %v3987_v45 = vpop.f32.mrf.mxu1 }
 0xeac   : > { %v3051_v36 = vadd.f32 %v3043_v12, %v5255_v11  ;;  %v3041_v49 = vmul.f32 0.044715, %v3033_v24  ;;  %v3036_v13 = vmul.f32 %v3028_v54, %v5264_v5  ;;  %v3026_v46 = vmul.f32 %v5269_v34, %v5269_v34 }
 0xead   : > { %v5275_v37 = vadd.f32 %v3987_v45, %v3474_v33  ;;  %v3010_v50 = vpop.f32.mrf.mxu1 }
 0xeae   : > { %v3059_v60 = vmul.f32 0.7978846, %v3051_v36  ;;  %v3049_v15 = vadd.f32 %v3041_v49, %v5259_v38  ;;  %v3044_v22 = vmul.f32 0.044715, %v3036_v13  ;;  %v3034_v20 = vmul.f32 %v3026_v46, %v5269_v34 }
 0xeaf   : > { %v3031_v23 = vmul.f32 %v5275_v37, %v5275_v37  ;;  %v5281_v40 = vadd.f32 %v3474_v33, %v3010_v50  ;;  %v3988_v51 = vpop.f32.mrf.mxu1 }
 0xeb0   : > { %v3057_v55 = vmul.f32 0.7978846, %v3049_v15  ;;  %v3052_v1 = vadd.f32 %v3044_v22, %v5264_v5  ;;  %v3042_v17 = vmul.f32 0.044715, %v3034_v20  ;;  %4224 = vtanh.f32 %v3059_v60 }
 0xeb1   : > { %v3039_v14 = vmul.f32 %v3031_v23, %v5275_v37  ;;  %v3029_v42 = vmul.f32 %v5281_v40, %v5281_v40  ;;  %v3022_v56 = vadd.f32 %v3988_v51, %v3474_v33  ;;  %v3013_v16 = vpop.f32.mrf.mxu1 }
 0xeb2   : > { %4226 = vtanh.f32 %v3057_v55  ;;  %v3060_v25 = vmul.f32 0.7978846, %v3052_v1  ;;  %v3050_v3 = vadd.f32 %v3042_v17, %v5269_v34  ;;  %v3014_v19 = vadd.f32 %v3474_v33, %v3013_v16 }
 0xeb3   : > { %v3047_v31 = vmul.f32 0.044715, %v3039_v14  ;;  %v3037_v21 = vmul.f32 %v3029_v42, %v5281_v40  ;;  %v3032_v43 = vmul.f32 %v3022_v56, %v3022_v56 }
 0xeb4   : > { %4228 = vtanh.f32 %v3060_v25  ;;  %v3058_v18 = vmul.f32 0.7978846, %v3050_v3  ;;  %v3030_v2 = vmul.f32 %v3014_v19, %v3014_v19 }
 0xeb5   : > { %v3055_v47 = vadd.f32 %v3047_v31, %v5275_v37  ;;  %v3045_v62 = vmul.f32 0.044715, %v3037_v21  ;;  %v3040_v6 = vmul.f32 %v3032_v43, %v3022_v56  ;;  %v3481_v43 = vld [vmem:[%s5347_s13] ss:$0 sm:$0xff] }
 0xeb6   : > { %4230 = vtanh.f32 %v3058_v18  ;;  %v3038_v8 = vmul.f32 %v3030_v2, %v3014_v19 }
 0xeb7   : > { %v3063_v63 = vmul.f32 0.7978846, %v3055_v47  ;;  %v3053_v53 = vadd.f32 %v3045_v62, %v5281_v40  ;;  %v3048_v9 = vmul.f32 0.044715, %v3040_v6 }
 0xeb8   : > { %v3046_v32 = vmul.f32 0.044715, %v3038_v8 }
 0xeb9   : > { %4232 = vtanh.f32 %v3063_v63  ;;  %v3061_v26 = vmul.f32 0.7978846, %v3053_v53  ;;  %v3056_v59 = vadd.f32 %v3048_v9, %v3022_v56 }
 0xeba   : > { %v3054_v57 = vadd.f32 %v3046_v32, %v3014_v19 }
 0xebb   : > { %4234 = vtanh.f32 %v3061_v26  ;;  %v3064_v27 = vmul.f32 0.7978846, %v3056_v59 }
 0xebc   : > { %v3062_v33 = vmul.f32 0.7978846, %v3054_v57 }
 0xebd   : > { %4236 = vtanh.f32 %v3064_v27  ;;  %v4225_v4 = vpop.eup %4224 }
 0xebe   : > { %4238 = vtanh.f32 %v3062_v33  ;;  %v3075_v44 = vadd.f32 1.0, %v4225_v4 }
 0xebf   : > { %v4227_v28 = vpop.eup %4226 }
 0xec0   : > { %v3073_v0 = vadd.f32 1.0, %v4227_v28  ;;  %v3083_v45 = vmul.f32 0.5, %v3075_v44 }
 0xec1   : > { %v4229_v29 = vpop.eup %4228 }
 0xec2   : > { %v3076_v52 = vadd.f32 1.0, %v4229_v29  ;;  %v3081_v54 = vmul.f32 0.5, %v3073_v0  ;;  %v3091_v15 = vmul.f32 %v3083_v45, %v5255_v11 }
 0xec3   : > { %v4231_v30 = vpop.eup %4230 }
 0xec4   : > { %v3084_v12 = vmul.f32 0.5, %v3076_v52  ;;  %v3074_v24 = vadd.f32 1.0, %v4231_v30  ;;  %v3089_v50 = vmul.f32 %v3081_v54, %v5259_v38 }
 0xec6   : > { %v4233_v36 = vpop.eup %4232  ;;  %v3082_v49 = vmul.f32 0.5, %v3074_v24  ;;  %v3092_v13 = vmul.f32 %v3084_v12, %v5264_v5 }
 0xec7   : > { %v3079_v20 = vadd.f32 1.0, %v4233_v36 }
 0xec8   : > { %v4235_v46 = vpop.eup %4234  ;;  %v3090_v60 = vmul.f32 %v3082_v49, %v5269_v34  ;;  %v3098_v1 = vpack.c.bf16 %v3092_v13, %v3091_v15 }
 0xec9   : > { %v3077_v22 = vadd.f32 1.0, %v4235_v46  ;;  %v3087_v16 = vmul.f32 0.5, %v3079_v20 }
 0xeca   : > { %v4237_v23 = vpop.eup %4236  ;;  %v3097_v51 = vpack.c.bf16 %v3090_v60, %v3089_v50 }
 0xecb   : > { %v4239_v55 = vpop.eup %4238  ;;  %v3080_v17 = vadd.f32 1.0, %v4237_v23  ;;  %v3085_v42 = vmul.f32 0.5, %v3077_v22  ;;  %v3095_v11 = vmul.f32 %v3087_v16, %v5275_v37 }
 0xecc   : > { %4005 = vmatprep.mubr.bf16.mxu0 %v3097_v51  ;;  %v3078_v14 = vadd.f32 1.0, %v4239_v55 }
 0xecd   : > { %4006 = vmatmul.mubr.bf16.vlgmr.msra.gmra.mxu0 %v3098_v1  ;;  %v3088_v5 = vmul.f32 0.5, %v3080_v17  ;;  %v3093_v34 = vmul.f32 %v3085_v42, %v5281_v40 }
 0xece   : > { %v3086_v25 = vmul.f32 0.5, %v3078_v14 }
 0xecf   : > { %v3096_v38 = vmul.f32 %v3088_v5, %v3022_v56 }
 0xed0   : > { %v3094_v3 = vmul.f32 %v3086_v25, %v3014_v19 }
 0xed1   : > { %v3100_v21 = vpack.c.bf16 %v3096_v38, %v3095_v11 }
 0xed2   : > { %v3099_v31 = vpack.c.bf16 %v3094_v3, %v3093_v34 }
 0xed4   : > { %4009 = vmatprep.mubr.bf16.mxu0 %v3099_v31 }
 0xed5   : > { %4010 = vmatmul.mubr.bf16.gmra.mxu0 %v3100_v21 }
 0xf8d   : > { %v4007_v18 = vpop.f32.mrf.mxu0 }
 0xf8e   : > { %v3215_v2 = vadd.f32 %v4007_v18, %v3481_v43 }
 0xf8f   : > { %v3206_v47 = vpop.f32.mrf.mxu0 }
 0xf90   : > { %v3239_v62 = vadd.f32 %v3215_v2, %v5120_v58  ;;  %v3207_v6 = vadd.f32 %v3481_v43, %v3206_v47 }
 0xf91   : > { %v4008_v37 = vpop.f32.mrf.mxu0 }
 0xf92   : > { %v3504_v40 = vpack.c.bf16 %v3239_v62, %v3239_v62  ;;  %v3237_v56 = vadd.f32 %v3207_v6, %v5118_v39  ;;  %v3218_v19 = vadd.f32 %v4008_v37, %v3481_v43 }
 0xf93   : > { %v3209_v8 = vpop.f32.mrf.mxu0 }
 0xf94   : > { %3280 = vst.msk [vmem:[%s5306_s18 + $0x8] sm:$0xf] %vm3277_vm4, %v3504_v40  ;;  %v3502_v58 = vpack.c.bf16 %v3237_v56, %v3237_v56  ;;  %v3240_v63 = vadd.f32 %v3218_v19, %v5128_v61  ;;  %v3210_v53 = vadd.f32 %v3481_v43, %v3209_v8 }
 0xf95   : > { %v4011_v9 = vpop.f32.mrf.mxu0 }
 0xf96   : > { %3278 = vst.msk [vmem:[%s5306_s18] sm:$0xf] %vm3277_vm4, %v3502_v58  ;;  %v3505_v32 = vpack.c.bf16 %v3240_v63, %v3240_v63  ;;  %v3238_v26 = vadd.f32 %v3210_v53, %v5126_v48  ;;  %v3231_v59 = vadd.f32 %v4011_v9, %v3481_v43 }
 0xf97   : > { %v3222_v57 = vpop.f32.mrf.mxu0 }
 0xf98   : > { %3281 = vst.msk [vmem:[%s5306_s18 + $0xc] sm:$0xf] %vm3277_vm4, %v3505_v32  ;;  %v3503_v39 = vpack.c.bf16 %v3238_v26, %v3238_v26  ;;  %v3243_v27 = vadd.f32 %v3231_v59, %v5140_v35  ;;  %v3223_v33 = vadd.f32 %v3481_v43, %v3222_v57 }
 0xf99   : > { %v4012_v61 = vpop.f32.mrf.mxu0 }
 0xf9a   : > { %3279 = vst.msk [vmem:[%s5306_s18 + $0x4] sm:$0xf] %vm3277_vm4, %v3503_v39  ;;  %v3508_v4 = vpack.c.bf16 %v3243_v27, %v3243_v27  ;;  %v3241_v28 = vadd.f32 %v3223_v33, %v5136_v7  ;;  %v3234_v0 = vadd.f32 %v4012_v61, %v3481_v43 }
 0xf9b   : > { %v3225_v29 = vpop.f32.mrf.mxu0 }
 0xf9c   : > { %3284 = vst.msk [vmem:[%s5306_s18 + $0x18] sm:$0xf] %vm3277_vm4, %v3508_v4  ;;  %v3506_v48 = vpack.c.bf16 %v3241_v28, %v3241_v28  ;;  %v3244_v44 = vadd.f32 %v3234_v0, %v5148_v41  ;;  %v3226_v52 = vadd.f32 %v3481_v43, %v3225_v29 }
 0xf9e   : > { %3282 = vst.msk [vmem:[%s5306_s18 + $0x10] sm:$0xf] %vm3277_vm4, %v3506_v48  ;;  %v3509_v30 = vpack.c.bf16 %v3244_v44, %v3244_v44  ;;  %v3242_v35 = vadd.f32 %v3226_v52, %v5146_v10 }
 0xfa0   : > { %3285 = vst.msk [vmem:[%s5306_s18 + $0x1c] sm:$0xf] %vm3277_vm4, %v3509_v30  ;;  %v3507_v12 = vpack.c.bf16 %v3242_v35, %v3242_v35 }
 0xfa2   : > { %3283 = vst.msk [vmem:[%s5306_s18 + $0x14] sm:$0xf] %vm3277_vm4, %v3507_v12 }
 0xfa3 PF: > { %s24_s29 = sadd.s32 1, %s4246_s29  }
 0xfa4   : > { %p21_p4 = scmp.ge.s32.totalorder %s24_s29, 4  }
 0xfa6   :  { %23 = sbr.rel (!%p21_p4) target bundleno = 1 (0x1), region = 106 }

// kernel: _lambda_.8
= control target key start
LH: loop header
LB: loop body
LE: loop exit
PB: predicated region body
PF: predicated region fallthrough
CT: control target
= control target key end

     0   :  { %s995_s12 = smov 0   ;;  %s1118_s0 = inlined_call_operand.vmem [shape: bf16[2,80,96], index: 0, kind: input, shape index: {}]   ;;  %s1119_s1 = inlined_call_operand.vmem [shape: bf16[3,96,16], index: 1, kind: input, shape index: {}]   ;;  %s1120_s2 = inlined_call_operand.vmem [shape: f32[1,16], index: 2, kind: input, shape index: {}]   ;;  %s1121_s3 = inlined_call_operand.vmem [shape: bf16[2,64,16], index: 3, kind: output, shape index: {}]  }
   0x1 LB: > { %s732_s13 = sadd.s32 4294967295, %s973_s12   ;;  %p736_p0 = scmp.ge.s32.totalorder %s973_s12, 1  ;;  %s973_s12 = sphi %s995_s12, %s13_s12  }
   0x2   : > { %p137_p1 = scmp.lt.s32.totalorder %s973_s12, 3 }
   0x4   : > { %p138_p2 = pnand %p736_p0, %p137_p1 }
   0x5   : > { %p161_p3 = scmp.lt.s32.totalorder (!%p138_p2), %s732_s13, 1 }
   0x6   : > { %141 = sbr.rel (%p138_p2) target bundleno = 267 (0x10b), region = 32 }
   0xb   : > { %v937_v0 = vld [vmem:[%s1119_s1 + $0x58] sm:$0xff]   ;;  %v938_v1 = vld [vmem:[%s1119_s1 + $0x28] sm:$0xff]   ;;  %v939_v2 = vld [vmem:[%s1119_s1 + $0x50] sm:$0xff]   ;;  %s1123_s13 = smov (!%p161_p3, %s732_s13), 1  ;;  %vm262_vm0 = vcmask 785408   ;;  %vm668_vm1 = vcmask 125952  }
   0xc   : > { %856 = vmatprep.subr.bf16.mxu0 %v937_v0  ;;  %876 = vmatprep.subr.bf16.mxu1 %v938_v1  ;;  %v940_v3 = vld [vmem:[%s1119_s1 + $0x20] sm:$0xff]   ;;  %v941_v4 = vld [vmem:[%s1119_s1 + $0x48] sm:$0xff]   ;;  %v942_v5 = vld [vmem:[%s1119_s1 + $0x18] sm:$0xff]   ;;  %s928_s26 = smul.u32 40, %s1123_s13  ;;  %s817_s4 = sshll.u32 %s1123_s13, 5 }
   0xd   : > { %857 = vmatpush3.bf16.msra.mxu0 %v937_v0  ;;  %877 = vmatpush3.bf16.msra.mxu1 %v938_v1  ;;  %v943_v6 = vld [vmem:[%s1119_s1 + $0x40] sm:$0xff]   ;;  %v944_v7 = vld [vmem:[%s1119_s1 + $0x10] sm:$0xff]   ;;  %v945_v8 = vld [vmem:[%s1119_s1 + $0x38] sm:$0xff]   ;;  %s1097_s7 = scalar_lea.vmem %s1121_s3, %s817_s4 }
   0xe   : > { %858 = vmatprep.subr.bf16.mxu0 %v939_v2  ;;  %878 = vmatprep.subr.bf16.mxu1 %v940_v3  ;;  %s1033_s6 = scalar_lea.vmem %s1118_s0, %s928_s26  ;;  %v946_v11 = vld [vmem:[%s1119_s1 + $0x8] sm:$0xff]   ;;  %v947_v15 = vld [vmem:[%s1119_s1 + $0x30] sm:$0xff]   ;;  %v948_v16 = vld [vmem:[%s1119_s1] sm:$0xff]  }
   0xf   : > { %v173_v9 = vld [vmem:[%s1033_s6 + $0x4] sm:$0xf]  ;;  %v174_v10 = vld [vmem:[%s1033_s6 + $0x8] sm:$0xf]  ;;  %v172_v13 = vld [vmem:[%s1033_s6] sm:$0xf] }
  0x10   : > { %v752_v12 = vcombine.low %v173_v9, %v174_v10  ;;  %v766_v14 = vcombine.low %v172_v13, %v173_v9  ;;  %v175_v17 = vld [vmem:[%s1033_s6 + $0xc] sm:$0xf]  ;;  %v176_v18 = vld [vmem:[%s1033_s6 + $0x10] sm:$0xf]  ;;  %v177_v20 = vld [vmem:[%s1033_s6 + $0x14] sm:$0xf] }
  0x11   : > { %859 = vmatpush3.bf16.msra.mxu0 %v939_v2  ;;  %879 = vmatpush3.bf16.msra.mxu1 %v940_v3  ;;  %v953_v19 = vld [vmem:[%s1119_s1 + $0x88] sm:$0xff]   ;;  %v753_v21 = vcombine.low %v175_v17, %v176_v18  ;;  %v178_v22 = vld [vmem:[%s1033_s6 + $0x18] sm:$0xf]  ;;  %v767_v23 = vcombine.low %v174_v10, %v175_v17  ;;  %v954_v24 = vld [vmem:[%s1119_s1 + $0x80] sm:$0xff]   ;;  %v768_v26 = vcombine.low %v176_v18, %v177_v20 }
  0x12   : > { %860 = vmatprep.subr.bf16.mxu0 %v941_v4  ;;  %880 = vmatprep.subr.bf16.mxu1 %v942_v5  ;;  %v754_v25 = vcombine.low %v177_v20, %v178_v22  ;;  %v179_v27 = vld [vmem:[%s1033_s6 + $0x1c] sm:$0xf]  ;;  %v192_v28 = vld [vmem:[%s1033_s6 + $0x20] sm:$0xf]  ;;  %v960_v32 = vld [vmem:[%s1119_s1 + $0x70] sm:$0xff]  }
  0x13   : > { %868 = vmatprep.mubr.msk.bf16.mxu0 %vm262_vm0, %v752_v12  ;;  %888 = vmatprep.mubr.msk.bf16.mxu1 %vm262_vm0, %v766_v14  ;;  %v955_v29 = vld [vmem:[%s1119_s1 + $0x78] sm:$0xff]   ;;  %v755_v30 = vcombine.low %v179_v27, %v192_v28  ;;  %v769_v31 = vcombine.low %v178_v22, %v179_v27  ;;  %v963_v33 = vld [vmem:[%s1033_s6 + $0x8] sm:$0xff]   ;;  %v962_v36 = vld [vmem:[%s1119_s1 + $0x60] sm:$0xff]  }
  0x14   : > { %v964_v34 = vld [vmem:[%s1033_s6 + $0x18] sm:$0xff]   ;;  %v961_v35 = vld [vmem:[%s1119_s1 + $0x68] sm:$0xff]   ;;  %v965_v37 = vld [vmem:[%s1033_s6 + $0x10] sm:$0xff]  }
  0x15   : > { %861 = vmatpush3.bf16.msra.mxu0 %v941_v4  ;;  %881 = vmatpush3.bf16.msra.mxu1 %v942_v5  ;;  %v966_v38 = vld [vmem:[%s1033_s6 + $0x20] sm:$0xff]  }
  0x16   : > { %862 = vmatprep.subr.bf16.mxu0 %v943_v6  ;;  %882 = vmatprep.subr.bf16.mxu1 %v944_v7  ;;  %v806_v58 = vld [vmem:[%s1120_s2] ss:$0 sm:$0xff] }
  0x19   : > { %863 = vmatpush3.bf16.msra.mxu0 %v943_v6  ;;  %883 = vmatpush3.bf16.msra.mxu1 %v944_v7 }
  0x1a   : > { %864 = vmatprep.subr.bf16.mxu0 %v945_v8  ;;  %884 = vmatprep.subr.bf16.mxu1 %v946_v11 }
  0x1d   : > { %865 = vmatpush3.bf16.msra.mxu0 %v945_v8  ;;  %885 = vmatpush3.bf16.msra.mxu1 %v946_v11 }
  0x1e   : > { %866 = vmatprep.subr.bf16.mxu0 %v947_v15  ;;  %886 = vmatprep.subr.bf16.mxu1 %v948_v16 }
  0x21   : > { %867 = vmatpush3.bf16.msra.mxu0 %v947_v15  ;;  %887 = vmatpush3.bf16.msra.mxu1 %v948_v16 }
  0x22   : > { %896 = vmatprep.subr.bf16.mxu0 %v953_v19  ;;  %916 = vmatprep.subr.bf16.mxu1 %v953_v19 }
  0x24   : > { %869 = vmatmul.mubr.msk.bf16.vlgmr.msra.gmra.mxu0 %vm262_vm0, %v753_v21  ;;  %889 = vmatmul.mubr.msk.bf16.vlgmr.msra.gmra.mxu1 %vm262_vm0, %v767_v23 }
  0x25   : > { %897 = vmatpush3.bf16.msra.mxu0 %v953_v19  ;;  %922 = vmatpush3.bf16.msra.mxu1 %v953_v19 }
  0x26   : > { %898 = vmatprep.subr.bf16.mxu0 %v954_v24  ;;  %917 = vmatprep.subr.bf16.mxu1 %v954_v24 }
  0x27   : > { %872 = vmatprep.mubr.msk.bf16.mxu0 %vm262_vm0, %v754_v25  ;;  %892 = vmatprep.mubr.msk.bf16.mxu1 %vm262_vm0, %v768_v26 }
  0x29   : > { %899 = vmatpush3.bf16.msra.mxu0 %v954_v24  ;;  %923 = vmatpush3.bf16.msra.mxu1 %v954_v24 }
  0x2a   : > { %900 = vmatprep.subr.bf16.mxu0 %v955_v29  ;;  %918 = vmatprep.subr.bf16.mxu1 %v955_v29 }
  0x2c   : > { %873 = vmatmul.mubr.msk.bf16.gmra.mxu0 %vm262_vm0, %v755_v30  ;;  %893 = vmatmul.mubr.msk.bf16.gmra.mxu1 %vm262_vm0, %v769_v31 }
  0x2d   : > { %901 = vmatpush3.bf16.msra.mxu0 %v955_v29  ;;  %924 = vmatpush3.bf16.msra.mxu1 %v955_v29 }
  0x2e   : > { %902 = vmatprep.subr.bf16.mxu0 %v960_v32  ;;  %919 = vmatprep.subr.bf16.mxu1 %v960_v32 }
  0x2f   : > { %908 = vmatprep.mubr.msk.bf16.mxu0 %vm262_vm0, %v963_v33  ;;  %912 = vmatprep.mubr.msk.bf16.mxu1 %vm262_vm0, %v964_v34 }
  0x31   : > { %903 = vmatpush3.bf16.msra.mxu0 %v960_v32  ;;  %925 = vmatpush3.bf16.msra.mxu1 %v960_v32 }
  0x32   : > { %904 = vmatprep.subr.bf16.mxu0 %v961_v35  ;;  %920 = vmatprep.subr.bf16.mxu1 %v961_v35 }
  0x35   : > { %905 = vmatpush3.bf16.msra.mxu0 %v961_v35  ;;  %926 = vmatpush3.bf16.msra.mxu1 %v961_v35 }
  0x36   : > { %906 = vmatprep.subr.bf16.mxu0 %v962_v36  ;;  %921 = vmatprep.subr.bf16.mxu1 %v962_v36 }
  0x39   : > { %907 = vmatpush3.bf16.msra.mxu0 %v962_v36  ;;  %927 = vmatpush3.bf16.msra.mxu1 %v962_v36 }
  0x3c   : > { %909 = vmatmul.mubr.msk.bf16.vlgmr.msra.gmra.mxu0 %vm262_vm0, %v965_v37  ;;  %913 = vmatmul.mubr.msk.bf16.vlgmr.msra.gmra.mxu1 %vm262_vm0, %v966_v38 }
  0xe4   : > { %v870_v39 = vpop.f32.mrf.mxu0  ;;  %v890_v40 = vpop.f32.mrf.mxu1 }
  0xe5   : > { %v437_v54 = vadd.f32 %v890_v40, %v870_v39 }
  0xe6   : > { %v309_v41 = vpop.f32.mrf.mxu0  ;;  %v428_v42 = vpop.f32.mrf.mxu1 }
  0xe7   : > { %v429_v59 = vadd.f32 %v428_v42, %v309_v41 }
  0xe8   : > { %v871_v43 = vpop.f32.mrf.mxu0  ;;  %v891_v44 = vpop.f32.mrf.mxu1 }
  0xe9   : > { %v440_v1 = vadd.f32 %v891_v44, %v871_v43 }
  0xea   : > { %v312_v45 = vpop.f32.mrf.mxu0  ;;  %v431_v46 = vpop.f32.mrf.mxu1 }
  0xeb   : > { %v432_v9 = vadd.f32 %v431_v46, %v312_v45 }
  0xec   : > { %v874_v47 = vpop.f32.mrf.mxu0  ;;  %v894_v48 = vpop.f32.mrf.mxu1 }
  0xed   : > { %v453_v56 = vadd.f32 %v894_v48, %v874_v47 }
  0xee   : > { %v325_v49 = vpop.f32.mrf.mxu0  ;;  %v444_v50 = vpop.f32.mrf.mxu1 }
  0xef   : > { %v445_v62 = vadd.f32 %v444_v50, %v325_v49 }
  0xf0   : > { %v875_v51 = vpop.f32.mrf.mxu0  ;;  %v895_v52 = vpop.f32.mrf.mxu1 }
  0xf1   : > { %v456_v5 = vadd.f32 %v895_v52, %v875_v51 }
  0xf2   : > { %v328_v53 = vpop.f32.mrf.mxu0  ;;  %v447_v55 = vpop.f32.mrf.mxu1 }
  0xf3   : > { %v448_v14 = vadd.f32 %v447_v55, %v328_v53 }
  0xfc   : > { %v910_v57 = vpop.f32.mrf.mxu0  ;;  %v914_v61 = vpop.f32.mrf.mxu1 }
  0xfd   : > { %v615_v60 = vadd.f32 %v910_v57, %v437_v54  ;;  %v619_v63 = vadd.f32 %v914_v61, %v453_v56 }
  0xfe   : > { %v582_v0 = vpop.f32.mrf.mxu0  ;;  %v598_v4 = vpop.f32.mrf.mxu1 }
  0xff   : > { %v630_v2 = vadd.f32 %v806_v58, %v615_v60  ;;  %v613_v3 = vadd.f32 %v582_v0, %v429_v59  ;;  %v634_v6 = vadd.f32 %v806_v58, %v619_v63  ;;  %v617_v7 = vadd.f32 %v598_v4, %v445_v62 }
 0x100   : > { %v911_v8 = vpop.f32.mrf.mxu0  ;;  %v915_v13 = vpop.f32.mrf.mxu1 }
 0x101   : > { %v820_v10 = vpack.c.bf16 %v630_v2, %v630_v2  ;;  %v628_v11 = vadd.f32 %v806_v58, %v613_v3  ;;  %v616_v12 = vadd.f32 %v911_v8, %v440_v1  ;;  %v824_v15 = vpack.c.bf16 %v634_v6, %v634_v6 }
 0x102   : > { %v632_v16 = vadd.f32 %v806_v58, %v617_v7  ;;  %v620_v17 = vadd.f32 %v915_v13, %v456_v5  ;;  %v585_v18 = vpop.f32.mrf.mxu0  ;;  %v601_v22 = vpop.f32.mrf.mxu1 }
 0x103   : > { %671 = vst.msk [vmem:[%s1097_s7 + $0x8] sm:$0xf] %vm668_vm1, %v820_v10  ;;  %v818_v19 = vpack.c.bf16 %v628_v11, %v628_v11  ;;  %v631_v20 = vadd.f32 %v806_v58, %v616_v12  ;;  %v614_v21 = vadd.f32 %v585_v18, %v432_v9  ;;  %675 = vst.msk [vmem:[%s1097_s7 + $0x18] sm:$0xf] %vm668_vm1, %v824_v15 }
 0x104   : > { %v822_v23 = vpack.c.bf16 %v632_v16, %v632_v16  ;;  %v635_v24 = vadd.f32 %v806_v58, %v620_v17  ;;  %v618_v25 = vadd.f32 %v601_v22, %v448_v14 }
 0x105   : > { %669 = vst.msk [vmem:[%s1097_s7] sm:$0xf] %vm668_vm1, %v818_v19  ;;  %v821_v26 = vpack.c.bf16 %v631_v20, %v631_v20  ;;  %v629_v27 = vadd.f32 %v806_v58, %v614_v21 }
 0x106   : > { %673 = vst.msk [vmem:[%s1097_s7 + $0x10] sm:$0xf] %vm668_vm1, %v822_v23  ;;  %v825_v28 = vpack.c.bf16 %v635_v24, %v635_v24  ;;  %v633_v29 = vadd.f32 %v806_v58, %v618_v25 }
 0x107   : > { %672 = vst.msk [vmem:[%s1097_s7 + $0xc] sm:$0xf] %vm668_vm1, %v821_v26  ;;  %v819_v30 = vpack.c.bf16 %v629_v27, %v629_v27 }
 0x108   : > { %676 = vst.msk [vmem:[%s1097_s7 + $0x1c] sm:$0xf] %vm668_vm1, %v825_v28  ;;  %v823_v31 = vpack.c.bf16 %v633_v29, %v633_v29 }
 0x109   : > { %670 = vst.msk [vmem:[%s1097_s7 + $0x4] sm:$0xf] %vm668_vm1, %v819_v30 }
 0x10a   : > { %674 = vst.msk [vmem:[%s1097_s7 + $0x14] sm:$0xf] %vm668_vm1, %v823_v31 }
 0x10b PF: > { %s13_s12 = sadd.s32 1, %s973_s12  }
 0x10c   : > { %p10_p4 = scmp.ge.s32.totalorder %s13_s12, 4  }
 0x10e   :  { %12 = sbr.rel (!%p10_p4) target bundleno = 1 (0x1), region = 64 }

// kernel: _lambda_.7
= control target key start
LH: loop header
LB: loop body
LE: loop exit
PB: predicated region body
PF: predicated region fallthrough
CT: control target
= control target key end

     0   :  { %s4502_s18 = smov 0   ;;  %s5540_s0 = inlined_call_operand.vmem [shape: bf16[2,64,32], index: 0, kind: input, shape index: {}]   ;;  %s5541_s1 = inlined_call_operand.vmem [shape: f32[1,32], index: 1, kind: input, shape index: {}, may-alias: {1,7,13}]   ;;  %s5542_s2 = inlined_call_operand.vmem [shape: f32[1,32], index: 2, kind: input, shape index: {}, may-alias: {2,6,8,12,14}]   ;;  %s5543_s3 = inlined_call_operand.vmem [shape: bf16[32,96], index: 3, kind: input, shape index: {}]   ;;  %s5544_s4 = inlined_call_operand.vmem [shape: f32[1,96], index: 4, kind: input, shape index: {}]   ;;  %s5545_s5 = inlined_call_operand.vmem [shape: bf16[32,32], index: 5, kind: input, shape index: {}]   ;;  %s5546_s6 = inlined_call_operand.vmem [shape: f32[1,32], index: 6, kind: input, shape index: {}, may-alias: {2,6,8,12,14}]   ;;  %s5547_s7 = inlined_call_operand.vmem [shape: f32[1,32], index: 7, kind: input, shape index: {}, may-alias: {1,7,13}]   ;;  %s5548_s8 = inlined_call_operand.vmem [shape: f32[1,32], index: 8, kind: input, shape index: {}, may-alias: {2,6,8,12,14}]   ;;  %s5549_s9 = inlined_call_operand.vmem [shape: bf16[32,128], index: 9, kind: input, shape index: {}]   ;;  %s5550_s10 = inlined_call_operand.vmem [shape: f32[1,128], index: 10, kind: input, shape index: {}]   ;;  %s5551_s11 = inlined_call_operand.vmem [shape: bf16[128,32], index: 11, kind: input, shape index: {}]   ;;  %s5552_s12 = inlined_call_operand.vmem [shape: f32[1,32], index: 12, kind: input, shape index: {}, may-alias: {2,6,8,12,14}]   ;;  %s5553_s13 = inlined_call_operand.vmem [shape: f32[1,32], index: 13, kind: input, shape index: {}, may-alias: {1,7,13}]   ;;  %s5554_s14 = inlined_call_operand.vmem [shape: f32[1,32], index: 14, kind: input, shape index: {}, may-alias: {2,6,8,12,14}]   ;;  %s5555_s15 = inlined_call_operand.vmem [shape: bf16[2,64,32], index: 15, kind: output, shape index: {}]  }
   0x1 LB: > { %s3486_s19 = sadd.s32 4294967295, %s4409_s18   ;;  %p3490_p0 = scmp.ge.s32.totalorder %s4409_s18, 1  ;;  %s4409_s18 = sphi %s4502_s18, %s25_s18  }
   0x2   : > { %p437_p1 = scmp.lt.s32.totalorder %s4409_s18, 3 }
   0x4   : > { %p438_p2 = pnand %p3490_p0, %p437_p1 }
   0x5   : > { %p485_p3 = scmp.lt.s32.totalorder (!%p438_p2), %s3486_s19, 1  ;;  %s4411_s22 = smov (!%p438_p2), 96  }
   0x6   : > { %441 = sbr.rel (%p438_p2) target bundleno = 4313 (0x10d9), region = 80  ;;  %s4413_s24 = smov (!%p438_p2), 88  }
   0x7   : > { %s4414_s25 = smov (!%p438_p2), 120   ;;  %s4415_s26 = smov (!%p438_p2), 56  }
   0x8   : > { %s4416_s29 = smov (!%p438_p2), 80   ;;  %s4417_s30 = smov (!%p438_p2), 112  }
   0x9   : > { %s4418_s16 = smov (!%p438_p2), 72   ;;  %s4419_s17 = smov (!%p438_p2), 104  }
   0xb   : > { %s5557_s19 = smov (!%p485_p3, %s3486_s19), 1  ;;  %vm514_vm0 = vcmask 261120   ;;  %v4199_v60 = vld [vmem:[%s5543_s3 + $0x8] sm:$0xff]   ;;  %v4200_v61 = vld [vmem:[%s5543_s3] sm:$0xff]   ;;  %vm776_vm1 = vcmask 64512   ;;  %vm922_vm2 = vcmask 523264  }
   0xc   : > { %s3647_s20 = sshll.u32 %s5557_s19, 5  ;;  %3848 = vmatprep.subr.bf16.mxu0 %v4199_v60  ;;  %vm1604_vm3 = vcmask 1043456   ;;  %vm3422_vm4 = vcmask 257024  }
   0xd   : > { %s489_s23 = scalar_lea.vmem %s5540_s0, %s3647_s20  ;;  %3849 = vmatpush3.bf16.msra.mxu0 %v4199_v60 }
   0xe   : > { %v3658_v0 = vld [vmem:[%s489_s23] sm:$0xff]   ;;  %v3673_v1 = vld [vmem:[%s489_s23 + $0x8] sm:$0xff]   ;;  %v3674_v6 = vld [vmem:[%s489_s23 + $0x10] sm:$0xff]   ;;  %3850 = vmatprep.subr.bf16.mxu0 %v4200_v61 }
   0xf   : > { %v4518_v2 = vunpack.c.l.bf16 %v3658_v0  ;;  %v4520_v3 = vunpack.c.l.bf16 %v3673_v1  ;;  %v4522_v4 = vunpack.c.h.bf16 %v3658_v0  ;;  %v4524_v5 = vunpack.c.h.bf16 %v3673_v1  ;;  %v3675_v13 = vld [vmem:[%s489_s23 + $0x18] sm:$0xff]   ;;  %s4412_s23 = smov 64  }
  0x10   : > { %v4534_v11 = vunpack.c.l.bf16 %v3674_v6  ;;  %v4536_v12 = vunpack.c.h.bf16 %v3674_v6  ;;  %v4542_v16 = vunpack.c.l.bf16 %v3675_v13  ;;  %v4544_v17 = vunpack.c.h.bf16 %v3675_v13 }
  0x11   : > { %v515_v7 = vsel %vm514_vm0, %v4518_v2, 0.0  ;;  %v521_v8 = vsel %vm514_vm0, %v4520_v3, 0.0  ;;  %v518_v9 = vsel %vm514_vm0, %v4522_v4, 0.0  ;;  %v524_v10 = vsel %vm514_vm0, %v4524_v5, 0.0  ;;  %3851 = vmatpush3.bf16.msra.mxu0 %v4200_v61 }
  0x12   : > { %516 = vadd.xlane.f32.xlu0 %v515_v7  ;;  %522 = vadd.xlane.f32.xlu1 %v521_v8  ;;  %v527_v14 = vsel %vm514_vm0, %v4534_v11, 0.0  ;;  %v530_v15 = vsel %vm514_vm0, %v4536_v12, 0.0  ;;  %v533_v18 = vsel %vm514_vm0, %v4542_v16, 0.0  ;;  %v536_v19 = vsel %vm514_vm0, %v4544_v17, 0.0 }
  0x16   : > { %519 = vadd.xlane.f32.xlu0 %v518_v9  ;;  %525 = vadd.xlane.f32.xlu1 %v524_v10 }
  0x1a   : > { %528 = vadd.xlane.f32.xlu0 %v527_v14  ;;  %531 = vadd.xlane.f32.xlu1 %v530_v15 }
  0x1e   : > { %534 = vadd.xlane.f32.xlu0 %v533_v18  ;;  %537 = vadd.xlane.f32.xlu1 %v536_v19 }
  0x9b   : > { %v517_v20 = vpop.xlane.xlu0 %516  ;;  %v523_v21 = vpop.xlane.xlu1 %522 }
  0x9c   : > { %v540_v22 = vmul.f32 0.03125, %v517_v20  ;;  %v542_v23 = vmul.f32 0.03125, %v523_v21 }
  0x9e   : > { %v4551_v24 = vsub.f32 %v4518_v2, %v540_v22  ;;  %v4554_v25 = vsub.f32 %v4520_v3, %v542_v23 }
  0x9f   : > { %v520_v26 = vpop.xlane.xlu0 %519  ;;  %v526_v27 = vpop.xlane.xlu1 %525 }
  0xa0   : > { %v541_v28 = vmul.f32 0.03125, %v520_v26  ;;  %v543_v29 = vmul.f32 0.03125, %v526_v27  ;;  %v556_v30 = vmul.f32 %v4551_v24, %v4551_v24  ;;  %v558_v31 = vmul.f32 %v4554_v25, %v4554_v25 }
  0xa2   : > { %v4561_v32 = vsub.f32 %v4522_v4, %v541_v28  ;;  %v4564_v33 = vsub.f32 %v4524_v5, %v543_v29  ;;  %v564_v34 = vsel %vm514_vm0, %v556_v30, 0.0  ;;  %v570_v37 = vsel %vm514_vm0, %v558_v31, 0.0 }
  0xa3   : > { %565 = vadd.xlane.f32.xlu0 %v564_v34  ;;  %v529_v35 = vpop.xlane.xlu0 %528  ;;  %v532_v36 = vpop.xlane.xlu1 %531 }
  0xa4   : > { %v544_v38 = vmul.f32 0.03125, %v529_v35  ;;  %v545_v39 = vmul.f32 0.03125, %v532_v36  ;;  %v557_v40 = vmul.f32 %v4561_v32, %v4561_v32  ;;  %v559_v41 = vmul.f32 %v4564_v33, %v4564_v33  ;;  %v3495_v36 = vld [vmem:[%s5541_s1] ss:$0 sm:$0xff] }
  0xa6   : > { %v4573_v42 = vsub.f32 %v4534_v11, %v544_v38  ;;  %v4576_v43 = vsub.f32 %v4536_v12, %v545_v39  ;;  %v567_v44 = vsel %vm514_vm0, %v557_v40, 0.0  ;;  %v573_v47 = vsel %vm514_vm0, %v559_v41, 0.0  ;;  %v3496_v41 = vld [vmem:[%s5542_s2] ss:$0 sm:$0xff] }
  0xa7   : > { %571 = vadd.xlane.f32.xlu0 %v570_v37  ;;  %568 = vadd.xlane.f32.xlu1 %v567_v44  ;;  %v535_v45 = vpop.xlane.xlu0 %534  ;;  %v538_v46 = vpop.xlane.xlu1 %537 }
  0xa8   : > { %v546_v48 = vmul.f32 0.03125, %v535_v45  ;;  %v547_v49 = vmul.f32 0.03125, %v538_v46  ;;  %v560_v50 = vmul.f32 %v4573_v42, %v4573_v42  ;;  %v561_v51 = vmul.f32 %v4576_v43, %v4576_v43 }
  0xaa   : > { %v4585_v52 = vsub.f32 %v4542_v16, %v546_v48  ;;  %v4588_v53 = vsub.f32 %v4544_v17, %v547_v49  ;;  %v576_v54 = vsel %vm514_vm0, %v560_v50, 0.0  ;;  %v579_v55 = vsel %vm514_vm0, %v561_v51, 0.0 }
  0xab   : > { %574 = vadd.xlane.f32.xlu1 %v573_v47  ;;  %577 = vadd.xlane.f32.xlu0 %v576_v54 }
  0xac   : > { %v562_v56 = vmul.f32 %v4585_v52, %v4585_v52  ;;  %v563_v57 = vmul.f32 %v4588_v53, %v4588_v53 }
  0xae   : > { %v582_v58 = vsel %vm514_vm0, %v562_v56, 0.0  ;;  %v585_v59 = vsel %vm514_vm0, %v563_v57, 0.0 }
  0xaf   : > { %580 = vadd.xlane.f32.xlu1 %v579_v55  ;;  %583 = vadd.xlane.f32.xlu0 %v582_v58 }
  0xb3   : > { %586 = vadd.xlane.f32.xlu1 %v585_v59 }
 0x12c   : > { %v566_v62 = vpop.xlane.xlu0 %565 }
 0x12d   : > { %v588_v63 = vmul.f32 0.03125, %v566_v62 }
 0x12f   : > { %v596_v0 = vadd.f32 1e-06, %v588_v63 }
 0x130   : > { %v569_v1 = vpop.xlane.xlu1 %568  ;;  %v572_v6 = vpop.xlane.xlu0 %571 }
 0x131   : > { %4211 = vrsqrt.f32 %v596_v0  ;;  %v589_v7 = vmul.f32 0.03125, %v569_v1  ;;  %v590_v8 = vmul.f32 0.03125, %v572_v6 }
 0x133   : > { %v597_v9 = vadd.f32 1e-06, %v589_v7  ;;  %v598_v10 = vadd.f32 1e-06, %v590_v8 }
 0x134   : > { %v575_v13 = vpop.xlane.xlu1 %574  ;;  %v578_v14 = vpop.xlane.xlu0 %577 }
 0x135   : > { %4213 = vrsqrt.f32 %v597_v9  ;;  %v591_v15 = vmul.f32 0.03125, %v575_v13  ;;  %v592_v18 = vmul.f32 0.03125, %v578_v14 }
 0x136   : > { %4215 = vrsqrt.f32 %v598_v10  ;;  %v3497_v10 = vld [vmem:[%s5544_s4] ss:$0 sm:$0xff] }
 0x137   : > { %v599_v19 = vadd.f32 1e-06, %v591_v15  ;;  %v600_v20 = vadd.f32 1e-06, %v592_v18 }
 0x138   : > { %v581_v21 = vpop.xlane.xlu1 %580  ;;  %v584_v22 = vpop.xlane.xlu0 %583 }
 0x139   : > { %4217 = vrsqrt.f32 %v599_v19  ;;  %v593_v23 = vmul.f32 0.03125, %v581_v21  ;;  %v594_v26 = vmul.f32 0.03125, %v584_v22 }
 0x13a   : > { %4219 = vrsqrt.f32 %v600_v20 }
 0x13b   : > { %v601_v27 = vadd.f32 1e-06, %v593_v23  ;;  %v602_v28 = vadd.f32 1e-06, %v594_v26 }
 0x13c   : > { %v587_v29 = vpop.xlane.xlu1 %586 }
 0x13d   : > { %4221 = vrsqrt.f32 %v601_v27  ;;  %v595_v30 = vmul.f32 0.03125, %v587_v29 }
 0x13e   : > { %v4212_v31 = vpop.eup %4211  ;;  %4223 = vrsqrt.f32 %v602_v28 }
 0x13f   : > { %v603_v34 = vadd.f32 1e-06, %v595_v30  ;;  %v612_v35 = vmul.f32 %v4212_v31, %v4551_v24 }
 0x141   : > { %4225 = vrsqrt.f32 %v603_v34  ;;  %v626_v40 = vmul.f32 %v3495_v36, %v612_v35 }
 0x142   : > { %v4214_v37 = vpop.eup %4213 }
 0x143   : > { %v4216_v38 = vpop.eup %4215  ;;  %v613_v39 = vmul.f32 %v4214_v37, %v4561_v32  ;;  %v640_v24 = vadd.f32 %v3496_v41, %v626_v40 }
 0x144   : > { %v614_v44 = vmul.f32 %v4216_v38, %v4554_v25 }
 0x145   : > { %v627_v45 = vmul.f32 %v3495_v36, %v613_v39 }
 0x146   : > { %v4218_v46 = vpop.eup %4217  ;;  %v628_v50 = vmul.f32 %v3495_v36, %v614_v44 }
 0x147   : > { %v4220_v47 = vpop.eup %4219  ;;  %v641_v48 = vadd.f32 %v3496_v41, %v627_v45  ;;  %v615_v49 = vmul.f32 %v4218_v46, %v4564_v33 }
 0x148   : > { %v616_v51 = vmul.f32 %v4220_v47, %v4573_v42  ;;  %v642_v57 = vadd.f32 %v3496_v41, %v628_v50 }
 0x149   : > { %v648_v54 = vpack.c.bf16 %v641_v48, %v640_v24  ;;  %v629_v55 = vmul.f32 %v3495_v36, %v615_v49 }
 0x14a   : > { %v4222_v32 = vpop.eup %4221  ;;  %v630_v59 = vmul.f32 %v3495_v36, %v616_v51 }
 0x14b   : > { %v4224_v56 = vpop.eup %4223  ;;  %3852 = vmatprep.mubr.msk.bf16.mxu0 %vm514_vm0, %v648_v54  ;;  %v643_v58 = vadd.f32 %v3496_v41, %v629_v55  ;;  %v617_v25 = vmul.f32 %v4222_v32, %v4576_v43 }
 0x14c   : > { %v618_v60 = vmul.f32 %v4224_v56, %v4585_v52  ;;  %v644_v33 = vadd.f32 %v3496_v41, %v630_v59 }
 0x14d   : > { %v649_v61 = vpack.c.bf16 %v643_v58, %v642_v57  ;;  %v631_v62 = vmul.f32 %v3495_v36, %v617_v25 }
 0x14e   : > { %v4226_v63 = vpop.eup %4225  ;;  %v632_v1 = vmul.f32 %v3495_v36, %v618_v60 }
 0x14f   : > { %3853 = vmatmul.mubr.msk.bf16.vlgmr.msra.gmra.mxu0 %vm514_vm0, %v649_v61  ;;  %v645_v42 = vadd.f32 %v3496_v41, %v631_v62  ;;  %v619_v0 = vmul.f32 %v4226_v63, %v4588_v53 }
 0x150   : > { %v646_v8 = vadd.f32 %v3496_v41, %v632_v1 }
 0x151   : > { %v650_v6 = vpack.c.bf16 %v645_v42, %v644_v33  ;;  %v633_v7 = vmul.f32 %v3495_v36, %v619_v0 }
 0x153   : > { %3856 = vmatprep.mubr.msk.bf16.mxu0 %vm514_vm0, %v650_v6  ;;  %v647_v9 = vadd.f32 %v3496_v41, %v633_v7 }
 0x155   : > { %v651_v43 = vpack.c.bf16 %v647_v9, %v646_v8 }
 0x157   : > { %3857 = vmatmul.mubr.msk.bf16.gmra.mxu0 %vm514_vm0, %v651_v43 }
 0x20f   : > { %v3854_v52 = vpop.f32.mrf.mxu0 }
 0x210   : > { %v4646_v30 = vadd.f32 %v3854_v52, %v3497_v10 }
 0x211   : > { %v721_v13 = vpop.f32.mrf.mxu0 }
 0x212   : > { %v4625_v14 = vadd.f32 %v3497_v10, %v721_v13 }
 0x213   : > { %v3855_v53 = vpop.f32.mrf.mxu0 }
 0x214   : > { %3876 = vmatprep.mubr.msk.f32.mxu1 %vm776_vm1, %v4625_v14  ;;  %v4637_v27 = vadd.f32 %v3855_v53, %v3497_v10 }
 0x215   : > { %v724_v15 = vpop.f32.mrf.mxu0 }
 0x216   : > { %v4643_v29 = vadd.f32 %v3497_v10, %v724_v15 }
 0x217   : > { %v3858_v18 = vpop.f32.mrf.mxu0 }
 0x218   : > { %v4629_v19 = vadd.f32 %v3858_v18, %v3497_v10 }
 0x219   : > { %v737_v20 = vpop.f32.mrf.mxu0 }
 0x21a   : > { %772 = vrot.lane.b32.xlu1 %v4629_v19, %s4411_s22  ;;  %v4640_v28 = vadd.f32 %v3497_v10, %v737_v20 }
 0x21b   : > { %v3859_v21 = vpop.f32.mrf.mxu0 }
 0x21c   : > { %v4632_v22 = vadd.f32 %v3859_v21, %v3497_v10 }
 0x21d   : > { %v740_v23 = vpop.f32.mrf.mxu0 }
 0x21e   : > { %v4634_v26 = vadd.f32 %v3497_v10, %v740_v23  ;;  %774 = vrot.lane.b32.xlu0 %v4632_v22, %s4411_s22 }
 0x220   : > { %770 = vrot.lane.b32.xlu1 %v4634_v26, %s4411_s22 }
 0x222   : > { %766 = vrot.lane.b32.xlu0 %v4637_v27, %s4411_s22 }
 0x224   : > { %768 = vrot.lane.b32.xlu1 %v4640_v28, %s4411_s22 }
 0x226   : > { %762 = vrot.lane.b32.xlu0 %v4643_v29, %s4411_s22 }
 0x228   : > { %764 = vrot.lane.b32.xlu1 %v4646_v30, %s4411_s22 }
 0x22a   : > { %1025 = vrot.lane.b32.xlu0 %v4632_v22, %s4412_s23 }
 0x22c   : > { %760 = vrot.lane.b32.xlu1 %v4625_v14, %s4411_s22 }
 0x22e   : > { %1017 = vrot.lane.b32.xlu0 %v4637_v27, %s4412_s23 }
 0x230   : > { %1023 = vrot.lane.b32.xlu1 %v4629_v19, %s4412_s23 }
 0x232   : > { %1013 = vrot.lane.b32.xlu0 %v4643_v29, %s4412_s23 }
 0x234   : > { %1019 = vrot.lane.b32.xlu1 %v4640_v28, %s4412_s23 }
 0x236   : > { %1199 = vrot.lane.b32.xlu0 %v4632_v22, %s4413_s24 }
 0x238   : > { %1015 = vrot.lane.b32.xlu1 %v4646_v30, %s4412_s23 }
 0x23c   : > { %1011 = vrot.lane.b32.xlu1 %v4625_v14, %s4412_s23 }
 0x240   : > { %1197 = vrot.lane.b32.xlu1 %v4629_v19, %s4413_s24 }
 0x244   : > { %1021 = vrot.lane.b32.xlu1 %v4634_v26, %s4412_s23  ;;  %s4420_s23 = smov 48  }
 0x28c   : > { %v773_v31 = vpop.permute.xlu1 %772 }
 0x290   : > { %v775_v34 = vpop.permute.xlu0 %774 }
 0x291   : > { %3860 = vmatprep.subr.msk.mxu1 %vm776_vm1, %v775_v34 }
 0x292   : > { %3861 = vmatpush3.xpose.msk.msra.mxu1 %vm776_vm1, %v775_v34  ;;  %v771_v35 = vpop.permute.xlu1 %770 }
 0x293   : > { %3862 = vmatprep.subr.msk.mxu1 %vm776_vm1, %v773_v31 }
 0x294   : > { %v767_v36 = vpop.permute.xlu0 %766 }
 0x296   : > { %3863 = vmatpush3.xpose.msk.msra.mxu1 %vm776_vm1, %v773_v31  ;;  %v769_v37 = vpop.permute.xlu1 %768 }
 0x297   : > { %3864 = vmatprep.subr.msk.mxu1 %vm776_vm1, %v771_v35 }
 0x298   : > { %v763_v38 = vpop.permute.xlu0 %762 }
 0x29a   : > { %3865 = vmatpush3.xpose.msk.msra.mxu1 %vm776_vm1, %v771_v35  ;;  %v765_v39 = vpop.permute.xlu1 %764 }
 0x29b   : > { %3866 = vmatprep.subr.msk.mxu1 %vm776_vm1, %v769_v37 }
 0x29c   : > { %v1026_v40 = vpop.permute.xlu0 %1025 }
 0x29d   : > { %3888 = vmatprep.subr.mxu0 %v1026_v40 }
 0x29e   : > { %3867 = vmatpush3.xpose.msk.msra.mxu1 %vm776_vm1, %v769_v37  ;;  %3889 = vmatpush3.msra.mxu0 %v1026_v40  ;;  %v761_v41 = vpop.permute.xlu1 %760 }
 0x29f   : > { %3868 = vmatprep.subr.msk.mxu1 %vm776_vm1, %v767_v36 }
 0x2a0   : > { %v1018_v48 = vpop.permute.xlu0 %1017 }
 0x2a2   : > { %3869 = vmatpush3.xpose.msk.msra.mxu1 %vm776_vm1, %v767_v36  ;;  %v1024_v44 = vpop.permute.xlu1 %1023 }
 0x2a3   : > { %3870 = vmatprep.subr.msk.mxu1 %vm776_vm1, %v765_v39  ;;  %3890 = vmatprep.subr.mxu0 %v1024_v44 }
 0x2a4   : > { %3891 = vmatpush3.msra.mxu0 %v1024_v44  ;;  %v1014_v50 = vpop.permute.xlu0 %1013 }
 0x2a6   : > { %3871 = vmatpush3.xpose.msk.msra.mxu1 %vm776_vm1, %v765_v39  ;;  %v1020_v45 = vpop.permute.xlu1 %1019 }
 0x2a7   : > { %3872 = vmatprep.subr.msk.mxu1 %vm776_vm1, %v763_v38 }
 0x2a8   : > { %v4695_v51 = vpop.permute.xlu0 %1199 }
 0x2aa   : > { %3873 = vmatpush3.xpose.msk.msra.mxu1 %vm776_vm1, %v763_v38  ;;  %v1016_v46 = vpop.permute.xlu1 %1015 }
 0x2ab   : > { %3874 = vmatprep.subr.msk.mxu1 %vm776_vm1, %v761_v41 }
 0x2ae   : > { %3875 = vmatpush3.xpose.msk.msra.mxu1 %vm776_vm1, %v761_v41  ;;  %v1012_v47 = vpop.permute.xlu1 %1011 }
 0x2b1   : > { %3877 = vmatmul.mubr.msk.f32.vlgmr.msra.gmra.mxu1 %vm776_vm1, %v4643_v29 }
 0x2b2   : > { %3879 = vmatprep.mubr.msk.f32.mxu1 %vm776_vm1, %v4646_v30  ;;  %v4683_v24 = vpop.permute.xlu1 %1197 }
 0x2b5   : > { %3880 = vmatmul.mubr.msk.f32.gmra.mxu1 %vm776_vm1, %v4637_v27 }
 0x2b6   : > { %3882 = vmatprep.mubr.msk.f32.mxu1 %vm776_vm1, %v4640_v28  ;;  %v1022_v49 = vpop.permute.xlu1 %1021 }
 0x2b7   : > { %3892 = vmatprep.subr.mxu0 %v1022_v49 }
 0x2b8   : > { %3893 = vmatpush3.msra.mxu0 %v1022_v49 }
 0x2b9   : > { %3883 = vmatmul.mubr.msk.f32.gmra.mxu1 %vm776_vm1, %v4634_v26  ;;  %3894 = vmatprep.subr.mxu0 %v1020_v45 }
 0x2ba   : > { %3885 = vmatprep.mubr.msk.f32.mxu1 %vm776_vm1, %v4629_v19  ;;  %3895 = vmatpush3.msra.mxu0 %v1020_v45 }
 0x2bb   : > { %3896 = vmatprep.subr.mxu0 %v1018_v48 }
 0x2bc   : > { %3897 = vmatpush3.msra.mxu0 %v1018_v48 }
 0x2bd   : > { %3886 = vmatmul.mubr.msk.f32.gmra.mxu1 %vm776_vm1, %v4632_v22  ;;  %3898 = vmatprep.subr.mxu0 %v1016_v46 }
 0x2be   : > { %3899 = vmatpush3.msra.mxu0 %v1016_v46 }
 0x2bf   : > { %3900 = vmatprep.subr.mxu0 %v1014_v50 }
 0x2c0   : > { %3901 = vmatpush3.msra.mxu0 %v1014_v50 }
 0x2c1   : > { %3902 = vmatprep.subr.mxu0 %v1012_v47 }
 0x2c2   : > { %3903 = vmatpush3.msra.mxu0 %v1012_v47 }
 0x2c3   : > { %3916 = vmatprep.subr.msk.mxu0 %vm776_vm1, %v4695_v51 }
 0x371   : > { %v3878_v54 = vpop.f32.mrf.mxu1 }
 0x372   : > { %v915_v55 = vmul.f32 0.35355338, %v3878_v54 }
 0x373   : > { %v875_v32 = vpop.f32.mrf.mxu1 }
 0x374   : > { %v914_v56 = vmul.f32 0.35355338, %v875_v32  ;;  %v926_v57 = vsel %vm922_vm2, %v915_v55, -inf }
 0x375   : > { %927 = vmax.xlane.f32.xlu1 %v926_v57  ;;  %v3881_v58 = vpop.f32.mrf.mxu1 }
 0x376   : > { %v917_v25 = vmul.f32 0.35355338, %v3881_v58  ;;  %v923_v59 = vsel %vm922_vm2, %v914_v56, -inf }
 0x377   : > { %924 = vmax.xlane.f32.xlu0 %v923_v59  ;;  %v885_v60 = vpop.f32.mrf.mxu1 }
 0x378   : > { %v916_v62 = vmul.f32 0.35355338, %v885_v60  ;;  %v932_v33 = vsel %vm922_vm2, %v917_v25, -inf }
 0x379   : > { %v3884_v61 = vpop.f32.mrf.mxu1 }
 0x37a   : > { %v919_v63 = vmul.f32 0.35355338, %v3884_v61  ;;  %v929_v8 = vsel %vm922_vm2, %v916_v62, -inf }
 0x37b   : > { %933 = vmax.xlane.f32.xlu0 %v932_v33  ;;  %v895_v42 = vpop.f32.mrf.mxu1 }
 0x37c   : > { %v938_v0 = vsel %vm922_vm2, %v919_v63, -inf  ;;  %v918_v6 = vmul.f32 0.35355338, %v895_v42 }
 0x37d   : > { %939 = vmax.xlane.f32.xlu1 %v938_v0  ;;  %v3887_v1 = vpop.f32.mrf.mxu1 }
 0x37e   : > { %v921_v7 = vmul.f32 0.35355338, %v3887_v1  ;;  %v935_v10 = vsel %vm922_vm2, %v918_v6, -inf }
 0x37f   : > { %930 = vmax.xlane.f32.xlu0 %v929_v8  ;;  %v905_v9 = vpop.f32.mrf.mxu1 }
 0x380   : > { %v944_v43 = vsel %vm922_vm2, %v921_v7, -inf  ;;  %v920_v52 = vmul.f32 0.35355338, %v905_v9 }
 0x381   : > { %945 = vmax.xlane.f32.xlu1 %v944_v43 }
 0x382   : > { %v941_v13 = vsel %vm922_vm2, %v920_v52, -inf }
 0x383   : > { %936 = vmax.xlane.f32.xlu0 %v935_v10 }
 0x387   : > { %942 = vmax.xlane.f32.xlu0 %v941_v13 }
 0x392   : > { %1193 = vrot.lane.b32.xlu1 %v4640_v28, %s4413_s24 }
 0x39d   : > { %1195 = vrot.lane.b32.xlu0 %v4634_v26, %s4413_s24 }
 0x3fe   : > { %v928_v53 = vpop.xlane.xlu1 %927 }
 0x3ff   : > { %v948_v15 = vsub.f32 %v915_v55, %v928_v53 }
 0x400   : > { %v925_v18 = vpop.xlane.xlu0 %924 }
 0x401   : > { %v957_v20 = vmul.f32 1.442695, %v948_v15  ;;  %v947_v21 = vsub.f32 %v914_v56, %v925_v18 }
 0x403   : > { %4227 = vpow2.f32 %v957_v20  ;;  %v955_v23 = vmul.f32 1.442695, %v947_v21 }
 0x404   : > { %v934_v37 = vpop.xlane.xlu0 %933 }
 0x405   : > { %4229 = vpow2.f32 %v955_v23  ;;  %v950_v40 = vsub.f32 %v917_v25, %v934_v37 }
 0x406   : > { %v940_v39 = vpop.xlane.xlu1 %939 }
 0x407   : > { %v961_v45 = vmul.f32 1.442695, %v950_v40  ;;  %v952_v46 = vsub.f32 %v919_v63, %v940_v39 }
 0x408   : > { %v931_v38 = vpop.xlane.xlu0 %930 }
 0x409   : > { %v949_v44 = vsub.f32 %v916_v62, %v931_v38  ;;  %4231 = vpow2.f32 %v961_v45  ;;  %v965_v54 = vmul.f32 1.442695, %v952_v46 }
 0x40a   : > { %v946_v47 = vpop.xlane.xlu1 %945 }
 0x40b   : > { %v959_v48 = vmul.f32 1.442695, %v949_v44  ;;  %v954_v55 = vsub.f32 %v921_v7, %v946_v47 }
 0x40c   : > { %v937_v41 = vpop.xlane.xlu0 %936 }
 0x40d   : > { %v951_v49 = vsub.f32 %v918_v6, %v937_v41  ;;  %4233 = vpow2.f32 %v959_v48  ;;  %v969_v57 = vmul.f32 1.442695, %v954_v55 }
 0x40e   : > { %4235 = vpow2.f32 %v965_v54  ;;  %v1194_v8 = vpop.permute.xlu1 %1193 }
 0x40f   : > { %v963_v32 = vmul.f32 1.442695, %v951_v49 }
 0x410   : > { %v4711_v31 = vpop.eup %4227  ;;  %v943_v50 = vpop.xlane.xlu0 %942 }
 0x411   : > { %v974_v34 = vsel %vm922_vm2, %v4711_v31, 0.0  ;;  %v953_v56 = vsub.f32 %v920_v52, %v943_v50  ;;  %4237 = vpow2.f32 %v963_v32 }
 0x412   : > { %v4715_v35 = vpop.eup %4229  ;;  %975 = vadd.xlane.f32.xlu1 %v974_v34  ;;  %4239 = vpow2.f32 %v969_v57 }
 0x413   : > { %v971_v36 = vsel %vm922_vm2, %v4715_v35, 0.0  ;;  %v967_v58 = vmul.f32 1.442695, %v953_v56 }
 0x414   : > { %972 = vadd.xlane.f32.xlu0 %v971_v36  ;;  %v1196_v9 = vpop.permute.xlu0 %1195 }
 0x415   : > { %4241 = vpow2.f32 %v967_v58 }
 0x416   : > { %v4723_v25 = vpop.eup %4231 }
 0x417   : > { %v980_v60 = vsel %vm922_vm2, %v4723_v25, 0.0 }
 0x41a   : > { %v4725_v59 = vpop.eup %4233 }
 0x41b   : > { %v4729_v61 = vpop.eup %4235  ;;  %v977_v62 = vsel %vm922_vm2, %v4725_v59, 0.0 }
 0x41c   : > { %v986_v33 = vsel %vm922_vm2, %v4729_v61, 0.0 }
 0x41e   : > { %v4733_v63 = vpop.eup %4237 }
 0x41f   : > { %v4737_v42 = vpop.eup %4239  ;;  %v983_v0 = vsel %vm922_vm2, %v4733_v63, 0.0 }
 0x420   : > { %v992_v6 = vsel %vm922_vm2, %v4737_v42, 0.0 }
 0x422   : > { %v4741_v1 = vpop.eup %4241 }
 0x423   : > { %1189 = vrot.lane.b32.xlu1 %v4646_v30, %s4413_s24  ;;  %v989_v7 = vsel %vm922_vm2, %v4741_v1, 0.0 }
 0x42a   : > { %1191 = vrot.lane.b32.xlu0 %v4637_v27, %s4413_s24 }
 0x447   : > { %981 = vadd.xlane.f32.xlu1 %v980_v60 }
 0x449   : > { %978 = vadd.xlane.f32.xlu0 %v977_v62 }
 0x44b   : > { %987 = vadd.xlane.f32.xlu1 %v986_v33 }
 0x44d   : > { %984 = vadd.xlane.f32.xlu0 %v983_v0 }
 0x44f   : > { %993 = vadd.xlane.f32.xlu1 %v992_v6 }
 0x451   : > { %990 = vadd.xlane.f32.xlu0 %v989_v7 }
 0x460   : > { %1185 = vrot.lane.b32.xlu1 %v4625_v14, %s4413_s24 }
 0x464   : > { %1171 = vrot.lane.b32.xlu1 %v4643_v29, %s4414_s25 }
 0x467   : > { %1187 = vrot.lane.b32.xlu0 %v4643_v29, %s4413_s24  ;;  %s4421_s24 = smov 40  }
 0x468   : > { %1175 = vrot.lane.b32.xlu1 %v4637_v27, %s4414_s25 }
 0x46b   : > { %1169 = vrot.lane.b32.xlu0 %v4625_v14, %s4414_s25 }
 0x46c   : > { %1179 = vrot.lane.b32.xlu1 %v4634_v26, %s4414_s25 }
 0x46f   : > { %1173 = vrot.lane.b32.xlu0 %v4646_v30, %s4414_s25 }
 0x470   : > { %1183 = vrot.lane.b32.xlu1 %v4632_v22, %s4414_s25 }
 0x473   : > { %1177 = vrot.lane.b32.xlu0 %v4640_v28, %s4414_s25 }
 0x474   : > { %1446 = vrot.lane.b32.xlu1 %v4629_v19, %s4415_s26 }
 0x477   : > { %1181 = vrot.lane.b32.xlu0 %v4629_v19, %s4414_s25 }
 0x478   : > { %1444 = vrot.lane.b32.xlu1 %v4634_v26, %s4415_s26 }
 0x47b   : > { %1448 = vrot.lane.b32.xlu0 %v4632_v22, %s4415_s26 }
 0x49b   : > { %v976_v43 = vpop.xlane.xlu1 %975 }
 0x49c   : > { %4243 = vrcp.f32 %v976_v43 }
 0x49d   : > { %v973_v52 = vpop.xlane.xlu0 %972 }
 0x49e   : > { %4245 = vrcp.f32 %v973_v52 }
 0x49f   : > { %v1190_v20 = vpop.permute.xlu1 %1189 }
 0x4a1   : > { %v1192_v18 = vpop.permute.xlu0 %1191 }
 0x4a9   : > { %v4244_v10 = vpop.eup %4243 }
 0x4aa   : > { %v1004_v15 = vmul.f32 %v4244_v10, %v4711_v31 }
 0x4ab   : > { %v4246_v13 = vpop.eup %4245 }
 0x4ac   : > { %v1003_v53 = vmul.f32 %v4246_v13, %v4715_v35 }
 0x4ae   : > { %3904 = vmatprep.mubr.msk.f32.mxu0 %vm922_vm2, %v1003_v53 }
 0x4af   : > { %3905 = vmatmul.mubr.msk.f32.vlgmr.msra.gmra.mxu0 %vm922_vm2, %v1004_v15 }
 0x4b0   : > { %3917 = vmatpush3.xpose.msk.msra.mxu0 %vm776_vm1, %v4695_v51 }
 0x4b1   : > { %3918 = vmatprep.subr.msk.mxu0 %vm776_vm1, %v4683_v24 }
 0x4b4   : > { %3919 = vmatpush3.xpose.msk.msra.mxu0 %vm776_vm1, %v4683_v24 }
 0x4b5   : > { %3920 = vmatprep.subr.msk.mxu0 %vm776_vm1, %v1196_v9 }
 0x4b8   : > { %3921 = vmatpush3.xpose.msk.msra.mxu0 %vm776_vm1, %v1196_v9 }
 0x4b9   : > { %3922 = vmatprep.subr.msk.mxu0 %vm776_vm1, %v1194_v8 }
 0x4bc   : > { %3923 = vmatpush3.xpose.msk.msra.mxu0 %vm776_vm1, %v1194_v8 }
 0x4bd   : > { %3924 = vmatprep.subr.msk.mxu0 %vm776_vm1, %v1192_v18 }
 0x4c0   : > { %3925 = vmatpush3.xpose.msk.msra.mxu0 %vm776_vm1, %v1192_v18 }
 0x4c1   : > { %3926 = vmatprep.subr.msk.mxu0 %vm776_vm1, %v1190_v20 }
 0x4c4   : > { %3927 = vmatpush3.xpose.msk.msra.mxu0 %vm776_vm1, %v1190_v20 }
 0x4d0   : > { %v982_v51 = vpop.xlane.xlu1 %981 }
 0x4d1   : > { %4247 = vrcp.f32 %v982_v51 }
 0x4d2   : > { %v979_v24 = vpop.xlane.xlu0 %978 }
 0x4d3   : > { %4249 = vrcp.f32 %v979_v24 }
 0x4d4   : > { %v988_v21 = vpop.xlane.xlu1 %987 }
 0x4d5   : > { %4251 = vrcp.f32 %v988_v21 }
 0x4d6   : > { %v985_v23 = vpop.xlane.xlu0 %984 }
 0x4d7   : > { %4253 = vrcp.f32 %v985_v23 }
 0x4d8   : > { %v994_v31 = vpop.xlane.xlu1 %993 }
 0x4d9   : > { %4255 = vrcp.f32 %v994_v31 }
 0x4da   : > { %v991_v34 = vpop.xlane.xlu0 %990 }
 0x4db   : > { %4257 = vrcp.f32 %v991_v34 }
 0x4dc   : > { %v1186_v35 = vpop.permute.xlu1 %1185 }
 0x4de   : > { %v1188_v36 = vpop.permute.xlu0 %1187  ;;  %v4248_v37 = vpop.eup %4247 }
 0x4df   : > { %3928 = vmatprep.subr.msk.mxu0 %vm776_vm1, %v1188_v36  ;;  %v1006_v44 = vmul.f32 %v4248_v37, %v4723_v25 }
 0x4e0   : > { %v4250_v38 = vpop.eup %4249  ;;  %3929 = vmatpush3.xpose.msk.msra.mxu0 %vm776_vm1, %v1188_v36  ;;  %v1172_v39 = vpop.permute.xlu1 %1171 }
 0x4e1   : > { %3930 = vmatprep.subr.msk.mxu0 %vm776_vm1, %v1186_v35  ;;  %v1005_v40 = vmul.f32 %v4250_v38, %v4725_v59 }
 0x4e2   : > { %v1170_v41 = vpop.permute.xlu0 %1169  ;;  %v4252_v45 = vpop.eup %4251 }
 0x4e3   : > { %3907 = vmatprep.mubr.msk.f32.mxu0 %vm922_vm2, %v1005_v40  ;;  %v1008_v50 = vmul.f32 %v4252_v45, %v4729_v61 }
 0x4e4   : > { %v4254_v46 = vpop.eup %4253  ;;  %3908 = vmatmul.mubr.msk.f32.gmra.mxu0 %vm922_vm2, %v1006_v44  ;;  %v1176_v47 = vpop.permute.xlu1 %1175 }
 0x4e5   : > { %3931 = vmatpush3.xpose.msk.msra.mxu0 %vm776_vm1, %v1186_v35  ;;  %v1007_v48 = vmul.f32 %v4254_v46, %v4733_v63  ;;  %v1168_v63 = vld [vmem:[%s5545_s5] sm:$0xf] }
 0x4e6   : > { %v1174_v49 = vpop.permute.xlu0 %1173  ;;  %v4256_v54 = vpop.eup %4255  ;;  %4177 = vmatprep.subr.msk.bf16.mxu0 %vm1604_vm3, %v1168_v63  ;;  %v1686_v33 = vsel %vm1604_vm3, %v1168_v63, 0 }
 0x4e7   : > { %3910 = vmatprep.mubr.msk.f32.mxu0 %vm922_vm2, %v1007_v48  ;;  %v1010_v58 = vmul.f32 %v4256_v54, %v4737_v42 }
 0x4e8   : > { %v4258_v55 = vpop.eup %4257  ;;  %3911 = vmatmul.mubr.msk.f32.gmra.mxu0 %vm922_vm2, %v1008_v50  ;;  %v1180_v32 = vpop.permute.xlu1 %1179 }
 0x4e9   : > { %v1009_v56 = vmul.f32 %v4258_v55, %v4741_v1 }
 0x4ea   : > { %v1178_v57 = vpop.permute.xlu0 %1177 }
 0x4eb   : > { %3913 = vmatprep.mubr.msk.f32.mxu0 %vm922_vm2, %v1009_v56 }
 0x4ec   : > { %3914 = vmatmul.mubr.msk.f32.gmra.mxu0 %vm922_vm2, %v1010_v58  ;;  %v1184_v25 = vpop.permute.xlu1 %1183 }
 0x4ed   : > { %3932 = vmatprep.mubr.msk.f32.mxu0 %vm776_vm1, %v1170_v41 }
 0x4ee   : > { %v1182_v59 = vpop.permute.xlu0 %1181 }
 0x4f0   : > { %3933 = vmatmul.mubr.msk.f32.vlgmr.msra.gmra.mxu0 %vm776_vm1, %v1172_v39  ;;  %v1447_v60 = vpop.permute.xlu1 %1446 }
 0x4f1   : > { %3935 = vmatprep.mubr.msk.f32.mxu0 %vm776_vm1, %v1174_v49  ;;  %3983 = vmatpush3.bf16.msra.mxu0 %v1686_v33 }
 0x4f2   : > { %v1449_v61 = vpop.permute.xlu0 %1448 }
 0x4f3   : > { %3944 = vmatprep.subr.mxu1 %v1449_v61 }
 0x4f4   : > { %3936 = vmatmul.mubr.msk.f32.gmra.mxu0 %vm776_vm1, %v1176_v47  ;;  %3945 = vmatpush3.msra.mxu1 %v1449_v61  ;;  %v1445_v62 = vpop.permute.xlu1 %1444 }
 0x4f5   : > { %3938 = vmatprep.mubr.msk.f32.mxu0 %vm776_vm1, %v1178_v57  ;;  %3946 = vmatprep.subr.mxu1 %v1447_v60 }
 0x4f6   : > { %3947 = vmatpush3.msra.mxu1 %v1447_v60 }
 0x4f7   : > { %3948 = vmatprep.subr.mxu1 %v1445_v62 }
 0x4f8   : > { %3939 = vmatmul.mubr.msk.f32.gmra.mxu0 %vm776_vm1, %v1180_v32  ;;  %3949 = vmatpush3.msra.mxu1 %v1445_v62 }
 0x4f9   : > { %3941 = vmatprep.mubr.msk.f32.mxu0 %vm776_vm1, %v1182_v59 }
 0x4fc   : > { %3942 = vmatmul.mubr.msk.f32.gmra.mxu0 %vm776_vm1, %v1184_v25 }
 0x56f   : > { %v3906_v42 = vpop.f32.mrf.mxu0 }
 0x571   : > { %v1125_v0 = vpop.f32.mrf.mxu0 }
 0x572   : > { %v1164_v1 = vpack.c.bf16 %v3906_v42, %v1125_v0 }
 0x574   : > { %3984 = vmatprep.mubr.msk.bf16.mxu0 %vm776_vm1, %v1164_v1 }
 0x5a4   : > { %v3909_v6 = vpop.f32.mrf.mxu0 }
 0x5a6   : > { %v1135_v7 = vpop.f32.mrf.mxu0 }
 0x5a7   : > { %v1165_v8 = vpack.c.bf16 %v3909_v6, %v1135_v7 }
 0x5a8   : > { %v3912_v9 = vpop.f32.mrf.mxu0 }
 0x5a9   : > { %3985 = vmatmul.mubr.msk.bf16.vlgmr.msra.gmra.mxu0 %vm776_vm1, %v1165_v8 }
 0x5aa   : > { %v1145_v43 = vpop.f32.mrf.mxu0 }
 0x5ab   : > { %v1166_v52 = vpack.c.bf16 %v3912_v9, %v1145_v43 }
 0x5ac   : > { %v3915_v10 = vpop.f32.mrf.mxu0 }
 0x5ad   : > { %3988 = vmatprep.mubr.msk.bf16.mxu0 %vm776_vm1, %v1166_v52 }
 0x5ae   : > { %v1155_v13 = vpop.f32.mrf.mxu0 }
 0x5af   : > { %v1167_v53 = vpack.c.bf16 %v3915_v10, %v1155_v13 }
 0x5b0   : > { %v3934_v15 = vpop.f32.mrf.mxu0 }
 0x5b1   : > { %v1339_v18 = vmul.f32 0.35355338, %v3934_v15  ;;  %3989 = vmatmul.mubr.msk.bf16.gmra.mxu0 %vm776_vm1, %v1167_v53 }
 0x5b2   : > { %v1299_v20 = vpop.f32.mrf.mxu0 }
 0x5b3   : > { %v1338_v51 = vmul.f32 0.35355338, %v1299_v20  ;;  %v1349_v24 = vsel %vm922_vm2, %v1339_v18, -inf }
 0x5b4   : > { %1350 = vmax.xlane.f32.xlu1 %v1349_v24  ;;  %v3937_v21 = vpop.f32.mrf.mxu0 }
 0x5b5   : > { %v1341_v23 = vmul.f32 0.35355338, %v3937_v21  ;;  %v1346_v31 = vsel %vm922_vm2, %v1338_v51, -inf }
 0x5b6   : > { %1347 = vmax.xlane.f32.xlu0 %v1346_v31  ;;  %v1309_v34 = vpop.f32.mrf.mxu0 }
 0x5b7   : > { %v1340_v36 = vmul.f32 0.35355338, %v1309_v34  ;;  %v1355_v38 = vsel %vm922_vm2, %v1341_v23, -inf }
 0x5b8   : > { %v3940_v35 = vpop.f32.mrf.mxu0 }
 0x5b9   : > { %v1343_v37 = vmul.f32 0.35355338, %v3940_v35  ;;  %v1352_v46 = vsel %vm922_vm2, %v1340_v36, -inf }
 0x5ba   : > { %1356 = vmax.xlane.f32.xlu0 %v1355_v38  ;;  %v1319_v39 = vpop.f32.mrf.mxu0 }
 0x5bb   : > { %v1361_v40 = vsel %vm922_vm2, %v1343_v37, -inf  ;;  %v1342_v44 = vmul.f32 0.35355338, %v1319_v39 }
 0x5bc   : > { %1362 = vmax.xlane.f32.xlu1 %v1361_v40  ;;  %v3943_v41 = vpop.f32.mrf.mxu0 }
 0x5bd   : > { %v4820_v45 = vmul.f32 0.35355338, %v3943_v41  ;;  %v1358_v48 = vsel %vm922_vm2, %v1342_v44, -inf }
 0x5be   : > { %1353 = vmax.xlane.f32.xlu0 %v1352_v46  ;;  %v1329_v49 = vpop.f32.mrf.mxu0 }
 0x5bf   : > { %v1367_v47 = vsel %vm922_vm2, %v4820_v45, -inf  ;;  %v1344_v50 = vmul.f32 0.35355338, %v1329_v49 }
 0x5c0   : > { %1368 = vmax.xlane.f32.xlu1 %v1367_v47 }
 0x5c1   : > { %v1364_v54 = vsel %vm922_vm2, %v1344_v50, -inf }
 0x5c2   : > { %1359 = vmax.xlane.f32.xlu0 %v1358_v48 }
 0x5d1   : > { %1442 = vrot.lane.b32.xlu1 %v4640_v28, %s4415_s26 }
 0x5d8   : > { %1440 = vrot.lane.b32.xlu0 %v4637_v27, %s4415_s26 }
 0x5f7   : > { %1365 = vmax.xlane.f32.xlu0 %v1364_v54 }
 0x60d   : > { %1438 = vrot.lane.b32.xlu0 %v4646_v30, %s4415_s26 }
 0x63d   : > { %v1351_v55 = vpop.xlane.xlu1 %1350 }
 0x63e   : > { %v1371_v32 = vsub.f32 %v1339_v18, %v1351_v55 }
 0x63f   : > { %v1348_v56 = vpop.xlane.xlu0 %1347 }
 0x640   : > { %v1380_v57 = vmul.f32 1.442695, %v1371_v32  ;;  %v1370_v58 = vsub.f32 %v1338_v51, %v1348_v56 }
 0x642   : > { %4259 = vpow2.f32 %v1380_v57  ;;  %v1378_v25 = vmul.f32 1.442695, %v1370_v58  ;;  %v1591_v58 = vld [vmem:[%s5545_s5 + $0x4] sm:$0xf] }
 0x643   : > { %v1357_v59 = vpop.xlane.xlu0 %1356 }
 0x644   : > { %4261 = vpow2.f32 %v1378_v25  ;;  %v1373_v60 = vsub.f32 %v1341_v23, %v1357_v59 }
 0x645   : > { %v1363_v61 = vpop.xlane.xlu1 %1362 }
 0x646   : > { %v1384_v62 = vmul.f32 1.442695, %v1373_v60  ;;  %v1375_v63 = vsub.f32 %v1343_v37, %v1363_v61  ;;  %v1606_v60 = vsel %vm1604_vm3, %v1591_v58, 0 }
 0x647   : > { %v1354_v33 = vpop.xlane.xlu0 %1353 }
 0x648   : > { %4263 = vpow2.f32 %v1384_v62  ;;  %v1372_v42 = vsub.f32 %v1340_v36, %v1354_v33  ;;  %v1388_v1 = vmul.f32 1.442695, %v1375_v63 }
 0x649   : > { %v1369_v0 = vpop.xlane.xlu1 %1368 }
 0x64a   : > { %v1382_v6 = vmul.f32 1.442695, %v1372_v42  ;;  %v1377_v31 = vsub.f32 %v4820_v45, %v1369_v0 }
 0x64b   : > { %v1360_v7 = vpop.xlane.xlu0 %1359 }
 0x64c   : > { %4265 = vpow2.f32 %v1382_v6  ;;  %v1374_v21 = vsub.f32 %v1342_v44, %v1360_v7  ;;  %v1392_v36 = vmul.f32 1.442695, %v1377_v31 }
 0x64d   : > { %v1443_v8 = vpop.permute.xlu1 %1442  ;;  %4267 = vpow2.f32 %v1388_v1 }
 0x64e   : > { %3950 = vmatprep.subr.mxu1 %v1443_v8  ;;  %v1386_v23 = vmul.f32 1.442695, %v1374_v21 }
 0x64f   : > { %v4833_v9 = vpop.eup %4259  ;;  %v1441_v43 = vpop.permute.xlu0 %1440  ;;  %3951 = vmatpush3.msra.mxu1 %v1443_v8 }
 0x650   : > { %3952 = vmatprep.subr.mxu1 %v1441_v43  ;;  %v1397_v52 = vsel %vm922_vm2, %v4833_v9, 0.0  ;;  %4269 = vpow2.f32 %v1386_v23 }
 0x651   : > { %v4837_v10 = vpop.eup %4261  ;;  %1398 = vadd.xlane.f32.xlu1 %v1397_v52  ;;  %3953 = vmatpush3.msra.mxu1 %v1441_v43 }
 0x652   : > { %v1394_v13 = vsel %vm922_vm2, %v4837_v10, 0.0 }
 0x653   : > { %1395 = vadd.xlane.f32.xlu0 %v1394_v13 }
 0x655   : > { %v4841_v53 = vpop.eup %4263 }
 0x656   : > { %v1403_v15 = vsel %vm922_vm2, %v4841_v53, 0.0 }
 0x657   : > { %1404 = vadd.xlane.f32.xlu1 %v1403_v15 }
 0x659   : > { %v4845_v18 = vpop.eup %4265 }
 0x65a   : > { %v1400_v20 = vsel %vm922_vm2, %v4845_v18, 0.0  ;;  %v4849_v51 = vpop.eup %4267 }
 0x65b   : > { %1401 = vadd.xlane.f32.xlu0 %v1400_v20  ;;  %v1409_v24 = vsel %vm922_vm2, %v4849_v51, 0.0 }
 0x65d   : > { %v4862_v39 = vpop.eup %4269 }
 0x65e   : > { %v1406_v40 = vsel %vm922_vm2, %v4862_v39, 0.0 }
 0x65f   : > { %1410 = vadd.xlane.f32.xlu0 %v1409_v24 }
 0x668   : > { %1434 = vrot.lane.b32.xlu1 %v4625_v14, %s4415_s26 }
 0x675   : > { %1436 = vrot.lane.b32.xlu0 %v4643_v29, %s4415_s26 }
 0x679   : > { %1783 = vrot.lane.b32.xlu0 %v4632_v22, %s4416_s29 }
 0x67d   : > { %1781 = vrot.lane.b32.xlu0 %v4629_v19, %s4416_s29 }
 0x680   : > { %v1366_v34 = vpop.xlane.xlu0 %1365 }
 0x681   : > { %v1376_v35 = vsub.f32 %v1344_v50, %v1366_v34  ;;  %1779 = vrot.lane.b32.xlu0 %v4634_v26, %s4416_s29 }
 0x683   : > { %v1390_v37 = vmul.f32 1.442695, %v1376_v35 }
 0x684   : > { %v1439_v38 = vpop.permute.xlu0 %1438 }
 0x685   : > { %4271 = vpow2.f32 %v1390_v37  ;;  %1777 = vrot.lane.b32.xlu0 %v4640_v28, %s4416_s29  ;;  %3954 = vmatprep.subr.mxu1 %v1439_v38 }
 0x686   : > { %3955 = vmatpush3.msra.mxu1 %v1439_v38  ;;  %4273 = vpow2.f32 %v1392_v36 }
 0x689   : > { %1775 = vrot.lane.b32.xlu0 %v4637_v27, %s4416_s29 }
 0x68c   : > { %1407 = vadd.xlane.f32.xlu1 %v1406_v40 }
 0x68d   : > { %1773 = vrot.lane.b32.xlu0 %v4646_v30, %s4416_s29 }
 0x691   : > { %1771 = vrot.lane.b32.xlu0 %v4643_v29, %s4416_s29 }
 0x692   : > { %v4869_v41 = vpop.eup %4271 }
 0x693   : > { %v1412_v44 = vsel %vm922_vm2, %v4869_v41, 0.0  ;;  %v4873_v45 = vpop.eup %4273 }
 0x694   : > { %1413 = vadd.xlane.f32.xlu1 %v1412_v44  ;;  %v1415_v46 = vsel %vm922_vm2, %v4873_v45, 0.0 }
 0x695   : > { %1769 = vrot.lane.b32.xlu0 %v4625_v14, %s4416_s29  ;;  %s5513_s29 = scalar_lea.vmem %s5555_s15, %s3647_s20 }
 0x698   : > { %1416 = vadd.xlane.f32.xlu1 %v1415_v46 }
 0x699   : > { %1753 = vrot.lane.b32.xlu0 %v4625_v14, %s4417_s30 }
 0x69d   : > { %1757 = vrot.lane.b32.xlu0 %v4646_v30, %s4417_s30 }
 0x6a1   : > { %1759 = vrot.lane.b32.xlu0 %v4637_v27, %s4417_s30 }
 0x6a5   : > { %1761 = vrot.lane.b32.xlu0 %v4640_v28, %s4417_s30 }
 0x6a9   : > { %1763 = vrot.lane.b32.xlu0 %v4634_v26, %s4417_s30  ;;  %1755 = vrot.lane.b32.xlu1 %v4643_v29, %s4417_s30 }
 0x6ad   : > { %1765 = vrot.lane.b32.xlu0 %v4629_v19, %s4417_s30  ;;  %1767 = vrot.lane.b32.xlu1 %v4632_v22, %s4417_s30 }
 0x6b1   : > { %2294 = vrot.lane.b32.xlu0 %v4632_v22, %s4418_s16  ;;  %2292 = vrot.lane.b32.xlu1 %v4629_v19, %s4418_s16 }
 0x6b5   : > { %2290 = vrot.lane.b32.xlu0 %v4634_v26, %s4418_s16  ;;  %2288 = vrot.lane.b32.xlu1 %v4640_v28, %s4418_s16 }
 0x6b9   : > { %2286 = vrot.lane.b32.xlu0 %v4637_v27, %s4418_s16  ;;  %2284 = vrot.lane.b32.xlu1 %v4646_v30, %s4418_s16 }
 0x6bd   : > { %2282 = vrot.lane.b32.xlu0 %v4643_v29, %s4418_s16  ;;  %2280 = vrot.lane.b32.xlu1 %v4625_v14, %s4418_s16 }
 0x6c1   : > { %2264 = vrot.lane.b32.xlu0 %v4625_v14, %s4419_s17  ;;  %2266 = vrot.lane.b32.xlu1 %v4643_v29, %s4419_s17 }
 0x6c5   : > { %2268 = vrot.lane.b32.xlu0 %v4646_v30, %s4419_s17  ;;  %2270 = vrot.lane.b32.xlu1 %v4637_v27, %s4419_s17 }
 0x6c9   : > { %2272 = vrot.lane.b32.xlu0 %v4640_v28, %s4419_s17  ;;  %2274 = vrot.lane.b32.xlu1 %v4634_v26, %s4419_s17 }
 0x6cd   : > { %2276 = vrot.lane.b32.xlu0 %v4629_v19, %s4419_s17  ;;  %2278 = vrot.lane.b32.xlu1 %v4632_v22, %s4419_s17 }
 0x6da   : > { %v1399_v47 = vpop.xlane.xlu1 %1398 }
 0x6dc   : > { %v1396_v48 = vpop.xlane.xlu0 %1395 }
 0x6dd   : > { %4275 = vrcp.f32 %v1396_v48 }
 0x6de   : > { %4277 = vrcp.f32 %v1399_v47 }
 0x6e0   : > { %v1405_v49 = vpop.xlane.xlu1 %1404 }
 0x6e1   : > { %4279 = vrcp.f32 %v1405_v49 }
 0x6e4   : > { %v1402_v50 = vpop.xlane.xlu0 %1401  ;;  %v1435_v25 = vpop.permute.xlu1 %1434 }
 0x6e5   : > { %4281 = vrcp.f32 %v1402_v50 }
 0x6e8   : > { %v1411_v54 = vpop.xlane.xlu0 %1410 }
 0x6e9   : > { %4283 = vrcp.f32 %v1411_v54 }
 0x6ea   : > { %v4276_v55 = vpop.eup %4275 }
 0x6eb   : > { %v1426_v32 = vmul.f32 %v4276_v55, %v4837_v10  ;;  %v4278_v56 = vpop.eup %4277 }
 0x6ec   : > { %v1437_v57 = vpop.permute.xlu0 %1436  ;;  %v1427_v59 = vmul.f32 %v4278_v56, %v4833_v9 }
 0x6ed   : > { %3956 = vmatprep.subr.mxu1 %v1437_v57  ;;  %3960 = vmatprep.mubr.msk.f32.mxu1 %vm922_vm2, %v1426_v32 }
 0x6ee   : > { %3957 = vmatpush3.msra.mxu1 %v1437_v57  ;;  %v4280_v61 = vpop.eup %4279 }
 0x6ef   : > { %3958 = vmatprep.subr.mxu1 %v1435_v25  ;;  %v1429_v42 = vmul.f32 %v4280_v61, %v4841_v53 }
 0x6f0   : > { %3959 = vmatpush3.msra.mxu1 %v1435_v25  ;;  %v1784_v63 = vpop.permute.xlu0 %1783 }
 0x6f1   : > { %3961 = vmatmul.mubr.msk.f32.vlgmr.msra.gmra.mxu1 %vm922_vm2, %v1427_v59  ;;  %4176 = vmatprep.subr.msk.bf16.mxu1 %vm1604_vm3, %v1591_v58 }
 0x6f2   : > { %v4282_v62 = vpop.eup %4281  ;;  %3973 = vmatpush3.bf16.msra.mxu1 %v1606_v60 }
 0x6f3   : > { %3992 = vmatprep.subr.msk.mxu1 %vm776_vm1, %v1784_v63  ;;  %v1428_v33 = vmul.f32 %v4282_v62, %v4845_v18 }
 0x6f4   : > { %v1782_v15 = vpop.permute.xlu0 %1781 }
 0x6f5   : > { %3963 = vmatprep.mubr.msk.f32.mxu1 %vm922_vm2, %v1428_v33 }
 0x6f6   : > { %3964 = vmatmul.mubr.msk.f32.gmra.mxu1 %vm922_vm2, %v1429_v42  ;;  %v4284_v7 = vpop.eup %4283 }
 0x6f7   : > { %v1431_v43 = vmul.f32 %v4284_v7, %v4849_v51 }
 0x6f8   : > { %v1780_v18 = vpop.permute.xlu0 %1779 }
 0x6fc   : > { %v1778_v20 = vpop.permute.xlu0 %1777 }
 0x700   : > { %v1776_v24 = vpop.permute.xlu0 %1775 }
 0x704   : > { %v1774_v21 = vpop.permute.xlu0 %1773 }
 0x708   : > { %v1772_v51 = vpop.permute.xlu0 %1771 }
 0x70c   : > { %v1770_v23 = vpop.permute.xlu0 %1769 }
 0x710   : > { %v1754_v35 = vpop.permute.xlu0 %1753 }
 0x714   : > { %v1758_v40 = vpop.permute.xlu0 %1757 }
 0x715   : > { %v1408_v0 = vpop.xlane.xlu1 %1407 }
 0x716   : > { %4285 = vrcp.f32 %v1408_v0 }
 0x71d   : > { %v1414_v1 = vpop.xlane.xlu1 %1413 }
 0x71e   : > { %4287 = vrcp.f32 %v1414_v1 }
 0x721   : > { %v1417_v6 = vpop.xlane.xlu1 %1416 }
 0x722   : > { %4289 = vrcp.f32 %v1417_v6 }
 0x723   : > { %v4286_v8 = vpop.eup %4285 }
 0x724   : > { %v1430_v9 = vmul.f32 %v4286_v8, %v4862_v39 }
 0x725   : > { %v1756_v55 = vpop.permute.xlu1 %1755 }
 0x726   : > { %3966 = vmatprep.mubr.msk.f32.mxu1 %vm922_vm2, %v1430_v9 }
 0x727   : > { %3967 = vmatmul.mubr.msk.f32.gmra.mxu1 %vm922_vm2, %v1431_v43 }
 0x729   : > { %v1768_v58 = vpop.permute.xlu1 %1767 }
 0x72b   : > { %v4288_v52 = vpop.eup %4287 }
 0x72c   : > { %v1432_v10 = vmul.f32 %v4288_v52, %v4869_v41  ;;  %v1760_v41 = vpop.permute.xlu0 %1759 }
 0x72d   : > { %v2293_v59 = vpop.permute.xlu1 %2292 }
 0x72e   : > { %3969 = vmatprep.mubr.msk.f32.mxu1 %vm922_vm2, %v1432_v10 }
 0x72f   : > { %v4290_v13 = vpop.eup %4289 }
 0x730   : > { %v1433_v53 = vmul.f32 %v4290_v13, %v4873_v45  ;;  %v1762_v44 = vpop.permute.xlu0 %1761 }
 0x731   : > { %v2289_v61 = vpop.permute.xlu1 %2288 }
 0x732   : > { %3970 = vmatmul.mubr.msk.f32.gmra.mxu1 %vm922_vm2, %v1433_v53 }
 0x734   : > { %v1764_v45 = vpop.permute.xlu0 %1763 }
 0x738   : > { %v1766_v46 = vpop.permute.xlu0 %1765 }
 0x73c   : > { %v2295_v47 = vpop.permute.xlu0 %2294 }
 0x740   : > { %v2291_v57 = vpop.permute.xlu0 %2290 }
 0x744   : > { %v2287_v25 = vpop.permute.xlu0 %2286 }
 0x748   : > { %v2283_v60 = vpop.permute.xlu0 %2282 }
 0x74c   : > { %v2265_v62 = vpop.permute.xlu0 %2264 }
 0x750   : > { %v2269_v0 = vpop.permute.xlu0 %2268 }
 0x754   : > { %v2273_v6 = vpop.permute.xlu0 %2272 }
 0x758   : > { %v2277_v8 = vpop.permute.xlu0 %2276 }
 0x7b1   : > { %v3962_v31 = vpop.f32.mrf.mxu1 }
 0x7b3   : > { %v1548_v34 = vpop.f32.mrf.mxu1 }
 0x7b4   : > { %v1587_v36 = vpack.c.bf16 %v3962_v31, %v1548_v34 }
 0x7b6   : > { %v3965_v37 = vpop.f32.mrf.mxu1  ;;  %3974 = vmatprep.mubr.msk.bf16.mxu1 %vm776_vm1, %v1587_v36 }
 0x7b8   : > { %v1558_v38 = vpop.f32.mrf.mxu1 }
 0x7b9   : > { %v1588_v39 = vpack.c.bf16 %v3965_v37, %v1558_v38 }
 0x7bb   : > { %3975 = vmatmul.mubr.msk.bf16.vlgmr.msra.gmra.mxu1 %vm776_vm1, %v1588_v39 }
 0x7bc   : > { %3993 = vmatpush3.xpose.msk.msra.mxu1 %vm776_vm1, %v1784_v63  ;;  %v2285_v63 = vpop.permute.xlu1 %2284 }
 0x7bd   : > { %3994 = vmatprep.subr.msk.mxu1 %vm776_vm1, %v1782_v15 }
 0x7c0   : > { %3995 = vmatpush3.xpose.msk.msra.mxu1 %vm776_vm1, %v1782_v15  ;;  %v2281_v33 = vpop.permute.xlu1 %2280 }
 0x7c1   : > { %3996 = vmatprep.subr.msk.mxu1 %vm776_vm1, %v1780_v18 }
 0x7c4   : > { %3997 = vmatpush3.xpose.msk.msra.mxu1 %vm776_vm1, %v1780_v18  ;;  %v2267_v42 = vpop.permute.xlu1 %2266 }
 0x7c5   : > { %3998 = vmatprep.subr.msk.mxu1 %vm776_vm1, %v1778_v20 }
 0x7c8   : > { %3999 = vmatpush3.xpose.msk.msra.mxu1 %vm776_vm1, %v1778_v20  ;;  %v2271_v1 = vpop.permute.xlu1 %2270 }
 0x7c9   : > { %4000 = vmatprep.subr.msk.mxu1 %vm776_vm1, %v1776_v24 }
 0x7cc   : > { %4001 = vmatpush3.xpose.msk.msra.mxu1 %vm776_vm1, %v1776_v24  ;;  %v2275_v7 = vpop.permute.xlu1 %2274 }
 0x7cd   : > { %4002 = vmatprep.subr.msk.mxu1 %vm776_vm1, %v1774_v21 }
 0x7d0   : > { %4003 = vmatpush3.xpose.msk.msra.mxu1 %vm776_vm1, %v1774_v21  ;;  %v2279_v9 = vpop.permute.xlu1 %2278 }
 0x7d1   : > { %4004 = vmatprep.subr.msk.mxu1 %vm776_vm1, %v1772_v51 }
 0x7d4   : > { %4005 = vmatpush3.xpose.msk.msra.mxu1 %vm776_vm1, %v1772_v51 }
 0x7d5   : > { %4006 = vmatprep.subr.msk.mxu1 %vm776_vm1, %v1770_v23 }
 0x7d8   : > { %4007 = vmatpush3.xpose.msk.msra.mxu1 %vm776_vm1, %v1770_v23 }
 0x7d9   : > { %4058 = vmatprep.subr.msk.mxu1 %vm776_vm1, %v2295_v47 }
 0x7e7   : > { %v3968_v48 = vpop.f32.mrf.mxu1 }
 0x7e9   : > { %v1568_v49 = vpop.f32.mrf.mxu1 }
 0x7ea   : > { %v1589_v50 = vpack.c.bf16 %v3968_v48, %v1568_v49 }
 0x7ec   : > { %3978 = vmatprep.mubr.msk.bf16.mxu1 %vm776_vm1, %v1589_v50 }
 0x7f2   : > { %v3971_v54 = vpop.f32.mrf.mxu1 }
 0x7f4   : > { %v1578_v32 = vpop.f32.mrf.mxu1 }
 0x7f5   : > { %v1590_v56 = vpack.c.bf16 %v3971_v54, %v1578_v32 }
 0x7f7   : > { %3979 = vmatmul.mubr.msk.bf16.gmra.mxu1 %vm776_vm1, %v1590_v56 }
 0x7f8   : > { %4008 = vmatprep.mubr.msk.f32.mxu1 %vm776_vm1, %v1754_v35 }
 0x7ff   : > { %4009 = vmatmul.mubr.msk.f32.vlgmr.msra.gmra.mxu1 %vm776_vm1, %v1756_v55 }
 0x800   : > { %4059 = vmatpush3.xpose.msk.msra.mxu1 %vm776_vm1, %v2295_v47  ;;  %4011 = vmatprep.mubr.msk.f32.mxu1 %vm776_vm1, %v1758_v40 }
 0x801   : > { %4060 = vmatprep.subr.msk.mxu1 %vm776_vm1, %v2293_v59 }
 0x803   : > { %4012 = vmatmul.mubr.msk.f32.gmra.mxu1 %vm776_vm1, %v1760_v41 }
 0x804   : > { %4061 = vmatpush3.xpose.msk.msra.mxu1 %vm776_vm1, %v2293_v59  ;;  %4014 = vmatprep.mubr.msk.f32.mxu1 %vm776_vm1, %v1762_v44 }
 0x805   : > { %4062 = vmatprep.subr.msk.mxu1 %vm776_vm1, %v2291_v57 }
 0x807   : > { %4015 = vmatmul.mubr.msk.f32.gmra.mxu1 %vm776_vm1, %v1764_v45 }
 0x808   : > { %4063 = vmatpush3.xpose.msk.msra.mxu1 %vm776_vm1, %v2291_v57  ;;  %4017 = vmatprep.mubr.msk.f32.mxu1 %vm776_vm1, %v1766_v46 }
 0x809   : > { %4064 = vmatprep.subr.msk.mxu1 %vm776_vm1, %v2289_v61 }
 0x80b   : > { %4018 = vmatmul.mubr.msk.f32.gmra.mxu1 %vm776_vm1, %v1768_v58 }
 0x80c   : > { %4065 = vmatpush3.xpose.msk.msra.mxu1 %vm776_vm1, %v2289_v61  ;;  %4074 = vmatprep.mubr.msk.f32.mxu1 %vm776_vm1, %v2265_v62 }
 0x80d   : > { %4066 = vmatprep.subr.msk.mxu1 %vm776_vm1, %v2287_v25 }
 0x810   : > { %4067 = vmatpush3.xpose.msk.msra.mxu1 %vm776_vm1, %v2287_v25 }
 0x811   : > { %4068 = vmatprep.subr.msk.mxu1 %vm776_vm1, %v2285_v63 }
 0x814   : > { %4069 = vmatpush3.xpose.msk.msra.mxu1 %vm776_vm1, %v2285_v63 }
 0x815   : > { %4070 = vmatprep.subr.msk.mxu1 %vm776_vm1, %v2283_v60 }
 0x818   : > { %4071 = vmatpush3.xpose.msk.msra.mxu1 %vm776_vm1, %v2283_v60 }
 0x819   : > { %4072 = vmatprep.subr.msk.mxu1 %vm776_vm1, %v2281_v33 }
 0x81c   : > { %4073 = vmatpush3.xpose.msk.msra.mxu1 %vm776_vm1, %v2281_v33 }
 0x81f   : > { %4075 = vmatmul.mubr.msk.f32.vlgmr.msra.gmra.mxu1 %vm776_vm1, %v2267_v42 }
 0x820   : > { %4077 = vmatprep.mubr.msk.f32.mxu1 %vm776_vm1, %v2269_v0 }
 0x823   : > { %4078 = vmatmul.mubr.msk.f32.gmra.mxu1 %vm776_vm1, %v2271_v1 }
 0x824   : > { %4080 = vmatprep.mubr.msk.f32.mxu1 %vm776_vm1, %v2273_v6 }
 0x827   : > { %4081 = vmatmul.mubr.msk.f32.gmra.mxu1 %vm776_vm1, %v2275_v7 }
 0x828   : > { %4083 = vmatprep.mubr.msk.f32.mxu1 %vm776_vm1, %v2277_v8 }
 0x82b   : > { %4084 = vmatmul.mubr.msk.f32.gmra.mxu1 %vm776_vm1, %v2279_v9 }
 0x87b   : > { %v4975_v43 = vpop.f32.mrf.mxu1 }
 0x87d   : > { %v4977_v52 = vpop.f32.mrf.mxu1 }
 0x87f   : > { %v4979_v10 = vpop.f32.mrf.mxu1 }
 0x881   : > { %v4981_v13 = vpop.f32.mrf.mxu1 }
 0x8b7   : > { %v4983_v53 = vpop.f32.mrf.mxu1 }
 0x8b9   : > { %v4985_v15 = vpop.f32.mrf.mxu1 }
 0x8bb   : > { %v4987_v18 = vpop.f32.mrf.mxu1 }
 0x8bd   : > { %v4989_v20 = vpop.f32.mrf.mxu1 }
 0x8bf   : > { %v4010_v24 = vpop.f32.mrf.mxu1 }
 0x8c0   : > { %v1923_v21 = vmul.f32 0.35355338, %v4010_v24 }
 0x8c1   : > { %v1883_v51 = vpop.f32.mrf.mxu1 }
 0x8c2   : > { %v1922_v23 = vmul.f32 0.35355338, %v1883_v51  ;;  %v1933_v31 = vsel %vm922_vm2, %v1923_v21, -inf }
 0x8c3   : > { %1934 = vmax.xlane.f32.xlu1 %v1933_v31  ;;  %v4013_v34 = vpop.f32.mrf.mxu1 }
 0x8c4   : > { %v1930_v35 = vsel %vm922_vm2, %v1922_v23, -inf  ;;  %v1925_v39 = vmul.f32 0.35355338, %v4013_v34 }
 0x8c5   : > { %1931 = vmax.xlane.f32.xlu0 %v1930_v35  ;;  %v1893_v36 = vpop.f32.mrf.mxu1 }
 0x8c6   : > { %v1924_v37 = vmul.f32 0.35355338, %v1893_v36  ;;  %v1939_v46 = vsel %vm922_vm2, %v1925_v39, -inf }
 0x8c7   : > { %v4016_v38 = vpop.f32.mrf.mxu1 }
 0x8c8   : > { %v1936_v40 = vsel %vm922_vm2, %v1924_v37, -inf  ;;  %v1927_v45 = vmul.f32 0.35355338, %v4016_v38 }
 0x8c9   : > { %1937 = vmax.xlane.f32.xlu0 %v1936_v40  ;;  %v1903_v41 = vpop.f32.mrf.mxu1 }
 0x8ca   : > { %v1926_v44 = vmul.f32 0.35355338, %v1903_v41  ;;  %v1945_v50 = vsel %vm922_vm2, %v1927_v45, -inf }
 0x8cb   : > { %v4019_v48 = vpop.f32.mrf.mxu1 }
 0x8cc   : > { %v1942_v47 = vsel %vm922_vm2, %v1926_v44, -inf  ;;  %v1929_v49 = vmul.f32 0.35355338, %v4019_v48 }
 0x8cd   : > { %1940 = vmax.xlane.f32.xlu0 %v1939_v46  ;;  %1943 = vmax.xlane.f32.xlu1 %v1942_v47  ;;  %v1913_v55 = vpop.f32.mrf.mxu1 }
 0x8ce   : > { %v1951_v54 = vsel %vm922_vm2, %v1929_v49, -inf  ;;  %v5006_v32 = vmul.f32 0.35355338, %v1913_v55 }
 0x8d0   : > { %v1948_v56 = vsel %vm922_vm2, %v5006_v32, -inf }
 0x8d1   : > { %1946 = vmax.xlane.f32.xlu0 %v1945_v50 }
 0x8d5   : > { %1952 = vmax.xlane.f32.xlu0 %v1951_v54 }
 0x8de   : > { %2032 = vrot.lane.b32.xlu1 %v4632_v22, %s4420_s23 }
 0x8e2   : > { %2028 = vrot.lane.b32.xlu1 %v4634_v26, %s4420_s23 }
 0x8eb   : > { %2030 = vrot.lane.b32.xlu0 %v4629_v19, %s4420_s23 }
 0x8ef   : > { %2024 = vrot.lane.b32.xlu0 %v4637_v27, %s4420_s23 }
 0x906   : > { %1949 = vmax.xlane.f32.xlu1 %v1948_v56 }
 0x917   : > { %2026 = vrot.lane.b32.xlu1 %v4640_v28, %s4420_s23 }
 0x91b   : > { %2022 = vrot.lane.b32.xlu1 %v4646_v30, %s4420_s23 }
 0x94c   : > { %v1935_v57 = vpop.xlane.xlu1 %1934 }
 0x94d   : > { %v1955_v58 = vsub.f32 %v1923_v21, %v1935_v57 }
 0x94e   : > { %v1932_v25 = vpop.xlane.xlu0 %1931 }
 0x94f   : > { %v1964_v59 = vmul.f32 1.442695, %v1955_v58  ;;  %v1954_v60 = vsub.f32 %v1922_v23, %v1932_v25 }
 0x951   : > { %4291 = vpow2.f32 %v1964_v59  ;;  %v1962_v61 = vmul.f32 1.442695, %v1954_v60  ;;  %v4076_v60 = vpop.f32.mrf.mxu1 }
 0x952   : > { %v1938_v62 = vpop.xlane.xlu0 %1937 }
 0x953   : > { %4293 = vpow2.f32 %v1962_v61  ;;  %v1956_v63 = vsub.f32 %v1924_v37, %v1938_v62  ;;  %v2394_v62 = vpop.f32.mrf.mxu1 }
 0x955   : > { %v1966_v33 = vmul.f32 1.442695, %v1956_v63  ;;  %v4079_v63 = vpop.f32.mrf.mxu1 }
 0x956   : > { %v1941_v42 = vpop.xlane.xlu0 %1940  ;;  %v1944_v0 = vpop.xlane.xlu1 %1943 }
 0x957   : > { %4295 = vpow2.f32 %v1966_v33  ;;  %v1957_v1 = vsub.f32 %v1925_v39, %v1941_v42  ;;  %v1958_v6 = vsub.f32 %v1926_v44, %v1944_v0  ;;  %v5047_v42 = vmul.f32 0.35355338, %v2394_v62  ;;  %v2404_v0 = vpop.f32.mrf.mxu1 }
 0x959   : > { %v1968_v7 = vmul.f32 1.442695, %v1957_v1  ;;  %v1970_v8 = vmul.f32 1.442695, %v1958_v6  ;;  %v5051_v1 = vmul.f32 0.35355338, %v2404_v0 }
 0x95a   : > { %v1947_v9 = vpop.xlane.xlu0 %1946  ;;  %v2033_v24 = vpop.permute.xlu1 %2032  ;;  %v2441_v6 = vsel %vm922_vm2, %v5047_v42, -inf }
 0x95b   : > { %4297 = vpow2.f32 %v1968_v7  ;;  %v1959_v21 = vsub.f32 %v1927_v45, %v1947_v9  ;;  %4020 = vmatprep.subr.mxu0 %v2033_v24  ;;  %v4082_v7 = vpop.f32.mrf.mxu1  ;;  %v2447_v9 = vsel %vm922_vm2, %v5051_v1, -inf }
 0x95c   : > { %4299 = vpow2.f32 %v1970_v8  ;;  %4021 = vmatpush3.msra.mxu0 %v2033_v24  ;;  %v5055_v8 = vmul.f32 0.35355338, %v4079_v63 }
 0x95d   : > { %v1972_v51 = vmul.f32 1.442695, %v1959_v21  ;;  %v2414_v24 = vpop.f32.mrf.mxu1  ;;  %v5059_v21 = vmul.f32 0.35355338, %v4082_v7 }
 0x95e   : > { %v5014_v23 = vpop.eup %4291  ;;  %v1953_v31 = vpop.xlane.xlu0 %1952 }
 0x95f   : > { %4301 = vpow2.f32 %v1972_v51  ;;  %v1961_v34 = vsub.f32 %v1929_v49, %v1953_v31  ;;  %v1981_v35 = vsel %vm922_vm2, %v5014_v23, 0.0  ;;  %v2029_v41 = vpop.permute.xlu1 %2028  ;;  %v2450_v51 = vsel %vm922_vm2, %v5055_v8, -inf  ;;  %v4085_v31 = vpop.f32.mrf.mxu1 }
 0x960   : > { %v5018_v36 = vpop.eup %4293  ;;  %1982 = vadd.xlane.f32.xlu0 %v1981_v35  ;;  %v2456_v35 = vsel %vm922_vm2, %v5059_v21, -inf }
 0x961   : > { %v1976_v37 = vmul.f32 1.442695, %v1961_v34  ;;  %v1978_v38 = vsel %vm922_vm2, %v5018_v36, 0.0  ;;  %v5063_v34 = vmul.f32 0.35355338, %v4085_v31 }
 0x962   : > { %v2031_v39 = vpop.permute.xlu0 %2030  ;;  %1979 = vadd.xlane.f32.xlu1 %v1978_v38  ;;  %v5075_v38 = vmul.f32 0.35355338, %v4076_v60  ;;  %v2175_v60 = vld [vmem:[%s5545_s5 + $0x8] sm:$0xf] }
 0x963   : > { %4303 = vpow2.f32 %v1976_v37  ;;  %4022 = vmatprep.subr.mxu0 %v2031_v39  ;;  %v2462_v37 = vsel %vm922_vm2, %v5063_v34, -inf  ;;  %v2189_v0 = vsel %vm1604_vm3, %v2175_v60, 0 }
 0x964   : > { %v5022_v40 = vpop.eup %4295  ;;  %4023 = vmatpush3.msra.mxu0 %v2031_v39  ;;  %v5077_v39 = vmul.f32 0.35355338, %v2414_v24 }
 0x965   : > { %4024 = vmatprep.subr.mxu0 %v2029_v41  ;;  %v1984_v44 = vsel %vm922_vm2, %v5022_v40, 0.0 }
 0x966   : > { %1985 = vadd.xlane.f32.xlu1 %v1984_v44  ;;  %4025 = vmatpush3.msra.mxu0 %v2029_v41  ;;  %v2025_v59 = vpop.permute.xlu0 %2024  ;;  %v2444_v41 = vsel %vm922_vm2, %v5075_v38, -inf  ;;  %v2424_v44 = vpop.f32.mrf.mxu1 }
 0x968   : > { %v5026_v45 = vpop.eup %4297 }
 0x969   : > { %v5028_v46 = vpop.eup %4299  ;;  %v1987_v47 = vsel %vm922_vm2, %v5026_v45, 0.0 }
 0x96a   : > { %1988 = vadd.xlane.f32.xlu0 %v1987_v47  ;;  %v1990_v48 = vsel %vm922_vm2, %v5028_v46, 0.0  ;;  %v5081_v47 = vmul.f32 0.35355338, %v2424_v44 }
 0x96b   : > { %1991 = vadd.xlane.f32.xlu1 %v1990_v48  ;;  %v2453_v48 = vsel %vm922_vm2, %v5077_v39, -inf }
 0x96c   : > { %v5034_v49 = vpop.eup %4301 }
 0x96d   : > { %v1993_v50 = vsel %vm922_vm2, %v5034_v49, 0.0 }
 0x96e   : > { %1994 = vadd.xlane.f32.xlu0 %v1993_v50 }
 0x970   : > { %v5038_v54 = vpop.eup %4303 }
 0x971   : > { %v1999_v55 = vsel %vm922_vm2, %v5038_v54, 0.0 }
 0x972   : > { %2000 = vadd.xlane.f32.xlu0 %v1999_v55 }
 0x988   : > { %2020 = vrot.lane.b32.xlu0 %v4643_v29, %s4420_s23 }
 0x98f   : > { %v1950_v56 = vpop.xlane.xlu1 %1949 }
 0x990   : > { %v1960_v57 = vsub.f32 %v5006_v32, %v1950_v56 }
 0x992   : > { %v1974_v58 = vmul.f32 1.442695, %v1960_v57 }
 0x993   : > { %v2027_v25 = vpop.permute.xlu1 %2026 }
 0x994   : > { %4305 = vpow2.f32 %v1974_v58  ;;  %4026 = vmatprep.subr.mxu0 %v2027_v25 }
 0x995   : > { %4027 = vmatpush3.msra.mxu0 %v2027_v25 }
 0x996   : > { %4028 = vmatprep.subr.mxu0 %v2025_v59 }
 0x997   : > { %4029 = vmatpush3.msra.mxu0 %v2025_v59  ;;  %v2023_v61 = vpop.permute.xlu1 %2022 }
 0x998   : > { %4030 = vmatprep.subr.mxu0 %v2023_v61 }
 0x999   : > { %4031 = vmatpush3.msra.mxu0 %v2023_v61 }
 0x9a1   : > { %v5045_v33 = vpop.eup %4305 }
 0x9a2   : > { %v1996_v32 = vsel %vm922_vm2, %v5045_v33, 0.0 }
 0x9a3   : > { %1997 = vadd.xlane.f32.xlu1 %v1996_v32 }
 0x9a7   : > { %2442 = vmax.xlane.f32.xlu0 %v2441_v6 }
 0x9ab   : > { %2448 = vmax.xlane.f32.xlu0 %v2447_v9 }
 0x9af   : > { %2451 = vmax.xlane.f32.xlu0 %v2450_v51 }
 0x9b3   : > { %2457 = vmax.xlane.f32.xlu0 %v2456_v35 }
 0x9b4   : > { %2018 = vrot.lane.b32.xlu1 %v4625_v14, %s4420_s23 }
 0x9b7   : > { %2463 = vmax.xlane.f32.xlu0 %v2462_v37 }
 0x9cd   : > { %2541 = vrot.lane.b32.xlu0 %v4629_v19, %s4421_s24  ;;  %v2459_v19 = vsel %vm922_vm2, %v5081_v47, -inf }
 0x9d1   : > { %2535 = vrot.lane.b32.xlu0 %v4637_v27, %s4421_s24 }
 0x9d8   : > { %2445 = vmax.xlane.f32.xlu1 %v2444_v41 }
 0x9dc   : > { %2454 = vmax.xlane.f32.xlu1 %v2453_v48 }
 0x9e0   : > { %2460 = vmax.xlane.f32.xlu1 %v2459_v19 }
 0x9e9   : > { %v1983_v50 = vpop.xlane.xlu0 %1982 }
 0x9eb   : > { %v1980_v27 = vpop.xlane.xlu1 %1979 }
 0x9ec   : > { %4307 = vrcp.f32 %v1980_v27 }
 0x9ed   : > { %4309 = vrcp.f32 %v1983_v50 }
 0x9f1   : > { %2543 = vrot.lane.b32.xlu1 %v4632_v22, %s4421_s24  ;;  %v1986_v22 = vpop.xlane.xlu1 %1985 }
 0x9f2   : > { %4311 = vrcp.f32 %v1986_v22 }
 0x9f3   : > { %v1989_v55 = vpop.xlane.xlu0 %1988 }
 0x9f4   : > { %4313 = vrcp.f32 %v1989_v55 }
 0x9f5   : > { %2539 = vrot.lane.b32.xlu1 %v4634_v26, %s4421_s24  ;;  %v1992_v26 = vpop.xlane.xlu1 %1991 }
 0x9f6   : > { %4315 = vrcp.f32 %v1992_v26 }
 0x9f7   : > { %v1995_v56 = vpop.xlane.xlu0 %1994 }
 0x9f8   : > { %4317 = vrcp.f32 %v1995_v56 }
 0x9f9   : > { %v4308_v57 = vpop.eup %4307  ;;  %2537 = vrot.lane.b32.xlu1 %v4640_v28, %s4421_s24 }
 0x9fa   : > { %v2010_v58 = vmul.f32 %v4308_v57, %v5018_v36  ;;  %v4310_v36 = vpop.eup %4309 }
 0x9fb   : > { %v2001_v25 = vpop.xlane.xlu0 %2000  ;;  %v2011_v63 = vmul.f32 %v4310_v36, %v5014_v23 }
 0x9fc   : > { %4036 = vmatprep.mubr.msk.f32.mxu0 %vm922_vm2, %v2010_v58  ;;  %4319 = vrcp.f32 %v2001_v25 }
 0x9fd   : > { %2533 = vrot.lane.b32.xlu1 %v4646_v30, %s4421_s24 }
 0x9ff   : > { %v2021_v59 = vpop.permute.xlu0 %2020  ;;  %v4312_v61 = vpop.eup %4311 }
 0xa00   : > { %4032 = vmatprep.subr.mxu0 %v2021_v59  ;;  %v2012_v7 = vmul.f32 %v4312_v61, %v5022_v40 }
 0xa01   : > { %4033 = vmatpush3.msra.mxu0 %v2021_v59  ;;  %v4314_v6 = vpop.eup %4313 }
 0xa03   : > { %v4316_v9 = vpop.eup %4315 }
 0xa04   : > { %v2014_v35 = vmul.f32 %v4316_v9, %v5028_v46 }
 0xa05   : > { %v4318_v31 = vpop.eup %4317 }
 0xa06   : > { %v2015_v41 = vmul.f32 %v4318_v31, %v5034_v49 }
 0xa09   : > { %v4320_v40 = vpop.eup %4319 }
 0xa2c   : > { %v1998_v28 = vpop.xlane.xlu1 %1997 }
 0xa2d   : > { %4321 = vrcp.f32 %v1998_v28 }
 0xa30   : > { %v2443_v30 = vpop.xlane.xlu0 %2442  ;;  %v2019_v62 = vpop.permute.xlu1 %2018 }
 0xa31   : > { %v2465_v32 = vsub.f32 %v5047_v42, %v2443_v30  ;;  %4034 = vmatprep.subr.mxu0 %v2019_v62  ;;  %v2013_v42 = vmul.f32 %v4314_v6, %v5026_v45  ;;  %v2017_v45 = vmul.f32 %v4320_v40, %v5038_v54 }
 0xa32   : > { %4035 = vmatpush3.msra.mxu0 %v2019_v62 }
 0xa33   : > { %v2473_v24 = vmul.f32 1.442695, %v2465_v32  ;;  %4037 = vmatmul.mubr.msk.f32.vlgmr.msra.gmra.mxu0 %vm922_vm2, %v2011_v63  ;;  %4178 = vmatprep.subr.msk.bf16.mxu0 %vm1604_vm3, %v2175_v60 }
 0xa34   : > { %v2449_v51 = vpop.xlane.xlu0 %2448  ;;  %4039 = vmatprep.mubr.msk.f32.mxu0 %vm922_vm2, %v2012_v7  ;;  %4049 = vmatpush3.bf16.msra.mxu0 %v2189_v0 }
 0xa35   : > { %4323 = vpow2.f32 %v2473_v24  ;;  %v2467_v23 = vsub.f32 %v5051_v1, %v2449_v51 }
 0xa37   : > { %v2477_v37 = vmul.f32 1.442695, %v2467_v23  ;;  %4040 = vmatmul.mubr.msk.f32.gmra.mxu0 %vm922_vm2, %v2013_v42 }
 0xa38   : > { %4042 = vmatprep.mubr.msk.f32.mxu0 %vm922_vm2, %v2014_v35  ;;  %v2452_v27 = vpop.xlane.xlu0 %2451 }
 0xa39   : > { %4325 = vpow2.f32 %v2477_v37  ;;  %v2468_v50 = vsub.f32 %v5055_v8, %v2452_v27 }
 0xa3a   : > { %v4322_v44 = vpop.eup %4321 }
 0xa3b   : > { %4043 = vmatmul.mubr.msk.f32.gmra.mxu0 %vm922_vm2, %v2015_v41  ;;  %v2016_v48 = vmul.f32 %v4322_v44, %v5045_v33  ;;  %v2479_v56 = vmul.f32 1.442695, %v2468_v50  ;;  %v5185_v41 = vpop.f32.mrf.mxu0 }
 0xa3c   : > { %v2458_v33 = vpop.xlane.xlu0 %2457 }
 0xa3d   : > { %4045 = vmatprep.mubr.msk.f32.mxu0 %vm922_vm2, %v2016_v48  ;;  %v2470_v57 = vsub.f32 %v5059_v21, %v2458_v33  ;;  %v5187_v44 = vpop.f32.mrf.mxu0 }
 0xa3f   : > { %4046 = vmatmul.mubr.msk.f32.gmra.mxu0 %vm922_vm2, %v2017_v45  ;;  %v2483_v26 = vmul.f32 1.442695, %v2470_v57  ;;  %v5189_v48 = vpop.f32.mrf.mxu0 }
 0xa40   : > { %v2464_v25 = vpop.xlane.xlu0 %2463 }
 0xa41   : > { %v2472_v28 = vsub.f32 %v5063_v34, %v2464_v25 }
 0xa42   : > { %v5118_v46 = vpop.eup %4323 }
 0xa43   : > { %v2489_v1 = vsel %vm922_vm2, %v5118_v46, 0.0 }
 0xa44   : > { %2490 = vadd.xlane.f32.xlu1 %v2489_v1  ;;  %v5136_v21 = vpop.permute.xlu0 %2541 }
 0xa46   : > { %v5122_v19 = vpop.eup %4325 }
 0xa47   : > { %v2495_v49 = vsel %vm922_vm2, %v5122_v19, 0.0 }
 0xa48   : > { %2496 = vadd.xlane.f32.xlu1 %v2495_v49  ;;  %v5156_v0 = vpop.permute.xlu0 %2535  ;;  %v5192_v49 = vpop.f32.mrf.mxu0 }
 0xa61   : > { %v2446_v55 = vpop.xlane.xlu1 %2445 }
 0xa62   : > { %v2466_v54 = vsub.f32 %v5075_v38, %v2446_v55  ;;  %v2487_v38 = vmul.f32 1.442695, %v2472_v28 }
 0xa64   : > { %v2475_v58 = vmul.f32 1.442695, %v2466_v54 }
 0xa65   : > { %v2455_v59 = vpop.xlane.xlu1 %2454 }
 0xa66   : > { %4327 = vpow2.f32 %v2475_v58  ;;  %v2469_v22 = vsub.f32 %v5077_v39, %v2455_v59 }
 0xa67   : > { %4329 = vpow2.f32 %v2479_v56 }
 0xa68   : > { %v2481_v36 = vmul.f32 1.442695, %v2469_v22 }
 0xa69   : > { %v2461_v60 = vpop.xlane.xlu1 %2460 }
 0xa6a   : > { %4331 = vpow2.f32 %v2481_v36  ;;  %v2471_v8 = vsub.f32 %v5081_v47, %v2461_v60 }
 0xa6b   : > { %4333 = vpow2.f32 %v2483_v26 }
 0xa6c   : > { %v2485_v61 = vmul.f32 1.442695, %v2471_v8 }
 0xa6d   : > { %v5132_v30 = vpop.permute.xlu1 %2543 }
 0xa6e   : > { %4335 = vpow2.f32 %v2485_v61  ;;  %4086 = vmatprep.subr.mxu0 %v5132_v30  ;;  %4160 = vmatprep.subr.mxu1 %v5132_v30 }
 0xa6f   : > { %4168 = vmatpush3.msra.mxu1 %v5132_v30  ;;  %4337 = vpow2.f32 %v2487_v38 }
 0xa70   : > { %4161 = vmatprep.subr.mxu1 %v5136_v21 }
 0xa71   : > { %4169 = vmatpush3.msra.mxu1 %v5136_v21  ;;  %v5141_v34 = vpop.permute.xlu1 %2539 }
 0xa72   : > { %4162 = vmatprep.subr.mxu1 %v5141_v34 }
 0xa73   : > { %v5144_v39 = vpop.eup %4327  ;;  %4170 = vmatpush3.msra.mxu1 %v5141_v34 }
 0xa74   : > { %v2492_v47 = vsel %vm922_vm2, %v5144_v39, 0.0  ;;  %v5149_v62 = vpop.eup %4329 }
 0xa75   : > { %2493 = vadd.xlane.f32.xlu0 %v2492_v47  ;;  %v5151_v63 = vpop.permute.xlu1 %2537  ;;  %v2498_v6 = vsel %vm922_vm2, %v5149_v62, 0.0 }
 0xa76   : > { %4163 = vmatprep.subr.mxu1 %v5151_v63 }
 0xa77   : > { %v5154_v32 = vpop.eup %4331  ;;  %4171 = vmatpush3.msra.mxu1 %v5151_v63 }
 0xa78   : > { %4164 = vmatprep.subr.mxu1 %v5156_v0  ;;  %v2501_v7 = vsel %vm922_vm2, %v5154_v32, 0.0  ;;  %v5164_v9 = vpop.eup %4333 }
 0xa79   : > { %2499 = vadd.xlane.f32.xlu0 %v2498_v6  ;;  %2502 = vadd.xlane.f32.xlu1 %v2501_v7  ;;  %v5166_v24 = vpop.permute.xlu1 %2533  ;;  %v2504_v23 = vsel %vm922_vm2, %v5164_v9, 0.0 }
 0xa7a   : > { %4172 = vmatpush3.msra.mxu1 %v5156_v0 }
 0xa7b   : > { %v5169_v51 = vpop.eup %4335  ;;  %4165 = vmatprep.subr.mxu1 %v5166_v24 }
 0xa7c   : > { %4173 = vmatpush3.msra.mxu1 %v5166_v24  ;;  %v2507_v42 = vsel %vm922_vm2, %v5169_v51, 0.0  ;;  %v5177_v31 = vpop.eup %4337 }
 0xa7d   : > { %2505 = vadd.xlane.f32.xlu0 %v2504_v23  ;;  %2508 = vadd.xlane.f32.xlu1 %v2507_v42  ;;  %v2510_v35 = vsel %vm922_vm2, %v5177_v31, 0.0 }
 0xa81   : > { %2511 = vadd.xlane.f32.xlu0 %v2510_v35 }
 0xa8e   : > { %2529 = vrot.lane.b32.xlu1 %v4625_v14, %s4421_s24  ;;  %v5195_v14 = vpop.f32.mrf.mxu0 }
 0xa90   : > { %v5197_v27 = vpop.f32.mrf.mxu0 }
 0xa97   : > { %2531 = vrot.lane.b32.xlu0 %v4643_v29, %s4421_s24  ;;  %v5199_v29 = vpop.f32.mrf.mxu0 }
 0xa99   : > { %v5201_v33 = vpop.f32.mrf.mxu0 }
 0xacd   : > { %v2491_v37 = vpop.xlane.xlu1 %2490 }
 0xad1   : > { %v2497_v40 = vpop.xlane.xlu1 %2496 }
 0xad2   : > { %4339 = vrcp.f32 %v2497_v40 }
 0xad3   : > { %4341 = vrcp.f32 %v2491_v37 }
 0xadf   : > { %v4340_v45 = vpop.eup %4339 }
 0xae0   : > { %v2523_v1 = vmul.f32 %v4340_v45, %v5122_v19  ;;  %v4342_v28 = vpop.eup %4341 }
 0xae1   : > { %v2521_v61 = vmul.f32 %v4342_v28, %v5118_v46 }
 0xae2   : > { %4105 = vmatprep.mubr.msk.f32.mxu1 %vm922_vm2, %v2523_v1  ;;  %v1723_v1 = vadd.f32 %v5187_v44, %v4977_v52  ;;  %v1739_v52 = vadd.f32 %v5197_v27, %v4985_v15 }
 0xaf3   : > { %v4038_v50 = vpop.f32.mrf.mxu0 }
 0xaf5   : > { %v2132_v55 = vpop.f32.mrf.mxu0 }
 0xaf6   : > { %v2171_v54 = vpack.c.bf16 %v4038_v50, %v2132_v55  ;;  %v1734_v55 = vadd.f32 %v5189_v48, %v4979_v10  ;;  %v1750_v10 = vadd.f32 %v5199_v29, %v4987_v18 }
 0xaf7   : > { %v4041_v56 = vpop.f32.mrf.mxu0 }
 0xaf8   : > { %4050 = vmatprep.mubr.msk.bf16.mxu0 %vm776_vm1, %v2171_v54 }
 0xaf9   : > { %v2142_v19 = vpop.f32.mrf.mxu0 }
 0xafa   : > { %v2172_v57 = vpack.c.bf16 %v4041_v56, %v2142_v19  ;;  %v1726_v19 = vadd.f32 %v5192_v49, %v4981_v13  ;;  %v1742_v13 = vadd.f32 %v5201_v33, %v4989_v20 }
 0xafb   : > { %v4044_v58 = vpop.f32.mrf.mxu0 }
 0xafc   : > { %4051 = vmatmul.mubr.msk.bf16.vlgmr.msra.gmra.mxu0 %vm776_vm1, %v2172_v57 }
 0xafd   : > { %4087 = vmatpush3.msra.mxu0 %v5132_v30  ;;  %v2152_v25 = vpop.f32.mrf.mxu0 }
 0xafe   : > { %v2173_v59 = vpack.c.bf16 %v4044_v58, %v2152_v25  ;;  %4088 = vmatprep.subr.mxu0 %v5136_v21  ;;  %v2494_v22 = vpop.xlane.xlu0 %2493  ;;  %v1747_v25 = vadd.f32 %v5195_v14, %v4983_v53 }
 0xaff   : > { %4089 = vmatpush3.msra.mxu0 %v5136_v21  ;;  %v4047_v26 = vpop.f32.mrf.mxu0  ;;  %4343 = vrcp.f32 %v2494_v22 }
 0xb00   : > { %4090 = vmatprep.subr.mxu0 %v5141_v34  ;;  %4054 = vmatprep.mubr.msk.bf16.mxu0 %vm776_vm1, %v2173_v59 }
 0xb01   : > { %4091 = vmatpush3.msra.mxu0 %v5141_v34  ;;  %v2162_v36 = vpop.f32.mrf.mxu0 }
 0xb02   : > { %v2174_v60 = vpack.c.bf16 %v4047_v26, %v2162_v36  ;;  %4092 = vmatprep.subr.mxu0 %v5151_v63  ;;  %v2500_v8 = vpop.xlane.xlu0 %2499  ;;  %v2503_v38 = vpop.xlane.xlu1 %2502 }
 0xb03   : > { %4345 = vrcp.f32 %v2500_v8  ;;  %4093 = vmatpush3.msra.mxu0 %v5151_v63 }
 0xb04   : > { %4347 = vrcp.f32 %v2503_v38  ;;  %4094 = vmatprep.subr.mxu0 %v5156_v0  ;;  %4055 = vmatmul.mubr.msk.bf16.gmra.mxu0 %vm776_vm1, %v2174_v60 }
 0xb05   : > { %4095 = vmatpush3.msra.mxu0 %v5156_v0  ;;  %4102 = vmatprep.mubr.msk.f32.mxu0 %vm922_vm2, %v2521_v61 }
 0xb06   : > { %4096 = vmatprep.subr.mxu0 %v5166_v24  ;;  %v2506_v30 = vpop.xlane.xlu0 %2505  ;;  %v2509_v21 = vpop.xlane.xlu1 %2508 }
 0xb07   : > { %4349 = vrcp.f32 %v2506_v30  ;;  %4097 = vmatpush3.msra.mxu0 %v5166_v24 }
 0xb08   : > { %4351 = vrcp.f32 %v2509_v21 }
 0xb0a   : > { %v2512_v34 = vpop.xlane.xlu0 %2511  ;;  %v2530_v6 = vpop.permute.xlu1 %2529 }
 0xb0b   : > { %4353 = vrcp.f32 %v2512_v34 }
 0xb0c   : > { %v4344_v46 = vpop.eup %4343 }
 0xb0d   : > { %v2522_v7 = vmul.f32 %v4344_v46, %v5144_v39 }
 0xb0e   : > { %v2532_v47 = vpop.permute.xlu0 %2531 }
 0xb0f   : > { %4098 = vmatprep.subr.mxu0 %v2532_v47  ;;  %4166 = vmatprep.subr.mxu1 %v2532_v47 }
 0xb10   : > { %v4346_v63 = vpop.eup %4345  ;;  %4099 = vmatpush3.msra.mxu0 %v2532_v47  ;;  %4174 = vmatpush3.msra.mxu1 %v2532_v47 }
 0xb11   : > { %v4348_v0 = vpop.eup %4347  ;;  %v2524_v23 = vmul.f32 %v4346_v63, %v5149_v62  ;;  %4100 = vmatprep.subr.mxu0 %v2530_v6  ;;  %4167 = vmatprep.subr.mxu1 %v2530_v6  ;;  %v3616_v63 = vld [vmem:[%s5546_s6] ss:$0 sm:$0xff] }
 0xb12   : > { %4101 = vmatpush3.msra.mxu0 %v2530_v6  ;;  %4175 = vmatpush3.msra.mxu1 %v2530_v6  ;;  %v2525_v24 = vmul.f32 %v4348_v0, %v5154_v32  ;;  %v2686_v32 = vld [vmem:[%s5545_s5 + $0xc] sm:$0xf] }
 0xb13   : > { %4103 = vmatmul.mubr.msk.f32.vlgmr.msra.gmra.mxu0 %vm922_vm2, %v2522_v7  ;;  %4106 = vmatmul.mubr.msk.f32.vlgmr.msra.gmra.mxu1 %vm922_vm2, %v2524_v23  ;;  %v2700_v45 = vsel %vm1604_vm3, %v2686_v32, 0 }
 0xb14   : > { %v4350_v42 = vpop.eup %4349  ;;  %4108 = vmatprep.mubr.msk.f32.mxu1 %vm922_vm2, %v2525_v24  ;;  %4179 = vmatprep.subr.msk.bf16.mxu0 %vm1604_vm3, %v2686_v32 }
 0xb15   : > { %v4352_v35 = vpop.eup %4351  ;;  %v2526_v37 = vmul.f32 %v4350_v42, %v5164_v9  ;;  %4115 = vmatpush3.bf16.msra.mxu0 %v2700_v45  ;;  %v1731_v9 = vadd.f32 %v5185_v41, %v4975_v43 }
 0xb16   : > { %v2527_v39 = vmul.f32 %v4352_v35, %v5169_v51 }
 0xb17   : > { %4109 = vmatmul.mubr.msk.f32.gmra.mxu1 %vm922_vm2, %v2526_v37 }
 0xb18   : > { %v4354_v62 = vpop.eup %4353  ;;  %4111 = vmatprep.mubr.msk.f32.mxu1 %vm922_vm2, %v2527_v39 }
 0xb19   : > { %v2528_v40 = vmul.f32 %v4354_v62, %v5177_v31 }
 0xb1b   : > { %4112 = vmatmul.mubr.msk.f32.gmra.mxu1 %vm922_vm2, %v2528_v40 }
 0xbbc   : > { %v4052_v51 = vpop.f32.mrf.mxu0 }
 0xbbd   : > { %v2258_v50 = vadd.f32 %v4052_v51, %v1731_v9 }
 0xbbe   : > { %v2225_v31 = vpop.f32.mrf.mxu0 }
 0xbbf   : > { %v2256_v54 = vadd.f32 %v2225_v31, %v1723_v1 }
 0xbc0   : > { %v4053_v56 = vpop.f32.mrf.mxu0 }
 0xbc1   : > { %v2259_v57 = vadd.f32 %v4053_v56, %v1734_v55 }
 0xbc2   : > { %v2228_v58 = vpop.f32.mrf.mxu0 }
 0xbc3   : > { %v2257_v43 = vadd.f32 %v2228_v58, %v1726_v19 }
 0xbc4   : > { %v4056_v41 = vpop.f32.mrf.mxu0 }
 0xbc5   : > { %v2262_v44 = vadd.f32 %v4056_v41, %v1747_v25 }
 0xbc6   : > { %v2241_v59 = vpop.f32.mrf.mxu0 }
 0xbc7   : > { %v2260_v48 = vadd.f32 %v2241_v59, %v1739_v52 }
 0xbc8   : > { %v4057_v22 = vpop.f32.mrf.mxu0 }
 0xbc9   : > { %v2263_v49 = vadd.f32 %v4057_v22, %v1750_v10 }
 0xbca   : > { %v2244_v26 = vpop.f32.mrf.mxu0 }
 0xbcb   : > { %v2261_v28 = vadd.f32 %v2244_v26, %v1742_v13 }
 0xbd3   : > { %v4104_v36 = vpop.f32.mrf.mxu0  ;;  %v4107_v53 = vpop.f32.mrf.mxu1 }
 0xbd5   : > { %v2643_v14 = vpop.f32.mrf.mxu0  ;;  %v2653_v60 = vpop.f32.mrf.mxu1 }
 0xbd6   : > { %v2682_v8 = vpack.c.bf16 %v4104_v36, %v2643_v14  ;;  %v2683_v38 = vpack.c.bf16 %v4107_v53, %v2653_v60 }
 0xbd7   : > { %v4110_v15 = vpop.f32.mrf.mxu1 }
 0xbd8   : > { %4116 = vmatprep.mubr.msk.bf16.mxu0 %vm776_vm1, %v2682_v8 }
 0xbd9   : > { %v2663_v27 = vpop.f32.mrf.mxu1  ;;  %4117 = vmatmul.mubr.msk.bf16.vlgmr.msra.gmra.mxu0 %vm776_vm1, %v2683_v38 }
 0xbda   : > { %v2684_v18 = vpack.c.bf16 %v4110_v15, %v2663_v27 }
 0xbdb   : > { %v4113_v29 = vpop.f32.mrf.mxu1 }
 0xbdc   : > { %4120 = vmatprep.mubr.msk.bf16.mxu0 %vm776_vm1, %v2684_v18 }
 0xbdd   : > { %v2673_v20 = vpop.f32.mrf.mxu1 }
 0xbde   : > { %v2685_v33 = vpack.c.bf16 %v4113_v29, %v2673_v20 }
 0xbe1   : > { %4121 = vmatmul.mubr.msk.bf16.gmra.mxu0 %vm776_vm1, %v2685_v33 }
 0xc99   : > { %v4118_v61 = vpop.f32.mrf.mxu0 }
 0xc9a   : > { %v2769_v30 = vadd.f32 %v4118_v61, %v2258_v50 }
 0xc9b   : > { %v2736_v21 = vpop.f32.mrf.mxu0 }
 0xc9c   : > { %v2767_v34 = vadd.f32 %v2736_v21, %v2256_v54  ;;  %v2777_v46 = vadd.f32 %v4520_v3, %v2769_v30 }
 0xc9d   : > { %v4119_v47 = vpop.f32.mrf.mxu0 }
 0xc9e   : > { %v2775_v6 = vadd.f32 %v4518_v2, %v2767_v34  ;;  %v2770_v0 = vadd.f32 %v4119_v47, %v2259_v57  ;;  %v5264_v42 = vadd.f32 %v3616_v63, %v2777_v46 }
 0xc9f   : > { %v2739_v7 = vpop.f32.mrf.mxu0 }
 0xca0   : > { %v5262_v23 = vadd.f32 %v3616_v63, %v2775_v6  ;;  %v2768_v24 = vadd.f32 %v2739_v7, %v2257_v43  ;;  %v2778_v35 = vadd.f32 %v4524_v5, %v2770_v0  ;;  %v2806_v51 = vsel %vm514_vm0, %v5264_v42, 0.0 }
 0xca1   : > { %v4122_v37 = vpop.f32.mrf.mxu0 }
 0xca2   : > { %v2776_v39 = vadd.f32 %v4522_v4, %v2768_v24  ;;  %v2773_v3 = vadd.f32 %v4122_v37, %v2262_v44  ;;  %v2800_v62 = vsel %vm514_vm0, %v5262_v23, 0.0  ;;  %v5272_v45 = vadd.f32 %v3616_v63, %v2778_v35 }
 0xca3   : > { %2801 = vadd.xlane.f32.xlu0 %v2800_v62  ;;  %v2752_v40 = vpop.f32.mrf.mxu0 }
 0xca4   : > { %v5270_v32 = vadd.f32 %v3616_v63, %v2776_v39  ;;  %v2771_v2 = vadd.f32 %v2752_v40, %v2260_v48  ;;  %v2781_v5 = vadd.f32 %v4542_v16, %v2773_v3  ;;  %v2809_v56 = vsel %vm514_vm0, %v5272_v45, 0.0 }
 0xca5   : > { %v4123_v9 = vpop.f32.mrf.mxu0 }
 0xca6   : > { %v2779_v1 = vadd.f32 %v4534_v11, %v2771_v2  ;;  %v2774_v4 = vadd.f32 %v4123_v9, %v2263_v49  ;;  %v2803_v50 = vsel %vm514_vm0, %v5270_v32, 0.0  ;;  %v5284_v19 = vadd.f32 %v3616_v63, %v2781_v5  ;;  %v4201_v2 = vld [vmem:[%s5549_s9 + $0x8] sm:$0xff]   ;;  %v4202_v9 = vld [vmem:[%s5549_s9] sm:$0xff]  }
 0xca7   : > { %2807 = vadd.xlane.f32.xlu0 %v2806_v51  ;;  %2804 = vadd.xlane.f32.xlu1 %v2803_v50  ;;  %v2755_v31 = vpop.f32.mrf.mxu0 }
 0xca8   : > { %v5280_v55 = vadd.f32 %v3616_v63, %v2779_v1  ;;  %v2772_v54 = vadd.f32 %v2755_v31, %v2261_v28  ;;  %v2782_v57 = vadd.f32 %v4544_v17, %v2774_v4  ;;  %v2818_v43 = vsel %vm514_vm0, %v5284_v19, 0.0  ;;  %4124 = vmatprep.subr.bf16.mxu1 %v4201_v2 }
 0xca9   : > { %4125 = vmatpush3.bf16.msra.mxu1 %v4201_v2 }
 0xcaa   : > { %v2780_v16 = vadd.f32 %v4536_v12, %v2772_v54  ;;  %v2812_v11 = vsel %vm514_vm0, %v5280_v55, 0.0  ;;  %v5292_v25 = vadd.f32 %v3616_v63, %v2782_v57  ;;  %4126 = vmatprep.subr.bf16.mxu1 %v4202_v9 }
 0xcab   : > { %2810 = vadd.xlane.f32.xlu0 %v2809_v56  ;;  %2813 = vadd.xlane.f32.xlu1 %v2812_v11 }
 0xcac   : > { %v5290_v58 = vadd.f32 %v3616_v63, %v2780_v16  ;;  %v2821_v12 = vsel %vm514_vm0, %v5292_v25, 0.0 }
 0xcad   : > { %4127 = vmatpush3.bf16.msra.mxu1 %v4202_v9 }
 0xcae   : > { %v2815_v41 = vsel %vm514_vm0, %v5290_v58, 0.0 }
 0xcaf   : > { %2819 = vadd.xlane.f32.xlu1 %v2818_v43  ;;  %2816 = vadd.xlane.f32.xlu0 %v2815_v41 }
 0xcb3   : > { %2822 = vadd.xlane.f32.xlu0 %v2821_v12 }
 0xd2c   : > { %v2802_v17 = vpop.xlane.xlu0 %2801 }
 0xd2d   : > { %v2824_v52 = vmul.f32 0.03125, %v2802_v17 }
 0xd2f   : > { %v5301_v44 = vsub.f32 %v5262_v23, %v2824_v52 }
 0xd30   : > { %v2808_v59 = vpop.xlane.xlu0 %2807  ;;  %v2805_v10 = vpop.xlane.xlu1 %2804 }
 0xd31   : > { %v2826_v48 = vmul.f32 0.03125, %v2808_v59  ;;  %v2825_v22 = vmul.f32 0.03125, %v2805_v10  ;;  %v2840_v13 = vmul.f32 %v5301_v44, %v5301_v44 }
 0xd33   : > { %v5306_v49 = vsub.f32 %v5264_v42, %v2826_v48  ;;  %v5309_v26 = vsub.f32 %v5270_v32, %v2825_v22  ;;  %v2848_v28 = vsel %vm514_vm0, %v2840_v13, 0.0 }
 0xd34   : > { %v2811_v36 = vpop.xlane.xlu0 %2810  ;;  %2849 = vadd.xlane.f32.xlu1 %v2848_v28  ;;  %v2814_v53 = vpop.xlane.xlu1 %2813 }
 0xd35   : > { %v2827_v14 = vmul.f32 0.03125, %v2811_v36  ;;  %v2828_v60 = vmul.f32 0.03125, %v2814_v53  ;;  %v2842_v8 = vmul.f32 %v5306_v49, %v5306_v49  ;;  %v2841_v38 = vmul.f32 %v5309_v26, %v5309_v26 }
 0xd37   : > { %v5317_v15 = vsub.f32 %v5272_v45, %v2827_v14  ;;  %v5320_v27 = vsub.f32 %v5280_v55, %v2828_v60  ;;  %v2854_v18 = vsel %vm514_vm0, %v2842_v8, 0.0  ;;  %v2851_v29 = vsel %vm514_vm0, %v2841_v38, 0.0  ;;  %v3617_v8 = vld [vmem:[%s5547_s7] ss:$0 sm:$0xff] }
 0xd38   : > { %2855 = vadd.xlane.f32.xlu1 %v2854_v18  ;;  %v2820_v20 = vpop.xlane.xlu1 %2819  ;;  %2852 = vadd.xlane.f32.xlu0 %v2851_v29  ;;  %v2817_v33 = vpop.xlane.xlu0 %2816 }
 0xd39   : > { %v2830_v61 = vmul.f32 0.03125, %v2820_v20  ;;  %v2829_v30 = vmul.f32 0.03125, %v2817_v33  ;;  %v2844_v21 = vmul.f32 %v5320_v27, %v5320_v27  ;;  %v2843_v34 = vmul.f32 %v5317_v15, %v5317_v15  ;;  %v3618_v33 = vld [vmem:[%s5548_s8] ss:$0 sm:$0xff] }
 0xd3b   : > { %v5329_v46 = vsub.f32 %v5284_v19, %v2830_v61  ;;  %v5332_v47 = vsub.f32 %v5290_v58, %v2829_v30  ;;  %v2860_v63 = vsel %vm514_vm0, %v2844_v21, 0.0  ;;  %v2857_v6 = vsel %vm514_vm0, %v2843_v34, 0.0 }
 0xd3c   : > { %2861 = vadd.xlane.f32.xlu1 %v2860_v63  ;;  %2858 = vadd.xlane.f32.xlu0 %v2857_v6  ;;  %v2823_v0 = vpop.xlane.xlu0 %2822 }
 0xd3d   : > { %v2831_v7 = vmul.f32 0.03125, %v2823_v0  ;;  %v2846_v24 = vmul.f32 %v5329_v46, %v5329_v46  ;;  %v2845_v35 = vmul.f32 %v5332_v47, %v5332_v47 }
 0xd3f   : > { %v5341_v37 = vsub.f32 %v5292_v25, %v2831_v7  ;;  %v2866_v39 = vsel %vm514_vm0, %v2846_v24, 0.0  ;;  %v2863_v3 = vsel %vm514_vm0, %v2845_v35, 0.0 }
 0xd40   : > { %2867 = vadd.xlane.f32.xlu1 %v2866_v39  ;;  %2864 = vadd.xlane.f32.xlu0 %v2863_v3 }
 0xd41   : > { %v2847_v62 = vmul.f32 %v5341_v37, %v5341_v37 }
 0xd43   : > { %v2869_v40 = vsel %vm514_vm0, %v2847_v62, 0.0 }
 0xd44   : > { %2870 = vadd.xlane.f32.xlu0 %v2869_v40 }
 0xdbd   : > { %v2850_v51 = vpop.xlane.xlu1 %2849 }
 0xdbe   : > { %v2872_v5 = vmul.f32 0.03125, %v2850_v51 }
 0xdc0   : > { %v2880_v1 = vadd.f32 1e-06, %v2872_v5 }
 0xdc1   : > { %v2856_v4 = vpop.xlane.xlu1 %2855  ;;  %v2853_v50 = vpop.xlane.xlu0 %2852 }
 0xdc2   : > { %4355 = vrsqrt.f32 %v2880_v1  ;;  %v2874_v31 = vmul.f32 0.03125, %v2856_v4  ;;  %v2873_v54 = vmul.f32 0.03125, %v2853_v50 }
 0xdc4   : > { %v2882_v56 = vadd.f32 1e-06, %v2874_v31  ;;  %v2881_v57 = vadd.f32 1e-06, %v2873_v54 }
 0xdc5   : > { %v2862_v16 = vpop.xlane.xlu1 %2861  ;;  %v2859_v11 = vpop.xlane.xlu0 %2858 }
 0xdc6   : > { %4357 = vrsqrt.f32 %v2882_v56  ;;  %v2876_v43 = vmul.f32 0.03125, %v2862_v16  ;;  %v2875_v41 = vmul.f32 0.03125, %v2859_v11  ;;  %v4206_v16 = vld [vmem:[%s5551_s11 + $0x20] sm:$0xff]   ;;  %v4207_v11 = vld [vmem:[%s5551_s11 + $0x18] sm:$0xff]  }
 0xdc7   : > { %4359 = vrsqrt.f32 %v2881_v57  ;;  %v4205_v57 = vld [vmem:[%s5551_s11 + $0x28] sm:$0xff]  }
 0xdc8   : > { %v2884_v12 = vadd.f32 1e-06, %v2876_v43  ;;  %v2883_v17 = vadd.f32 1e-06, %v2875_v41  ;;  %v4208_v43 = vld [vmem:[%s5551_s11 + $0x10] sm:$0xff]   ;;  %v4209_v41 = vld [vmem:[%s5551_s11 + $0x8] sm:$0xff]  }
 0xdc9   : > { %v2868_v52 = vpop.xlane.xlu1 %2867  ;;  %v2865_v59 = vpop.xlane.xlu0 %2864 }
 0xdca   : > { %4361 = vrsqrt.f32 %v2884_v12  ;;  %v2878_v10 = vmul.f32 0.03125, %v2868_v52  ;;  %v2877_v48 = vmul.f32 0.03125, %v2865_v59  ;;  %v4210_v12 = vld [vmem:[%s5551_s11] sm:$0xff]  }
 0xdcb   : > { %4363 = vrsqrt.f32 %v2883_v17  ;;  %v3619_v17 = vld [vmem:[%s5550_s10] ss:$0 sm:$0xff] }
 0xdcc   : > { %v2886_v22 = vadd.f32 1e-06, %v2878_v10  ;;  %v2885_v13 = vadd.f32 1e-06, %v2877_v48 }
 0xdcd   : > { %v2871_v28 = vpop.xlane.xlu0 %2870 }
 0xdce   : > { %4365 = vrsqrt.f32 %v2886_v22  ;;  %v2879_v36 = vmul.f32 0.03125, %v2871_v28 }
 0xdcf   : > { %v4356_v53 = vpop.eup %4355  ;;  %4367 = vrsqrt.f32 %v2885_v13 }
 0xdd0   : > { %v2887_v14 = vadd.f32 1e-06, %v2879_v36  ;;  %v2896_v60 = vmul.f32 %v4356_v53, %v5301_v44 }
 0xdd2   : > { %4369 = vrsqrt.f32 %v2887_v14  ;;  %v2910_v29 = vmul.f32 %v3617_v8, %v2896_v60 }
 0xdd3   : > { %v4358_v38 = vpop.eup %4357 }
 0xdd4   : > { %v4360_v18 = vpop.eup %4359  ;;  %v2898_v20 = vmul.f32 %v4358_v38, %v5306_v49  ;;  %v2924_v44 = vadd.f32 %v3618_v33, %v2910_v29 }
 0xdd5   : > { %v2897_v61 = vmul.f32 %v4360_v18, %v5309_v26 }
 0xdd6   : > { %v2912_v63 = vmul.f32 %v3617_v8, %v2898_v20 }
 0xdd7   : > { %v4362_v30 = vpop.eup %4361  ;;  %v2911_v21 = vmul.f32 %v3617_v8, %v2897_v61 }
 0xdd8   : > { %v4364_v34 = vpop.eup %4363  ;;  %v2900_v7 = vmul.f32 %v4362_v30, %v5320_v27  ;;  %v2926_v62 = vadd.f32 %v3618_v33, %v2912_v63 }
 0xdd9   : > { %v2899_v6 = vmul.f32 %v4364_v34, %v5317_v15  ;;  %v2925_v0 = vadd.f32 %v3618_v33, %v2911_v21 }
 0xdda   : > { %v2914_v2 = vmul.f32 %v3617_v8, %v2900_v7 }
 0xddb   : > { %v4366_v24 = vpop.eup %4365  ;;  %v2913_v35 = vmul.f32 %v3617_v8, %v2899_v6  ;;  %v2932_v39 = vpack.c.bf16 %v2925_v0, %v2924_v44 }
 0xddc   : > { %v4368_v49 = vpop.eup %4367  ;;  %v2902_v3 = vmul.f32 %v4366_v24, %v5329_v46  ;;  %v2928_v27 = vadd.f32 %v3618_v33, %v2914_v2 }
 0xddd   : > { %4128 = vmatprep.mubr.msk.bf16.mxu1 %vm514_vm0, %v2932_v39  ;;  %v2927_v26 = vadd.f32 %v3618_v33, %v2913_v35  ;;  %v2901_v40 = vmul.f32 %v4368_v49, %v5332_v47  ;;  %v4203_v47 = vld [vmem:[%s5551_s11 + $0x38] sm:$0xff]  }
 0xdde   : > { %v2916_v1 = vmul.f32 %v3617_v8, %v2902_v3  ;;  %4136 = vmatprep.subr.bf16.mxu0 %v4203_v47 }
 0xddf   : > { %v4370_v9 = vpop.eup %4369  ;;  %v2933_v51 = vpack.c.bf16 %v2927_v26, %v2926_v62  ;;  %v2915_v5 = vmul.f32 %v3617_v8, %v2901_v40  ;;  %4137 = vmatpush3.bf16.msra.mxu0 %v4203_v47 }
 0xde0   : > { %v2903_v15 = vmul.f32 %v4370_v9, %v5341_v37  ;;  %v2930_v46 = vadd.f32 %v3618_v33, %v2916_v1  ;;  %v4204_v37 = vld [vmem:[%s5551_s11 + $0x30] sm:$0xff]  }
 0xde1   : > { %4129 = vmatmul.mubr.msk.bf16.vlgmr.msra.gmra.mxu1 %vm514_vm0, %v2933_v51  ;;  %v2929_v4 = vadd.f32 %v3618_v33, %v2915_v5  ;;  %4138 = vmatprep.subr.bf16.mxu0 %v4204_v37 }
 0xde2   : > { %v2917_v50 = vmul.f32 %v3617_v8, %v2903_v15 }
 0xde3   : > { %v2934_v31 = vpack.c.bf16 %v2929_v4, %v2928_v27  ;;  %4139 = vmatpush3.bf16.msra.mxu0 %v4204_v37 }
 0xde4   : > { %v2931_v54 = vadd.f32 %v3618_v33, %v2917_v50  ;;  %4140 = vmatprep.subr.bf16.mxu0 %v4205_v57 }
 0xde5   : > { %4132 = vmatprep.mubr.msk.bf16.mxu1 %vm514_vm0, %v2934_v31 }
 0xde6   : > { %v2935_v56 = vpack.c.bf16 %v2931_v54, %v2930_v46 }
 0xde7   : > { %4141 = vmatpush3.bf16.msra.mxu0 %v4205_v57 }
 0xde8   : > { %4142 = vmatprep.subr.bf16.mxu0 %v4206_v16 }
 0xde9   : > { %4133 = vmatmul.mubr.msk.bf16.gmra.mxu1 %vm514_vm0, %v2935_v56 }
 0xdeb   : > { %4143 = vmatpush3.bf16.msra.mxu0 %v4206_v16 }
 0xdec   : > { %4144 = vmatprep.subr.bf16.mxu0 %v4207_v11 }
 0xdef   : > { %4145 = vmatpush3.bf16.msra.mxu0 %v4207_v11 }
 0xdf0   : > { %4146 = vmatprep.subr.bf16.mxu0 %v4208_v43 }
 0xdf3   : > { %4147 = vmatpush3.bf16.msra.mxu0 %v4208_v43 }
 0xdf4   : > { %4148 = vmatprep.subr.bf16.mxu0 %v4209_v41 }
 0xdf7   : > { %4149 = vmatpush3.bf16.msra.mxu0 %v4209_v41 }
 0xdf8   : > { %4150 = vmatprep.subr.bf16.mxu0 %v4210_v12 }
 0xdfb   : > { %4151 = vmatpush3.bf16.msra.mxu0 %v4210_v12 }
 0xea1   : > { %v4130_v52 = vpop.f32.mrf.mxu1 }
 0xea2   : > { %v5399_v59 = vadd.f32 %v4130_v52, %v3619_v17 }
 0xea3   : > { %v3005_v10 = vpop.f32.mrf.mxu1 }
 0xea4   : > { %v3038_v48 = vmul.f32 %v5399_v59, %v5399_v59  ;;  %v5403_v22 = vadd.f32 %v3619_v17, %v3005_v10 }
 0xea5   : > { %v4131_v13 = vpop.f32.mrf.mxu1 }
 0xea6   : > { %v3046_v28 = vmul.f32 %v3038_v48, %v5399_v59  ;;  %v3036_v36 = vmul.f32 %v5403_v22, %v5403_v22  ;;  %v5408_v53 = vadd.f32 %v4131_v13, %v3619_v17 }
 0xea7   : > { %v3008_v14 = vpop.f32.mrf.mxu1 }
 0xea8   : > { %v3054_v60 = vmul.f32 0.044715, %v3046_v28  ;;  %v3044_v8 = vmul.f32 %v3036_v36, %v5403_v22  ;;  %v3039_v38 = vmul.f32 %v5408_v53, %v5408_v53  ;;  %v5413_v18 = vadd.f32 %v3619_v17, %v3008_v14 }
 0xea9   : > { %v4134_v29 = vpop.f32.mrf.mxu1 }
 0xeaa   : > { %v3062_v20 = vadd.f32 %v3054_v60, %v5399_v59  ;;  %v3052_v33 = vmul.f32 0.044715, %v3044_v8  ;;  %v3047_v61 = vmul.f32 %v3039_v38, %v5408_v53  ;;  %v3037_v30 = vmul.f32 %v5413_v18, %v5413_v18 }
 0xeab   : > { %v5419_v21 = vadd.f32 %v4134_v29, %v3619_v17  ;;  %v3021_v34 = vpop.f32.mrf.mxu1 }
 0xeac   : > { %v3070_v44 = vmul.f32 0.7978846, %v3062_v20  ;;  %v3060_v63 = vadd.f32 %v3052_v33, %v5403_v22  ;;  %v3055_v6 = vmul.f32 0.044715, %v3047_v61  ;;  %v3045_v0 = vmul.f32 %v3037_v30, %v5413_v18 }
 0xead   : > { %v3042_v7 = vmul.f32 %v5419_v21, %v5419_v21  ;;  %v5425_v24 = vadd.f32 %v3619_v17, %v3021_v34  ;;  %v4135_v35 = vpop.f32.mrf.mxu1 }
 0xeae   : > { %v3068_v39 = vmul.f32 0.7978846, %v3060_v63  ;;  %v3063_v49 = vadd.f32 %v3055_v6, %v5408_v53  ;;  %v3053_v3 = vmul.f32 0.044715, %v3045_v0  ;;  %4371 = vtanh.f32 %v3070_v44 }
 0xeaf   : > { %v3050_v62 = vmul.f32 %v3042_v7, %v5419_v21  ;;  %v3040_v26 = vmul.f32 %v5425_v24, %v5425_v24  ;;  %v3033_v40 = vadd.f32 %v4135_v35, %v3619_v17  ;;  %v3024_v2 = vpop.f32.mrf.mxu1 }
 0xeb0   : > { %4373 = vtanh.f32 %v3068_v39  ;;  %v3071_v9 = vmul.f32 0.7978846, %v3063_v49  ;;  %v3061_v51 = vadd.f32 %v3053_v3, %v5413_v18  ;;  %v3025_v5 = vadd.f32 %v3619_v17, %v3024_v2 }
 0xeb1   : > { %v3058_v15 = vmul.f32 0.044715, %v3050_v62  ;;  %v3048_v1 = vmul.f32 %v3040_v26, %v5425_v24  ;;  %v3043_v27 = vmul.f32 %v3033_v40, %v3033_v40 }
 0xeb2   : > { %4375 = vtanh.f32 %v3071_v9  ;;  %v3069_v4 = vmul.f32 0.7978846, %v3061_v51  ;;  %v3041_v50 = vmul.f32 %v3025_v5, %v3025_v5 }
 0xeb3   : > { %v3066_v31 = vadd.f32 %v3058_v15, %v5419_v21  ;;  %v3056_v46 = vmul.f32 0.044715, %v3048_v1  ;;  %v3051_v54 = vmul.f32 %v3043_v27, %v3033_v40  ;;  %v3626_v27 = vld [vmem:[%s5552_s12] ss:$0 sm:$0xff] }
 0xeb4   : > { %4377 = vtanh.f32 %v3069_v4  ;;  %v3049_v56 = vmul.f32 %v3041_v50, %v3025_v5 }
 0xeb5   : > { %v3074_v47 = vmul.f32 0.7978846, %v3066_v31  ;;  %v3064_v37 = vadd.f32 %v3056_v46, %v5425_v24  ;;  %v3059_v57 = vmul.f32 0.044715, %v3051_v54 }
 0xeb6   : > { %v3057_v16 = vmul.f32 0.044715, %v3049_v56 }
 0xeb7   : > { %4379 = vtanh.f32 %v3074_v47  ;;  %v3072_v11 = vmul.f32 0.7978846, %v3064_v37  ;;  %v3067_v43 = vadd.f32 %v3059_v57, %v3033_v40 }
 0xeb8   : > { %v3065_v41 = vadd.f32 %v3057_v16, %v3025_v5 }
 0xeb9   : > { %4381 = vtanh.f32 %v3072_v11  ;;  %v3075_v12 = vmul.f32 0.7978846, %v3067_v43 }
 0xeba   : > { %v3073_v17 = vmul.f32 0.7978846, %v3065_v41 }
 0xebb   : > { %4383 = vtanh.f32 %v3075_v12  ;;  %v4372_v52 = vpop.eup %4371 }
 0xebc   : > { %4385 = vtanh.f32 %v3073_v17  ;;  %v3086_v28 = vadd.f32 1.0, %v4372_v52 }
 0xebd   : > { %v4374_v10 = vpop.eup %4373 }
 0xebe   : > { %v3084_v48 = vadd.f32 1.0, %v4374_v10  ;;  %v3094_v29 = vmul.f32 0.5, %v3086_v28 }
 0xebf   : > { %v4376_v13 = vpop.eup %4375 }
 0xec0   : > { %v3087_v36 = vadd.f32 1.0, %v4376_v13  ;;  %v3092_v38 = vmul.f32 0.5, %v3084_v48  ;;  %v3102_v63 = vmul.f32 %v3094_v29, %v5399_v59 }
 0xec1   : > { %v4378_v14 = vpop.eup %4377 }
 0xec2   : > { %v3095_v60 = vmul.f32 0.5, %v3087_v36  ;;  %v3085_v8 = vadd.f32 1.0, %v4378_v14  ;;  %v3100_v34 = vmul.f32 %v3092_v38, %v5403_v22 }
 0xec4   : > { %v4380_v20 = vpop.eup %4379  ;;  %v3093_v33 = vmul.f32 0.5, %v3085_v8  ;;  %v3103_v61 = vmul.f32 %v3095_v60, %v5408_v53 }
 0xec5   : > { %v3090_v0 = vadd.f32 1.0, %v4380_v20 }
 0xec6   : > { %v4382_v30 = vpop.eup %4381  ;;  %v3101_v44 = vmul.f32 %v3093_v33, %v5413_v18  ;;  %v3109_v49 = vpack.c.bf16 %v3103_v61, %v3102_v63 }
 0xec7   : > { %v3088_v6 = vadd.f32 1.0, %v4382_v30  ;;  %v3098_v2 = vmul.f32 0.5, %v3090_v0 }
 0xec8   : > { %v4384_v7 = vpop.eup %4383  ;;  %v3108_v35 = vpack.c.bf16 %v3101_v44, %v3100_v34 }
 0xec9   : > { %v4386_v39 = vpop.eup %4385  ;;  %v3091_v3 = vadd.f32 1.0, %v4384_v7  ;;  %v3096_v26 = vmul.f32 0.5, %v3088_v6  ;;  %v3106_v59 = vmul.f32 %v3098_v2, %v5419_v21 }
 0xeca   : > { %4152 = vmatprep.mubr.bf16.mxu0 %v3108_v35  ;;  %v3089_v62 = vadd.f32 1.0, %v4386_v39 }
 0xecb   : > { %4153 = vmatmul.mubr.bf16.vlgmr.msra.gmra.mxu0 %v3109_v49  ;;  %v3099_v53 = vmul.f32 0.5, %v3091_v3  ;;  %v3104_v22 = vmul.f32 %v3096_v26, %v5425_v24 }
 0xecc   : > { %v3097_v9 = vmul.f32 0.5, %v3089_v62 }
 0xecd   : > { %v3107_v51 = vmul.f32 %v3099_v53, %v3033_v40 }
 0xece   : > { %v3105_v18 = vmul.f32 %v3097_v9, %v3025_v5 }
 0xecf   : > { %v3111_v1 = vpack.c.bf16 %v3107_v51, %v3106_v59 }
 0xed0   : > { %v3110_v15 = vpack.c.bf16 %v3105_v18, %v3104_v22 }
 0xed2   : > { %4156 = vmatprep.mubr.bf16.mxu0 %v3110_v15 }
 0xed3   : > { %4157 = vmatmul.mubr.bf16.gmra.mxu0 %v3111_v1 }
 0xf8b   : > { %v4154_v4 = vpop.f32.mrf.mxu0 }
 0xf8c   : > { %v3226_v50 = vadd.f32 %v4154_v4, %v3626_v27 }
 0xf8d   : > { %v3217_v31 = vpop.f32.mrf.mxu0 }
 0xf8e   : > { %v3250_v46 = vadd.f32 %v3226_v50, %v5264_v42  ;;  %v3218_v54 = vadd.f32 %v3626_v27, %v3217_v31 }
 0xf8f   : > { %v4155_v40 = vpop.f32.mrf.mxu0 }
 0xf90   : > { %v3248_v24 = vadd.f32 %v3218_v54, %v5262_v23  ;;  %v3229_v5 = vadd.f32 %v4155_v40, %v3626_v27  ;;  %v3264_v21 = vsel %vm514_vm0, %v3250_v46, 0.0 }
 0xf91   : > { %3265 = vadd.xlane.f32.xlu1 %v3264_v21  ;;  %v3220_v56 = vpop.f32.mrf.mxu0 }
 0xf92   : > { %v3251_v47 = vadd.f32 %v3229_v5, %v5272_v45  ;;  %v3221_v37 = vadd.f32 %v3626_v27, %v3220_v56  ;;  %v3258_v43 = vsel %vm514_vm0, %v3248_v24, 0.0 }
 0xf93   : > { %v4158_v57 = vpop.f32.mrf.mxu0 }
 0xf94   : > { %v3249_v16 = vadd.f32 %v3221_v37, %v5270_v32  ;;  %v3267_v11 = vsel %vm514_vm0, %v3251_v47, 0.0  ;;  %v3242_v41 = vadd.f32 %v4158_v57, %v3626_v27 }
 0xf95   : > { %3268 = vadd.xlane.f32.xlu0 %v3267_v11  ;;  %3259 = vadd.xlane.f32.xlu1 %v3258_v43  ;;  %v3233_v42 = vpop.f32.mrf.mxu0 }
 0xf96   : > { %v3234_v23 = vadd.f32 %v3626_v27, %v3233_v42  ;;  %v3261_v52 = vsel %vm514_vm0, %v3249_v16, 0.0  ;;  %v3254_v10 = vadd.f32 %v3242_v41, %v5284_v19 }
 0xf97   : > { %v4159_v12 = vpop.f32.mrf.mxu0 }
 0xf98   : > { %v3252_v17 = vadd.f32 %v3234_v23, %v5280_v55  ;;  %v3245_v48 = vadd.f32 %v4159_v12, %v3626_v27  ;;  %v3276_v60 = vsel %vm514_vm0, %v3254_v10, 0.0 }
 0xf99   : > { %3262 = vadd.xlane.f32.xlu0 %v3261_v52  ;;  %v3236_v45 = vpop.f32.mrf.mxu0 }
 0xf9a   : > { %v3237_v32 = vadd.f32 %v3626_v27, %v3236_v45  ;;  %v3270_v13 = vsel %vm514_vm0, %v3252_v17, 0.0  ;;  %v3255_v36 = vadd.f32 %v3245_v48, %v5292_v25 }
 0xf9b   : > { %3271 = vadd.xlane.f32.xlu1 %v3270_v13 }
 0xf9c   : > { %v3253_v28 = vadd.f32 %v3237_v32, %v5290_v58  ;;  %v3279_v55 = vsel %vm514_vm0, %v3255_v36, 0.0 }
 0xf9e   : > { %v3273_v14 = vsel %vm514_vm0, %v3253_v28, 0.0 }
 0xf9f   : > { %3274 = vadd.xlane.f32.xlu0 %v3273_v14  ;;  %3277 = vadd.xlane.f32.xlu1 %v3276_v60  ;;  %v3635_v60 = vld [vmem:[%s5553_s13] ss:$0 sm:$0xff] }
 0xfa3   : > { %3280 = vadd.xlane.f32.xlu0 %v3279_v55 }
0x101a   : > { %v3266_v8 = vpop.xlane.xlu1 %3265 }
0x101b   : > { %v3284_v19 = vmul.f32 0.03125, %v3266_v8 }
0x101d   : > { %v5460_v38 = vsub.f32 %v3250_v46, %v3284_v19 }
0x101e   : > { %v3260_v29 = vpop.xlane.xlu1 %3259  ;;  %v3269_v20 = vpop.xlane.xlu0 %3268 }
0x101f   : > { %v3282_v33 = vmul.f32 0.03125, %v3260_v29  ;;  %v3285_v61 = vmul.f32 0.03125, %v3269_v20  ;;  %v3300_v58 = vmul.f32 %v5460_v38, %v5460_v38  ;;  %v3636_v29 = vld [vmem:[%s5554_s14] ss:$0 sm:$0xff] }
0x1021   : > { %v5464_v25 = vsub.f32 %v3248_v24, %v3282_v33  ;;  %v5466_v30 = vsub.f32 %v3251_v47, %v3285_v61  ;;  %v3312_v34 = vsel %vm514_vm0, %v3300_v58, 0.0 }
0x1022   : > { %3313 = vadd.xlane.f32.xlu1 %v3312_v34  ;;  %v3263_v44 = vpop.xlane.xlu0 %3262 }
0x1023   : > { %v3283_v63 = vmul.f32 0.03125, %v3263_v44  ;;  %v3298_v6 = vmul.f32 %v5464_v25, %v5464_v25  ;;  %v3301_v0 = vmul.f32 %v5466_v30, %v5466_v30 }
0x1024   : > { %v3272_v7 = vpop.xlane.xlu1 %3271 }
0x1025   : > { %v5473_v35 = vsub.f32 %v3249_v16, %v3283_v63  ;;  %v3286_v39 = vmul.f32 0.03125, %v3272_v7  ;;  %v3306_v49 = vsel %vm514_vm0, %v3298_v6, 0.0  ;;  %v3315_v3 = vsel %vm514_vm0, %v3301_v0, 0.0 }
0x1026   : > { %3307 = vadd.xlane.f32.xlu1 %v3306_v49  ;;  %3316 = vadd.xlane.f32.xlu0 %v3315_v3 }
0x1027   : > { %v5477_v62 = vsub.f32 %v3252_v17, %v3286_v39  ;;  %v3299_v26 = vmul.f32 %v5473_v35, %v5473_v35 }
0x1028   : > { %v3278_v2 = vpop.xlane.xlu1 %3277  ;;  %v3275_v53 = vpop.xlane.xlu0 %3274 }
0x1029   : > { %v3288_v9 = vmul.f32 0.03125, %v3278_v2  ;;  %v3287_v51 = vmul.f32 0.03125, %v3275_v53  ;;  %v3309_v22 = vsel %vm514_vm0, %v3299_v26, 0.0  ;;  %v3302_v18 = vmul.f32 %v5477_v62, %v5477_v62 }
0x102a   : > { %3310 = vadd.xlane.f32.xlu0 %v3309_v22 }
0x102b   : > { %v5484_v59 = vsub.f32 %v3254_v10, %v3288_v9  ;;  %v5486_v15 = vsub.f32 %v3253_v28, %v3287_v51  ;;  %v3318_v1 = vsel %vm514_vm0, %v3302_v18, 0.0 }
0x102c   : > { %3319 = vadd.xlane.f32.xlu1 %v3318_v1  ;;  %v3281_v27 = vpop.xlane.xlu0 %3280 }
0x102d   : > { %v3289_v4 = vmul.f32 0.03125, %v3281_v27  ;;  %v3304_v50 = vmul.f32 %v5484_v59, %v5484_v59  ;;  %v3303_v31 = vmul.f32 %v5486_v15, %v5486_v15 }
0x102f   : > { %v5493_v46 = vsub.f32 %v3255_v36, %v3289_v4  ;;  %v3324_v54 = vsel %vm514_vm0, %v3304_v50, 0.0  ;;  %v3321_v40 = vsel %vm514_vm0, %v3303_v31, 0.0 }
0x1030   : > { %3325 = vadd.xlane.f32.xlu1 %v3324_v54  ;;  %3322 = vadd.xlane.f32.xlu0 %v3321_v40 }
0x1031   : > { %v3305_v24 = vmul.f32 %v5493_v46, %v5493_v46 }
0x1033   : > { %v3327_v5 = vsel %vm514_vm0, %v3305_v24, 0.0 }
0x1034   : > { %3328 = vadd.xlane.f32.xlu0 %v3327_v5 }
0x10ab   : > { %v3314_v21 = vpop.xlane.xlu1 %3313 }
0x10ac   : > { %v3332_v56 = vmul.f32 0.03125, %v3314_v21 }
0x10ae   : > { %v3340_v47 = vadd.f32 1e-06, %v3332_v56 }
0x10af   : > { %v3308_v37 = vpop.xlane.xlu1 %3307  ;;  %v3317_v57 = vpop.xlane.xlu0 %3316 }
0x10b0   : > { %4387 = vrsqrt.f32 %v3340_v47  ;;  %v3330_v16 = vmul.f32 0.03125, %v3308_v37  ;;  %v3333_v11 = vmul.f32 0.03125, %v3317_v57 }
0x10b2   : > { %v3338_v43 = vadd.f32 1e-06, %v3330_v16  ;;  %v3341_v42 = vadd.f32 1e-06, %v3333_v11 }
0x10b3   : > { %v3311_v41 = vpop.xlane.xlu0 %3310 }
0x10b4   : > { %4389 = vrsqrt.f32 %v3338_v43  ;;  %v3331_v23 = vmul.f32 0.03125, %v3311_v41 }
0x10b5   : > { %4391 = vrsqrt.f32 %v3341_v42  ;;  %v3320_v12 = vpop.xlane.xlu1 %3319 }
0x10b6   : > { %v3339_v17 = vadd.f32 1e-06, %v3331_v23  ;;  %v3334_v52 = vmul.f32 0.03125, %v3320_v12 }
0x10b8   : > { %4393 = vrsqrt.f32 %v3339_v17  ;;  %v3342_v45 = vadd.f32 1e-06, %v3334_v52 }
0x10b9   : > { %v3326_v10 = vpop.xlane.xlu1 %3325  ;;  %v3323_v48 = vpop.xlane.xlu0 %3322 }
0x10ba   : > { %4395 = vrsqrt.f32 %v3342_v45  ;;  %v3336_v32 = vmul.f32 0.03125, %v3326_v10  ;;  %v3335_v13 = vmul.f32 0.03125, %v3323_v48 }
0x10bc   : > { %v3344_v28 = vadd.f32 1e-06, %v3336_v32  ;;  %v3343_v36 = vadd.f32 1e-06, %v3335_v13 }
0x10bd   : > { %v4388_v14 = vpop.eup %4387  ;;  %v3329_v55 = vpop.xlane.xlu0 %3328 }
0x10be   : > { %v3356_v8 = vmul.f32 %v4388_v14, %v5460_v38  ;;  %4397 = vrsqrt.f32 %v3344_v28  ;;  %v3337_v19 = vmul.f32 0.03125, %v3329_v55 }
0x10bf   : > { %4399 = vrsqrt.f32 %v3343_v36 }
0x10c0   : > { %v3370_v20 = vmul.f32 %v3635_v60, %v3356_v8  ;;  %v3345_v33 = vadd.f32 1e-06, %v3337_v19 }
0x10c1   : > { %v4390_v61 = vpop.eup %4389 }
0x10c2   : > { %v4392_v58 = vpop.eup %4391  ;;  %v3384_v34 = vadd.f32 %v3636_v29, %v3370_v20  ;;  %v3354_v44 = vmul.f32 %v4390_v61, %v5464_v25  ;;  %4401 = vrsqrt.f32 %v3345_v33 }
0x10c3   : > { %v3357_v38 = vmul.f32 %v4392_v58, %v5466_v30 }
0x10c4   : > { %v3651_v63 = vpack.c.bf16 %v3384_v34, %v3384_v34  ;;  %v3368_v6 = vmul.f32 %v3635_v60, %v3354_v44 }
0x10c5   : > { %v4394_v0 = vpop.eup %4393  ;;  %v3371_v7 = vmul.f32 %v3635_v60, %v3357_v38 }
0x10c6   : > { %3425 = vst.msk [vmem:[%s5513_s29 + $0x8] sm:$0xf] %vm3422_vm4, %v3651_v63  ;;  %v3382_v25 = vadd.f32 %v3636_v29, %v3368_v6  ;;  %v3355_v39 = vmul.f32 %v4394_v0, %v5473_v35 }
0x10c7   : > { %v4396_v49 = vpop.eup %4395  ;;  %v3385_v3 = vadd.f32 %v3636_v29, %v3371_v7 }
0x10c8   : > { %v3649_v26 = vpack.c.bf16 %v3382_v25, %v3382_v25  ;;  %v3369_v2 = vmul.f32 %v3635_v60, %v3355_v39  ;;  %v3358_v53 = vmul.f32 %v4396_v49, %v5477_v62 }
0x10c9   : > { %v3652_v9 = vpack.c.bf16 %v3385_v3, %v3385_v3 }
0x10ca   : > { %3423 = vst.msk [vmem:[%s5513_s29] sm:$0xf] %vm3422_vm4, %v3649_v26  ;;  %v3383_v30 = vadd.f32 %v3636_v29, %v3369_v2  ;;  %v3372_v51 = vmul.f32 %v3635_v60, %v3358_v53 }
0x10cb   : > { %v4398_v22 = vpop.eup %4397  ;;  %3426 = vst.msk [vmem:[%s5513_s29 + $0xc] sm:$0xf] %vm3422_vm4, %v3652_v9 }
0x10cc   : > { %v4400_v18 = vpop.eup %4399  ;;  %v3650_v1 = vpack.c.bf16 %v3383_v30, %v3383_v30  ;;  %v3386_v35 = vadd.f32 %v3636_v29, %v3372_v51  ;;  %v3360_v27 = vmul.f32 %v4398_v22, %v5484_v59 }
0x10cd   : > { %v3359_v4 = vmul.f32 %v4400_v18, %v5486_v15 }
0x10ce   : > { %3424 = vst.msk [vmem:[%s5513_s29 + $0x4] sm:$0xf] %vm3422_vm4, %v3650_v1  ;;  %v3653_v62 = vpack.c.bf16 %v3386_v35, %v3386_v35  ;;  %v3374_v50 = vmul.f32 %v3635_v60, %v3360_v27 }
0x10cf   : > { %v4402_v31 = vpop.eup %4401  ;;  %v3373_v54 = vmul.f32 %v3635_v60, %v3359_v4 }
0x10d0   : > { %3427 = vst.msk [vmem:[%s5513_s29 + $0x10] sm:$0xf] %vm3422_vm4, %v3653_v62  ;;  %v3388_v40 = vadd.f32 %v3636_v29, %v3374_v50  ;;  %v3361_v24 = vmul.f32 %v4402_v31, %v5493_v46 }
0x10d1   : > { %v3387_v5 = vadd.f32 %v3636_v29, %v3373_v54 }
0x10d2   : > { %v3655_v21 = vpack.c.bf16 %v3388_v40, %v3388_v40  ;;  %v3375_v56 = vmul.f32 %v3635_v60, %v3361_v24 }
0x10d3   : > { %v3654_v47 = vpack.c.bf16 %v3387_v5, %v3387_v5 }
0x10d4   : > { %3429 = vst.msk [vmem:[%s5513_s29 + $0x18] sm:$0xf] %vm3422_vm4, %v3655_v21  ;;  %v3389_v59 = vadd.f32 %v3636_v29, %v3375_v56 }
0x10d5   : > { %3428 = vst.msk [vmem:[%s5513_s29 + $0x14] sm:$0xf] %vm3422_vm4, %v3654_v47 }
0x10d6   : > { %v3656_v15 = vpack.c.bf16 %v3389_v59, %v3389_v59 }
0x10d8   : > { %3430 = vst.msk [vmem:[%s5513_s29 + $0x1c] sm:$0xf] %vm3422_vm4, %v3656_v15 }
0x10d9 PF: > { %s25_s18 = sadd.s32 1, %s4409_s18  }
0x10da   : > { %p22_p4 = scmp.ge.s32.totalorder %s25_s18, 4  }
0x10dc   :  { %24 = sbr.rel (!%p22_p4) target bundleno = 1 (0x1), region = 110 }

// kernel: _lambda_.9
= control target key start
LH: loop header
LB: loop body
LE: loop exit
PB: predicated region body
PF: predicated region fallthrough
CT: control target
= control target key end

     0   :  { %s1930_s20 = smov 0   ;;  %s2309_s0 = inlined_call_operand.vmem [shape: bf16[2,288,48], index: 0, kind: input, shape index: {}]   ;;  %s2310_s1 = inlined_call_operand.vmem [shape: bf16[3,48,32], index: 1, kind: input, shape index: {}]   ;;  %s2311_s2 = inlined_call_operand.vmem [shape: f32[1,32], index: 2, kind: input, shape index: {}]   ;;  %s2312_s3 = inlined_call_operand.vmem [shape: f32[1,32], index: 3, kind: input, shape index: {}]   ;;  %s2313_s4 = inlined_call_operand.<no memory space> [shape: f32[1,1], index: 4, kind: input, shape index: {}]   ;;  %s2314_s5 = inlined_call_operand.vmem [shape: f32[2,1,256], index: 5, kind: output, shape index: {}]  }
   0x1   :  { %v10_v0 = vstv %s2313_s4 }
   0x2   :  { %11 = vst [vmem:[#allocation2] sm:$0x1] %v10_v0 }
   0x3 LB: > { %s1477_s21 = sadd.s32 4294967295, %s1893_s20   ;;  %p1481_p0 = scmp.ge.s32.totalorder %s1893_s20, 1  ;;  %s1893_s20 = sphi %s1930_s20, %s17_s20  }
   0x4   : > { %p189_p1 = scmp.lt.s32.totalorder %s1893_s20, 3 }
   0x6   : > { %p190_p2 = pnand %p1481_p0, %p189_p1 }
   0x8   : > { %193 = sbr.rel (%p190_p2) target bundleno = 595 (0x253), region = 40 }
   0xd   : > { %v1845_v1 = vld [vmem:[%s2310_s1 + $0x28] sm:$0xff]   ;;  %p216_p3 = scmp.lt.s32.totalorder %s1477_s21, 1  ;;  %v1846_v2 = vld [vmem:[%s2310_s1 + $0x20] sm:$0xff]   ;;  %v1847_v3 = vld [vmem:[%s2310_s1 + $0x18] sm:$0xff]   ;;  %vm371_vm0 = vcmask 392192   ;;  %vm1228_vm1 = vcmask 261120  }
   0xe   : > { %1713 = vmatprep.subr.bf16.mxu0 %v1845_v1  ;;  %1827 = vmatprep.subr.bf16.mxu1 %v1845_v1  ;;  %v1852_v4 = vld [vmem:[%s2310_s1 + $0x40] sm:$0xff]   ;;  %v1857_v5 = vld [vmem:[%s2310_s1 + $0x10] sm:$0xff]   ;;  %v1858_v11 = vld [vmem:[%s2310_s1 + $0x38] sm:$0xff]  }
   0xf   : > { %s2341_s21 = smov (!%p216_p3, %s1477_s21), 1  ;;  %1714 = vmatpush3.bf16.msra.mxu0 %v1845_v1  ;;  %1830 = vmatpush3.bf16.msra.mxu1 %v1845_v1  ;;  %v1863_v13 = vld [vmem:[%s2310_s1 + $0x8] sm:$0xff]   ;;  %v1864_v18 = vld [vmem:[%s2310_s1] sm:$0xff]   ;;  %v1868_v19 = vld [vmem:[%s2310_s1 + $0x30] sm:$0xff]  }
  0x10   : > { %1715 = vmatprep.subr.bf16.mxu0 %v1846_v2  ;;  %1828 = vmatprep.subr.bf16.mxu1 %v1846_v2  ;;  %s1833_s27 = smul.u32 144, %s2341_s21  ;;  %s1483_s4 = sshll.u32 %s2341_s21, 1 }
  0x11   : > { %s224_s26 = scalar_lea.vmem %s2314_s5, %s1483_s4 }
  0x12   : > { %s1953_s30 = scalar_lea.vmem %s2309_s0, %s1833_s27 }
  0x13   : > { %1716 = vmatpush3.bf16.msra.mxu0 %v1846_v2  ;;  %1831 = vmatpush3.bf16.msra.mxu1 %v1846_v2  ;;  %v1848_v6 = vld [vmem:[%s1953_s30 + $0x8] sm:$0xff]   ;;  %v1963_v7 = vld [vmem:[%s1953_s30 + $0x58] sm:$0xff]   ;;  %v1850_v8 = vld [vmem:[%s1953_s30 + $0x10] sm:$0xff]  }
  0x14   : > { %1717 = vmatprep.subr.bf16.mxu0 %v1847_v3  ;;  %1829 = vmatprep.subr.bf16.mxu1 %v1847_v3  ;;  %v1970_v9 = vld [vmem:[%s1953_s30 + $0x60] sm:$0xff]   ;;  %v1853_v10 = vld [vmem:[%s1953_s30 + $0x18] sm:$0xff]   ;;  %v1977_v12 = vld [vmem:[%s1953_s30 + $0x68] sm:$0xff]  }
  0x15   : > { %1719 = vmatprep.mubr.msk.bf16.mxu0 %vm371_vm0, %v1848_v6  ;;  %1739 = vmatprep.mubr.msk.bf16.mxu1 %vm371_vm0, %v1963_v7  ;;  %v1855_v14 = vld [vmem:[%s1953_s30 + $0x20] sm:$0xff]   ;;  %v1990_v15 = vld [vmem:[%s1953_s30 + $0x70] sm:$0xff]   ;;  %v1859_v16 = vld [vmem:[%s1953_s30 + $0x28] sm:$0xff]  }
  0x16   : > { %v1994_v17 = vld [vmem:[%s1953_s30 + $0x78] sm:$0xff]   ;;  %v1861_v20 = vld [vmem:[%s1953_s30 + $0x30] sm:$0xff]   ;;  %v1862_v21 = vld [vmem:[%s1953_s30 + $0x80] sm:$0xff]  }
  0x17   : > { %1718 = vmatpush3.bf16.msra.mxu0 %v1847_v3  ;;  %1832 = vmatpush3.bf16.msra.mxu1 %v1847_v3  ;;  %v1865_v22 = vld [vmem:[%s1953_s30 + $0x38] sm:$0xff]   ;;  %v1866_v23 = vld [vmem:[%s1953_s30] sm:$0xff]   ;;  %v1869_v25 = vld [vmem:[%s1953_s30 + $0x48] sm:$0xff]  }
  0x18   : > { %1789 = vmatprep.subr.bf16.mxu0 %v1852_v4  ;;  %1751 = vmatprep.subr.bf16.mxu1 %v1857_v5  ;;  %v1867_v24 = vld [vmem:[%s1953_s30 + $0x40] sm:$0xff]   ;;  %v1870_v26 = vld [vmem:[%s1953_s30 + $0x50] sm:$0xff]   ;;  %v1872_v28 = vld [vmem:[%s1953_s30 + $0x18] sm:$0xff]  }
  0x19   : > { %v1871_v27 = vld [vmem:[%s1953_s30 + $0x10] sm:$0xff]   ;;  %v1873_v29 = vld [vmem:[%s1953_s30 + $0x20] sm:$0xff]   ;;  %v1874_v30 = vld [vmem:[%s1953_s30 + $0x28] sm:$0xff]  }
  0x1a   : > { %1720 = vmatmul.mubr.msk.bf16.vlgmr.msra.gmra.mxu0 %vm371_vm0, %v1850_v8  ;;  %1740 = vmatmul.mubr.msk.bf16.vlgmr.msra.gmra.mxu1 %vm371_vm0, %v1970_v9  ;;  %v1875_v31 = vld [vmem:[%s1953_s30 + $0x30] sm:$0xff]   ;;  %v1876_v32 = vld [vmem:[%s1953_s30 + $0x38] sm:$0xff]   ;;  %v1877_v33 = vld [vmem:[%s1953_s30 + $0x40] sm:$0xff]  }
  0x1b   : > { %1790 = vmatpush3.bf16.msra.mxu0 %v1852_v4  ;;  %1723 = vmatprep.mubr.msk.bf16.mxu0 %vm371_vm0, %v1853_v10  ;;  %v1878_v34 = vld [vmem:[%s1953_s30 + $0x48] sm:$0xff]   ;;  %v1879_v35 = vld [vmem:[%s1953_s30 + $0x50] sm:$0xff]   ;;  %v1880_v36 = vld [vmem:[%s1953_s30 + $0x58] sm:$0xff]  }
  0x1c   : > { %1743 = vmatprep.mubr.msk.bf16.mxu1 %vm371_vm0, %v1977_v12  ;;  %1752 = vmatpush3.bf16.msra.mxu1 %v1857_v5  ;;  %v1881_v37 = vld [vmem:[%s1953_s30 + $0x60] sm:$0xff]   ;;  %v1882_v38 = vld [vmem:[%s1953_s30 + $0x68] sm:$0xff]   ;;  %v1883_v39 = vld [vmem:[%s1953_s30 + $0x70] sm:$0xff]  }
  0x1d   : > { %1791 = vmatprep.subr.bf16.mxu0 %v1858_v11  ;;  %1753 = vmatprep.subr.bf16.mxu1 %v1863_v13  ;;  %v1884_v40 = vld [vmem:[%s1953_s30 + $0x78] sm:$0xff]   ;;  %v1885_v41 = vld [vmem:[%s1953_s30 + $0x80] sm:$0xff]   ;;  %v1886_v42 = vld [vmem:[%s1953_s30 + $0x88] sm:$0xff]  }
  0x1f   : > { %1792 = vmatpush3.bf16.msra.mxu0 %v1858_v11 }
  0x20   : > { %1754 = vmatpush3.bf16.msra.mxu1 %v1863_v13  ;;  %1793 = vmatprep.subr.bf16.mxu0 %v1868_v19 }
  0x21   : > { %1755 = vmatprep.subr.bf16.mxu1 %v1864_v18 }
  0x22   : > { %1724 = vmatmul.mubr.msk.bf16.gmra.mxu0 %vm371_vm0, %v1855_v14  ;;  %1744 = vmatmul.mubr.msk.bf16.gmra.mxu1 %vm371_vm0, %v1990_v15 }
  0x23   : > { %1727 = vmatprep.mubr.msk.bf16.mxu0 %vm371_vm0, %v1859_v16  ;;  %1747 = vmatprep.mubr.msk.bf16.mxu1 %vm371_vm0, %v1994_v17 }
  0x24   : > { %1756 = vmatpush3.bf16.msra.mxu1 %v1864_v18  ;;  %1794 = vmatpush3.bf16.msra.mxu0 %v1868_v19 }
  0x2a   : > { %1728 = vmatmul.mubr.msk.bf16.gmra.mxu0 %vm371_vm0, %v1861_v20  ;;  %1748 = vmatmul.mubr.msk.bf16.gmra.mxu1 %vm371_vm0, %v1862_v21 }
  0x2b   : > { %1731 = vmatprep.mubr.msk.bf16.mxu0 %vm371_vm0, %v1865_v22  ;;  %1757 = vmatprep.mubr.msk.bf16.mxu1 %vm371_vm0, %v1866_v23 }
  0x32   : > { %1732 = vmatmul.mubr.msk.bf16.gmra.mxu0 %vm371_vm0, %v1867_v24  ;;  %1758 = vmatmul.mubr.msk.bf16.vlgmr.msra.gmra.mxu1 %vm371_vm0, %v1848_v6 }
  0x33   : > { %1735 = vmatprep.mubr.msk.bf16.mxu0 %vm371_vm0, %v1869_v25  ;;  %1761 = vmatprep.mubr.msk.bf16.mxu1 %vm371_vm0, %v1850_v8 }
  0x3a   : > { %1736 = vmatmul.mubr.msk.bf16.gmra.mxu0 %vm371_vm0, %v1870_v26  ;;  %1762 = vmatmul.mubr.msk.bf16.gmra.mxu1 %vm371_vm0, %v1853_v10 }
  0x3b   : > { %1765 = vmatprep.mubr.msk.bf16.mxu1 %vm371_vm0, %v1855_v14  ;;  %1795 = vmatprep.mubr.msk.bf16.mxu0 %vm371_vm0, %v1871_v27 }
  0x42   : > { %1766 = vmatmul.mubr.msk.bf16.gmra.mxu1 %vm371_vm0, %v1859_v16  ;;  %1796 = vmatmul.mubr.msk.bf16.vlgmr.msra.gmra.mxu0 %vm371_vm0, %v1872_v28 }
  0x43   : > { %1769 = vmatprep.mubr.msk.bf16.mxu1 %vm371_vm0, %v1861_v20  ;;  %1799 = vmatprep.mubr.msk.bf16.mxu0 %vm371_vm0, %v1873_v29  ;;  %v2113_v29 = vld [vmem:[%s2312_s3] sm:$0x1] }
  0x44   : > { %2316 = vst [vmem:[#allocation3_spill] sm:$0xff] %v2113_v29 }
  0x4a   : > { %1770 = vmatmul.mubr.msk.bf16.gmra.mxu1 %vm371_vm0, %v1865_v22  ;;  %1800 = vmatmul.mubr.msk.bf16.gmra.mxu0 %vm371_vm0, %v1874_v30 }
  0x4b   : > { %1773 = vmatprep.mubr.msk.bf16.mxu1 %vm371_vm0, %v1867_v24  ;;  %1803 = vmatprep.mubr.msk.bf16.mxu0 %vm371_vm0, %v1875_v31 }
  0x52   : > { %1774 = vmatmul.mubr.msk.bf16.gmra.mxu1 %vm371_vm0, %v1869_v25  ;;  %1804 = vmatmul.mubr.msk.bf16.gmra.mxu0 %vm371_vm0, %v1876_v32 }
  0x53   : > { %1777 = vmatprep.mubr.msk.bf16.mxu1 %vm371_vm0, %v1870_v26  ;;  %1807 = vmatprep.mubr.msk.bf16.mxu0 %vm371_vm0, %v1877_v33 }
  0x5a   : > { %1778 = vmatmul.mubr.msk.bf16.gmra.mxu1 %vm371_vm0, %v1963_v7  ;;  %1808 = vmatmul.mubr.msk.bf16.gmra.mxu0 %vm371_vm0, %v1878_v34 }
  0x5b   : > { %1781 = vmatprep.mubr.msk.bf16.mxu1 %vm371_vm0, %v1970_v9  ;;  %1811 = vmatprep.mubr.msk.bf16.mxu0 %vm371_vm0, %v1879_v35 }
  0x62   : > { %1782 = vmatmul.mubr.msk.bf16.gmra.mxu1 %vm371_vm0, %v1977_v12  ;;  %1812 = vmatmul.mubr.msk.bf16.gmra.mxu0 %vm371_vm0, %v1880_v36  ;;  %v1218_v36 = vld [vmem:[#allocation2] sm:$0x1] }
  0x63   : > { %1785 = vmatprep.mubr.msk.bf16.mxu1 %vm371_vm0, %v1990_v15  ;;  %1815 = vmatprep.mubr.msk.bf16.mxu0 %vm371_vm0, %v1881_v37 }
  0x6a   : > { %1786 = vmatmul.mubr.msk.bf16.gmra.mxu1 %vm371_vm0, %v1994_v17  ;;  %1816 = vmatmul.mubr.msk.bf16.gmra.mxu0 %vm371_vm0, %v1882_v38 }
  0x6b   : > { %1819 = vmatprep.mubr.msk.bf16.mxu0 %vm371_vm0, %v1883_v39  ;;  %1711 = vmatprep.mubr.msk.f32.mxu1 %vm1228_vm1, %v2113_v29  ;;  %v1895_v39 = vmov 0  }
  0x6c   : > { %1844 = vset.pattern.permute.xlu0 %v1895_v39 }
  0x6d   : > { %1221 = vperm.xlu0 %1844, %v1218_v36  }
  0x72   : > { %1820 = vmatmul.mubr.msk.bf16.gmra.mxu0 %vm371_vm0, %v1884_v40 }
  0x73   : > { %1823 = vmatprep.mubr.msk.bf16.mxu0 %vm371_vm0, %v1885_v41 }
  0x7a   : > { %1824 = vmatmul.mubr.msk.bf16.gmra.mxu0 %vm371_vm0, %v1886_v42 }
  0xda   : > { %v1721_v43 = vpop.f32.mrf.mxu0  ;;  %v2074_v44 = vpop.f32.mrf.mxu1 }
  0xdc   : > { %v454_v45 = vpop.f32.mrf.mxu0  ;;  %v2076_v46 = vpop.f32.mrf.mxu1 }
  0xde   : > { %v1722_v47 = vpop.f32.mrf.mxu0  ;;  %v2078_v48 = vpop.f32.mrf.mxu1 }
  0xe0   : > { %v457_v49 = vpop.f32.mrf.mxu0  ;;  %v2080_v50 = vpop.f32.mrf.mxu1 }
  0xe2   : > { %v1725_v51 = vpop.f32.mrf.mxu0  ;;  %v2082_v52 = vpop.f32.mrf.mxu1 }
  0xe4   : > { %v470_v53 = vpop.f32.mrf.mxu0  ;;  %v2084_v54 = vpop.f32.mrf.mxu1 }
  0xe6   : > { %v1726_v55 = vpop.f32.mrf.mxu0  ;;  %v2086_v56 = vpop.f32.mrf.mxu1 }
  0xe8   : > { %v473_v57 = vpop.f32.mrf.mxu0  ;;  %v2088_v58 = vpop.f32.mrf.mxu1 }
  0xea   : > { %v1729_v59 = vpop.f32.mrf.mxu0  ;;  %v2090_v60 = vpop.f32.mrf.mxu1 }
  0xec   : > { %v486_v61 = vpop.f32.mrf.mxu0  ;;  %v2092_v62 = vpop.f32.mrf.mxu1 }
  0xee   : > { %v2094_v63 = vpop.f32.mrf.mxu0  ;;  %v2096_v0 = vpop.f32.mrf.mxu1 }
  0xf0   : > { %v2098_v1 = vpop.f32.mrf.mxu0  ;;  %v2100_v2 = vpop.f32.mrf.mxu1 }
  0xf2   : > { %v2102_v3 = vpop.f32.mrf.mxu0  ;;  %v1759_v4 = vpop.f32.mrf.mxu1 }
  0xf3   : > { %v650_v5 = vadd.f32 %v1759_v4, %v1721_v43 }
  0xf4   : > { %v2104_v6 = vpop.f32.mrf.mxu0  ;;  %v641_v7 = vpop.f32.mrf.mxu1 }
  0xf5   : > { %v642_v8 = vadd.f32 %v641_v7, %v454_v45 }
  0xf6   : > { %v2106_v9 = vpop.f32.mrf.mxu0  ;;  %v1760_v10 = vpop.f32.mrf.mxu1 }
  0xf7   : > { %v653_v11 = vadd.f32 %v1760_v10, %v1722_v47 }
  0xf8   : > { %v2108_v12 = vpop.f32.mrf.mxu0  ;;  %v644_v13 = vpop.f32.mrf.mxu1 }
  0xf9   : > { %v645_v14 = vadd.f32 %v644_v13, %v457_v49 }
  0xfa   : > { %v1737_v15 = vpop.f32.mrf.mxu0  ;;  %v1763_v16 = vpop.f32.mrf.mxu1 }
  0xfb   : > { %v666_v17 = vadd.f32 %v1763_v16, %v1725_v51 }
  0xfc   : > { %v518_v18 = vpop.f32.mrf.mxu0  ;;  %v657_v19 = vpop.f32.mrf.mxu1 }
  0xfd   : > { %v658_v20 = vadd.f32 %v657_v19, %v470_v53 }
  0xfe   : > { %v1738_v21 = vpop.f32.mrf.mxu0  ;;  %v1764_v22 = vpop.f32.mrf.mxu1 }
  0xff   : > { %v669_v23 = vadd.f32 %v1764_v22, %v1726_v55 }
 0x100   : > { %v521_v24 = vpop.f32.mrf.mxu0  ;;  %v660_v25 = vpop.f32.mrf.mxu1 }
 0x101   : > { %v661_v26 = vadd.f32 %v660_v25, %v473_v57 }
 0x102   : > { %v1767_v27 = vpop.f32.mrf.mxu1  ;;  %v1797_v28 = vpop.f32.mrf.mxu0 }
 0x103   : > { %v682_v30 = vadd.f32 %v1767_v27, %v1729_v59  ;;  %v2115_v31 = vadd.f32 %v1797_v28, %v650_v5 }
 0x104   : > { %v673_v32 = vpop.f32.mrf.mxu1  ;;  %v987_v33 = vpop.f32.mrf.mxu0 }
 0x105   : > { %2317 = vst [vmem:[#allocation4_spill] sm:$0xff] %v2115_v31  ;;  %v674_v34 = vadd.f32 %v673_v32, %v486_v61  ;;  %v2119_v35 = vadd.f32 %v987_v33, %v642_v8 }
 0x106   : > { %v2121_v37 = vpop.f32.mrf.mxu1  ;;  %v1798_v38 = vpop.f32.mrf.mxu0 }
 0x107   : > { %2318 = vst [vmem:[#allocation5_spill] sm:$0xff] %v2119_v35  ;;  %v2123_v40 = vadd.f32 %v1798_v38, %v653_v11 }
 0x108   : > { %v2125_v41 = vpop.f32.mrf.mxu1  ;;  %v990_v42 = vpop.f32.mrf.mxu0 }
 0x109   : > { %2319 = vst [vmem:[#allocation6_spill] sm:$0xff] %v2123_v40  ;;  %v2127_v43 = vadd.f32 %v990_v42, %v645_v14 }
 0x10a   : > { %v2129_v45 = vpop.f32.mrf.mxu1  ;;  %v1801_v47 = vpop.f32.mrf.mxu0 }
 0x10b   : > { %2320 = vst [vmem:[#allocation7_spill] sm:$0xff] %v2127_v43  ;;  %v2131_v49 = vadd.f32 %v1801_v47, %v666_v17 }
 0x10c   : > { %v2133_v51 = vpop.f32.mrf.mxu1  ;;  %v1003_v53 = vpop.f32.mrf.mxu0 }
 0x10d   : > { %v2135_v55 = vadd.f32 %v1003_v53, %v658_v20 }
 0x10e   : > { %v1772_v57 = vpop.f32.mrf.mxu1  ;;  %v1802_v59 = vpop.f32.mrf.mxu0 }
 0x10f   : > { %2321 = vst [vmem:[#allocation8_spill] sm:$0xff] %v2135_v55  ;;  %v2137_v61 = vadd.f32 %v1802_v59, %v669_v23 }
 0x110   : > { %v2139_v4 = vpop.f32.mrf.mxu1  ;;  %v1006_v5 = vpop.f32.mrf.mxu0 }
 0x111   : > { %v2141_v7 = vadd.f32 %v1006_v5, %v661_v26 }
 0x112   : > { %v1775_v8 = vpop.f32.mrf.mxu1  ;;  %v1805_v10 = vpop.f32.mrf.mxu0 }
 0x113   : > { %2322 = vst [vmem:[#allocation9_spill] sm:$0xff] %v2141_v7  ;;  %v714_v11 = vadd.f32 %v1775_v8, %v1737_v15  ;;  %v2143_v13 = vadd.f32 %v1805_v10, %v682_v30  ;;  %v2189_v7 = vld [vmem:[%s2311_s2] ss:$0 sm:$0xff] }
 0x114   : > { %v705_v14 = vpop.f32.mrf.mxu1  ;;  %v1019_v16 = vpop.f32.mrf.mxu0 }
 0x115   : > { %v706_v17 = vadd.f32 %v705_v14, %v518_v18  ;;  %v2145_v19 = vadd.f32 %v1019_v16, %v674_v34 }
 0x116   : > { %v1776_v20 = vpop.f32.mrf.mxu1  ;;  %v2147_v22 = vpop.f32.mrf.mxu0 }
 0x117   : > { %v717_v23 = vadd.f32 %v1776_v20, %v1738_v21 }
 0x118   : > { %v708_v25 = vpop.f32.mrf.mxu1  ;;  %v2149_v27 = vpop.f32.mrf.mxu0 }
 0x119   : > { %v709_v28 = vadd.f32 %v708_v25, %v521_v24 }
 0x11a   : > { %v2151_v26 = vpop.f32.mrf.mxu1  ;;  %v1809_v32 = vpop.f32.mrf.mxu0 }
 0x11c   : > { %v2153_v33 = vpop.f32.mrf.mxu1  ;;  %v1035_v15 = vpop.f32.mrf.mxu0 }
 0x11e   : > { %v2155_v30 = vpop.f32.mrf.mxu1  ;;  %v1810_v36 = vpop.f32.mrf.mxu0 }
 0x120   : > { %v2157_v18 = vpop.f32.mrf.mxu1  ;;  %v1038_v34 = vpop.f32.mrf.mxu0 }
 0x122   : > { %v2159_v38 = vpop.f32.mrf.mxu1  ;;  %v1813_v39 = vpop.f32.mrf.mxu0 }
 0x123   : > { %v2161_v21 = vadd.f32 %v1813_v39, %v714_v11 }
 0x124   : > { %v2163_v42 = vpop.f32.mrf.mxu1  ;;  %v1051_v24 = vpop.f32.mrf.mxu0 }
 0x125   : > { %2323 = vst [vmem:[#allocation10_spill] sm:$0xff] %v2161_v21  ;;  %v2165_v47 = vadd.f32 %v1051_v24, %v706_v17 }
 0x126   : > { %v1814_v53 = vpop.f32.mrf.mxu0  ;;  %v1784_v5 = vpop.f32.mrf.mxu1 }
 0x127   : > { %2324 = vst [vmem:[#allocation11_spill] sm:$0xff] %v2165_v47  ;;  %v2167_v59 = vadd.f32 %v1814_v53, %v717_v23 }
 0x128   : > { %v1054_v8 = vpop.f32.mrf.mxu0  ;;  %v740_v16 = vpop.f32.mrf.mxu1 }
 0x129   : > { %2325 = vst [vmem:[#allocation12_spill] sm:$0xff] %v2167_v59  ;;  %v2169_v10 = vadd.f32 %v1054_v8, %v709_v28  ;;  %v701_v28 = vadd.f32 %v1772_v57, %v2106_v9  ;;  %v698_v59 = vadd.f32 %v2129_v45, %v2102_v3  ;;  %v693_v3 = vadd.f32 %v2139_v4, %v2108_v12 }
 0x12a   : > { %v2171_v14 = vpop.f32.mrf.mxu0  ;;  %v1787_v11 = vpop.f32.mrf.mxu1  ;;  %v749_v12 = vadd.f32 %v1784_v5, %v2086_v56 }
 0x12b   : > { %2326 = vst [vmem:[#allocation13_spill] sm:$0xff] %v2169_v10  ;;  %v762_v47 = vadd.f32 %v1787_v11, %v2090_v60  ;;  %v1129_v43 = vadd.f32 %v1810_v36, %v701_v28 }
 0x12c   : > { %v2173_v20 = vpop.f32.mrf.mxu0  ;;  %v753_v17 = vpop.f32.mrf.mxu1 }
 0x12d   : > { %2327 = vst [vmem:[#allocation14_spill] sm:$0xff] %v2173_v20  ;;  %v1128_v20 = vadd.f32 %v1809_v32, %v698_v59  ;;  %v1168_v60 = vadd.f32 %v2189_v7, %v1129_v43  ;;  %v754_v45 = vadd.f32 %v753_v17, %v2092_v62 }
 0x12e   : > { %v2175_v25 = vpop.f32.mrf.mxu0  ;;  %v1788_v53 = vpop.f32.mrf.mxu1 }
 0x12f   : > { %v765_v21 = vadd.f32 %v1788_v53, %v2096_v0  ;;  %v1167_v28 = vadd.f32 %v2189_v7, %v1128_v20 }
 0x130   : > { %v2177_v39 = vpop.f32.mrf.mxu0  ;;  %v756_v10 = vpop.f32.mrf.mxu1 }
 0x131   : > { %v757_v9 = vadd.f32 %v756_v10, %v2100_v2  ;;  %v1127_v2 = vadd.f32 %v1038_v34, %v693_v3  ;;  %v1199_v62 = vmax.f32 %v1167_v28, 0.0  ;;  %v685_v10 = vadd.f32 %v2121_v37, %v2094_v63 }
 0x132   : > { %v1821_v29 = vpop.f32.mrf.mxu0  ;;  %v741_v63 = vadd.f32 %v740_v16, %v2088_v58  ;;  %v1163_v58 = vadd.f32 %v2189_v7, %v2143_v13 }
 0x133   : > { %v1125_v56 = vadd.f32 %v2147_v22, %v685_v10 }
 0x134   : > { %v2179_v24 = vpop.f32.mrf.mxu0  ;;  %v2328_v28 = vld [vmem:[#allocation14_spill] sm:$0xff] }
 0x135   : > { %v1164_v37 = vadd.f32 %v2189_v7, %v1125_v56 }
 0x136   : > { %v1822_v23 = vpop.f32.mrf.mxu0 }
 0x137   : > { %v1141_v34 = vadd.f32 %v1822_v23, %v749_v12  ;;  %v1196_v16 = vmax.f32 %v1164_v37, 0.0 }
 0x138   : > { %v1086_v35 = vpop.f32.mrf.mxu0 }
 0x139   : > { %v1180_v20 = vadd.f32 %v2189_v7, %v1141_v34  ;;  %v1139_v22 = vadd.f32 %v1086_v35, %v741_v63  ;;  %v2336_v63 = vld [vmem:[#allocation7_spill] sm:$0xff] }
 0x13a   : > { %v1825_v8 = vpop.f32.mrf.mxu0  ;;  %v1154_v37 = vadd.f32 %v2189_v7, %v2336_v63 }
 0x13b   : > { %v1144_v40 = vadd.f32 %v1825_v8, %v762_v47  ;;  %v1200_v8 = vmax.f32 %v1168_v60, 0.0  ;;  %v1212_v23 = vmax.f32 %v1180_v20, 0.0  ;;  %v1178_v35 = vadd.f32 %v2189_v7, %v1139_v22  ;;  %v2338_v22 = vld [vmem:[#allocation5_spill] sm:$0xff] }
 0x13c   : > { %v1099_v31 = vpop.f32.mrf.mxu0 }
 0x13d   : > { %v1183_v11 = vadd.f32 %v2189_v7, %v1144_v40  ;;  %v1142_v32 = vadd.f32 %v1099_v31, %v754_v45  ;;  %v690_v40 = vadd.f32 %v2133_v51, %v2104_v6  ;;  %v746_v6 = vadd.f32 %v2159_v38, %v2082_v52 }
 0x13e   : > { %v1826_v55 = vpop.f32.mrf.mxu0 }
 0x13f   : > { %v1145_v57 = vadd.f32 %v1826_v55, %v765_v21  ;;  %v1215_v55 = vmax.f32 %v1183_v11, 0.0  ;;  %v1126_v4 = vadd.f32 %v1035_v15, %v690_v40  ;;  %v1166_v21 = vadd.f32 %v2189_v7, %v1127_v2  ;;  %v2329_v2 = vld [vmem:[#allocation9_spill] sm:$0xff]  ;;  %v2331_v40 = vld [vmem:[#allocation12_spill] sm:$0xff] }
 0x140   : > { %v1102_v36 = vpop.f32.mrf.mxu0  ;;  %v1181_v31 = vadd.f32 %v2189_v7, %v1142_v32  ;;  %v1140_v5 = vadd.f32 %v1821_v29, %v746_v6  ;;  %v738_v29 = vadd.f32 %v2163_v42, %v2084_v54  ;;  %v1195_v54 = vmax.f32 %v1163_v58, 0.0  ;;  %v2334_v6 = vld [vmem:[#allocation4_spill] sm:$0xff] }
 0x141   : > { %v1184_v0 = vadd.f32 %v2189_v7, %v1145_v57  ;;  %v1143_v47 = vadd.f32 %v1102_v36, %v757_v9  ;;  %v1165_v51 = vadd.f32 %v2189_v7, %v1126_v4  ;;  %v1198_v15 = vmax.f32 %v1166_v21, 0.0  ;;  %v2332_v4 = vld [vmem:[#allocation6_spill] sm:$0xff] }
 0x142   : > { %v1213_v17 = vmax.f32 %v1181_v31, 0.0  ;;  %v1179_v38 = vadd.f32 %v2189_v7, %v1140_v5  ;;  %v677_v9 = vadd.f32 %v2125_v41, %v2098_v1  ;;  %v1138_v36 = vadd.f32 %v2179_v24, %v738_v29  ;;  %v2333_v31 = vld [vmem:[#allocation10_spill] sm:$0xff]  ;;  %v2335_v5 = vld [vmem:[#allocation13_spill] sm:$0xff] }
 0x143   : > { %v1216_v53 = vmax.f32 %v1184_v0, 0.0  ;;  %v1182_v43 = vadd.f32 %v2189_v7, %v1143_v47  ;;  %v1197_v52 = vmax.f32 %v1165_v51, 0.0  ;;  %v733_v1 = vadd.f32 %v2155_v30, %v2078_v48 }
 0x144   : > { %v1123_v57 = vadd.f32 %v2149_v27, %v677_v9  ;;  %v1211_v60 = vmax.f32 %v1179_v38, 0.0  ;;  %v1177_v42 = vadd.f32 %v2189_v7, %v1138_v36  ;;  %v1210_v27 = vmax.f32 %v1178_v35, 0.0 }
 0x145   : > { %1679 = vmatprep.subr.msk.mxu1 %vm1228_vm1, %v1216_v53  ;;  %v1214_v59 = vmax.f32 %v1182_v43, 0.0  ;;  %v1137_v13 = vadd.f32 %v2175_v25, %v733_v1  ;;  %v730_v24 = vadd.f32 %v2151_v26, %v2074_v44  ;;  %v1161_v48 = vadd.f32 %v2189_v7, %v2145_v19  ;;  %v1222_v1 = vpop.permute.xlu0 %1221 }
 0x146   : > { %1680 = vmatpush3.xpose.msk.msra.mxu1 %vm1228_vm1, %v1200_v8  ;;  %v1162_v41 = vadd.f32 %v2189_v7, %v1123_v57  ;;  %v1209_v47 = vmax.f32 %v1177_v42, 0.0  ;;  %v725_v25 = vadd.f32 %v2157_v18, %v2080_v50  ;;  %v1160_v44 = vadd.f32 %v2189_v7, %v2137_v61  ;;  %v2339_v57 = vld [vmem:[#allocation3_spill] sm:$0xff] }
 0x147   : > { %1681 = vmatprep.subr.msk.mxu1 %vm1228_vm1, %v1215_v55  ;;  %v1136_v11 = vadd.f32 %v2171_v14, %v730_v24  ;;  %v1176_v0 = vadd.f32 %v2189_v7, %v1137_v13  ;;  %v1193_v26 = vmax.f32 %v1161_v48, 0.0  ;;  %v722_v14 = vadd.f32 %v2153_v33, %v2076_v46 }
 0x148   : > { %v1194_v30 = vmax.f32 %v1162_v41, 0.0  ;;  %v1135_v45 = vadd.f32 %v2177_v39, %v725_v25  ;;  %v1159_v50 = vadd.f32 %v2189_v7, %v2131_v49  ;;  %v1192_v18 = vmax.f32 %v1160_v44, 0.0  ;;  %v2330_v49 = vld [vmem:[#allocation8_spill] sm:$0xff] }
 0x149   : > { %v1175_v3 = vadd.f32 %v2189_v7, %v1136_v11  ;;  %v1208_v19 = vmax.f32 %v1176_v0, 0.0  ;;  %v1134_v61 = vadd.f32 %v2328_v28, %v722_v14  ;;  %v1158_v55 = vadd.f32 %v2189_v7, %v2329_v2 }
 0x14a   : > { %1682 = vmatpush3.xpose.msk.msra.mxu1 %vm1228_vm1, %v1199_v62  ;;  %v1174_v8 = vadd.f32 %v2189_v7, %v1135_v45  ;;  %v1191_v39 = vmax.f32 %v1159_v50, 0.0  ;;  %v1157_v32 = vadd.f32 %v2189_v7, %v2330_v49  ;;  %v1172_v12 = vadd.f32 %v2189_v7, %v2331_v40 }
 0x14b   : > { %1683 = vmatprep.subr.msk.mxu1 %vm1228_vm1, %v1214_v59  ;;  %v1207_v53 = vmax.f32 %v1175_v3, 0.0  ;;  %v1173_v46 = vadd.f32 %v2189_v7, %v1134_v61  ;;  %v1190_v43 = vmax.f32 %v1158_v55, 0.0  ;;  %v1156_v21 = vadd.f32 %v2189_v7, %v2332_v4 }
 0x14c   : > { %v1206_v33 = vmax.f32 %v1174_v8, 0.0  ;;  %v1189_v34 = vmax.f32 %v1157_v32, 0.0  ;;  %v1171_v59 = vadd.f32 %v2189_v7, %v2333_v31  ;;  %v1204_v10 = vmax.f32 %v1172_v12, 0.0 }
 0x14d   : > { %v1205_v62 = vmax.f32 %v1173_v46, 0.0  ;;  %v1155_v56 = vadd.f32 %v2189_v7, %v2334_v6  ;;  %v1188_v51 = vmax.f32 %v1156_v21, 0.0  ;;  %v1170_v20 = vadd.f32 %v2189_v7, %v2335_v5 }
 0x14e   : > { %1684 = vmatpush3.xpose.msk.msra.mxu1 %vm1228_vm1, %v1198_v15  ;;  %v1203_v15 = vmax.f32 %v1171_v59, 0.0  ;;  %v1153_v9 = vadd.f32 %v2189_v7, %v2338_v22  ;;  %v1186_v29 = vmax.f32 %v1154_v37, 0.0 }
 0x14f   : > { %1685 = vmatprep.subr.msk.mxu1 %vm1228_vm1, %v1213_v17  ;;  %v1187_v17 = vmax.f32 %v1155_v56, 0.0 }
 0x152   : > { %1686 = vmatpush3.xpose.msk.msra.mxu1 %vm1228_vm1, %v1197_v52  ;;  %v2337_v52 = vld [vmem:[#allocation11_spill] sm:$0xff] }
 0x153   : > { %1687 = vmatprep.subr.msk.mxu1 %vm1228_vm1, %v1212_v23  ;;  %v1169_v38 = vadd.f32 %v2189_v7, %v2337_v52  ;;  %v1202_v23 = vmax.f32 %v1170_v20, 0.0 }
 0x155   : > { %v1201_v58 = vmax.f32 %v1169_v38, 0.0 }
 0x156   : > { %1688 = vmatpush3.xpose.msk.msra.mxu1 %vm1228_vm1, %v1196_v16  ;;  %v1185_v16 = vmax.f32 %v1153_v9, 0.0 }
 0x157   : > { %1689 = vmatprep.subr.msk.mxu1 %vm1228_vm1, %v1211_v60  ;;  %v1224_v60 = vlaneseq }
 0x159   : > { %v1225_v36 = vshrl.u32 %v1224_v60, 7  ;;  %vm1421_vm2 = vcmp.lt.s32.totalorder %v1224_v60, 256 }
 0x15a   : > { %1690 = vmatpush3.xpose.msk.msra.mxu1 %vm1228_vm1, %v1195_v54  ;;  %v1896_v54 = vmov 1966171168  }
 0x15b   : > { %1691 = vmatprep.subr.msk.mxu1 %vm1228_vm1, %v1210_v27  ;;  %v1226_v35 = vsub.s32 0, %v1225_v36  ;;  %v1405_v41 = vunpack.c.l.s4 %v1896_v54 }
 0x15d   : > { %v1227_v7 = vrot.slane %v1222_v1, %v1226_v35  ;;  %v1406_v42 = vunpack.c.0.s8 %v1405_v41 }
 0x15e   : > { %1692 = vmatpush3.xpose.msk.msra.mxu1 %vm1228_vm1, %v1194_v30 }
 0x15f   : > { %1693 = vmatprep.subr.msk.mxu1 %vm1228_vm1, %v1209_v47  ;;  %v1409_v30 = vsub.s32 %v1406_v42, %v1225_v36 }
 0x162   : > { %1694 = vmatpush3.xpose.msk.msra.mxu1 %vm1228_vm1, %v1193_v26 }
 0x163   : > { %1695 = vmatprep.subr.msk.mxu1 %vm1228_vm1, %v1208_v19 }
 0x166   : > { %1696 = vmatpush3.xpose.msk.msra.mxu1 %vm1228_vm1, %v1192_v18 }
 0x167   : > { %1697 = vmatprep.subr.msk.mxu1 %vm1228_vm1, %v1207_v53 }
 0x16a   : > { %1698 = vmatpush3.xpose.msk.msra.mxu1 %vm1228_vm1, %v1191_v39 }
 0x16b   : > { %1699 = vmatprep.subr.msk.mxu1 %vm1228_vm1, %v1206_v33 }
 0x16e   : > { %1700 = vmatpush3.xpose.msk.msra.mxu1 %vm1228_vm1, %v1190_v43 }
 0x16f   : > { %1701 = vmatprep.subr.msk.mxu1 %vm1228_vm1, %v1205_v62 }
 0x172   : > { %1702 = vmatpush3.xpose.msk.msra.mxu1 %vm1228_vm1, %v1189_v34 }
 0x173   : > { %1703 = vmatprep.subr.msk.mxu1 %vm1228_vm1, %v1204_v10 }
 0x176   : > { %1704 = vmatpush3.xpose.msk.msra.mxu1 %vm1228_vm1, %v1188_v51 }
 0x177   : > { %1705 = vmatprep.subr.msk.mxu1 %vm1228_vm1, %v1203_v15 }
 0x17a   : > { %1706 = vmatpush3.xpose.msk.msra.mxu1 %vm1228_vm1, %v1187_v17 }
 0x17b   : > { %1707 = vmatprep.subr.msk.mxu1 %vm1228_vm1, %v1202_v23 }
 0x17e   : > { %1708 = vmatpush3.xpose.msk.msra.mxu1 %vm1228_vm1, %v1186_v29 }
 0x17f   : > { %1709 = vmatprep.subr.msk.mxu1 %vm1228_vm1, %v1201_v58 }
 0x182   : > { %1710 = vmatpush3.xpose.msk.msra.mxu1 %vm1228_vm1, %v1185_v16 }
 0x185   : > { %1712 = vmatmul.mubr.msk.f32.vlgmr.msra.gmra.mxu1 %vm1228_vm1, %v2339_v57 }
 0x245   : > { %v1394_v13 = vpop.f32.mrf.mxu1 }
 0x246   : > { %v1395_v27 = vadd.f32 %v1394_v13, %v1227_v7 }
 0x247   : > { %v1396_v24 = vpop.f32.mrf.mxu1 }
 0x248   : > { %v1397_v48 = vadd.f32 %v1396_v24, %v1227_v7  ;;  %v1399_v11 = vmax.f32 %v1395_v27, 0.0 }
 0x24a   : > { %v1400_v0 = vmax.f32 %v1397_v48, 0.0 }
 0x24c   : > { %v1403_v47 = vcombine.low %v1399_v11, %v1400_v0 }
 0x24e   : > { %v1410_v25 = vrot.slane %v1403_v47, %v1409_v30 }
 0x250   : > { %v1417_v44 = vrot.slane %v1410_v25, %v1409_v30 }
 0x252   : > { %1423 = vst.msk [vmem:[%s224_s26] sm:$0x3] %vm1421_vm2, %v1417_v44 }
 0x253 PF: > { %s17_s20 = sadd.s32 1, %s1893_s20  }
 0x254   : > { %p14_p4 = scmp.ge.s32.totalorder %s17_s20, 4  }
 0x256   :  { %16 = sbr.rel (!%p14_p4) target bundleno = 3 (0x3), region = 72 }

</bundles_post_ra>
